<compile_context>
chip_gen: v7x
topology: tpu7x:2x2x1
jax: 0.10.0
libtpu: 0.0.40
codegen_flags: <defaults>
</compile_context>

<pallas_src>
import functools

import jax
import jax.numpy as jnp
from jax.experimental import pallas as pl
from jax.experimental.pallas import tpu as pltpu


# ----------------------------------------------------------------------------
# Tiled Pallas GEMM + bias + activation (bf16 inputs, f32 accumulate).
# ----------------------------------------------------------------------------
def _gemm_kernel(x_ref, w_ref, b_ref, o_ref, acc_ref, *, act):
    k = pl.program_id(2)

    @pl.when(k == 0)
    def _():
        # Bias-initialized accumulator: removes the add from the epilogue.
        acc_ref[...] = jnp.broadcast_to(b_ref[...], acc_ref.shape)

    acc_ref[...] += jnp.dot(x_ref[...], w_ref[...],
                            preferred_element_type=jnp.float32)

    @pl.when(k == pl.num_programs(2) - 1)
    def _():
        r = acc_ref[...]
        if act == "relu":
            r = jnp.maximum(r, 0.0)
        elif act == "tanh":
            r = jnp.tanh(r)
        o_ref[...] = r.astype(o_ref.dtype)


def _rup(v, m):
    return ((v + m - 1) // m) * m


def _plan_dim(dim, unit, cap=512):
    """Pick a tile (multiple of `unit`, <= cap) FIRST, then pad dim up to it."""
    p = _rup(dim, unit)
    if p <= cap:
        return p, p                       # single block, minimal padding
    blk = cap
    if _rup(dim, cap // 2) < _rup(dim, cap):
        blk = cap // 2                    # avoid pathological padding waste
    return blk, _rup(dim, blk)


@functools.lru_cache(maxsize=None)
def _vmem_hard_cap():
    # Generation-aware cap: v7x has 64 MiB VMEM / TensorCore, v5e/v6e 128 MiB.
    try:
        cap = int(getattr(pltpu.get_tpu_info(), "vmem_capacity_bytes",
                          128 << 20))
    except Exception:
        cap = 128 << 20
    return (40 << 20) if cap <= (64 << 20) else (64 << 20)


def _vmem_limit(request_bytes):
    return int(min(max(int(request_bytes), 16 << 20), _vmem_hard_cap()))


def pallas_gemm(x, w, b, act="none", out_dtype=jnp.bfloat16):
    """y = act(x @ w + b).  x:(M,K)  w:(K,N)  b:(N,).  Output dtype out_dtype."""
    M, K = x.shape
    Kw, N = w.shape
    assert K == Kw

    bm, Mp = _plan_dim(M, 8)
    bk, Kp = _plan_dim(K, 128)
    bn, Np = _plan_dim(N, 128)

    # v7x has 2 TensorCores: ensure a "parallel" axis has >= 2 grid points.
    if Mp == bm and Np == bn:
        if Np > 128:
            bn = Np // 2 if (Np // 2) % 128 == 0 else 128
        elif Mp > 8 and (Mp // 2) % 8 == 0:
            bm = Mp // 2

    xb = x.astype(jnp.bfloat16)
    wb = w.astype(jnp.bfloat16)
    if (Mp, Kp) != (M, K):
        xb = jnp.pad(xb, ((0, Mp - M), (0, Kp - K)))
    if (Kp, Np) != (K, N):
        wb = jnp.pad(wb, ((0, Kp - K), (0, Np - N)))
    bb = b.astype(jnp.float32)
    if Np != N:
        bb = jnp.pad(bb, (0, Np - N))
    bb = bb.reshape(1, Np)

    out_itemsize = jnp.dtype(out_dtype).itemsize
    tile_bytes = (2 * (bm * bk * 2 + bk * bn * 2 + bn * 4)     # dbl-buf inputs
                  + 2 * bm * bn * out_itemsize                  # dbl-buf output
                  + bm * bn * 4 + (2 << 20))                    # acc + headroom

    out = pl.pallas_call(
        functools.partial(_gemm_kernel, act=act),
        out_shape=jax.ShapeDtypeStruct((Mp, Np), out_dtype),
        grid=(Mp // bm, Np // bn, Kp // bk),
        in_specs=[
            pl.BlockSpec((bm, bk), lambda i, j, k: (i, k)),
            pl.BlockSpec((bk, bn), lambda i, j, k: (k, j)),
            pl.BlockSpec((1, bn), lambda i, j, k: (0, j)),
        ],
        out_specs=pl.BlockSpec((bm, bn), lambda i, j, k: (i, j)),
        scratch_shapes=[pltpu.VMEM((bm, bn), jnp.float32)],
        compiler_params=pltpu.CompilerParams(
            dimension_semantics=("parallel", "parallel", "arbitrary"),
            vmem_limit_bytes=_vmem_limit(tile_bytes),
        ),
    )(xb, wb, bb)

    if (Mp, Np) != (M, N):
        out = out[:M, :N]
    return out


# ----------------------------------------------------------------------------
# Fused FC bottleneck:  tanh(x@W1+b1) -> z = .@W2+b2 -> tanh(z@W3+b3)
#                       -> d = tanh(.@W4+b4)   in a single pallas_call.
# ----------------------------------------------------------------------------
def _fc_chain_kernel(x_ref, w1_ref, b1_ref, w2_ref, b2_ref,
                     w3_ref, b3_ref, w4_ref, b4_ref, z_ref, d_ref):
    h = jnp.tanh(jnp.dot(x_ref[...], w1_ref[...],
                         preferred_element_type=jnp.float32) + b1_ref[...])
    z = jnp.dot(h.astype(jnp.bfloat16), w2_ref[...],
                preferred_element_type=jnp.float32) + b2_ref[...]
    z_ref[...] = z.astype(z_ref.dtype)
    d = jnp.tanh(jnp.dot(z.astype(jnp.bfloat16), w3_ref[...],
                         preferred_element_type=jnp.float32) + b3_ref[...])
    d = jnp.tanh(jnp.dot(d.astype(jnp.bfloat16), w4_ref[...],
                         preferred_element_type=jnp.float32) + b4_ref[...])
    d_ref[...] = d.astype(d_ref.dtype)


def fc_bottleneck(xf, params):
    """Returns (z f32 (M,200), d bf16 (M, 512*del1^2))."""
    M, K1 = xf.shape
    w1, b1 = params["fc1_w"], params["fc1_b"]     # (K1, 1000)
    w2, b2 = params["lat_w"], params["lat_b"]     # (1000, 200)
    w3, b3 = params["dfc1_w"], params["dfc1_b"]   # (200, 1000)
    w4, b4 = params["dfc2_w"], params["dfc2_b"]   # (1000, K1)

    Mp = max(_rup(M, 8), 8)
    K1p = _rup(K1, 128)
    H = _rup(w1.shape[1], 128)
    L = _rup(w2.shape[1], 128)

    # Double-buffered bf16 weights must fit comfortably in VMEM to fuse.
    weight_bytes = 2 * 2 * (K1p * H + H * L + L * H + H * K1p)
    if weight_bytes > (24 << 20):
        # Fallback: per-layer GEMMs (large image sizes).
        h = pallas_gemm(xf, w1, b1, act="tanh", out_dtype=jnp.bfloat16)
        z = pallas_gemm(h, w2, b2, act="none", out_dtype=jnp.float32)
        d = pallas_gemm(z, w3, b3, act="tanh", out_dtype=jnp.bfloat16)
        d = pallas_gemm(d, w4, b4, act="tanh", out_dtype=jnp.bfloat16)
        return z, d

    def pad2(a, r, c):
        a = a.astype(jnp.bfloat16)
        return jnp.pad(a, ((0, r - a.shape[0]), (0, c - a.shape[1])))

    def padb(v, c):
        v = v.astype(jnp.float32)
        return jnp.pad(v, (0, c - v.shape[0])).reshape(1, c)

    xb = pad2(xf, Mp, K1p)
    ops = (xb,
           pad2(w1, K1p, H), padb(b1, H),
           pad2(w2, H, L), padb(b2, L),
           pad2(w3, L, H), padb(b3, H),
           pad2(w4, H, K1p), padb(b4, K1p))

    def _full(shape):
        return pl.BlockSpec(shape, lambda i: (0,) * len(shape))

    z_out, d_out = pl.pallas_call(
        _fc_chain_kernel,
        out_shape=(jax.ShapeDtypeStruct((Mp, L), jnp.float32),
                   jax.ShapeDtypeStruct((Mp, K1p), jnp.bfloat16)),
        grid=(1,),
        in_specs=[_full(o.shape) for o in ops],
        out_specs=(_full((Mp, L)), _full((Mp, K1p))),
        compiler_params=pltpu.CompilerParams(
            dimension_semantics=("arbitrary",),
            vmem_limit_bytes=_vmem_limit(weight_bytes + (8 << 20)),
        ),
    )(*ops)

    return z_out[:M, :w2.shape[1]], d_out[:M, :K1]


# ----------------------------------------------------------------------------
# Glue: im2col / maxpool (pure indexing & reshapes, done by XLA, in bf16).
# ----------------------------------------------------------------------------
def _im2col(xp, k, stride):
    # xp: NHWC, already padded.  Patch flattening order is (di, dj, c_in).
    Nb, Hp, Wp, C = xp.shape
    Ho = (Hp - k) // stride + 1
    Wo = (Wp - k) // stride + 1
    cols = []
    for di in range(k):
        for dj in range(k):
            cols.append(
                xp[:, di:di + stride * Ho:stride, dj:dj + stride * Wo:stride, :])
    cols = jnp.concatenate(cols, axis=-1)           # (N, Ho, Wo, k*k*C)
    return cols.reshape(Nb * Ho * Wo, k * k * C), (Nb, Ho, Wo)


def conv2d(x, w_mat, b, *, k, stride, pad, act, out_dtype=jnp.bfloat16):
    # x: NHWC ; w_mat: (k*k*Cin, Cout) pre-packed ; b: (Cout,)
    # TODO(synk): fuse the im2col gather into the GEMM via per-tap index_maps.
    Cout = w_mat.shape[1]
    xp = jnp.pad(x, ((0, 0), (pad, pad), (pad, pad), (0, 0)))
    patches, (Nb, Ho, Wo) = _im2col(xp, k, stride)
    y = pallas_gemm(patches, w_mat, b, act=act, out_dtype=out_dtype)
    return y.reshape(Nb, Ho, Wo, Cout)


def conv_transpose2d(x, w_big, b4, *, act, out_dtype=jnp.bfloat16):
    # ConvTranspose2d(kernel=3, stride=2, padding=1, output_padding=1) via
    # sub-pixel decomposition: one stride-1 2x2-window GEMM on the undilated
    # input produces all 4 output parities; depth-to-space interleaves them.
    Nb, H, W, Cin = x.shape
    cout = w_big.shape[1] // 4
    xp = jnp.pad(x, ((0, 0), (0, 1), (0, 1), (0, 0)))
    patches, _ = _im2col(xp, 2, 1)                  # (Nb*H*W, 4*Cin)
    y = pallas_gemm(patches, w_big, b4, act=act, out_dtype=out_dtype)
    y = y.reshape(Nb, H, W, 2, 2, cout)             # phase (p, q)
    # TODO(synk): scatter the 4 phases via out_specs index_map to avoid this
    # depth-to-space relayout (one HBM read+write per decoder activation).
    return jnp.transpose(y, (0, 1, 3, 2, 4, 5)).reshape(Nb, 2 * H, 2 * W, cout)


def maxpool(x, k):
    # MaxPool2d(kernel_size=k, stride=k) on NHWC input.
    Nb, H, W, C = x.shape
    return x.reshape(Nb, H // k, k, W // k, k, C).max(axis=(2, 4))


# ----------------------------------------------------------------------------
# Parameters: PyTorch-shaped init, then one-time packing into GEMM layouts.
# ----------------------------------------------------------------------------
def init_params(key, image_size):
    del1 = image_size // 16
    shapes = {
        "e1_w": (64, 3, 3, 3), "e1_b": (64,),
        "e2_w": (128, 64, 3, 3), "e2_b": (128,),
        "e3_w": (256, 128, 3, 3), "e3_b": (256,),
        "e4_w": (512, 256, 3, 3), "e4_b": (512,),
        "fc1_w": (1000, 512 * del1 * del1), "fc1_b": (1000,),
        "lat_w": (200, 1000), "lat_b": (200,),
        "dfc1_w": (1000, 200), "dfc1_b": (1000,),
        "dfc2_w": (512 * del1 * del1, 1000), "dfc2_b": (512 * del1 * del1,),
        "dl1_w": (513, 256, 3, 3), "dl1_b": (256,),
        "dl2_w": (257, 128, 3, 3), "dl2_b": (128,),
        "dl3_w": (129, 64, 3, 3), "dl3_b": (64,),
        "dl4_w": (65, 3, 3, 3), "dl4_b": (3,),
    }
    names = sorted(shapes)
    keys = jax.random.split(key, len(names))
    params = {}
    for name, k in zip(names, keys):
        shp = shapes[name]
        if name.endswith("_b"):
            params[name] = jnp.zeros(shp, jnp.float32)
        else:
            params[name] = 0.05 * jax.random.normal(k, shp, jnp.float32)
    return params


def _pack_conv_w(w):
    # Conv2d weight (Cout, Cin, kh, kw) -> (kh*kw*Cin, Cout); order (ky,kx,ci).
    Cout, Cin, kh, kw = w.shape
    return jnp.transpose(w, (2, 3, 1, 0)).reshape(kh * kw * Cin, Cout)


def _pack_convT_w(w):
    # ConvTranspose2d weight (Cin, Cout, 3, 3) -> sub-pixel matrix (4Cin, 4Cout)
    # Row blocks: 2x2 input tap (di, dj); column blocks: output phase (p, q).
    # Block[(di,dj),(p,q)] = w[:, :, p+1-2*di, q+1-2*dj] (zero if out of range),
    # which is exactly y[2a+p,2b+q] = sum_tap x[a+di,b+dj] @ w[.., ky, kx].
    # TODO(synk): validate packing against jax.lax.conv_transpose in unit tests.
    Cin, Cout = w.shape[0], w.shape[1]
    zero = jnp.zeros((Cin, Cout), w.dtype)
    rows = []
    for di in range(2):
        for dj in range(2):
            cols = []
            for p in range(2):
                for q in range(2):
                    ky, kx = p + 1 - 2 * di, q + 1 - 2 * dj
                    cols.append(w[:, :, ky, kx]
                                if (0 <= ky < 3 and 0 <= kx < 3) else zero)
            rows.append(jnp.concatenate(cols, axis=1))
    return jnp.concatenate(rows, axis=0)


def pack_params(p):
    """One-time packing into GEMM layouts + bf16 weights (call outside jit)."""
    q = {}
    for name in ("e1", "e2", "e3", "e4"):
        q[name + "_w"] = _pack_conv_w(p[name + "_w"]).astype(jnp.bfloat16)
        q[name + "_b"] = p[name + "_b"].astype(jnp.float32)
    for name in ("fc1", "lat", "dfc1", "dfc2"):
        q[name + "_w"] = p[name + "_w"].T.astype(jnp.bfloat16)   # (in, out)
        q[name + "_b"] = p[name + "_b"].astype(jnp.float32)
    for name in ("dl1", "dl2", "dl3", "dl4"):
        q[name + "_w"] = _pack_convT_w(p[name + "_w"]).astype(jnp.bfloat16)
        q[name + "_b"] = jnp.tile(p[name + "_b"], 4).astype(jnp.float32)
    return q


# ----------------------------------------------------------------------------
# Forward pass (matches AE_VGG16.forward; returns (z, x_hat)).
# ----------------------------------------------------------------------------
def ae_vgg16_forward(params, x_nchw, mask_nchw, *, image_size):
    N = x_nchw.shape[0]
    del1 = image_size // 16
    x = jnp.transpose(x_nchw, (0, 2, 3, 1)).astype(jnp.bfloat16)   # NHWC
    mask = jnp.transpose(mask_nchw, (0, 2, 3, 1))                  # NHWC f32

    # encoder (bf16 intermediate activations)
    x = conv2d(x, params["e1_w"], params["e1_b"], k=3, stride=2, pad=1, act="relu")
    x = conv2d(x, params["e2_w"], params["e2_b"], k=3, stride=2, pad=1, act="relu")
    x = conv2d(x, params["e3_w"], params["e3_b"], k=3, stride=2, pad=1, act="relu")
    x = conv2d(x, params["e4_w"], params["e4_b"], k=3, stride=2, pad=1, act="relu")

    # flatten in torch's (C, H, W) order, then fused FC bottleneck
    xf = jnp.transpose(x, (0, 3, 1, 2)).reshape(N, -1)
    z, d = fc_bottleneck(xf, params)               # z: f32, d: bf16

    xh = d.reshape(N, 512, del1, del1)             # torch .view -> NCHW
    xh = jnp.transpose(xh, (0, 2, 3, 1))           # NHWC

    # decoder conv-transpose stack with mask maxpool concats (channel last)
    xh = jnp.concatenate([xh, maxpool(mask, 16).astype(xh.dtype)], axis=-1)
    xh = conv_transpose2d(xh, params["dl1_w"], params["dl1_b"], act="relu")
    xh = jnp.concatenate([xh, maxpool(mask, 8).astype(xh.dtype)], axis=-1)
    xh = conv_transpose2d(xh, params["dl2_w"], params["dl2_b"], act="relu")
    xh = jnp.concatenate([xh, maxpool(mask, 4).astype(xh.dtype)], axis=-1)
    xh = conv_transpose2d(xh, params["dl3_w"], params["dl3_b"], act="relu")
    xh = jnp.concatenate([xh, maxpool(mask, 2).astype(xh.dtype)], axis=-1)
    xh = conv_transpose2d(xh, params["dl4_w"], params["dl4_b"], act="none",
                          out_dtype=jnp.float32)   # final output in f32

    return z, jnp.transpose(xh, (0, 3, 1, 2))      # x_hat back to NCHW


if __name__ == "__main__":
    IMAGE_SIZE = 16   # must be divisible by 16 (del1_size = IMAGE_SIZE // 16)
    BATCH = 2
    key = jax.random.PRNGKey(0)
    kp, kx, km = jax.random.split(key, 3)

    raw_params = init_params(kp, IMAGE_SIZE)
    params = jax.tree_util.tree_map(
        jax.block_until_ready, pack_params(raw_params))   # pack once, outside jit

    x = jax.random.normal(kx, (BATCH, 3, IMAGE_SIZE, IMAGE_SIZE), jnp.float32)
    mask = (jax.random.uniform(km, (BATCH, 1, IMAGE_SIZE, IMAGE_SIZE))
            > 0.5).astype(jnp.float32)

    fwd = jax.jit(functools.partial(ae_vgg16_forward, image_size=IMAGE_SIZE))
    z, x_hat = fwd(params, x, mask)
    jax.block_until_ready((z, x_hat))

    assert z.shape == (BATCH, 200)
    assert z.dtype == jnp.float32
    assert x_hat.shape == (BATCH, 3, IMAGE_SIZE, IMAGE_SIZE)
    assert x_hat.dtype == jnp.float32
    assert bool(jnp.all(jnp.isfinite(z))) and bool(jnp.all(jnp.isfinite(x_hat)))
    print("KERNEL_OK")
</pallas_src>

<mosaic_0001>
module attributes {stable_mosaic.version = 11 : i64} {
  func.func @_gemm_kernel(%arg0: i32, %arg1: i32, %arg2: i32, %arg3: memref<64x128xbf16, #tpu.memory_space<vmem>>, %arg4: memref<128x128xbf16, #tpu.memory_space<vmem>>, %arg5: memref<1x128xf32, #tpu.memory_space<vmem>>, %arg6: memref<64x128xbf16, #tpu.memory_space<vmem>>, %arg7: memref<64x128xf32, #tpu.memory_space<vmem>>) attributes {dimension_semantics = [#tpu.dimension_semantics<parallel>, #tpu.dimension_semantics<parallel>, #tpu.dimension_semantics<arbitrary>], iteration_bounds = array<i64: 2, 1, 1>, scalar_prefetch = 0 : i64, scratch_operands = 1 : i64, tpu.core_type = #tpu.core_type<tc>, window_params = [{transform_indices = @transform_0, window_bounds = array<i64: 64, 128>}, {transform_indices = @transform_1, window_bounds = array<i64: 128, 128>}, {transform_indices = @transform_2, window_bounds = array<i64: 1, 128>}, {transform_indices = @transform_3, window_bounds = array<i64: 64, 128>}]} {
    %c0_i32 = arith.constant 0 : i32
    %0 = arith.cmpi eq, %arg2, %c0_i32 : i32
    %1 = arith.extui %0 : i1 to i32
    %c0_i32_0 = arith.constant 0 : i32
    %2 = arith.cmpi ne, %1, %c0_i32_0 : i32
    scf.if %2 {
      %c0_10 = arith.constant 0 : index
      %c0_11 = arith.constant 0 : index
      %12 = vector.load %arg5[%c0_10, %c0_11] : memref<1x128xf32, #tpu.memory_space<vmem>>, vector<1x128xf32>
      %13 = vector.shape_cast %12 : vector<1x128xf32> to vector<1x128xf32>
      %14 = vector.broadcast %13 : vector<1x128xf32> to vector<64x128xf32>
      %c0_12 = arith.constant 0 : index
      %c0_13 = arith.constant 0 : index
      %15 = vector.load %arg7[%c0_12, %c0_13] : memref<64x128xf32, #tpu.memory_space<vmem>>, vector<64x128xf32>
      tpu.vector_store %arg7[%c0_12, %c0_13], %14 {strides = array<i32>} : memref<64x128xf32, #tpu.memory_space<vmem>>, vector<64x128xf32>,
    } else {
    }
    %c0 = arith.constant 0 : index
    %c0_1 = arith.constant 0 : index
    %3 = vector.load %arg7[%c0, %c0_1] : memref<64x128xf32, #tpu.memory_space<vmem>>, vector<64x128xf32>
    %c0_2 = arith.constant 0 : index
    %c0_3 = arith.constant 0 : index
    %4 = vector.load %arg3[%c0_2, %c0_3] : memref<64x128xbf16, #tpu.memory_space<vmem>>, vector<64x128xbf16>
    %c0_4 = arith.constant 0 : index
    %c0_5 = arith.constant 0 : index
    %5 = vector.load %arg4[%c0_4, %c0_5] : memref<128x128xbf16, #tpu.memory_space<vmem>>, vector<128x128xbf16>
    %cst = arith.constant dense<0.000000e+00> : vector<64x128xf32>
    %6 = tpu.matmul %4, %5, %cst {dimension_numbers = #tpu.dot_dimension_numbers<[1], [0], [0], [1], [0, 0, 1, 1], [], []>} : vector<64x128xbf16>, vector<128x128xbf16>, vector<64x128xf32> -> vector<64x128xf32>
    %7 = arith.addf %3, %6 : vector<64x128xf32>
    %c0_6 = arith.constant 0 : index
    %c0_7 = arith.constant 0 : index
    %8 = vector.load %arg7[%c0_6, %c0_7] : memref<64x128xf32, #tpu.memory_space<vmem>>, vector<64x128xf32>
    tpu.vector_store %arg7[%c0_6, %c0_7], %7 {strides = array<i32>} : memref<64x128xf32, #tpu.memory_space<vmem>>, vector<64x128xf32>,
    %c0_i32_8 = arith.constant 0 : i32
    %9 = arith.cmpi eq, %arg2, %c0_i32_8 : i32
    %10 = arith.extui %9 : i1 to i32
    %c0_i32_9 = arith.constant 0 : i32
    %11 = arith.cmpi ne, %10, %c0_i32_9 : i32
    scf.if %11 {
      %c0_10 = arith.constant 0 : index
      %c0_11 = arith.constant 0 : index
      %12 = vector.load %arg7[%c0_10, %c0_11] : memref<64x128xf32, #tpu.memory_space<vmem>>, vector<64x128xf32>
      %cst_12 = arith.constant 0.000000e+00 : f32
      %13 = vector.broadcast %cst_12 : f32 to vector<64x128xf32>
      %14 = arith.maximumf %12, %13 : vector<64x128xf32>
      %15 = arith.truncf %14 : vector<64x128xf32> to vector<64x128xbf16>
      %c0_13 = arith.constant 0 : index
      %c0_14 = arith.constant 0 : index
      %16 = vector.load %arg6[%c0_13, %c0_14] : memref<64x128xbf16, #tpu.memory_space<vmem>>, vector<64x128xbf16>
      tpu.vector_store %arg6[%c0_13, %c0_14], %15 {strides = array<i32>} : memref<64x128xbf16, #tpu.memory_space<vmem>>, vector<64x128xbf16>,
    } else {
    }
    return
  }
  func.func @transform_0(%arg0: i32, %arg1: i32, %arg2: i32) -> (i32, i32) {
    %c0_i32 = arith.constant 0 : i32
    return %arg0, %arg2 : i32, i32
  }
  func.func @transform_1(%arg0: i32, %arg1: i32, %arg2: i32) -> (i32, i32) {
    %c0_i32 = arith.constant 0 : i32
    return %arg2, %arg1 : i32, i32
  }
  func.func @transform_2(%arg0: i32, %arg1: i32, %arg2: i32) -> (i32, i32) {
    %c0_i32 = arith.constant 0 : i32
    %c0_i32_0 = arith.constant 0 : i32
    return %c0_i32, %arg1 : i32, i32
  }
  func.func @transform_3(%arg0: i32, %arg1: i32, %arg2: i32) -> (i32, i32) {
    %c0_i32 = arith.constant 0 : i32
    return %arg0, %arg1 : i32, i32
  }
}

module attributes {stable_mosaic.version = 11 : i64} {
  func.func @_gemm_kernel(%arg0: i32, %arg1: i32, %arg2: i32, %arg3: memref<16x256xbf16, #tpu.memory_space<vmem>>, %arg4: memref<256x128xbf16, #tpu.memory_space<vmem>>, %arg5: memref<1x128xf32, #tpu.memory_space<vmem>>, %arg6: memref<16x128xbf16, #tpu.memory_space<vmem>>, %arg7: memref<16x128xf32, #tpu.memory_space<vmem>>) attributes {dimension_semantics = [#tpu.dimension_semantics<parallel>, #tpu.dimension_semantics<parallel>, #tpu.dimension_semantics<arbitrary>], iteration_bounds = array<i64: 2, 1, 3>, scalar_prefetch = 0 : i64, scratch_operands = 1 : i64, tpu.core_type = #tpu.core_type<tc>, window_params = [{transform_indices = @transform_0, window_bounds = array<i64: 16, 256>}, {transform_indices = @transform_1, window_bounds = array<i64: 256, 128>}, {transform_indices = @transform_2, window_bounds = array<i64: 1, 128>}, {transform_indices = @transform_3, window_bounds = array<i64: 16, 128>}]} {
    %c0_i32 = arith.constant 0 : i32
    %0 = arith.cmpi eq, %arg2, %c0_i32 : i32
    %1 = arith.extui %0 : i1 to i32
    %c0_i32_0 = arith.constant 0 : i32
    %2 = arith.cmpi ne, %1, %c0_i32_0 : i32
    scf.if %2 {
      %c0_9 = arith.constant 0 : index
      %c0_10 = arith.constant 0 : index
      %12 = vector.load %arg5[%c0_9, %c0_10] : memref<1x128xf32, #tpu.memory_space<vmem>>, vector<1x128xf32>
      %13 = vector.shape_cast %12 : vector<1x128xf32> to vector<1x128xf32>
      %14 = vector.broadcast %13 : vector<1x128xf32> to vector<16x128xf32>
      %c0_11 = arith.constant 0 : index
      %c0_12 = arith.constant 0 : index
      %15 = vector.load %arg7[%c0_11, %c0_12] : memref<16x128xf32, #tpu.memory_space<vmem>>, vector<16x128xf32>
      tpu.vector_store %arg7[%c0_11, %c0_12], %14 {strides = array<i32>} : memref<16x128xf32, #tpu.memory_space<vmem>>, vector<16x128xf32>,
    } else {
    }
    %c0 = arith.constant 0 : index
    %c0_1 = arith.constant 0 : index
    %3 = vector.load %arg7[%c0, %c0_1] : memref<16x128xf32, #tpu.memory_space<vmem>>, vector<16x128xf32>
    %c0_2 = arith.constant 0 : index
    %c0_3 = arith.constant 0 : index
    %4 = vector.load %arg3[%c0_2, %c0_3] : memref<16x256xbf16, #tpu.memory_space<vmem>>, vector<16x256xbf16>
    %c0_4 = arith.constant 0 : index
    %c0_5 = arith.constant 0 : index
    %5 = vector.load %arg4[%c0_4, %c0_5] : memref<256x128xbf16, #tpu.memory_space<vmem>>, vector<256x128xbf16>
    %cst = arith.constant dense<0.000000e+00> : vector<16x128xf32>
    %6 = tpu.matmul %4, %5, %cst {dimension_numbers = #tpu.dot_dimension_numbers<[1], [0], [0], [1], [0, 0, 1, 1], [], []>} : vector<16x256xbf16>, vector<256x128xbf16>, vector<16x128xf32> -> vector<16x128xf32>
    %7 = arith.addf %3, %6 : vector<16x128xf32>
    %c0_6 = arith.constant 0 : index
    %c0_7 = arith.constant 0 : index
    %8 = vector.load %arg7[%c0_6, %c0_7] : memref<16x128xf32, #tpu.memory_space<vmem>>, vector<16x128xf32>
    tpu.vector_store %arg7[%c0_6, %c0_7], %7 {strides = array<i32>} : memref<16x128xf32, #tpu.memory_space<vmem>>, vector<16x128xf32>,
    %c2_i32 = arith.constant 2 : i32
    %9 = arith.cmpi eq, %arg2, %c2_i32 : i32
    %10 = arith.extui %9 : i1 to i32
    %c0_i32_8 = arith.constant 0 : i32
    %11 = arith.cmpi ne, %10, %c0_i32_8 : i32
    scf.if %11 {
      %c0_9 = arith.constant 0 : index
      %c0_10 = arith.constant 0 : index
      %12 = vector.load %arg7[%c0_9, %c0_10] : memref<16x128xf32, #tpu.memory_space<vmem>>, vector<16x128xf32>
      %cst_11 = arith.constant 0.000000e+00 : f32
      %13 = vector.broadcast %cst_11 : f32 to vector<16x128xf32>
      %14 = arith.maximumf %12, %13 : vector<16x128xf32>
      %15 = arith.truncf %14 : vector<16x128xf32> to vector<16x128xbf16>
      %c0_12 = arith.constant 0 : index
      %c0_13 = arith.constant 0 : index
      %16 = vector.load %arg6[%c0_12, %c0_13] : memref<16x128xbf16, #tpu.memory_space<vmem>>, vector<16x128xbf16>
      tpu.vector_store %arg6[%c0_12, %c0_13], %15 {strides = array<i32>} : memref<16x128xbf16, #tpu.memory_space<vmem>>, vector<16x128xbf16>,
    } else {
    }
    return
  }
  func.func @transform_0(%arg0: i32, %arg1: i32, %arg2: i32) -> (i32, i32) {
    %c0_i32 = arith.constant 0 : i32
    return %arg0, %arg2 : i32, i32
  }
  func.func @transform_1(%arg0: i32, %arg1: i32, %arg2: i32) -> (i32, i32) {
    %c0_i32 = arith.constant 0 : i32
    return %arg2, %arg1 : i32, i32
  }
  func.func @transform_2(%arg0: i32, %arg1: i32, %arg2: i32) -> (i32, i32) {
    %c0_i32 = arith.constant 0 : i32
    %c0_i32_0 = arith.constant 0 : i32
    return %c0_i32, %arg1 : i32, i32
  }
  func.func @transform_3(%arg0: i32, %arg1: i32, %arg2: i32) -> (i32, i32) {
    %c0_i32 = arith.constant 0 : i32
    return %arg0, %arg1 : i32, i32
  }
}

module attributes {stable_mosaic.version = 11 : i64} {
  func.func @_gemm_kernel(%arg0: i32, %arg1: i32, %arg2: i32, %arg3: memref<8x256xbf16, #tpu.memory_space<vmem>>, %arg4: memref<256x128xbf16, #tpu.memory_space<vmem>>, %arg5: memref<1x128xf32, #tpu.memory_space<vmem>>, %arg6: memref<8x128xbf16, #tpu.memory_space<vmem>>, %arg7: memref<8x128xf32, #tpu.memory_space<vmem>>) attributes {dimension_semantics = [#tpu.dimension_semantics<parallel>, #tpu.dimension_semantics<parallel>, #tpu.dimension_semantics<arbitrary>], iteration_bounds = array<i64: 1, 2, 5>, scalar_prefetch = 0 : i64, scratch_operands = 1 : i64, tpu.core_type = #tpu.core_type<tc>, window_params = [{transform_indices = @transform_0, window_bounds = array<i64: 8, 256>}, {transform_indices = @transform_1, window_bounds = array<i64: 256, 128>}, {transform_indices = @transform_2, window_bounds = array<i64: 1, 128>}, {transform_indices = @transform_3, window_bounds = array<i64: 8, 128>}]} {
    %c0_i32 = arith.constant 0 : i32
    %0 = arith.cmpi eq, %arg2, %c0_i32 : i32
    %1 = arith.extui %0 : i1 to i32
    %c0_i32_0 = arith.constant 0 : i32
    %2 = arith.cmpi ne, %1, %c0_i32_0 : i32
    scf.if %2 {
      %c0_9 = arith.constant 0 : index
      %c0_10 = arith.constant 0 : index
      %12 = vector.load %arg5[%c0_9, %c0_10] : memref<1x128xf32, #tpu.memory_space<vmem>>, vector<1x128xf32>
      %13 = vector.shape_cast %12 : vector<1x128xf32> to vector<1x128xf32>
      %14 = vector.broadcast %13 : vector<1x128xf32> to vector<8x128xf32>
      %c0_11 = arith.constant 0 : index
      %c0_12 = arith.constant 0 : index
      %15 = vector.load %arg7[%c0_11, %c0_12] : memref<8x128xf32, #tpu.memory_space<vmem>>, vector<8x128xf32>
      tpu.vector_store %arg7[%c0_11, %c0_12], %14 {strides = array<i32>} : memref<8x128xf32, #tpu.memory_space<vmem>>, vector<8x128xf32>,
    } else {
    }
    %c0 = arith.constant 0 : index
    %c0_1 = arith.constant 0 : index
    %3 = vector.load %arg7[%c0, %c0_1] : memref<8x128xf32, #tpu.memory_space<vmem>>, vector<8x128xf32>
    %c0_2 = arith.constant 0 : index
    %c0_3 = arith.constant 0 : index
    %4 = vector.load %arg3[%c0_2, %c0_3] : memref<8x256xbf16, #tpu.memory_space<vmem>>, vector<8x256xbf16>
    %c0_4 = arith.constant 0 : index
    %c0_5 = arith.constant 0 : index
    %5 = vector.load %arg4[%c0_4, %c0_5] : memref<256x128xbf16, #tpu.memory_space<vmem>>, vector<256x128xbf16>
    %cst = arith.constant dense<0.000000e+00> : vector<8x128xf32>
    %6 = tpu.matmul %4, %5, %cst {dimension_numbers = #tpu.dot_dimension_numbers<[1], [0], [0], [1], [0, 0, 1, 1], [], []>} : vector<8x256xbf16>, vector<256x128xbf16>, vector<8x128xf32> -> vector<8x128xf32>
    %7 = arith.addf %3, %6 : vector<8x128xf32>
    %c0_6 = arith.constant 0 : index
    %c0_7 = arith.constant 0 : index
    %8 = vector.load %arg7[%c0_6, %c0_7] : memref<8x128xf32, #tpu.memory_space<vmem>>, vector<8x128xf32>
    tpu.vector_store %arg7[%c0_6, %c0_7], %7 {strides = array<i32>} : memref<8x128xf32, #tpu.memory_space<vmem>>, vector<8x128xf32>,
    %c4_i32 = arith.constant 4 : i32
    %9 = arith.cmpi eq, %arg2, %c4_i32 : i32
    %10 = arith.extui %9 : i1 to i32
    %c0_i32_8 = arith.constant 0 : i32
    %11 = arith.cmpi ne, %10, %c0_i32_8 : i32
    scf.if %11 {
      %c0_9 = arith.constant 0 : index
      %c0_10 = arith.constant 0 : index
      %12 = vector.load %arg7[%c0_9, %c0_10] : memref<8x128xf32, #tpu.memory_space<vmem>>, vector<8x128xf32>
      %cst_11 = arith.constant 0.000000e+00 : f32
      %13 = vector.broadcast %cst_11 : f32 to vector<8x128xf32>
      %14 = arith.maximumf %12, %13 : vector<8x128xf32>
      %15 = arith.truncf %14 : vector<8x128xf32> to vector<8x128xbf16>
      %c0_12 = arith.constant 0 : index
      %c0_13 = arith.constant 0 : index
      %16 = vector.load %arg6[%c0_12, %c0_13] : memref<8x128xbf16, #tpu.memory_space<vmem>>, vector<8x128xbf16>
      tpu.vector_store %arg6[%c0_12, %c0_13], %15 {strides = array<i32>} : memref<8x128xbf16, #tpu.memory_space<vmem>>, vector<8x128xbf16>,
    } else {
    }
    return
  }
  func.func @transform_0(%arg0: i32, %arg1: i32, %arg2: i32) -> (i32, i32) {
    %c0_i32 = arith.constant 0 : i32
    return %arg0, %arg2 : i32, i32
  }
  func.func @transform_1(%arg0: i32, %arg1: i32, %arg2: i32) -> (i32, i32) {
    %c0_i32 = arith.constant 0 : i32
    return %arg2, %arg1 : i32, i32
  }
  func.func @transform_2(%arg0: i32, %arg1: i32, %arg2: i32) -> (i32, i32) {
    %c0_i32 = arith.constant 0 : i32
    %c0_i32_0 = arith.constant 0 : i32
    return %c0_i32, %arg1 : i32, i32
  }
  func.func @transform_3(%arg0: i32, %arg1: i32, %arg2: i32) -> (i32, i32) {
    %c0_i32 = arith.constant 0 : i32
    return %arg0, %arg1 : i32, i32
  }
}

module attributes {stable_mosaic.version = 11 : i64} {
  func.func @_gemm_kernel(%arg0: i32, %arg1: i32, %arg2: i32, %arg3: memref<8x256xbf16, #tpu.memory_space<vmem>>, %arg4: memref<256x256xbf16, #tpu.memory_space<vmem>>, %arg5: memref<1x256xf32, #tpu.memory_space<vmem>>, %arg6: memref<8x256xbf16, #tpu.memory_space<vmem>>, %arg7: memref<8x256xf32, #tpu.memory_space<vmem>>) attributes {dimension_semantics = [#tpu.dimension_semantics<parallel>, #tpu.dimension_semantics<parallel>, #tpu.dimension_semantics<arbitrary>], iteration_bounds = array<i64: 1, 2, 9>, scalar_prefetch = 0 : i64, scratch_operands = 1 : i64, tpu.core_type = #tpu.core_type<tc>, window_params = [{transform_indices = @transform_0, window_bounds = array<i64: 8, 256>}, {transform_indices = @transform_1, window_bounds = array<i64: 256, 256>}, {transform_indices = @transform_2, window_bounds = array<i64: 1, 256>}, {transform_indices = @transform_3, window_bounds = array<i64: 8, 256>}]} {
    %c0_i32 = arith.constant 0 : i32
    %0 = arith.cmpi eq, %arg2, %c0_i32 : i32
    %1 = arith.extui %0 : i1 to i32
    %c0_i32_0 = arith.constant 0 : i32
    %2 = arith.cmpi ne, %1, %c0_i32_0 : i32
    scf.if %2 {
      %c0_9 = arith.constant 0 : index
      %c0_10 = arith.constant 0 : index
      %12 = vector.load %arg5[%c0_9, %c0_10] : memref<1x256xf32, #tpu.memory_space<vmem>>, vector<1x256xf32>
      %13 = vector.shape_cast %12 : vector<1x256xf32> to vector<1x256xf32>
      %14 = vector.broadcast %13 : vector<1x256xf32> to vector<8x256xf32>
      %c0_11 = arith.constant 0 : index
      %c0_12 = arith.constant 0 : index
      %15 = vector.load %arg7[%c0_11, %c0_12] : memref<8x256xf32, #tpu.memory_space<vmem>>, vector<8x256xf32>
      tpu.vector_store %arg7[%c0_11, %c0_12], %14 {strides = array<i32>} : memref<8x256xf32, #tpu.memory_space<vmem>>, vector<8x256xf32>,
    } else {
    }
    %c0 = arith.constant 0 : index
    %c0_1 = arith.constant 0 : index
    %3 = vector.load %arg7[%c0, %c0_1] : memref<8x256xf32, #tpu.memory_space<vmem>>, vector<8x256xf32>
    %c0_2 = arith.constant 0 : index
    %c0_3 = arith.constant 0 : index
    %4 = vector.load %arg3[%c0_2, %c0_3] : memref<8x256xbf16, #tpu.memory_space<vmem>>, vector<8x256xbf16>
    %c0_4 = arith.constant 0 : index
    %c0_5 = arith.constant 0 : index
    %5 = vector.load %arg4[%c0_4, %c0_5] : memref<256x256xbf16, #tpu.memory_space<vmem>>, vector<256x256xbf16>
    %cst = arith.constant dense<0.000000e+00> : vector<8x256xf32>
    %6 = tpu.matmul %4, %5, %cst {dimension_numbers = #tpu.dot_dimension_numbers<[1], [0], [0], [1], [0, 0, 1, 1], [], []>} : vector<8x256xbf16>, vector<256x256xbf16>, vector<8x256xf32> -> vector<8x256xf32>
    %7 = arith.addf %3, %6 : vector<8x256xf32>
    %c0_6 = arith.constant 0 : index
    %c0_7 = arith.constant 0 : index
    %8 = vector.load %arg7[%c0_6, %c0_7] : memref<8x256xf32, #tpu.memory_space<vmem>>, vector<8x256xf32>
    tpu.vector_store %arg7[%c0_6, %c0_7], %7 {strides = array<i32>} : memref<8x256xf32, #tpu.memory_space<vmem>>, vector<8x256xf32>,
    %c8_i32 = arith.constant 8 : i32
    %9 = arith.cmpi eq, %arg2, %c8_i32 : i32
    %10 = arith.extui %9 : i1 to i32
    %c0_i32_8 = arith.constant 0 : i32
    %11 = arith.cmpi ne, %10, %c0_i32_8 : i32
    scf.if %11 {
      %c0_9 = arith.constant 0 : index
      %c0_10 = arith.constant 0 : index
      %12 = vector.load %arg7[%c0_9, %c0_10] : memref<8x256xf32, #tpu.memory_space<vmem>>, vector<8x256xf32>
      %cst_11 = arith.constant 0.000000e+00 : f32
      %13 = vector.broadcast %cst_11 : f32 to vector<8x256xf32>
      %14 = arith.maximumf %12, %13 : vector<8x256xf32>
      %15 = arith.truncf %14 : vector<8x256xf32> to vector<8x256xbf16>
      %c0_12 = arith.constant 0 : index
      %c0_13 = arith.constant 0 : index
      %16 = vector.load %arg6[%c0_12, %c0_13] : memref<8x256xbf16, #tpu.memory_space<vmem>>, vector<8x256xbf16>
      tpu.vector_store %arg6[%c0_12, %c0_13], %15 {strides = array<i32>} : memref<8x256xbf16, #tpu.memory_space<vmem>>, vector<8x256xbf16>,
    } else {
    }
    return
  }
  func.func @transform_0(%arg0: i32, %arg1: i32, %arg2: i32) -> (i32, i32) {
    %c0_i32 = arith.constant 0 : i32
    return %arg0, %arg2 : i32, i32
  }
  func.func @transform_1(%arg0: i32, %arg1: i32, %arg2: i32) -> (i32, i32) {
    %c0_i32 = arith.constant 0 : i32
    return %arg2, %arg1 : i32, i32
  }
  func.func @transform_2(%arg0: i32, %arg1: i32, %arg2: i32) -> (i32, i32) {
    %c0_i32 = arith.constant 0 : i32
    %c0_i32_0 = arith.constant 0 : i32
    return %c0_i32, %arg1 : i32, i32
  }
  func.func @transform_3(%arg0: i32, %arg1: i32, %arg2: i32) -> (i32, i32) {
    %c0_i32 = arith.constant 0 : i32
    return %arg0, %arg1 : i32, i32
  }
}

module attributes {stable_mosaic.version = 11 : i64} {
  func.func @_fc_chain_kernel(%arg0: i32, %arg1: memref<8x512xbf16, #tpu.memory_space<vmem>>, %arg2: memref<512x1024xbf16, #tpu.memory_space<vmem>>, %arg3: memref<1x1024xf32, #tpu.memory_space<vmem>>, %arg4: memref<1024x256xbf16, #tpu.memory_space<vmem>>, %arg5: memref<1x256xf32, #tpu.memory_space<vmem>>, %arg6: memref<256x1024xbf16, #tpu.memory_space<vmem>>, %arg7: memref<1x1024xf32, #tpu.memory_space<vmem>>, %arg8: memref<1024x512xbf16, #tpu.memory_space<vmem>>, %arg9: memref<1x512xf32, #tpu.memory_space<vmem>>, %arg10: memref<8x256xf32, #tpu.memory_space<vmem>>, %arg11: memref<8x512xbf16, #tpu.memory_space<vmem>>) attributes {dimension_semantics = [#tpu.dimension_semantics<arbitrary>], iteration_bounds = array<i64: 1>, scalar_prefetch = 0 : i64, scratch_operands = 0 : i64, tpu.core_type = #tpu.core_type<tc>, window_params = [{pipeline_mode = #tpu.pipeline_mode<synchronous>, transform_indices = @transform_0, window_bounds = array<i64: 8, 512>}, {pipeline_mode = #tpu.pipeline_mode<synchronous>, transform_indices = @transform_1, window_bounds = array<i64: 512, 1024>}, {pipeline_mode = #tpu.pipeline_mode<synchronous>, transform_indices = @transform_2, window_bounds = array<i64: 1, 1024>}, {pipeline_mode = #tpu.pipeline_mode<synchronous>, transform_indices = @transform_3, window_bounds = array<i64: 1024, 256>}, {pipeline_mode = #tpu.pipeline_mode<synchronous>, transform_indices = @transform_4, window_bounds = array<i64: 1, 256>}, {pipeline_mode = #tpu.pipeline_mode<synchronous>, transform_indices = @transform_5, window_bounds = array<i64: 256, 1024>}, {pipeline_mode = #tpu.pipeline_mode<synchronous>, transform_indices = @transform_6, window_bounds = array<i64: 1, 1024>}, {pipeline_mode = #tpu.pipeline_mode<synchronous>, transform_indices = @transform_7, window_bounds = array<i64: 1024, 512>}, {pipeline_mode = #tpu.pipeline_mode<synchronous>, transform_indices = @transform_8, window_bounds = array<i64: 1, 512>}, {pipeline_mode = #tpu.pipeline_mode<synchronous>, transform_indices = @transform_9, window_bounds = array<i64: 8, 256>}, {pipeline_mode = #tpu.pipeline_mode<synchronous>, transform_indices = @transform_10, window_bounds = array<i64: 8, 512>}]} {
    %c0 = arith.constant 0 : index
    %c0_0 = arith.constant 0 : index
    %0 = vector.load %arg1[%c0, %c0_0] : memref<8x512xbf16, #tpu.memory_space<vmem>>, vector<8x512xbf16>
    %c0_1 = arith.constant 0 : index
    %c0_2 = arith.constant 0 : index
    %1 = vector.load %arg2[%c0_1, %c0_2] : memref<512x1024xbf16, #tpu.memory_space<vmem>>, vector<512x1024xbf16>
    %cst = arith.constant dense<0.000000e+00> : vector<8x1024xf32>
    %2 = tpu.matmul %0, %1, %cst {dimension_numbers = #tpu.dot_dimension_numbers<[1], [0], [0], [1], [0, 0, 1, 1], [], []>} : vector<8x512xbf16>, vector<512x1024xbf16>, vector<8x1024xf32> -> vector<8x1024xf32>
    %c0_3 = arith.constant 0 : index
    %c0_4 = arith.constant 0 : index
    %3 = vector.load %arg3[%c0_3, %c0_4] : memref<1x1024xf32, #tpu.memory_space<vmem>>, vector<1x1024xf32>
    %4 = vector.broadcast %3 : vector<1x1024xf32> to vector<8x1024xf32>
    %5 = arith.addf %2, %4 : vector<8x1024xf32>
    %6 = math.tanh %5 : vector<8x1024xf32>
    %7 = arith.truncf %6 : vector<8x1024xf32> to vector<8x1024xbf16>
    %c0_5 = arith.constant 0 : index
    %c0_6 = arith.constant 0 : index
    %8 = vector.load %arg4[%c0_5, %c0_6] : memref<1024x256xbf16, #tpu.memory_space<vmem>>, vector<1024x256xbf16>
    %cst_7 = arith.constant dense<0.000000e+00> : vector<8x256xf32>
    %9 = tpu.matmul %7, %8, %cst_7 {dimension_numbers = #tpu.dot_dimension_numbers<[1], [0], [0], [1], [0, 0, 1, 1], [], []>} : vector<8x1024xbf16>, vector<1024x256xbf16>, vector<8x256xf32> -> vector<8x256xf32>
    %c0_8 = arith.constant 0 : index
    %c0_9 = arith.constant 0 : index
    %10 = vector.load %arg5[%c0_8, %c0_9] : memref<1x256xf32, #tpu.memory_space<vmem>>, vector<1x256xf32>
    %11 = vector.broadcast %10 : vector<1x256xf32> to vector<8x256xf32>
    %12 = arith.addf %9, %11 : vector<8x256xf32>
    %c0_10 = arith.constant 0 : index
    %c0_11 = arith.constant 0 : index
    %13 = vector.load %arg10[%c0_10, %c0_11] : memref<8x256xf32, #tpu.memory_space<vmem>>, vector<8x256xf32>
    tpu.vector_store %arg10[%c0_10, %c0_11], %12 {strides = array<i32>} : memref<8x256xf32, #tpu.memory_space<vmem>>, vector<8x256xf32>,
    %14 = arith.truncf %12 : vector<8x256xf32> to vector<8x256xbf16>
    %c0_12 = arith.constant 0 : index
    %c0_13 = arith.constant 0 : index
    %15 = vector.load %arg6[%c0_12, %c0_13] : memref<256x1024xbf16, #tpu.memory_space<vmem>>, vector<256x1024xbf16>
    %cst_14 = arith.constant dense<0.000000e+00> : vector<8x1024xf32>
    %16 = tpu.matmul %14, %15, %cst_14 {dimension_numbers = #tpu.dot_dimension_numbers<[1], [0], [0], [1], [0, 0, 1, 1], [], []>} : vector<8x256xbf16>, vector<256x1024xbf16>, vector<8x1024xf32> -> vector<8x1024xf32>
    %c0_15 = arith.constant 0 : index
    %c0_16 = arith.constant 0 : index
    %17 = vector.load %arg7[%c0_15, %c0_16] : memref<1x1024xf32, #tpu.memory_space<vmem>>, vector<1x1024xf32>
    %18 = vector.broadcast %17 : vector<1x1024xf32> to vector<8x1024xf32>
    %19 = arith.addf %16, %18 : vector<8x1024xf32>
    %20 = math.tanh %19 : vector<8x1024xf32>
    %21 = arith.truncf %20 : vector<8x1024xf32> to vector<8x1024xbf16>
    %c0_17 = arith.constant 0 : index
    %c0_18 = arith.constant 0 : index
    %22 = vector.load %arg8[%c0_17, %c0_18] : memref<1024x512xbf16, #tpu.memory_space<vmem>>, vector<1024x512xbf16>
    %cst_19 = arith.constant dense<0.000000e+00> : vector<8x512xf32>
    %23 = tpu.matmul %21, %22, %cst_19 {dimension_numbers = #tpu.dot_dimension_numbers<[1], [0], [0], [1], [0, 0, 1, 1], [], []>} : vector<8x1024xbf16>, vector<1024x512xbf16>, vector<8x512xf32> -> vector<8x512xf32>
    %c0_20 = arith.constant 0 : index
    %c0_21 = arith.constant 0 : index
    %24 = vector.load %arg9[%c0_20, %c0_21] : memref<1x512xf32, #tpu.memory_space<vmem>>, vector<1x512xf32>
    %25 = vector.broadcast %24 : vector<1x512xf32> to vector<8x512xf32>
    %26 = arith.addf %23, %25 : vector<8x512xf32>
    %27 = math.tanh %26 : vector<8x512xf32>
    %28 = arith.truncf %27 : vector<8x512xf32> to vector<8x512xbf16>
    %c0_22 = arith.constant 0 : index
    %c0_23 = arith.constant 0 : index
    %29 = vector.load %arg11[%c0_22, %c0_23] : memref<8x512xbf16, #tpu.memory_space<vmem>>, vector<8x512xbf16>
    tpu.vector_store %arg11[%c0_22, %c0_23], %28 {strides = array<i32>} : memref<8x512xbf16, #tpu.memory_space<vmem>>, vector<8x512xbf16>,
    return
  }
  func.func @transform_0(%arg0: i32) -> (i32, i32) {
    %c0_i32 = arith.constant 0 : i32
    %c0_i32_0 = arith.constant 0 : i32
    %c0_i32_1 = arith.constant 0 : i32
    return %c0_i32, %c0_i32_0 : i32, i32
  }
  func.func @transform_1(%arg0: i32) -> (i32, i32) {
    %c0_i32 = arith.constant 0 : i32
    %c0_i32_0 = arith.constant 0 : i32
    %c0_i32_1 = arith.constant 0 : i32
    return %c0_i32, %c0_i32_0 : i32, i32
  }
  func.func @transform_2(%arg0: i32) -> (i32, i32) {
    %c0_i32 = arith.constant 0 : i32
    %c0_i32_0 = arith.constant 0 : i32
    %c0_i32_1 = arith.constant 0 : i32
    return %c0_i32, %c0_i32_0 : i32, i32
  }
  func.func @transform_3(%arg0: i32) -> (i32, i32) {
    %c0_i32 = arith.constant 0 : i32
    %c0_i32_0 = arith.constant 0 : i32
    %c0_i32_1 = arith.constant 0 : i32
    return %c0_i32, %c0_i32_0 : i32, i32
  }
  func.func @transform_4(%arg0: i32) -> (i32, i32) {
    %c0_i32 = arith.constant 0 : i32
    %c0_i32_0 = arith.constant 0 : i32
    %c0_i32_1 = arith.constant 0 : i32
    return %c0_i32, %c0_i32_0 : i32, i32
  }
  func.func @transform_5(%arg0: i32) -> (i32, i32) {
    %c0_i32 = arith.constant 0 : i32
    %c0_i32_0 = arith.constant 0 : i32
    %c0_i32_1 = arith.constant 0 : i32
    return %c0_i32, %c0_i32_0 : i32, i32
  }
  func.func @transform_6(%arg0: i32) -> (i32, i32) {
    %c0_i32 = arith.constant 0 : i32
    %c0_i32_0 = arith.constant 0 : i32
    %c0_i32_1 = arith.constant 0 : i32
    return %c0_i32, %c0_i32_0 : i32, i32
  }
  func.func @transform_7(%arg0: i32) -> (i32, i32) {
    %c0_i32 = arith.constant 0 : i32
    %c0_i32_0 = arith.constant 0 : i32
    %c0_i32_1 = arith.constant 0 : i32
    return %c0_i32, %c0_i32_0 : i32, i32
  }
  func.func @transform_8(%arg0: i32) -> (i32, i32) {
    %c0_i32 = arith.constant 0 : i32
    %c0_i32_0 = arith.constant 0 : i32
    %c0_i32_1 = arith.constant 0 : i32
    return %c0_i32, %c0_i32_0 : i32, i32
  }
  func.func @transform_9(%arg0: i32) -> (i32, i32) {
    %c0_i32 = arith.constant 0 : i32
    %c0_i32_0 = arith.constant 0 : i32
    %c0_i32_1 = arith.constant 0 : i32
    return %c0_i32, %c0_i32_0 : i32, i32
  }
  func.func @transform_10(%arg0: i32) -> (i32, i32) {
    %c0_i32 = arith.constant 0 : i32
    %c0_i32_0 = arith.constant 0 : i32
    %c0_i32_1 = arith.constant 0 : i32
    return %c0_i32, %c0_i32_0 : i32, i32
  }
}

module attributes {stable_mosaic.version = 11 : i64} {
  func.func @_gemm_kernel(%arg0: i32, %arg1: i32, %arg2: i32, %arg3: memref<8x256xbf16, #tpu.memory_space<vmem>>, %arg4: memref<256x512xbf16, #tpu.memory_space<vmem>>, %arg5: memref<1x512xf32, #tpu.memory_space<vmem>>, %arg6: memref<8x512xbf16, #tpu.memory_space<vmem>>, %arg7: memref<8x512xf32, #tpu.memory_space<vmem>>) attributes {dimension_semantics = [#tpu.dimension_semantics<parallel>, #tpu.dimension_semantics<parallel>, #tpu.dimension_semantics<arbitrary>], iteration_bounds = array<i64: 1, 2, 9>, scalar_prefetch = 0 : i64, scratch_operands = 1 : i64, tpu.core_type = #tpu.core_type<tc>, window_params = [{transform_indices = @transform_0, window_bounds = array<i64: 8, 256>}, {transform_indices = @transform_1, window_bounds = array<i64: 256, 512>}, {transform_indices = @transform_2, window_bounds = array<i64: 1, 512>}, {transform_indices = @transform_3, window_bounds = array<i64: 8, 512>}]} {
    %c0_i32 = arith.constant 0 : i32
    %0 = arith.cmpi eq, %arg2, %c0_i32 : i32
    %1 = arith.extui %0 : i1 to i32
    %c0_i32_0 = arith.constant 0 : i32
    %2 = arith.cmpi ne, %1, %c0_i32_0 : i32
    scf.if %2 {
      %c0_9 = arith.constant 0 : index
      %c0_10 = arith.constant 0 : index
      %12 = vector.load %arg5[%c0_9, %c0_10] : memref<1x512xf32, #tpu.memory_space<vmem>>, vector<1x512xf32>
      %13 = vector.shape_cast %12 : vector<1x512xf32> to vector<1x512xf32>
      %14 = vector.broadcast %13 : vector<1x512xf32> to vector<8x512xf32>
      %c0_11 = arith.constant 0 : index
      %c0_12 = arith.constant 0 : index
      %15 = vector.load %arg7[%c0_11, %c0_12] : memref<8x512xf32, #tpu.memory_space<vmem>>, vector<8x512xf32>
      tpu.vector_store %arg7[%c0_11, %c0_12], %14 {strides = array<i32>} : memref<8x512xf32, #tpu.memory_space<vmem>>, vector<8x512xf32>,
    } else {
    }
    %c0 = arith.constant 0 : index
    %c0_1 = arith.constant 0 : index
    %3 = vector.load %arg7[%c0, %c0_1] : memref<8x512xf32, #tpu.memory_space<vmem>>, vector<8x512xf32>
    %c0_2 = arith.constant 0 : index
    %c0_3 = arith.constant 0 : index
    %4 = vector.load %arg3[%c0_2, %c0_3] : memref<8x256xbf16, #tpu.memory_space<vmem>>, vector<8x256xbf16>
    %c0_4 = arith.constant 0 : index
    %c0_5 = arith.constant 0 : index
    %5 = vector.load %arg4[%c0_4, %c0_5] : memref<256x512xbf16, #tpu.memory_space<vmem>>, vector<256x512xbf16>
    %cst = arith.constant dense<0.000000e+00> : vector<8x512xf32>
    %6 = tpu.matmul %4, %5, %cst {dimension_numbers = #tpu.dot_dimension_numbers<[1], [0], [0], [1], [0, 0, 1, 1], [], []>} : vector<8x256xbf16>, vector<256x512xbf16>, vector<8x512xf32> -> vector<8x512xf32>
    %7 = arith.addf %3, %6 : vector<8x512xf32>
    %c0_6 = arith.constant 0 : index
    %c0_7 = arith.constant 0 : index
    %8 = vector.load %arg7[%c0_6, %c0_7] : memref<8x512xf32, #tpu.memory_space<vmem>>, vector<8x512xf32>
    tpu.vector_store %arg7[%c0_6, %c0_7], %7 {strides = array<i32>} : memref<8x512xf32, #tpu.memory_space<vmem>>, vector<8x512xf32>,
    %c8_i32 = arith.constant 8 : i32
    %9 = arith.cmpi eq, %arg2, %c8_i32 : i32
    %10 = arith.extui %9 : i1 to i32
    %c0_i32_8 = arith.constant 0 : i32
    %11 = arith.cmpi ne, %10, %c0_i32_8 : i32
    scf.if %11 {
      %c0_9 = arith.constant 0 : index
      %c0_10 = arith.constant 0 : index
      %12 = vector.load %arg7[%c0_9, %c0_10] : memref<8x512xf32, #tpu.memory_space<vmem>>, vector<8x512xf32>
      %cst_11 = arith.constant 0.000000e+00 : f32
      %13 = vector.broadcast %cst_11 : f32 to vector<8x512xf32>
      %14 = arith.maximumf %12, %13 : vector<8x512xf32>
      %15 = arith.truncf %14 : vector<8x512xf32> to vector<8x512xbf16>
      %c0_12 = arith.constant 0 : index
      %c0_13 = arith.constant 0 : index
      %16 = vector.load %arg6[%c0_12, %c0_13] : memref<8x512xbf16, #tpu.memory_space<vmem>>, vector<8x512xbf16>
      tpu.vector_store %arg6[%c0_12, %c0_13], %15 {strides = array<i32>} : memref<8x512xbf16, #tpu.memory_space<vmem>>, vector<8x512xbf16>,
    } else {
    }
    return
  }
  func.func @transform_0(%arg0: i32, %arg1: i32, %arg2: i32) -> (i32, i32) {
    %c0_i32 = arith.constant 0 : i32
    return %arg0, %arg2 : i32, i32
  }
  func.func @transform_1(%arg0: i32, %arg1: i32, %arg2: i32) -> (i32, i32) {
    %c0_i32 = arith.constant 0 : i32
    return %arg2, %arg1 : i32, i32
  }
  func.func @transform_2(%arg0: i32, %arg1: i32, %arg2: i32) -> (i32, i32) {
    %c0_i32 = arith.constant 0 : i32
    %c0_i32_0 = arith.constant 0 : i32
    return %c0_i32, %arg1 : i32, i32
  }
  func.func @transform_3(%arg0: i32, %arg1: i32, %arg2: i32) -> (i32, i32) {
    %c0_i32 = arith.constant 0 : i32
    return %arg0, %arg1 : i32, i32
  }
}

module attributes {stable_mosaic.version = 11 : i64} {
  func.func @_gemm_kernel(%arg0: i32, %arg1: i32, %arg2: i32, %arg3: memref<8x256xbf16, #tpu.memory_space<vmem>>, %arg4: memref<256x256xbf16, #tpu.memory_space<vmem>>, %arg5: memref<1x256xf32, #tpu.memory_space<vmem>>, %arg6: memref<8x256xbf16, #tpu.memory_space<vmem>>, %arg7: memref<8x256xf32, #tpu.memory_space<vmem>>) attributes {dimension_semantics = [#tpu.dimension_semantics<parallel>, #tpu.dimension_semantics<parallel>, #tpu.dimension_semantics<arbitrary>], iteration_bounds = array<i64: 1, 2, 5>, scalar_prefetch = 0 : i64, scratch_operands = 1 : i64, tpu.core_type = #tpu.core_type<tc>, window_params = [{transform_indices = @transform_0, window_bounds = array<i64: 8, 256>}, {transform_indices = @transform_1, window_bounds = array<i64: 256, 256>}, {transform_indices = @transform_2, window_bounds = array<i64: 1, 256>}, {transform_indices = @transform_3, window_bounds = array<i64: 8, 256>}]} {
    %c0_i32 = arith.constant 0 : i32
    %0 = arith.cmpi eq, %arg2, %c0_i32 : i32
    %1 = arith.extui %0 : i1 to i32
    %c0_i32_0 = arith.constant 0 : i32
    %2 = arith.cmpi ne, %1, %c0_i32_0 : i32
    scf.if %2 {
      %c0_9 = arith.constant 0 : index
      %c0_10 = arith.constant 0 : index
      %12 = vector.load %arg5[%c0_9, %c0_10] : memref<1x256xf32, #tpu.memory_space<vmem>>, vector<1x256xf32>
      %13 = vector.shape_cast %12 : vector<1x256xf32> to vector<1x256xf32>
      %14 = vector.broadcast %13 : vector<1x256xf32> to vector<8x256xf32>
      %c0_11 = arith.constant 0 : index
      %c0_12 = arith.constant 0 : index
      %15 = vector.load %arg7[%c0_11, %c0_12] : memref<8x256xf32, #tpu.memory_space<vmem>>, vector<8x256xf32>
      tpu.vector_store %arg7[%c0_11, %c0_12], %14 {strides = array<i32>} : memref<8x256xf32, #tpu.memory_space<vmem>>, vector<8x256xf32>,
    } else {
    }
    %c0 = arith.constant 0 : index
    %c0_1 = arith.constant 0 : index
    %3 = vector.load %arg7[%c0, %c0_1] : memref<8x256xf32, #tpu.memory_space<vmem>>, vector<8x256xf32>
    %c0_2 = arith.constant 0 : index
    %c0_3 = arith.constant 0 : index
    %4 = vector.load %arg3[%c0_2, %c0_3] : memref<8x256xbf16, #tpu.memory_space<vmem>>, vector<8x256xbf16>
    %c0_4 = arith.constant 0 : index
    %c0_5 = arith.constant 0 : index
    %5 = vector.load %arg4[%c0_4, %c0_5] : memref<256x256xbf16, #tpu.memory_space<vmem>>, vector<256x256xbf16>
    %cst = arith.constant dense<0.000000e+00> : vector<8x256xf32>
    %6 = tpu.matmul %4, %5, %cst {dimension_numbers = #tpu.dot_dimension_numbers<[1], [0], [0], [1], [0, 0, 1, 1], [], []>} : vector<8x256xbf16>, vector<256x256xbf16>, vector<8x256xf32> -> vector<8x256xf32>
    %7 = arith.addf %3, %6 : vector<8x256xf32>
    %c0_6 = arith.constant 0 : index
    %c0_7 = arith.constant 0 : index
    %8 = vector.load %arg7[%c0_6, %c0_7] : memref<8x256xf32, #tpu.memory_space<vmem>>, vector<8x256xf32>
    tpu.vector_store %arg7[%c0_6, %c0_7], %7 {strides = array<i32>} : memref<8x256xf32, #tpu.memory_space<vmem>>, vector<8x256xf32>,
    %c4_i32 = arith.constant 4 : i32
    %9 = arith.cmpi eq, %arg2, %c4_i32 : i32
    %10 = arith.extui %9 : i1 to i32
    %c0_i32_8 = arith.constant 0 : i32
    %11 = arith.cmpi ne, %10, %c0_i32_8 : i32
    scf.if %11 {
      %c0_9 = arith.constant 0 : index
      %c0_10 = arith.constant 0 : index
      %12 = vector.load %arg7[%c0_9, %c0_10] : memref<8x256xf32, #tpu.memory_space<vmem>>, vector<8x256xf32>
      %cst_11 = arith.constant 0.000000e+00 : f32
      %13 = vector.broadcast %cst_11 : f32 to vector<8x256xf32>
      %14 = arith.maximumf %12, %13 : vector<8x256xf32>
      %15 = arith.truncf %14 : vector<8x256xf32> to vector<8x256xbf16>
      %c0_12 = arith.constant 0 : index
      %c0_13 = arith.constant 0 : index
      %16 = vector.load %arg6[%c0_12, %c0_13] : memref<8x256xbf16, #tpu.memory_space<vmem>>, vector<8x256xbf16>
      tpu.vector_store %arg6[%c0_12, %c0_13], %15 {strides = array<i32>} : memref<8x256xbf16, #tpu.memory_space<vmem>>, vector<8x256xbf16>,
    } else {
    }
    return
  }
  func.func @transform_0(%arg0: i32, %arg1: i32, %arg2: i32) -> (i32, i32) {
    %c0_i32 = arith.constant 0 : i32
    return %arg0, %arg2 : i32, i32
  }
  func.func @transform_1(%arg0: i32, %arg1: i32, %arg2: i32) -> (i32, i32) {
    %c0_i32 = arith.constant 0 : i32
    return %arg2, %arg1 : i32, i32
  }
  func.func @transform_2(%arg0: i32, %arg1: i32, %arg2: i32) -> (i32, i32) {
    %c0_i32 = arith.constant 0 : i32
    %c0_i32_0 = arith.constant 0 : i32
    return %c0_i32, %arg1 : i32, i32
  }
  func.func @transform_3(%arg0: i32, %arg1: i32, %arg2: i32) -> (i32, i32) {
    %c0_i32 = arith.constant 0 : i32
    return %arg0, %arg1 : i32, i32
  }
}

module attributes {stable_mosaic.version = 11 : i64} {
  func.func @_gemm_kernel(%arg0: i32, %arg1: i32, %arg2: i32, %arg3: memref<32x256xbf16, #tpu.memory_space<vmem>>, %arg4: memref<256x128xbf16, #tpu.memory_space<vmem>>, %arg5: memref<1x128xf32, #tpu.memory_space<vmem>>, %arg6: memref<32x128xbf16, #tpu.memory_space<vmem>>, %arg7: memref<32x128xf32, #tpu.memory_space<vmem>>) attributes {dimension_semantics = [#tpu.dimension_semantics<parallel>, #tpu.dimension_semantics<parallel>, #tpu.dimension_semantics<arbitrary>], iteration_bounds = array<i64: 1, 2, 3>, scalar_prefetch = 0 : i64, scratch_operands = 1 : i64, tpu.core_type = #tpu.core_type<tc>, window_params = [{transform_indices = @transform_0, window_bounds = array<i64: 32, 256>}, {transform_indices = @transform_1, window_bounds = array<i64: 256, 128>}, {transform_indices = @transform_2, window_bounds = array<i64: 1, 128>}, {transform_indices = @transform_3, window_bounds = array<i64: 32, 128>}]} {
    %c0_i32 = arith.constant 0 : i32
    %0 = arith.cmpi eq, %arg2, %c0_i32 : i32
    %1 = arith.extui %0 : i1 to i32
    %c0_i32_0 = arith.constant 0 : i32
    %2 = arith.cmpi ne, %1, %c0_i32_0 : i32
    scf.if %2 {
      %c0_9 = arith.constant 0 : index
      %c0_10 = arith.constant 0 : index
      %12 = vector.load %arg5[%c0_9, %c0_10] : memref<1x128xf32, #tpu.memory_space<vmem>>, vector<1x128xf32>
      %13 = vector.shape_cast %12 : vector<1x128xf32> to vector<1x128xf32>
      %14 = vector.broadcast %13 : vector<1x128xf32> to vector<32x128xf32>
      %c0_11 = arith.constant 0 : index
      %c0_12 = arith.constant 0 : index
      %15 = vector.load %arg7[%c0_11, %c0_12] : memref<32x128xf32, #tpu.memory_space<vmem>>, vector<32x128xf32>
      tpu.vector_store %arg7[%c0_11, %c0_12], %14 {strides = array<i32>} : memref<32x128xf32, #tpu.memory_space<vmem>>, vector<32x128xf32>,
    } else {
    }
    %c0 = arith.constant 0 : index
    %c0_1 = arith.constant 0 : index
    %3 = vector.load %arg7[%c0, %c0_1] : memref<32x128xf32, #tpu.memory_space<vmem>>, vector<32x128xf32>
    %c0_2 = arith.constant 0 : index
    %c0_3 = arith.constant 0 : index
    %4 = vector.load %arg3[%c0_2, %c0_3] : memref<32x256xbf16, #tpu.memory_space<vmem>>, vector<32x256xbf16>
    %c0_4 = arith.constant 0 : index
    %c0_5 = arith.constant 0 : index
    %5 = vector.load %arg4[%c0_4, %c0_5] : memref<256x128xbf16, #tpu.memory_space<vmem>>, vector<256x128xbf16>
    %cst = arith.constant dense<0.000000e+00> : vector<32x128xf32>
    %6 = tpu.matmul %4, %5, %cst {dimension_numbers = #tpu.dot_dimension_numbers<[1], [0], [0], [1], [0, 0, 1, 1], [], []>} : vector<32x256xbf16>, vector<256x128xbf16>, vector<32x128xf32> -> vector<32x128xf32>
    %7 = arith.addf %3, %6 : vector<32x128xf32>
    %c0_6 = arith.constant 0 : index
    %c0_7 = arith.constant 0 : index
    %8 = vector.load %arg7[%c0_6, %c0_7] : memref<32x128xf32, #tpu.memory_space<vmem>>, vector<32x128xf32>
    tpu.vector_store %arg7[%c0_6, %c0_7], %7 {strides = array<i32>} : memref<32x128xf32, #tpu.memory_space<vmem>>, vector<32x128xf32>,
    %c2_i32 = arith.constant 2 : i32
    %9 = arith.cmpi eq, %arg2, %c2_i32 : i32
    %10 = arith.extui %9 : i1 to i32
    %c0_i32_8 = arith.constant 0 : i32
    %11 = arith.cmpi ne, %10, %c0_i32_8 : i32
    scf.if %11 {
      %c0_9 = arith.constant 0 : index
      %c0_10 = arith.constant 0 : index
      %12 = vector.load %arg7[%c0_9, %c0_10] : memref<32x128xf32, #tpu.memory_space<vmem>>, vector<32x128xf32>
      %cst_11 = arith.constant 0.000000e+00 : f32
      %13 = vector.broadcast %cst_11 : f32 to vector<32x128xf32>
      %14 = arith.maximumf %12, %13 : vector<32x128xf32>
      %15 = arith.truncf %14 : vector<32x128xf32> to vector<32x128xbf16>
      %c0_12 = arith.constant 0 : index
      %c0_13 = arith.constant 0 : index
      %16 = vector.load %arg6[%c0_12, %c0_13] : memref<32x128xbf16, #tpu.memory_space<vmem>>, vector<32x128xbf16>
      tpu.vector_store %arg6[%c0_12, %c0_13], %15 {strides = array<i32>} : memref<32x128xbf16, #tpu.memory_space<vmem>>, vector<32x128xbf16>,
    } else {
    }
    return
  }
  func.func @transform_0(%arg0: i32, %arg1: i32, %arg2: i32) -> (i32, i32) {
    %c0_i32 = arith.constant 0 : i32
    return %arg0, %arg2 : i32, i32
  }
  func.func @transform_1(%arg0: i32, %arg1: i32, %arg2: i32) -> (i32, i32) {
    %c0_i32 = arith.constant 0 : i32
    return %arg2, %arg1 : i32, i32
  }
  func.func @transform_2(%arg0: i32, %arg1: i32, %arg2: i32) -> (i32, i32) {
    %c0_i32 = arith.constant 0 : i32
    %c0_i32_0 = arith.constant 0 : i32
    return %c0_i32, %arg1 : i32, i32
  }
  func.func @transform_3(%arg0: i32, %arg1: i32, %arg2: i32) -> (i32, i32) {
    %c0_i32 = arith.constant 0 : i32
    return %arg0, %arg1 : i32, i32
  }
}

module attributes {stable_mosaic.version = 11 : i64} {
  func.func @_gemm_kernel(%arg0: i32, %arg1: i32, %arg2: i32, %arg3: memref<64x384xbf16, #tpu.memory_space<vmem>>, %arg4: memref<384x128xbf16, #tpu.memory_space<vmem>>, %arg5: memref<1x128xf32, #tpu.memory_space<vmem>>, %arg6: memref<64x128xf32, #tpu.memory_space<vmem>>, %arg7: memref<64x128xf32, #tpu.memory_space<vmem>>) attributes {dimension_semantics = [#tpu.dimension_semantics<parallel>, #tpu.dimension_semantics<parallel>, #tpu.dimension_semantics<arbitrary>], iteration_bounds = array<i64: 2, 1, 1>, scalar_prefetch = 0 : i64, scratch_operands = 1 : i64, tpu.core_type = #tpu.core_type<tc>, window_params = [{transform_indices = @transform_0, window_bounds = array<i64: 64, 384>}, {transform_indices = @transform_1, window_bounds = array<i64: 384, 128>}, {transform_indices = @transform_2, window_bounds = array<i64: 1, 128>}, {transform_indices = @transform_3, window_bounds = array<i64: 64, 128>}]} {
    %c0_i32 = arith.constant 0 : i32
    %0 = arith.cmpi eq, %arg2, %c0_i32 : i32
    %1 = arith.extui %0 : i1 to i32
    %c0_i32_0 = arith.constant 0 : i32
    %2 = arith.cmpi ne, %1, %c0_i32_0 : i32
    scf.if %2 {
      %c0_10 = arith.constant 0 : index
      %c0_11 = arith.constant 0 : index
      %12 = vector.load %arg5[%c0_10, %c0_11] : memref<1x128xf32, #tpu.memory_space<vmem>>, vector<1x128xf32>
      %13 = vector.shape_cast %12 : vector<1x128xf32> to vector<1x128xf32>
      %14 = vector.broadcast %13 : vector<1x128xf32> to vector<64x128xf32>
      %c0_12 = arith.constant 0 : index
      %c0_13 = arith.constant 0 : index
      %15 = vector.load %arg7[%c0_12, %c0_13] : memref<64x128xf32, #tpu.memory_space<vmem>>, vector<64x128xf32>
      tpu.vector_store %arg7[%c0_12, %c0_13], %14 {strides = array<i32>} : memref<64x128xf32, #tpu.memory_space<vmem>>, vector<64x128xf32>,
    } else {
    }
    %c0 = arith.constant 0 : index
    %c0_1 = arith.constant 0 : index
    %3 = vector.load %arg7[%c0, %c0_1] : memref<64x128xf32, #tpu.memory_space<vmem>>, vector<64x128xf32>
    %c0_2 = arith.constant 0 : index
    %c0_3 = arith.constant 0 : index
    %4 = vector.load %arg3[%c0_2, %c0_3] : memref<64x384xbf16, #tpu.memory_space<vmem>>, vector<64x384xbf16>
    %c0_4 = arith.constant 0 : index
    %c0_5 = arith.constant 0 : index
    %5 = vector.load %arg4[%c0_4, %c0_5] : memref<384x128xbf16, #tpu.memory_space<vmem>>, vector<384x128xbf16>
    %cst = arith.constant dense<0.000000e+00> : vector<64x128xf32>
    %6 = tpu.matmul %4, %5, %cst {dimension_numbers = #tpu.dot_dimension_numbers<[1], [0], [0], [1], [0, 0, 1, 1], [], []>} : vector<64x384xbf16>, vector<384x128xbf16>, vector<64x128xf32> -> vector<64x128xf32>
    %7 = arith.addf %3, %6 : vector<64x128xf32>
    %c0_6 = arith.constant 0 : index
    %c0_7 = arith.constant 0 : index
    %8 = vector.load %arg7[%c0_6, %c0_7] : memref<64x128xf32, #tpu.memory_space<vmem>>, vector<64x128xf32>
    tpu.vector_store %arg7[%c0_6, %c0_7], %7 {strides = array<i32>} : memref<64x128xf32, #tpu.memory_space<vmem>>, vector<64x128xf32>,
    %c0_i32_8 = arith.constant 0 : i32
    %9 = arith.cmpi eq, %arg2, %c0_i32_8 : i32
    %10 = arith.extui %9 : i1 to i32
    %c0_i32_9 = arith.constant 0 : i32
    %11 = arith.cmpi ne, %10, %c0_i32_9 : i32
    scf.if %11 {
      %c0_10 = arith.constant 0 : index
      %c0_11 = arith.constant 0 : index
      %12 = vector.load %arg7[%c0_10, %c0_11] : memref<64x128xf32, #tpu.memory_space<vmem>>, vector<64x128xf32>
      %c0_12 = arith.constant 0 : index
      %c0_13 = arith.constant 0 : index
      %13 = vector.load %arg6[%c0_12, %c0_13] : memref<64x128xf32, #tpu.memory_space<vmem>>, vector<64x128xf32>
      tpu.vector_store %arg6[%c0_12, %c0_13], %12 {strides = array<i32>} : memref<64x128xf32, #tpu.memory_space<vmem>>, vector<64x128xf32>,
    } else {
    }
    return
  }
  func.func @transform_0(%arg0: i32, %arg1: i32, %arg2: i32) -> (i32, i32) {
    %c0_i32 = arith.constant 0 : i32
    return %arg0, %arg2 : i32, i32
  }
  func.func @transform_1(%arg0: i32, %arg1: i32, %arg2: i32) -> (i32, i32) {
    %c0_i32 = arith.constant 0 : i32
    return %arg2, %arg1 : i32, i32
  }
  func.func @transform_2(%arg0: i32, %arg1: i32, %arg2: i32) -> (i32, i32) {
    %c0_i32 = arith.constant 0 : i32
    %c0_i32_0 = arith.constant 0 : i32
    return %c0_i32, %arg1 : i32, i32
  }
  func.func @transform_3(%arg0: i32, %arg1: i32, %arg2: i32) -> (i32, i32) {
    %c0_i32 = arith.constant 0 : i32
    return %arg0, %arg1 : i32, i32
  }
}

</mosaic_0001>

<bundles_post_ra>
// kernel: ae_vgg16_forward.9
= control target key start
LH: loop header
LB: loop body
LE: loop exit
PB: predicated region body
PF: predicated region fallthrough
CT: control target
= control target key end

     0   :  { %s831_s12 = smov 0   ;;  %s833_s13 = smov 0   ;;  %s904_s0 = inlined_call_operand.vmem [shape: bf16[128,128], index: 0, kind: input, shape index: {}]   ;;  %s905_s1 = inlined_call_operand.vmem [shape: bf16[128,128], index: 1, kind: input, shape index: {}]   ;;  %s906_s2 = inlined_call_operand.vmem [shape: f32[1,128], index: 2, kind: input, shape index: {}]   ;;  %s907_s3 = inlined_call_operand.vmem [shape: bf16[128,128], index: 3, kind: output, shape index: {}]  }
   0x1   :  { %s835_s14 = smov 0  }
   0x2 LB: > { %s32_s15 = sadd.s32 1, %s805_s13  ;;  %p640_p0 = scmp.ge.s32.totalorder %s809_s14, 1  ;;  %s809_s14 = sphi %s835_s14, %s13_s14   ;;  %s805_s13 = sphi %s833_s13, %s909_s13   ;;  %s801_s12 = sphi %s831_s12, %s908_s12  }
   0x3   : > { %p34_p1 = scmp.ge.s32.totalorder %s32_s15, 2  ;;  %p188_p2 = scmp.lt.s32.totalorder %s809_s14, 3 }
   0x5   : > { %s911_s15 = smov (%p34_p1, %s32_s15), 0  ;;  %p189_p3 = pnand %p640_p0, %p188_p2 }
   0x6   : > { %v775_v0 = vld [vmem:[%s905_s1] sm:$0xff] (!%p189_p3)   ;;  %s641_s18 = sshll.u32 (!%p189_p3), %s801_s12, 3  ;;  %v776_v1 = vld [vmem:[%s905_s1 + $0x8] sm:$0xff] (!%p189_p3)   ;;  %v777_v2 = vld [vmem:[%s905_s1 + $0x10] sm:$0xff] (!%p189_p3)  }
   0x7   : > { %192 = sbr.rel (%p189_p3) target bundleno = 261 (0x105), region = 32  ;;  %p230_p4 = scmp.lt.s32.totalorder (!%p189_p3), %s641_s18, 15  ;;  %711 = vmatprep.subr.bf16.mxu0 (!%p189_p3), %v775_v0  ;;  %735 = vmatprep.subr.bf16.mxu1 (!%p189_p3), %v775_v0  ;;  %v778_v3 = vld [vmem:[%s905_s1 + $0x18] sm:$0xff] (!%p189_p3)   ;;  %v779_v6 = vld [vmem:[%s905_s1 + $0x20] sm:$0xff] (!%p189_p3)   ;;  %v780_v7 = vld [vmem:[%s905_s1 + $0x28] sm:$0xff] (!%p189_p3)  }
   0x8   : > { %712 = vmatpush3.bf16.msra.mxu0 (!%p189_p3), %v775_v0  ;;  %743 = vmatpush3.bf16.msra.mxu1 (!%p189_p3), %v775_v0  ;;  %v781_v8 = vld [vmem:[%s905_s1 + $0x30] sm:$0xff] (!%p189_p3)   ;;  %v782_v9 = vld [vmem:[%s905_s1 + $0x38] sm:$0xff] (!%p189_p3)   ;;  %v645_v12 = vld [vmem:[%s906_s2] ss:$0 sm:$0xff] (!%p189_p3) }
   0x9   : > { %713 = vmatprep.subr.bf16.mxu0 (!%p189_p3), %v776_v1  ;;  %736 = vmatprep.subr.bf16.mxu1 (!%p189_p3), %v776_v1 }
   0xc   : > { %714 = vmatpush3.bf16.msra.mxu0 (!%p189_p3), %v776_v1  ;;  %744 = vmatpush3.bf16.msra.mxu1 (!%p189_p3), %v776_v1 }
   0xd   : > { %715 = vmatprep.subr.bf16.mxu0 (!%p189_p3), %v777_v2  ;;  %737 = vmatprep.subr.bf16.mxu1 (!%p189_p3), %v777_v2 }
   0xe   : > { %s913_s18 = smov (!%p230_p4, %s641_s18), 15 }
   0xf   : > { %s642_s23 = sshll.u32 %s913_s18, 2 }
  0x10   : > { %s866_s26 = scalar_lea.vmem %s904_s0, %s642_s23  ;;  %716 = vmatpush3.bf16.msra.mxu0 %v777_v2  ;;  %745 = vmatpush3.bf16.msra.mxu1 %v777_v2  ;;  %s257_s17 = scalar_lea.vmem %s907_s3, %s642_s23 }
  0x11   : > { %v783_v4 = vld [vmem:[%s866_s26] sm:$0xff]   ;;  %v784_v5 = vld [vmem:[%s866_s26 + $0x10] sm:$0xff]   ;;  %717 = vmatprep.subr.bf16.mxu0 %v778_v3  ;;  %738 = vmatprep.subr.bf16.mxu1 %v778_v3  ;;  %v785_v10 = vld [vmem:[%s866_s26 + $0x8] sm:$0xff]  }
  0x12   : > { %727 = vmatprep.mubr.bf16.mxu0 %v783_v4  ;;  %731 = vmatprep.mubr.bf16.mxu1 %v784_v5  ;;  %v786_v11 = vld [vmem:[%s866_s26 + $0x18] sm:$0xff]  }
  0x14   : > { %718 = vmatpush3.bf16.msra.mxu0 %v778_v3  ;;  %746 = vmatpush3.bf16.msra.mxu1 %v778_v3 }
  0x15   : > { %719 = vmatprep.subr.bf16.mxu0 %v779_v6  ;;  %739 = vmatprep.subr.bf16.mxu1 %v779_v6 }
  0x18   : > { %720 = vmatpush3.bf16.msra.mxu0 %v779_v6  ;;  %747 = vmatpush3.bf16.msra.mxu1 %v779_v6 }
  0x19   : > { %721 = vmatprep.subr.bf16.mxu0 %v780_v7  ;;  %740 = vmatprep.subr.bf16.mxu1 %v780_v7 }
  0x1c   : > { %722 = vmatpush3.bf16.msra.mxu0 %v780_v7  ;;  %748 = vmatpush3.bf16.msra.mxu1 %v780_v7 }
  0x1d   : > { %723 = vmatprep.subr.bf16.mxu0 %v781_v8  ;;  %741 = vmatprep.subr.bf16.mxu1 %v781_v8 }
  0x20   : > { %724 = vmatpush3.bf16.msra.mxu0 %v781_v8  ;;  %749 = vmatpush3.bf16.msra.mxu1 %v781_v8 }
  0x21   : > { %725 = vmatprep.subr.bf16.mxu0 %v782_v9  ;;  %742 = vmatprep.subr.bf16.mxu1 %v782_v9 }
  0x24   : > { %726 = vmatpush3.bf16.msra.mxu0 %v782_v9  ;;  %750 = vmatpush3.bf16.msra.mxu1 %v782_v9 }
  0x27   : > { %728 = vmatmul.mubr.bf16.vlgmr.msra.gmra.mrb[0].mxu0 %v785_v10  ;;  %732 = vmatmul.mubr.bf16.vlgmr.msra.gmra.mrb[0].mxu1 %v786_v11 }
  0xfa   : > { %v729_v13 = vpop.f32.mrb[0].mxu0  ;;  %v733_v14 = vpop.f32.mrb[0].mxu1 }
  0xfb   : > { %v450_v15 = vadd.f32 %v729_v13, %v645_v12  ;;  %v454_v16 = vadd.f32 %v733_v14, %v645_v12  ;;  %v417_v17 = vpop.f32.mrb[1].mxu0  ;;  %v433_v18 = vpop.f32.mrb[1].mxu1 }
  0xfc   : > { %v448_v19 = vadd.f32 %v645_v12, %v417_v17  ;;  %v452_v20 = vadd.f32 %v645_v12, %v433_v18  ;;  %v730_v21 = vpop.f32.mrb[2].mxu0  ;;  %v734_v22 = vpop.f32.mrb[2].mxu1 }
  0xfd   : > { %v451_v23 = vadd.f32 %v730_v21, %v645_v12  ;;  %v455_v24 = vadd.f32 %v734_v22, %v645_v12  ;;  %v420_v25 = vpop.f32.mrb[3].mxu0  ;;  %v436_v26 = vpop.f32.mrb[3].mxu1  ;;  %v477_v29 = vmax.f32 %v450_v15, 0.0  ;;  %v481_v30 = vmax.f32 %v454_v16, 0.0 }
  0xfe   : > { %v449_v27 = vadd.f32 %v645_v12, %v420_v25  ;;  %v453_v28 = vadd.f32 %v645_v12, %v436_v26  ;;  %v475_v33 = vmax.f32 %v448_v19, 0.0  ;;  %v479_v34 = vmax.f32 %v452_v20, 0.0 }
  0xff   : > { %v478_v31 = vmax.f32 %v451_v23, 0.0  ;;  %v482_v32 = vmax.f32 %v455_v24, 0.0 }
 0x100   : > { %v476_v35 = vmax.f32 %v449_v27, 0.0  ;;  %v480_v36 = vmax.f32 %v453_v28, 0.0 }
 0x101   : > { %v684_v37 = vpack.c.bf16 %v478_v31, %v477_v29  ;;  %v694_v38 = vpack.c.bf16 %v482_v32, %v481_v30 }
 0x102   : > { %v679_v39 = vpack.c.bf16 %v476_v35, %v475_v33  ;;  %v689_v40 = vpack.c.bf16 %v480_v36, %v479_v34 }
 0x103   : > { %696 = vst [vmem:[%s257_s17 + $0x8] sm:$0xff] %v684_v37   ;;  %698 = vst [vmem:[%s257_s17 + $0x18] sm:$0xff] %v694_v38  }
 0x104   : > { %680 = vst [vmem:[%s257_s17] sm:$0xff] %v679_v39   ;;  %697 = vst [vmem:[%s257_s17 + $0x10] sm:$0xff] %v689_v40  }
 0x105 PF: > { %s13_s14 = sadd.s32 1, %s809_s14   ;;  %s908_s12 = smov %s805_s13 }
 0x106   : > { %p10_p5 = scmp.ge.s32.totalorder %s13_s14, 4   ;;  %s909_s13 = smov %s911_s15 }
 0x108   :  { %12 = sbr.rel (!%p10_p5) target bundleno = 2 (0x2), region = 76 }

// kernel: ae_vgg16_forward.10
= control target key start
LH: loop header
LB: loop body
LE: loop exit
PB: predicated region body
PF: predicated region fallthrough
CT: control target
= control target key end

     0   :  { %8 = vsyncpa [#allocation5], 0  ;;  %s903_s12 = smov 0   ;;  %s905_s13 = smov 0   ;;  %s1070_s0 = inlined_call_operand.vmem [shape: bf16[32,768], index: 0, kind: input, shape index: {}]   ;;  %s1071_s1 = inlined_call_operand.vmem [shape: bf16[768,128], index: 1, kind: input, shape index: {}]   ;;  %s1072_s2 = inlined_call_operand.hbm [shape: f32[1,128], index: 2, kind: input, shape index: {}]   ;;  %s1073_s3 = inlined_call_operand.vmem [shape: bf16[32,128], index: 3, kind: output, shape index: {}]  }
   0x1   :  { %s907_s14 = smov 0   ;;  %s909_s15 = smov 0  }
   0x2   :  { %s911_s16 = smov 0   ;;  %s913_s17 = smov 0  }
   0x3   :  { %s915_s18 = smov 0  }
   0x4 LB: > { %s636_s19 = sadd.s32 4294967295, %s880_s18   ;;  %s26_s20 = sadd.s32 1, %s872_s16  ;;  %s880_s18 = sphi %s915_s18, %s14_s18   ;;  %s876_s17 = sphi %s913_s17, %s1089_s17   ;;  %s872_s16 = sphi %s911_s16, %s1088_s16   ;;  %s868_s15 = sphi %s909_s15, %s1087_s15   ;;  %s864_s14 = sphi %s907_s14, %s1086_s14   ;;  %s860_s13 = sphi %s905_s13, %s1085_s13   ;;  %s856_s12 = sphi %s903_s12, %s1084_s12  }
   0x5   : > { %p27_p0 = scmp.ge.s32.totalorder %s26_s20, 3  ;;  %s33_s21 = sadd.s32 1, %s876_s17 }
   0x6   : > { %s42_s22 = sadd.s32 1, %s860_s13  ;;  %p49_p1 = scmp.ne.s32.totalorder %s860_s13, %s856_s12 }
   0x7   : > { %s1091_s20 = smov (%p27_p0, %s26_s20), 0  ;;  %s1093_s21 = smov (!%p27_p0, %s33_s21), %s876_s17 }
   0x8   : > { %s38_s23 = ssub.s32 %s872_s16, %s1091_s20  ;;  %p50_p2 = scmp.eq.s32.totalorder %s880_s18, 0 }
   0x9   : > { %p35_p3 = scmp.ge.s32.totalorder %s1093_s21, 2  ;;  %p638_p4 = scmp.ge.s32.totalorder %s880_s18, 1 }
   0xa   : > { %p951_p5 = por %p50_p2, %p49_p1  ;;  %p148_p6 = scmp.lt.s32.totalorder %s880_s18, 7 }
   0xb   : > { %s1095_s21 = smov (%p35_p3, %s1093_s21), 0  ;;  %p964_p8 = scmp.eq.s32.totalorder %s636_s19, 0 }
   0xc   : > { %s1077_s24 = scalar_select %p951_p5, 1, 0 }
   0xd   : > { %p958_p7 = pnand %p638_p4, %p148_p6  ;;  %s37_s26 = ssub.s32 %s876_s17, %s1095_s21 }
   0xe   : > { %s1079_s27 = scalar_select %p964_p8, 1, 0 }
   0xf   : > { %s1078_s25 = scalar_select %p958_p7, 1, 0 }
  0x10   : > { %s39_s28 = sor.u32 %s38_s23, %s37_s26  ;;  %p712_p9 = pneg %p958_p7 }
  0x11   : > { %p40_p10 = scmp.eq.s32.totalorder %s39_s28, 0  ;;  %s882_s29 = smov [#allocation4]  }
  0x12   : > { %s163_s30 = sshll.u32 %s882_s29, 4  ;;  %p972_p11 = pnand %p964_p8, %p712_p9  ;;  %s164_s30 = int_to_ptr.vmem [resolvable:$true] %s163_s30 }
  0x13   : > { %s977_s5 = scalar_select %p40_p10, %s860_s13, %s42_s22  }
  0x14   : > { %s794_s8 = scalar_lea.hbm %s1072_s2, 16  ;;  %p796_p13 = pneg %p972_p11 }
  0x15   : > { %p795_p12 = scmp.ne.s32.totalorder %s1072_s2, %s794_s8  ;;  %p801_p2 = scmp.lt.u32.totalorder %s794_s8, %s1072_s2 }
  0x17   : > { %p797_p0 = pnand %p796_p13, %p795_p12 }
  0x19   : > { %p798_p1 = pneg %p797_p0 }
  0x1b   : > { %p803_p3 = pnand %p801_p2, %p798_p1 }
  0x1d   : > { %806 = shalt.err (!%p803_p3)
}
  0x1e   : > { %s807_s22 = scalar_lea.vmem %s164_s30, 16  ;;  %s814_s23 = scalar_lea.vmem %s164_s30, 32 }
  0x1f   : > { %p808_p4 = scmp.ne.s32.totalorder %s164_s30, %s807_s22  ;;  %p815_p10 = scmp.lt.s32.totalorder %s164_s30, %s164_s30 }
  0x20   : > { %p816_p8 = scmp.lt.s32.totalorder %s814_s23, %s807_s22 }
  0x21   : > { %p810_p6 = pnand %p808_p4, %p796_p13 }
  0x22   : > { %p817_p7 = por %p816_p8, %p815_p10 }
  0x23   : > { %p811_p9 = pneg %p810_p6 }
  0x25   : > { %p818_p5 = pnand %p817_p7, %p811_p9 }
  0x27   : > { %821 = shalt.err (!%p818_p5)
}
  0x28   : > { %715 = dma.hbm_to_vmem [thread:$0]  (!%p972_p11), %s1072_s2, 16, %s164_s30, [#allocation5]  }
  0x29   : > { %p640_p12 = scmp.ge.s32.totalorder %s880_s18, 6 }
  0x2a   : > { %p1081_p0 = scmp.ne.s32.totalorder (!%p640_p12), %s1077_s24, 0 }
  0x2b   : > { %170 = sbr.rel (%p640_p12) target bundleno = 59 (0x3b), region = 20 }
  0x32   : > { %173 = sbr.rel (!%p1081_p0) target bundleno = 59 (0x3b), region = 24  ;;  %s175_s29 = sand.u32 (%p1081_p0), 1, %s860_s13  }
  0x33   : > { %s643_s6 = sshll.u32 (%p1081_p0), %s872_s16, 1  ;;  %s641_s7 = sshll.u32 (%p1081_p0), %s175_s29, 4 }
  0x34   : > { %s707_s8 = smul.u32 (%p1081_p0), 12, %s876_s17  ;;  %s177_s30 = scalar_lea.vmem (%p1081_p0), [#allocation3], %s641_s7 }
  0x36   : > { %s181_s9 = sadd.s32 (%p1081_p0), %s707_s8, %s643_s6 }
  0x37   : > { %s645_s10 = sshll.u32 (%p1081_p0), %s181_s9, 2 }
  0x38   : > { %s183_s19 = scalar_lea.vmem (%p1081_p0), %s1070_s0, %s645_s10 }
  0x39   : > { %v213_v0 = vld [vmem:[%s183_s19] sm:$0xff]  ;;  %v215_v1 = vld [vmem:[%s183_s19 + $0x18] sm:$0xff] }
  0x3a   : > { %214 = vst [vmem:[%s177_s30] sm:$0xff] %v213_v0  ;;  %216 = vst [vmem:[%s177_s30 + $0x8] sm:$0xff] %v215_v1 }
  0x3b PF: > { %p1082_p5 = scmp.ne.s32.totalorder %s1078_s25, 0 }
  0x3c   : > { %s240_s24 = sand.u32 (!%p1082_p5), 1, %s856_s12   ;;  %p1083_p7 = scmp.ne.s32.totalorder (!%p1082_p5), %s1079_s27, 0 }
  0x3d   : > { %237 = sbr.rel (%p1082_p5) target bundleno = 347 (0x15b), region = 66  ;;  %s1007_s22 = sshll.u32 (!%p1082_p5), %s240_s24, 4 }
  0x3e   : > { %s242_s23 = scalar_lea.vmem (!%p1082_p5), [#allocation3], %s1007_s22 }
  0x44   : > { %851 = dma.done.wait (%p1083_p7), [#allocation5], 16  }
  0x45   : > { %853 = vsyncadd (%p1083_p7), [#allocation5], 4294967280  ;;  %s649_s26 = sshll.u32 %s864_s14, 5  ;;  %s651_s28 = sshll.u32 %s868_s15, 1 }
  0x46   : > { %p281_p8 = scmp.lt.s32.totalorder %s649_s26, 95  ;;  %p290_p11 = scmp.lt.s32.totalorder %s651_s28, 3 }
  0x47   : > { %p653_p13 = scmp.ne.s32.totalorder %s864_s14, 0 }
  0x48   : > { %s1097_s26 = smov (!%p281_p8, %s649_s26), 95  ;;  %s1099_s28 = smov (!%p290_p11, %s651_s28), 3 }
  0x49   : > { %s650_s25 = sshll.u32 %s1097_s26, 2  ;;  %s652_s7 = sshll.u32 %s1099_s28, 2  ;;  %v654_v2 = vld [vmem:[#allocation4] ss:$0 sm:$0xff] (!%p653_p13) }
  0x4a   : > { %s1019_s6 = scalar_lea.vmem %s1071_s1, %s650_s25  ;;  %s1024_s27 = scalar_lea.vmem %s1073_s3, %s652_s7  ;;  %310 = vst [vmem:[#allocation2] sm:$0xff] (!%p653_p13), %v654_v2  ;;  %311 = vst [vmem:[#allocation2 + $0x8] sm:$0xff] (!%p653_p13), %v654_v2 }
  0x4b   : > { %302 = sbr.rel (%p653_p13) target bundleno = 82 (0x52), region = 78 }
  0x52 PF: > { %v775_v3 = vld [vmem:[%s1019_s6 + $0x40] sm:$0xff]   ;;  %v777_v5 = vld [vmem:[%s1019_s6 + $0x48] sm:$0xff]   ;;  %v779_v7 = vld [vmem:[%s1019_s6 + $0x50] sm:$0xff]   ;;  %p673_p1 = scmp.ne.s32.totalorder %s864_s14, 2 }
  0x53   : > { %v776_v4 = vld [vmem:[%s1019_s6] sm:$0xff]   ;;  %685 = vmatprep.subr.bf16.mxu0 %v775_v3  ;;  %v778_v6 = vld [vmem:[%s1019_s6 + $0x8] sm:$0xff]   ;;  %v780_v8 = vld [vmem:[%s1019_s6 + $0x10] sm:$0xff]  }
  0x54   : > { %686 = vmatpush3.bf16.msra.mxu0 %v776_v4  ;;  %v781_v9 = vld [vmem:[%s1019_s6 + $0x58] sm:$0xff]   ;;  %v783_v11 = vld [vmem:[%s1019_s6 + $0x60] sm:$0xff]   ;;  %v785_v13 = vld [vmem:[%s1019_s6 + $0x68] sm:$0xff]  }
  0x55   : > { %687 = vmatprep.subr.bf16.mxu0 %v777_v5  ;;  %v782_v10 = vld [vmem:[%s1019_s6 + $0x18] sm:$0xff]   ;;  %v784_v12 = vld [vmem:[%s1019_s6 + $0x20] sm:$0xff]   ;;  %v786_v15 = vld [vmem:[%s1019_s6 + $0x28] sm:$0xff]  }
  0x56   : > { %v793_v14 = vld [vmem:[%s242_s23 + $0x4] ss:$8 sps:$4 sm:$0xff]   ;;  %v791_v20 = vld [vmem:[%s242_s23] ss:$8 sps:$4 sm:$0xff]  }
  0x57   : > { %486 = vmatprep.mubr.bf16.mxu0 %v793_v14  ;;  %v787_v16 = vld [vmem:[%s1019_s6 + $0x70] sm:$0xff]   ;;  %v789_v18 = vld [vmem:[%s1019_s6 + $0x78] sm:$0xff]   ;;  %v312_v22 = vld [vmem:[#allocation2] sm:$0xff] }
  0x58   : > { %688 = vmatpush3.bf16.msra.mxu0 %v778_v6  ;;  %v788_v17 = vld [vmem:[%s1019_s6 + $0x30] sm:$0xff]   ;;  %v790_v19 = vld [vmem:[%s1019_s6 + $0x38] sm:$0xff]   ;;  %v313_v26 = vld [vmem:[#allocation2 + $0x8] sm:$0xff] }
  0x59   : > { %689 = vmatprep.subr.bf16.mxu0 %v779_v7 }
  0x5c   : > { %690 = vmatpush3.bf16.msra.mxu0 %v780_v8 }
  0x5d   : > { %691 = vmatprep.subr.bf16.mxu0 %v781_v9 }
  0x60   : > { %692 = vmatpush3.bf16.msra.mxu0 %v782_v10 }
  0x61   : > { %693 = vmatprep.subr.bf16.mxu0 %v783_v11 }
  0x64   : > { %694 = vmatpush3.bf16.msra.mxu0 %v784_v12 }
  0x65   : > { %695 = vmatprep.subr.bf16.mxu0 %v785_v13 }
  0x68   : > { %696 = vmatpush3.bf16.msra.mxu0 %v786_v15 }
  0x69   : > { %697 = vmatprep.subr.bf16.mxu0 %v787_v16 }
  0x6c   : > { %698 = vmatpush3.bf16.msra.mxu0 %v788_v17 }
  0x6d   : > { %699 = vmatprep.subr.bf16.mxu0 %v789_v18 }
  0x70   : > { %700 = vmatpush3.bf16.msra.mxu0 %v790_v19 }
  0x73   : > { %487 = vmatmul.mubr.bf16.vlgmr.msra.gmra.mrb[0].mxu0 %v791_v20 }
 0x146   : > { %v701_v21 = vpop.f32.mrb[0].mxu0 }
 0x147   : > { %v702_v23 = vpop.f32.mrb[1].mxu0 }
 0x148   : > { %v703_v24 = vadd.f32 %v702_v23, %v701_v21  ;;  %v704_v25 = vpop.f32.mrb[2].mxu0  ;;  %502 = sbr.rel (%p673_p1) target bundleno = 347 (0x15b), region = 82 }
 0x149   : > { %v705_v27 = vpop.f32.mrb[3].mxu0 }
 0x14a   : > { %v495_v28 = vadd.f32 %v703_v24, %v312_v22  ;;  %v706_v29 = vadd.f32 %v705_v27, %v704_v25 }
 0x14c   : > { %497 = vst [vmem:[#allocation2] sm:$0xff] %v495_v28  ;;  %v496_v30 = vadd.f32 %v706_v29, %v313_v26 }
 0x14e   : > { %498 = vst [vmem:[#allocation2 + $0x8] sm:$0xff] %v496_v30 }
 0x153   : > { %v503_v31 = vld [vmem:[#allocation2] sm:$0xff] }
 0x154   : > { %v505_v33 = vmax.f32 %v503_v31, 0.0 }
 0x155   : > { %v504_v32 = vld [vmem:[#allocation2 + $0x8] sm:$0xff] }
 0x156   : > { %v506_v34 = vmax.f32 %v504_v32, 0.0 }
 0x158   : > { %v683_v35 = vpack.c.bf16 %v506_v34, %v505_v33 }
 0x15a   : > { %684 = vst [vmem:[%s1024_s27] sm:$0xff] %v683_v35  }
 0x15b PF: > { %s14_s18 = sadd.s32 1, %s880_s18   ;;  %s1084_s12 = smov %s860_s13 }
 0x15c   : > { %p11_p2 = scmp.ge.s32.totalorder %s14_s18, 8   ;;  %s1085_s13 = smov %s977_s5 }
 0x15d   : > { %s1086_s14 = smov %s872_s16  ;;  %s1087_s15 = smov %s876_s17 }
 0x15e   : > { %s1088_s16 = smov %s1091_s20  ;;  %s1089_s17 = smov %s1095_s21 }
 0x15f   :  { %13 = sbr.rel (!%p11_p2) target bundleno = 4 (0x4), region = 122 }
 0x166   :  { %545 = vsyncpa [#allocation5], 1 }
 0x167   :  { %547 = vsyncpa [#allocation5 + $0x1], 1 }

// kernel: ae_vgg16_forward.11
= control target key start
LH: loop header
LB: loop body
LE: loop exit
PB: predicated region body
PF: predicated region fallthrough
CT: control target
= control target key end

     0   :  { %s946_s12 = smov 0   ;;  %s948_s13 = smov 0   ;;  %s1136_s0 = inlined_call_operand.vmem [shape: bf16[8,1280], index: 0, kind: input, shape index: {}]   ;;  %s1137_s1 = inlined_call_operand.vmem [shape: bf16[1280,256], index: 1, kind: input, shape index: {}]   ;;  %s1138_s2 = inlined_call_operand.vmem [shape: f32[1,256], index: 2, kind: input, shape index: {}]   ;;  %s1139_s3 = inlined_call_operand.vmem [shape: bf16[8,256], index: 3, kind: output, shape index: {}]  }
   0x1   :  { %s950_s14 = smov 0   ;;  %s952_s15 = smov 0  }
   0x2   :  { %s954_s16 = smov 0   ;;  %s956_s17 = smov 0  }
   0x3   :  { %s958_s18 = smov 0  }
   0x4 LB: > { %s25_s19 = sadd.s32 1, %s916_s16  ;;  %s28_s20 = sadd.s32 1, %s920_s17  ;;  %s924_s18 = sphi %s958_s18, %s13_s18   ;;  %s920_s17 = sphi %s956_s17, %s1145_s17   ;;  %s916_s16 = sphi %s954_s16, %s1144_s16   ;;  %s912_s15 = sphi %s952_s15, %s1143_s15   ;;  %s908_s14 = sphi %s950_s14, %s1142_s14   ;;  %s904_s13 = sphi %s948_s13, %s1141_s13   ;;  %s900_s12 = sphi %s946_s12, %s1140_s12  }
   0x5   : > { %p26_p0 = scmp.ge.s32.totalorder %s25_s19, 5  ;;  %p76_p1 = scmp.ne.s32.totalorder %s904_s13, %s900_s12 }
   0x6   : > { %p77_p2 = scmp.eq.s32.totalorder %s924_s18, 0  ;;  %s69_s24 = sadd.s32 1, %s904_s13 }
   0x7   : > { %s1147_s19 = smov (%p26_p0, %s25_s19), 0  ;;  %s1149_s20 = smov (!%p26_p0, %s28_s20), %s920_s17 }
   0x8   : > { %p78_p3 = por %p77_p2, %p76_p1  ;;  %p30_p4 = scmp.ge.s32.totalorder %s1149_s20, 2 }
   0x9   : > { %s64_s21 = ssub.s32 %s916_s16, %s1147_s19  ;;  %p740_p6 = scmp.ge.s32.totalorder %s924_s18, 10 }
   0xa   : > { %s1151_s20 = smov (%p30_p4, %s1149_s20), 0 }
   0xb   : > { %s65_s22 = ssub.s32 %s920_s17, %s1151_s20  ;;  %156 = sbr.rel (%p740_p6) target bundleno = 45 (0x2d), region = 16 }
   0xc   : > { %s66_s23 = sor.u32 %s65_s22, %s64_s21 }
   0xd   : > { %p67_p5 = scmp.eq.s32.totalorder %s66_s23, 0 }
   0xf   : > { %s997_s25 = scalar_select %p67_p5, %s904_s13, %s69_s24  }
  0x12   : > { %172 = sbr.rel (!%p78_p3) target bundleno = 45 (0x2d), region = 24  ;;  %s174_s26 = sand.u32 (%p78_p3), 1, %s904_s13  }
  0x13   : > { %s773_s27 = sshll.u32 (%p78_p3), %s916_s16, 6  ;;  %s741_s28 = sshll.u32 (%p78_p3), %s174_s26, 7 }
  0x14   : > { %s179_s29 = sadd.s32 (%p78_p3), %s920_s17, %s773_s27  ;;  %s1011_s7 = scalar_lea.vmem (%p78_p3), [#allocation3], %s741_s28 }
  0x15   : > { %s744_s30 = sshll.u32 (%p78_p3), %s179_s29, 2 }
  0x16   : > { %s1006_s6 = scalar_lea.vmem (%p78_p3), %s1137_s1, %s744_s30 }
  0x17   : > { %v197_v0 = vld [vmem:[%s1006_s6] sm:$0xf] (%p78_p3)  ;;  %v199_v1 = vld [vmem:[%s1006_s6 + $0x8] sm:$0xf] (%p78_p3)  ;;  %v201_v2 = vld [vmem:[%s1006_s6 + $0x10] sm:$0xf] (%p78_p3) }
  0x18   : > { %198 = vst [vmem:[%s1011_s7] sm:$0xf] (%p78_p3), %v197_v0  ;;  %200 = vst [vmem:[%s1011_s7 + $0x4] sm:$0xf] (%p78_p3), %v199_v1  ;;  %v203_v3 = vld [vmem:[%s1006_s6 + $0x18] sm:$0xf] (%p78_p3) }
  0x19   : > { %202 = vst [vmem:[%s1011_s7 + $0x8] sm:$0xf] %v201_v2  ;;  %v205_v4 = vld [vmem:[%s1006_s6 + $0x20] sm:$0xf]  ;;  %v207_v5 = vld [vmem:[%s1006_s6 + $0x28] sm:$0xf] }
  0x1a   : > { %204 = vst [vmem:[%s1011_s7 + $0xc] sm:$0xf] %v203_v3  ;;  %206 = vst [vmem:[%s1011_s7 + $0x10] sm:$0xf] %v205_v4  ;;  %v209_v6 = vld [vmem:[%s1006_s6 + $0x30] sm:$0xf] }
  0x1b   : > { %208 = vst [vmem:[%s1011_s7 + $0x14] sm:$0xf] %v207_v5  ;;  %v211_v7 = vld [vmem:[%s1006_s6 + $0x38] sm:$0xf]  ;;  %v213_v8 = vld [vmem:[%s1006_s6 + $0x40] sm:$0xf] }
  0x1c   : > { %210 = vst [vmem:[%s1011_s7 + $0x18] sm:$0xf] %v209_v6  ;;  %212 = vst [vmem:[%s1011_s7 + $0x1c] sm:$0xf] %v211_v7  ;;  %v215_v9 = vld [vmem:[%s1006_s6 + $0x48] sm:$0xf] }
  0x1d   : > { %214 = vst [vmem:[%s1011_s7 + $0x20] sm:$0xf] %v213_v8  ;;  %v217_v10 = vld [vmem:[%s1006_s6 + $0x50] sm:$0xf]  ;;  %v219_v11 = vld [vmem:[%s1006_s6 + $0x58] sm:$0xf] }
  0x1e   : > { %216 = vst [vmem:[%s1011_s7 + $0x24] sm:$0xf] %v215_v9  ;;  %218 = vst [vmem:[%s1011_s7 + $0x28] sm:$0xf] %v217_v10  ;;  %v221_v12 = vld [vmem:[%s1006_s6 + $0x60] sm:$0xf] }
  0x1f   : > { %220 = vst [vmem:[%s1011_s7 + $0x2c] sm:$0xf] %v219_v11  ;;  %v223_v13 = vld [vmem:[%s1006_s6 + $0x68] sm:$0xf]  ;;  %v225_v14 = vld [vmem:[%s1006_s6 + $0x70] sm:$0xf] }
  0x20   : > { %222 = vst [vmem:[%s1011_s7 + $0x30] sm:$0xf] %v221_v12  ;;  %224 = vst [vmem:[%s1011_s7 + $0x34] sm:$0xf] %v223_v13  ;;  %v227_v15 = vld [vmem:[%s1006_s6 + $0x78] sm:$0xf] }
  0x21   : > { %226 = vst [vmem:[%s1011_s7 + $0x38] sm:$0xf] %v225_v14  ;;  %v229_v16 = vld [vmem:[%s1006_s6 + $0x80] sm:$0xf]  ;;  %v231_v17 = vld [vmem:[%s1006_s6 + $0x88] sm:$0xf] }
  0x22   : > { %228 = vst [vmem:[%s1011_s7 + $0x3c] sm:$0xf] %v227_v15  ;;  %230 = vst [vmem:[%s1011_s7 + $0x40] sm:$0xf] %v229_v16  ;;  %v233_v18 = vld [vmem:[%s1006_s6 + $0x90] sm:$0xf] }
  0x23   : > { %232 = vst [vmem:[%s1011_s7 + $0x44] sm:$0xf] %v231_v17  ;;  %v235_v19 = vld [vmem:[%s1006_s6 + $0x98] sm:$0xf]  ;;  %v237_v20 = vld [vmem:[%s1006_s6 + $0xa0] sm:$0xf] }
  0x24   : > { %234 = vst [vmem:[%s1011_s7 + $0x48] sm:$0xf] %v233_v18  ;;  %236 = vst [vmem:[%s1011_s7 + $0x4c] sm:$0xf] %v235_v19  ;;  %v239_v21 = vld [vmem:[%s1006_s6 + $0xa8] sm:$0xf] }
  0x25   : > { %238 = vst [vmem:[%s1011_s7 + $0x50] sm:$0xf] %v237_v20  ;;  %v241_v22 = vld [vmem:[%s1006_s6 + $0xb0] sm:$0xf]  ;;  %v243_v23 = vld [vmem:[%s1006_s6 + $0xb8] sm:$0xf] }
  0x26   : > { %240 = vst [vmem:[%s1011_s7 + $0x54] sm:$0xf] %v239_v21  ;;  %242 = vst [vmem:[%s1011_s7 + $0x58] sm:$0xf] %v241_v22  ;;  %v245_v24 = vld [vmem:[%s1006_s6 + $0xc0] sm:$0xf] }
  0x27   : > { %244 = vst [vmem:[%s1011_s7 + $0x5c] sm:$0xf] %v243_v23  ;;  %v247_v25 = vld [vmem:[%s1006_s6 + $0xc8] sm:$0xf]  ;;  %v249_v26 = vld [vmem:[%s1006_s6 + $0xd0] sm:$0xf] }
  0x28   : > { %246 = vst [vmem:[%s1011_s7 + $0x60] sm:$0xf] %v245_v24  ;;  %248 = vst [vmem:[%s1011_s7 + $0x64] sm:$0xf] %v247_v25  ;;  %v251_v27 = vld [vmem:[%s1006_s6 + $0xd8] sm:$0xf] }
  0x29   : > { %250 = vst [vmem:[%s1011_s7 + $0x68] sm:$0xf] %v249_v26  ;;  %v253_v28 = vld [vmem:[%s1006_s6 + $0xe0] sm:$0xf]  ;;  %v255_v29 = vld [vmem:[%s1006_s6 + $0xe8] sm:$0xf] }
  0x2a   : > { %252 = vst [vmem:[%s1011_s7 + $0x6c] sm:$0xf] %v251_v27  ;;  %254 = vst [vmem:[%s1011_s7 + $0x70] sm:$0xf] %v253_v28  ;;  %v257_v30 = vld [vmem:[%s1006_s6 + $0xf0] sm:$0xf] }
  0x2b   : > { %256 = vst [vmem:[%s1011_s7 + $0x74] sm:$0xf] %v255_v29  ;;  %v259_v31 = vld [vmem:[%s1006_s6 + $0xf8] sm:$0xf]  ;;  %258 = vst [vmem:[%s1011_s7 + $0x78] sm:$0xf] %v257_v30 }
  0x2c   : > { %260 = vst [vmem:[%s1011_s7 + $0x7c] sm:$0xf] %v259_v31 }
  0x2d PF: > { %p745_p7 = scmp.ge.s32.totalorder %s924_s18, 1  ;;  %p352_p8 = scmp.lt.s32.totalorder %s924_s18, 11 }
  0x2f   : > { %p353_p9 = pnand %p745_p7, %p352_p8 }
  0x30   : > { %s359_s8 = sand.u32 (!%p353_p9), 1, %s900_s12   ;;  %s747_s9 = sshll.u32 (!%p353_p9), %s908_s14, 1 }
  0x31   : > { %356 = sbr.rel (%p353_p9) target bundleno = 329 (0x149), region = 69  ;;  %s746_s10 = sshll.u32 (!%p353_p9), %s359_s8, 7 }
  0x32   : > { %p400_p10 = scmp.lt.s32.totalorder (!%p353_p9), %s747_s9, 9  ;;  %p408_p11 = scmp.lt.s32.totalorder (!%p353_p9), %s912_s15, 1 }
  0x33   : > { %s1093_s4 = scalar_lea.vmem (!%p353_p9), [#allocation3], %s746_s10  ;;  %p750_p12 = scmp.ne.s32.totalorder (!%p353_p9), %s908_s14, 0 }
  0x38   : > { %s1153_s9 = smov (!%p400_p10, %s747_s9), 9  ;;  %s1155_s15 = smov (!%p408_p11, %s912_s15), 1 }
  0x39   : > { %s748_s11 = sshll.u32 %s1153_s9, 2  ;;  %s410_s27 = scalar_lea.vmem %s1138_s2, %s1155_s15 }
  0x3a   : > { %s1083_s23 = scalar_lea.vmem %s1136_s0, %s748_s11  ;;  %s749_s28 = sshll.u32 %s1155_s15, 2  ;;  %v751_v32 = vld [vmem:[%s410_s27] ss:$0 sm:$0xff] (!%p750_p12) }
  0x3b   : > { %s1091_s12 = scalar_lea.vmem %s1139_s3, %s749_s28  ;;  %423 = sbr.rel (%p750_p12) target bundleno = 66 (0x42), region = 77  ;;  %431 = vst [vmem:[#allocation2] sm:$0xff] (!%p750_p12), %v751_v32 }
  0x42 PF: > { %v852_v33 = vld [vmem:[%s1093_s4 + $0x40] sm:$0xff]   ;;  %v854_v35 = vld [vmem:[%s1093_s4 + $0x48] sm:$0xff]   ;;  %v856_v37 = vld [vmem:[%s1093_s4 + $0x50] sm:$0xff]   ;;  %p770_p13 = scmp.ne.s32.totalorder %s908_s14, 4 }
  0x43   : > { %v853_v34 = vld [vmem:[%s1093_s4] sm:$0xff]   ;;  %774 = vmatprep.subr.bf16.mxu0 %v852_v33  ;;  %v855_v36 = vld [vmem:[%s1093_s4 + $0x8] sm:$0xff]   ;;  %v857_v38 = vld [vmem:[%s1093_s4 + $0x10] sm:$0xff]  }
  0x44   : > { %775 = vmatpush3.bf16.msra.mxu0 %v853_v34  ;;  %v858_v39 = vld [vmem:[%s1093_s4 + $0x58] sm:$0xff]   ;;  %v860_v41 = vld [vmem:[%s1093_s4 + $0x60] sm:$0xff]   ;;  %v862_v43 = vld [vmem:[%s1093_s4 + $0x68] sm:$0xff]  }
  0x45   : > { %776 = vmatprep.subr.bf16.mxu0 %v854_v35  ;;  %v859_v40 = vld [vmem:[%s1093_s4 + $0x18] sm:$0xff]   ;;  %v861_v42 = vld [vmem:[%s1093_s4 + $0x20] sm:$0xff]   ;;  %v863_v46 = vld [vmem:[%s1093_s4 + $0x28] sm:$0xff]  }
  0x46   : > { %v433_v44 = vld [vmem:[%s1083_s23] sm:$0xff]  ;;  %v864_v47 = vld [vmem:[%s1093_s4 + $0x70] sm:$0xff]  }
  0x47   : > { %v753_v45 = vcombine.high %v433_v44, %v433_v44  ;;  %v865_v48 = vld [vmem:[%s1093_s4 + $0x30] sm:$0xff]   ;;  %v866_v49 = vld [vmem:[%s1093_s4 + $0x78] sm:$0xff]   ;;  %v752_v51 = vcombine.low %v433_v44, %v433_v44 }
  0x48   : > { %777 = vmatpush3.bf16.msra.mxu0 %v855_v36  ;;  %v867_v50 = vld [vmem:[%s1093_s4 + $0x38] sm:$0xff]  }
  0x49   : > { %778 = vmatprep.subr.bf16.mxu0 %v856_v37  ;;  %601 = vmatprep.mubr.bf16.mxu0 %v753_v45  ;;  %v432_v53 = vld [vmem:[#allocation2] sm:$0xff] }
  0x4c   : > { %779 = vmatpush3.bf16.msra.mxu0 %v857_v38 }
  0x4d   : > { %780 = vmatprep.subr.bf16.mxu0 %v858_v39 }
  0x50   : > { %781 = vmatpush3.bf16.msra.mxu0 %v859_v40 }
  0x51   : > { %782 = vmatprep.subr.bf16.mxu0 %v860_v41 }
  0x54   : > { %783 = vmatpush3.bf16.msra.mxu0 %v861_v42 }
  0x55   : > { %784 = vmatprep.subr.bf16.mxu0 %v862_v43 }
  0x58   : > { %785 = vmatpush3.bf16.msra.mxu0 %v863_v46 }
  0x59   : > { %786 = vmatprep.subr.bf16.mxu0 %v864_v47 }
  0x5c   : > { %787 = vmatpush3.bf16.msra.mxu0 %v865_v48 }
  0x5d   : > { %788 = vmatprep.subr.bf16.mxu0 %v866_v49 }
  0x60   : > { %789 = vmatpush3.bf16.msra.mxu0 %v867_v50 }
  0x63   : > { %602 = vmatmul.mubr.bf16.vlgmr.msra.gmra.mrb[0].mxu0 %v752_v51 }
 0x136   : > { %v790_v52 = vpop.f32.mrb[0].mxu0  ;;  %614 = sbr.rel (%p770_p13) target bundleno = 329 (0x149), region = 81 }
 0x137   : > { %v791_v54 = vpop.f32.mrb[1].mxu0 }
 0x138   : > { %v792_v55 = vadd.f32 %v791_v54, %v790_v52  ;;  %v793_v56 = vpop.f32.mrb[2].mxu0 }
 0x139   : > { %v794_v57 = vpop.f32.mrb[3].mxu0 }
 0x13a   : > { %v609_v58 = vadd.f32 %v792_v55, %v432_v53 }
 0x13c   : > { %610 = vst [vmem:[#allocation2] sm:$0xff] %v609_v58 }
 0x143   : > { %v615_v59 = vld [vmem:[#allocation2] sm:$0xff] }
 0x144   : > { %v616_v60 = vmax.f32 %v615_v59, 0.0 }
 0x146   : > { %v617_v61 = vpack.c.bf16 %v616_v60, %v616_v60 }
 0x148   : > { %618 = vst [vmem:[%s1091_s12] sm:$0xf] %v617_v61 }
 0x149 PF: > { %s13_s18 = sadd.s32 1, %s924_s18   ;;  %s1140_s12 = smov %s904_s13 }
 0x14a   : > { %p10_p0 = scmp.ge.s32.totalorder %s13_s18, 12   ;;  %s1141_s13 = smov %s997_s25 }
 0x14b   : > { %s1142_s14 = smov %s916_s16  ;;  %s1143_s15 = smov %s920_s17 }
 0x14c   : > { %s1144_s16 = smov %s1147_s19  ;;  %s1145_s17 = smov %s1151_s20 }
 0x14d   :  { %12 = sbr.rel (!%p10_p0) target bundleno = 4 (0x4), region = 122 }

// kernel: ae_vgg16_forward.12
= control target key start
LH: loop header
LB: loop body
LE: loop exit
PB: predicated region body
PF: predicated region fallthrough
CT: control target
= control target key end

     0   :  { %s1066_s12 = smov 0   ;;  %s1068_s13 = smov 0   ;;  %s1271_s0 = inlined_call_operand.vmem [shape: bf16[8,2304], index: 0, kind: input, shape index: {}]   ;;  %s1272_s1 = inlined_call_operand.vmem [shape: bf16[2304,512], index: 1, kind: input, shape index: {}]   ;;  %s1273_s2 = inlined_call_operand.vmem [shape: f32[1,512], index: 2, kind: input, shape index: {}]   ;;  %s1274_s3 = inlined_call_operand.vmem [shape: bf16[8,512], index: 3, kind: output, shape index: {}]  }
   0x1   :  { %s1070_s14 = smov 0   ;;  %s1072_s15 = smov 0  }
   0x2   :  { %s1074_s16 = smov 0   ;;  %s1076_s17 = smov 0  }
   0x3   :  { %s1078_s18 = smov 0  }
   0x4 LB: > { %s25_s19 = sadd.s32 1, %s1036_s16  ;;  %s28_s20 = sadd.s32 1, %s1040_s17  ;;  %s1044_s18 = sphi %s1078_s18, %s13_s18   ;;  %s1040_s17 = sphi %s1076_s17, %s1280_s17   ;;  %s1036_s16 = sphi %s1074_s16, %s1279_s16   ;;  %s1032_s15 = sphi %s1072_s15, %s1278_s15   ;;  %s1028_s14 = sphi %s1070_s14, %s1277_s14   ;;  %s1024_s13 = sphi %s1068_s13, %s1276_s13   ;;  %s1020_s12 = sphi %s1066_s12, %s1275_s12  }
   0x5   : > { %p26_p0 = scmp.ge.s32.totalorder %s25_s19, 9  ;;  %p76_p1 = scmp.ne.s32.totalorder %s1024_s13, %s1020_s12 }
   0x6   : > { %p77_p2 = scmp.eq.s32.totalorder %s1044_s18, 0  ;;  %s69_s24 = sadd.s32 1, %s1024_s13 }
   0x7   : > { %s1282_s19 = smov (%p26_p0, %s25_s19), 0  ;;  %s1284_s20 = smov (!%p26_p0, %s28_s20), %s1040_s17 }
   0x8   : > { %p78_p3 = por %p77_p2, %p76_p1  ;;  %p30_p4 = scmp.ge.s32.totalorder %s1284_s20, 2 }
   0x9   : > { %s64_s21 = ssub.s32 %s1036_s16, %s1282_s19  ;;  %p830_p6 = scmp.ge.s32.totalorder %s1044_s18, 18 }
   0xa   : > { %s1286_s20 = smov (%p30_p4, %s1284_s20), 0 }
   0xb   : > { %s65_s22 = ssub.s32 %s1040_s17, %s1286_s20  ;;  %156 = sbr.rel (%p830_p6) target bundleno = 41 (0x29), region = 16 }
   0xc   : > { %s66_s23 = sor.u32 %s65_s22, %s64_s21 }
   0xd   : > { %p67_p5 = scmp.eq.s32.totalorder %s66_s23, 0 }
   0xf   : > { %s1117_s25 = scalar_select %p67_p5, %s1024_s13, %s69_s24  }
  0x12   : > { %172 = sbr.rel (!%p78_p3) target bundleno = 41 (0x29), region = 24  ;;  %s174_s26 = sand.u32 (%p78_p3), 1, %s1024_s13  }
  0x13   : > { %s833_s27 = sshll.u32 (%p78_p3), %s1040_s17, 1  ;;  %s831_s28 = sshll.u32 (%p78_p3), %s174_s26, 8 }
  0x14   : > { %s882_s29 = sshll.u32 (%p78_p3), %s1036_s16, 7  ;;  %s1131_s8 = scalar_lea.vmem (%p78_p3), [#allocation3], %s831_s28 }
  0x15   : > { %s180_s30 = sadd.s32 (%p78_p3), %s882_s29, %s833_s27 }
  0x16   : > { %s835_s4 = sshll.u32 (%p78_p3), %s180_s30, 2 }
  0x17   : > { %s1126_s7 = scalar_lea.vmem (%p78_p3), %s1272_s1, %s835_s4 }
  0x18   : > { %v272_v0 = vld [vmem:[%s1126_s7] sm:$0xff] (%p78_p3)  ;;  %v274_v1 = vld [vmem:[%s1126_s7 + $0x10] sm:$0xff] (%p78_p3) }
  0x19   : > { %v276_v2 = vld [vmem:[%s1126_s7 + $0x20] sm:$0xff]  ;;  %273 = vst [vmem:[%s1131_s8] sm:$0xff] %v272_v0  ;;  %275 = vst [vmem:[%s1131_s8 + $0x8] sm:$0xff] %v274_v1  ;;  %v278_v3 = vld [vmem:[%s1126_s7 + $0x30] sm:$0xff] }
  0x1a   : > { %277 = vst [vmem:[%s1131_s8 + $0x10] sm:$0xff] %v276_v2  ;;  %v280_v4 = vld [vmem:[%s1126_s7 + $0x40] sm:$0xff]  ;;  %v282_v5 = vld [vmem:[%s1126_s7 + $0x50] sm:$0xff]  ;;  %279 = vst [vmem:[%s1131_s8 + $0x18] sm:$0xff] %v278_v3 }
  0x1b   : > { %281 = vst [vmem:[%s1131_s8 + $0x20] sm:$0xff] %v280_v4  ;;  %283 = vst [vmem:[%s1131_s8 + $0x28] sm:$0xff] %v282_v5  ;;  %v284_v6 = vld [vmem:[%s1126_s7 + $0x60] sm:$0xff]  ;;  %v286_v7 = vld [vmem:[%s1126_s7 + $0x70] sm:$0xff] }
  0x1c   : > { %v288_v8 = vld [vmem:[%s1126_s7 + $0x80] sm:$0xff]  ;;  %285 = vst [vmem:[%s1131_s8 + $0x30] sm:$0xff] %v284_v6  ;;  %287 = vst [vmem:[%s1131_s8 + $0x38] sm:$0xff] %v286_v7  ;;  %v290_v9 = vld [vmem:[%s1126_s7 + $0x90] sm:$0xff] }
  0x1d   : > { %289 = vst [vmem:[%s1131_s8 + $0x40] sm:$0xff] %v288_v8  ;;  %v292_v10 = vld [vmem:[%s1126_s7 + $0xa0] sm:$0xff]  ;;  %v294_v11 = vld [vmem:[%s1126_s7 + $0xb0] sm:$0xff]  ;;  %291 = vst [vmem:[%s1131_s8 + $0x48] sm:$0xff] %v290_v9 }
  0x1e   : > { %293 = vst [vmem:[%s1131_s8 + $0x50] sm:$0xff] %v292_v10  ;;  %295 = vst [vmem:[%s1131_s8 + $0x58] sm:$0xff] %v294_v11  ;;  %v296_v12 = vld [vmem:[%s1126_s7 + $0xc0] sm:$0xff]  ;;  %v298_v13 = vld [vmem:[%s1126_s7 + $0xd0] sm:$0xff] }
  0x1f   : > { %v300_v14 = vld [vmem:[%s1126_s7 + $0xe0] sm:$0xff]  ;;  %297 = vst [vmem:[%s1131_s8 + $0x60] sm:$0xff] %v296_v12  ;;  %299 = vst [vmem:[%s1131_s8 + $0x68] sm:$0xff] %v298_v13  ;;  %v302_v15 = vld [vmem:[%s1126_s7 + $0xf0] sm:$0xff] }
  0x20   : > { %301 = vst [vmem:[%s1131_s8 + $0x70] sm:$0xff] %v300_v14  ;;  %v304_v16 = vld [vmem:[%s1126_s7 + $0x100] sm:$0xff]  ;;  %v306_v17 = vld [vmem:[%s1126_s7 + $0x110] sm:$0xff]  ;;  %303 = vst [vmem:[%s1131_s8 + $0x78] sm:$0xff] %v302_v15 }
  0x21   : > { %305 = vst [vmem:[%s1131_s8 + $0x80] sm:$0xff] %v304_v16  ;;  %307 = vst [vmem:[%s1131_s8 + $0x88] sm:$0xff] %v306_v17  ;;  %v308_v18 = vld [vmem:[%s1126_s7 + $0x120] sm:$0xff]  ;;  %v310_v19 = vld [vmem:[%s1126_s7 + $0x130] sm:$0xff] }
  0x22   : > { %v312_v20 = vld [vmem:[%s1126_s7 + $0x140] sm:$0xff]  ;;  %309 = vst [vmem:[%s1131_s8 + $0x90] sm:$0xff] %v308_v18  ;;  %311 = vst [vmem:[%s1131_s8 + $0x98] sm:$0xff] %v310_v19  ;;  %v314_v21 = vld [vmem:[%s1126_s7 + $0x150] sm:$0xff] }
  0x23   : > { %313 = vst [vmem:[%s1131_s8 + $0xa0] sm:$0xff] %v312_v20  ;;  %v316_v22 = vld [vmem:[%s1126_s7 + $0x160] sm:$0xff]  ;;  %v318_v23 = vld [vmem:[%s1126_s7 + $0x170] sm:$0xff]  ;;  %315 = vst [vmem:[%s1131_s8 + $0xa8] sm:$0xff] %v314_v21 }
  0x24   : > { %317 = vst [vmem:[%s1131_s8 + $0xb0] sm:$0xff] %v316_v22  ;;  %319 = vst [vmem:[%s1131_s8 + $0xb8] sm:$0xff] %v318_v23  ;;  %v320_v24 = vld [vmem:[%s1126_s7 + $0x180] sm:$0xff]  ;;  %v322_v25 = vld [vmem:[%s1126_s7 + $0x190] sm:$0xff] }
  0x25   : > { %v324_v26 = vld [vmem:[%s1126_s7 + $0x1a0] sm:$0xff]  ;;  %321 = vst [vmem:[%s1131_s8 + $0xc0] sm:$0xff] %v320_v24  ;;  %323 = vst [vmem:[%s1131_s8 + $0xc8] sm:$0xff] %v322_v25  ;;  %v326_v27 = vld [vmem:[%s1126_s7 + $0x1b0] sm:$0xff] }
  0x26   : > { %325 = vst [vmem:[%s1131_s8 + $0xd0] sm:$0xff] %v324_v26  ;;  %v328_v28 = vld [vmem:[%s1126_s7 + $0x1c0] sm:$0xff]  ;;  %v330_v29 = vld [vmem:[%s1126_s7 + $0x1d0] sm:$0xff]  ;;  %327 = vst [vmem:[%s1131_s8 + $0xd8] sm:$0xff] %v326_v27 }
  0x27   : > { %329 = vst [vmem:[%s1131_s8 + $0xe0] sm:$0xff] %v328_v28  ;;  %331 = vst [vmem:[%s1131_s8 + $0xe8] sm:$0xff] %v330_v29  ;;  %v332_v30 = vld [vmem:[%s1126_s7 + $0x1e0] sm:$0xff]  ;;  %v334_v31 = vld [vmem:[%s1126_s7 + $0x1f0] sm:$0xff] }
  0x28   : > { %333 = vst [vmem:[%s1131_s8 + $0xf0] sm:$0xff] %v332_v30  ;;  %335 = vst [vmem:[%s1131_s8 + $0xf8] sm:$0xff] %v334_v31 }
  0x29 PF: > { %p836_p7 = scmp.ge.s32.totalorder %s1044_s18, 1  ;;  %p348_p8 = scmp.lt.s32.totalorder %s1044_s18, 19 }
  0x2b   : > { %p349_p9 = pnand %p836_p7, %p348_p8 }
  0x2c   : > { %s355_s9 = sand.u32 (!%p349_p9), 1, %s1020_s12   ;;  %s838_s10 = sshll.u32 (!%p349_p9), %s1028_s14, 1 }
  0x2d   : > { %352 = sbr.rel (%p349_p9) target bundleno = 355 (0x163), region = 66  ;;  %s837_s11 = sshll.u32 (!%p349_p9), %s355_s9, 8 }
  0x2e   : > { %p398_p10 = scmp.lt.s32.totalorder (!%p349_p9), %s838_s10, 17  ;;  %s840_s21 = sshll.u32 (!%p349_p9), %s1032_s15, 1 }
  0x2f   : > { %p408_p11 = scmp.lt.s32.totalorder (!%p349_p9), %s840_s21, 3  ;;  %s1212_s15 = scalar_lea.vmem (!%p349_p9), [#allocation3], %s837_s11 }
  0x30   : > { %p843_p12 = scmp.ne.s32.totalorder (!%p349_p9), %s1028_s14, 0 }
  0x34   : > { %s1288_s10 = smov (!%p398_p10, %s838_s10), 17  ;;  %s1290_s21 = smov (!%p408_p11, %s840_s21), 3 }
  0x35   : > { %s839_s22 = sshll.u32 %s1288_s10, 2  ;;  %s410_s29 = scalar_lea.vmem %s1273_s2, %s1290_s21  ;;  %v428_v32 = vlaneseq (!%p843_p12) }
  0x36   : > { %s1202_s26 = scalar_lea.vmem %s1271_s0, %s839_s22  ;;  %s842_s30 = sshll.u32 %s1290_s21, 2  ;;  %v426_v34 = vld [vmem:[%s410_s29] sm:$0x3] (!%p843_p12) }
  0x37   : > { %s1210_s5 = scalar_lea.vmem %s1274_s3, %s842_s30  ;;  %425 = sbr.rel (%p843_p12) target bundleno = 62 (0x3e), region = 74  ;;  %v429_v33 = vshrl.u32 (!%p843_p12), %v428_v32, 7 }
  0x39   : > { %v430_v35 = vsub.s32 (!%p843_p12), 0, %v429_v33  ;;  %v434_v36 = vsub.s32 (!%p843_p12), 1, %v429_v33 }
  0x3b   : > { %v431_v37 = vrot.slane (!%p843_p12), %v426_v34, %v430_v35  ;;  %v435_v38 = vrot.slane (!%p843_p12), %v426_v34, %v434_v36 }
  0x3d   : > { %438 = vst [vmem:[#allocation2] sm:$0xff] (!%p843_p12), %v431_v37  ;;  %439 = vst [vmem:[#allocation2 + $0x8] sm:$0xff] (!%p843_p12), %v435_v38 }
  0x3e PF: > { %v940_v39 = vld [vmem:[%s1212_s15 + $0x4] ss:$8 sps:$4 sm:$0xff]   ;;  %v942_v40 = vld [vmem:[%s1212_s15] ss:$8 sps:$4 sm:$0xff]   ;;  %v943_v41 = vld [vmem:[%s1212_s15 + $0x14] ss:$8 sps:$4 sm:$0xff]  }
  0x3f   : > { %642 = vmatprep.subr.bf16.mxu0 %v940_v39  ;;  %v945_v42 = vld [vmem:[%s1212_s15 + $0x10] ss:$8 sps:$4 sm:$0xff]   ;;  %v946_v43 = vld [vmem:[%s1212_s15 + $0x24] ss:$8 sps:$4 sm:$0xff]   ;;  %v948_v44 = vld [vmem:[%s1212_s15 + $0x20] ss:$8 sps:$4 sm:$0xff]  }
  0x40   : > { %643 = vmatpush1.bf16.msra.mxu0 %v942_v40  ;;  %v949_v45 = vld [vmem:[%s1212_s15 + $0x34] ss:$8 sps:$4 sm:$0xff]   ;;  %v951_v46 = vld [vmem:[%s1212_s15 + $0x30] ss:$8 sps:$4 sm:$0xff]   ;;  %v952_v47 = vld [vmem:[%s1212_s15 + $0x44] ss:$8 sps:$4 sm:$0xff]  }
  0x41   : > { %644 = vmatprep.subr.bf16.mxu0 %v943_v41  ;;  %v954_v48 = vld [vmem:[%s1212_s15 + $0x40] ss:$8 sps:$4 sm:$0xff]   ;;  %v955_v49 = vld [vmem:[%s1212_s15 + $0x54] ss:$8 sps:$4 sm:$0xff]   ;;  %v957_v50 = vld [vmem:[%s1212_s15 + $0x50] ss:$8 sps:$4 sm:$0xff]  }
  0x42   : > { %v958_v51 = vld [vmem:[%s1212_s15 + $0x64] ss:$8 sps:$4 sm:$0xff]   ;;  %v442_v52 = vld [vmem:[%s1202_s26] sm:$0xff]  ;;  %v960_v54 = vld [vmem:[%s1212_s15 + $0x60] ss:$8 sps:$4 sm:$0xff]   ;;  %p878_p13 = scmp.ne.s32.totalorder %s1028_s14, 8 }
  0x43   : > { %v845_v53 = vcombine.high %v442_v52, %v442_v52  ;;  %v961_v55 = vld [vmem:[%s1212_s15 + $0x74] ss:$8 sps:$4 sm:$0xff]   ;;  %v963_v56 = vld [vmem:[%s1212_s15 + $0x70] ss:$8 sps:$4 sm:$0xff]   ;;  %v964_v57 = vld [vmem:[%s1212_s15 + $0x84] ss:$8 sps:$4 sm:$0xff]   ;;  %v844_v9 = vcombine.low %v442_v52, %v442_v52 }
  0x44   : > { %645 = vmatpush1.bf16.msra.mxu0 %v945_v42  ;;  %v966_v58 = vld [vmem:[%s1212_s15 + $0x80] ss:$8 sps:$4 sm:$0xff]   ;;  %v967_v59 = vld [vmem:[%s1212_s15 + $0x94] ss:$8 sps:$4 sm:$0xff]   ;;  %v969_v60 = vld [vmem:[%s1212_s15 + $0x90] ss:$8 sps:$4 sm:$0xff]  }
  0x45   : > { %646 = vmatprep.subr.bf16.mxu0 %v946_v43  ;;  %674 = vmatprep.mubr.bf16.mxu0 %v845_v53  ;;  %v970_v61 = vld [vmem:[%s1212_s15 + $0xa4] ss:$8 sps:$4 sm:$0xff]   ;;  %v972_v62 = vld [vmem:[%s1212_s15 + $0xa0] ss:$8 sps:$4 sm:$0xff]   ;;  %v973_v63 = vld [vmem:[%s1212_s15 + $0xb4] ss:$8 sps:$4 sm:$0xff]  }
  0x46   : > { %v975_v0 = vld [vmem:[%s1212_s15 + $0xb0] ss:$8 sps:$4 sm:$0xff]   ;;  %v976_v1 = vld [vmem:[%s1212_s15 + $0xc4] ss:$8 sps:$4 sm:$0xff]   ;;  %v978_v2 = vld [vmem:[%s1212_s15 + $0xc0] ss:$8 sps:$4 sm:$0xff]  }
  0x47   : > { %v979_v3 = vld [vmem:[%s1212_s15 + $0xd4] ss:$8 sps:$4 sm:$0xff]   ;;  %v981_v4 = vld [vmem:[%s1212_s15 + $0xd0] ss:$8 sps:$4 sm:$0xff]   ;;  %v982_v5 = vld [vmem:[%s1212_s15 + $0xe4] ss:$8 sps:$4 sm:$0xff]  }
  0x48   : > { %647 = vmatpush1.bf16.msra.mxu0 %v948_v44  ;;  %v984_v6 = vld [vmem:[%s1212_s15 + $0xe0] ss:$8 sps:$4 sm:$0xff]   ;;  %v985_v7 = vld [vmem:[%s1212_s15 + $0xf4] ss:$8 sps:$4 sm:$0xff]   ;;  %v987_v8 = vld [vmem:[%s1212_s15 + $0xf0] ss:$8 sps:$4 sm:$0xff]  }
  0x49   : > { %648 = vmatprep.subr.bf16.mxu0 %v949_v45  ;;  %v440_v10 = vld [vmem:[#allocation2] sm:$0xff]  ;;  %v441_v11 = vld [vmem:[#allocation2 + $0x8] sm:$0xff] }
  0x4c   : > { %649 = vmatpush1.bf16.msra.mxu0 %v951_v46 }
  0x4d   : > { %650 = vmatprep.subr.bf16.mxu0 %v952_v47 }
  0x50   : > { %651 = vmatpush1.bf16.msra.mxu0 %v954_v48 }
  0x51   : > { %652 = vmatprep.subr.bf16.mxu0 %v955_v49 }
  0x54   : > { %653 = vmatpush1.bf16.msra.mxu0 %v957_v50 }
  0x55   : > { %654 = vmatprep.subr.bf16.mxu0 %v958_v51 }
  0x58   : > { %655 = vmatpush1.bf16.msra.mxu0 %v960_v54 }
  0x59   : > { %656 = vmatprep.subr.bf16.mxu0 %v961_v55 }
  0x5c   : > { %657 = vmatpush1.bf16.msra.mxu0 %v963_v56 }
  0x5d   : > { %658 = vmatprep.subr.bf16.mxu0 %v964_v57 }
  0x60   : > { %659 = vmatpush1.bf16.msra.mxu0 %v966_v58 }
  0x61   : > { %660 = vmatprep.subr.bf16.mxu0 %v967_v59 }
  0x64   : > { %661 = vmatpush1.bf16.msra.mxu0 %v969_v60 }
  0x65   : > { %662 = vmatprep.subr.bf16.mxu0 %v970_v61 }
  0x68   : > { %663 = vmatpush1.bf16.msra.mxu0 %v972_v62 }
  0x69   : > { %664 = vmatprep.subr.bf16.mxu0 %v973_v63 }
  0x6c   : > { %665 = vmatpush1.bf16.msra.mxu0 %v975_v0 }
  0x6d   : > { %666 = vmatprep.subr.bf16.mxu0 %v976_v1 }
  0x70   : > { %667 = vmatpush1.bf16.msra.mxu0 %v978_v2 }
  0x71   : > { %668 = vmatprep.subr.bf16.mxu0 %v979_v3 }
  0x74   : > { %669 = vmatpush1.bf16.msra.mxu0 %v981_v4 }
  0x75   : > { %670 = vmatprep.subr.bf16.mxu0 %v982_v5 }
  0x78   : > { %671 = vmatpush1.bf16.msra.mxu0 %v984_v6 }
  0x79   : > { %672 = vmatprep.subr.bf16.mxu0 %v985_v7 }
  0x7c   : > { %673 = vmatpush1.bf16.msra.mxu0 %v987_v8 }
  0x7f   : > { %675 = vmatmul.mubr.bf16.vlgmr.msra.gmra.mrb[0].mxu0 %v844_v9 }
 0x150   : > { %690 = sbr.rel (%p878_p13) target bundleno = 355 (0x163), region = 78 }
 0x152   : > { %v676_v12 = vpop.f32.mrb[0].mxu0 }
 0x153   : > { %v683_v13 = vadd.f32 %v676_v12, %v440_v10  ;;  %v678_v14 = vpop.f32.mrb[1].mxu0 }
 0x154   : > { %v684_v15 = vadd.f32 %v678_v14, %v441_v11  ;;  %v680_v16 = vpop.f32.mrb[2].mxu0 }
 0x155   : > { %685 = vst [vmem:[#allocation2] sm:$0xff] %v683_v13  ;;  %v681_v17 = vpop.f32.mrb[3].mxu0 }
 0x156   : > { %686 = vst [vmem:[#allocation2 + $0x8] sm:$0xff] %v684_v15 }
 0x15c   : > { %v691_v18 = vld [vmem:[#allocation2] sm:$0xff] }
 0x15d   : > { %v692_v19 = vld [vmem:[#allocation2 + $0x8] sm:$0xff]  ;;  %v693_v20 = vmax.f32 %v691_v18, 0.0 }
 0x15e   : > { %v694_v21 = vmax.f32 %v692_v19, 0.0 }
 0x160   : > { %v883_v22 = vpack.c.bf16 %v694_v21, %v693_v20 }
 0x162   : > { %703 = vst [vmem:[%s1210_s5] sm:$0xff] %v883_v22 }
 0x163 PF: > { %s13_s18 = sadd.s32 1, %s1044_s18   ;;  %s1275_s12 = smov %s1024_s13 }
 0x164   : > { %p10_p0 = scmp.ge.s32.totalorder %s13_s18, 20   ;;  %s1276_s13 = smov %s1117_s25 }
 0x165   : > { %s1277_s14 = smov %s1036_s16  ;;  %s1278_s15 = smov %s1040_s17 }
 0x166   : > { %s1279_s16 = smov %s1282_s19  ;;  %s1280_s17 = smov %s1286_s20 }
 0x167   :  { %12 = sbr.rel (!%p10_p0) target bundleno = 4 (0x4), region = 119 }

// kernel: ae_vgg16_forward.14
= control target key start
LH: loop header
LB: loop body
LE: loop exit
PB: predicated region body
PF: predicated region fallthrough
CT: control target
= control target key end

     0   :  { %s1399_s12 = smov 0   ;;  %s1401_s13 = smov 0   ;;  %s1701_s0 = inlined_call_operand.vmem [shape: bf16[8,2304], index: 0, kind: input, shape index: {}]   ;;  %s1702_s1 = inlined_call_operand.vmem [shape: bf16[2304,1024], index: 1, kind: input, shape index: {}]   ;;  %s1703_s2 = inlined_call_operand.vmem [shape: f32[1,1024], index: 2, kind: input, shape index: {}]   ;;  %s1704_s3 = inlined_call_operand.vmem [shape: bf16[8,1024], index: 3, kind: output, shape index: {}]  }
   0x1   :  { %s1403_s14 = smov 0   ;;  %s1405_s15 = smov 0  }
   0x2   :  { %s1407_s16 = smov 0   ;;  %s1409_s17 = smov 0  }
   0x3   :  { %s1411_s18 = smov 0  }
   0x4 LB: > { %s25_s19 = sadd.s32 1, %s1369_s16  ;;  %s28_s20 = sadd.s32 1, %s1373_s17  ;;  %s1377_s18 = sphi %s1411_s18, %s13_s18   ;;  %s1373_s17 = sphi %s1409_s17, %s1710_s17   ;;  %s1369_s16 = sphi %s1407_s16, %s1709_s16   ;;  %s1365_s15 = sphi %s1405_s15, %s1708_s15   ;;  %s1361_s14 = sphi %s1403_s14, %s1707_s14   ;;  %s1357_s13 = sphi %s1401_s13, %s1706_s13   ;;  %s1353_s12 = sphi %s1399_s12, %s1705_s12  }
   0x5   : > { %p26_p0 = scmp.ge.s32.totalorder %s25_s19, 9  ;;  %p76_p1 = scmp.ne.s32.totalorder %s1357_s13, %s1353_s12 }
   0x6   : > { %p77_p2 = scmp.eq.s32.totalorder %s1377_s18, 0  ;;  %s69_s24 = sadd.s32 1, %s1357_s13 }
   0x7   : > { %s1712_s19 = smov (%p26_p0, %s25_s19), 0  ;;  %s1714_s20 = smov (!%p26_p0, %s28_s20), %s1373_s17 }
   0x8   : > { %p78_p3 = por %p77_p2, %p76_p1  ;;  %p30_p4 = scmp.ge.s32.totalorder %s1714_s20, 2 }
   0x9   : > { %s64_s21 = ssub.s32 %s1369_s16, %s1712_s19  ;;  %p1081_p6 = scmp.ge.s32.totalorder %s1377_s18, 18 }
   0xa   : > { %s1716_s20 = smov (%p30_p4, %s1714_s20), 0 }
   0xb   : > { %s65_s22 = ssub.s32 %s1373_s17, %s1716_s20  ;;  %156 = sbr.rel (%p1081_p6) target bundleno = 57 (0x39), region = 16 }
   0xc   : > { %s66_s23 = sor.u32 %s65_s22, %s64_s21 }
   0xd   : > { %p67_p5 = scmp.eq.s32.totalorder %s66_s23, 0 }
   0xf   : > { %s1450_s25 = scalar_select %p67_p5, %s1357_s13, %s69_s24  }
  0x12   : > { %172 = sbr.rel (!%p78_p3) target bundleno = 57 (0x39), region = 24  ;;  %s174_s26 = sand.u32 (%p78_p3), 1, %s1357_s13  }
  0x13   : > { %s1084_s27 = sshll.u32 (%p78_p3), %s1373_s17, 2  ;;  %s1082_s28 = sshll.u32 (%p78_p3), %s174_s26, 9 }
  0x14   : > { %s1166_s29 = sshll.u32 (%p78_p3), %s1369_s16, 8  ;;  %s1464_s8 = scalar_lea.vmem (%p78_p3), [#allocation3], %s1082_s28 }
  0x15   : > { %s180_s30 = sadd.s32 (%p78_p3), %s1166_s29, %s1084_s27 }
  0x16   : > { %s1086_s4 = sshll.u32 (%p78_p3), %s180_s30, 2 }
  0x17   : > { %s1459_s7 = scalar_lea.vmem (%p78_p3), %s1702_s1, %s1086_s4 }
  0x18   : > { %v195_v0 = vld [vmem:[%s1459_s7] sm:$0xff] (%p78_p3)  ;;  %v197_v1 = vld [vmem:[%s1459_s7 + $0x8] sm:$0xff] (%p78_p3) }
  0x19   : > { %v199_v2 = vld [vmem:[%s1459_s7 + $0x20] sm:$0xff]  ;;  %196 = vst [vmem:[%s1464_s8] sm:$0xff] %v195_v0  ;;  %198 = vst [vmem:[%s1464_s8 + $0x8] sm:$0xff] %v197_v1  ;;  %v201_v3 = vld [vmem:[%s1459_s7 + $0x28] sm:$0xff] }
  0x1a   : > { %200 = vst [vmem:[%s1464_s8 + $0x10] sm:$0xff] %v199_v2  ;;  %v203_v4 = vld [vmem:[%s1459_s7 + $0x40] sm:$0xff]  ;;  %v205_v5 = vld [vmem:[%s1459_s7 + $0x48] sm:$0xff]  ;;  %202 = vst [vmem:[%s1464_s8 + $0x18] sm:$0xff] %v201_v3 }
  0x1b   : > { %204 = vst [vmem:[%s1464_s8 + $0x20] sm:$0xff] %v203_v4  ;;  %206 = vst [vmem:[%s1464_s8 + $0x28] sm:$0xff] %v205_v5  ;;  %v207_v6 = vld [vmem:[%s1459_s7 + $0x60] sm:$0xff]  ;;  %v209_v7 = vld [vmem:[%s1459_s7 + $0x68] sm:$0xff] }
  0x1c   : > { %v211_v8 = vld [vmem:[%s1459_s7 + $0x80] sm:$0xff]  ;;  %208 = vst [vmem:[%s1464_s8 + $0x30] sm:$0xff] %v207_v6  ;;  %210 = vst [vmem:[%s1464_s8 + $0x38] sm:$0xff] %v209_v7  ;;  %v213_v9 = vld [vmem:[%s1459_s7 + $0x88] sm:$0xff] }
  0x1d   : > { %212 = vst [vmem:[%s1464_s8 + $0x40] sm:$0xff] %v211_v8  ;;  %v215_v10 = vld [vmem:[%s1459_s7 + $0xa0] sm:$0xff]  ;;  %v217_v11 = vld [vmem:[%s1459_s7 + $0xa8] sm:$0xff]  ;;  %214 = vst [vmem:[%s1464_s8 + $0x48] sm:$0xff] %v213_v9 }
  0x1e   : > { %216 = vst [vmem:[%s1464_s8 + $0x50] sm:$0xff] %v215_v10  ;;  %218 = vst [vmem:[%s1464_s8 + $0x58] sm:$0xff] %v217_v11  ;;  %v219_v12 = vld [vmem:[%s1459_s7 + $0xc0] sm:$0xff]  ;;  %v221_v13 = vld [vmem:[%s1459_s7 + $0xc8] sm:$0xff] }
  0x1f   : > { %v223_v14 = vld [vmem:[%s1459_s7 + $0xe0] sm:$0xff]  ;;  %220 = vst [vmem:[%s1464_s8 + $0x60] sm:$0xff] %v219_v12  ;;  %222 = vst [vmem:[%s1464_s8 + $0x68] sm:$0xff] %v221_v13  ;;  %v225_v15 = vld [vmem:[%s1459_s7 + $0xe8] sm:$0xff] }
  0x20   : > { %224 = vst [vmem:[%s1464_s8 + $0x70] sm:$0xff] %v223_v14  ;;  %v227_v16 = vld [vmem:[%s1459_s7 + $0x100] sm:$0xff]  ;;  %v229_v17 = vld [vmem:[%s1459_s7 + $0x108] sm:$0xff]  ;;  %226 = vst [vmem:[%s1464_s8 + $0x78] sm:$0xff] %v225_v15 }
  0x21   : > { %228 = vst [vmem:[%s1464_s8 + $0x80] sm:$0xff] %v227_v16  ;;  %230 = vst [vmem:[%s1464_s8 + $0x88] sm:$0xff] %v229_v17  ;;  %v231_v18 = vld [vmem:[%s1459_s7 + $0x120] sm:$0xff]  ;;  %v233_v19 = vld [vmem:[%s1459_s7 + $0x128] sm:$0xff] }
  0x22   : > { %v235_v20 = vld [vmem:[%s1459_s7 + $0x140] sm:$0xff]  ;;  %232 = vst [vmem:[%s1464_s8 + $0x90] sm:$0xff] %v231_v18  ;;  %234 = vst [vmem:[%s1464_s8 + $0x98] sm:$0xff] %v233_v19  ;;  %v237_v21 = vld [vmem:[%s1459_s7 + $0x148] sm:$0xff] }
  0x23   : > { %236 = vst [vmem:[%s1464_s8 + $0xa0] sm:$0xff] %v235_v20  ;;  %v239_v22 = vld [vmem:[%s1459_s7 + $0x160] sm:$0xff]  ;;  %v241_v23 = vld [vmem:[%s1459_s7 + $0x168] sm:$0xff]  ;;  %238 = vst [vmem:[%s1464_s8 + $0xa8] sm:$0xff] %v237_v21 }
  0x24   : > { %240 = vst [vmem:[%s1464_s8 + $0xb0] sm:$0xff] %v239_v22  ;;  %242 = vst [vmem:[%s1464_s8 + $0xb8] sm:$0xff] %v241_v23  ;;  %v243_v24 = vld [vmem:[%s1459_s7 + $0x180] sm:$0xff]  ;;  %v245_v25 = vld [vmem:[%s1459_s7 + $0x188] sm:$0xff] }
  0x25   : > { %v247_v26 = vld [vmem:[%s1459_s7 + $0x1a0] sm:$0xff]  ;;  %244 = vst [vmem:[%s1464_s8 + $0xc0] sm:$0xff] %v243_v24  ;;  %246 = vst [vmem:[%s1464_s8 + $0xc8] sm:$0xff] %v245_v25  ;;  %v249_v27 = vld [vmem:[%s1459_s7 + $0x1a8] sm:$0xff] }
  0x26   : > { %248 = vst [vmem:[%s1464_s8 + $0xd0] sm:$0xff] %v247_v26  ;;  %v251_v28 = vld [vmem:[%s1459_s7 + $0x1c0] sm:$0xff]  ;;  %v253_v29 = vld [vmem:[%s1459_s7 + $0x1c8] sm:$0xff]  ;;  %250 = vst [vmem:[%s1464_s8 + $0xd8] sm:$0xff] %v249_v27 }
  0x27   : > { %252 = vst [vmem:[%s1464_s8 + $0xe0] sm:$0xff] %v251_v28  ;;  %254 = vst [vmem:[%s1464_s8 + $0xe8] sm:$0xff] %v253_v29  ;;  %v255_v30 = vld [vmem:[%s1459_s7 + $0x1e0] sm:$0xff]  ;;  %v257_v31 = vld [vmem:[%s1459_s7 + $0x1e8] sm:$0xff] }
  0x28   : > { %v259_v32 = vld [vmem:[%s1459_s7 + $0x200] sm:$0xff]  ;;  %256 = vst [vmem:[%s1464_s8 + $0xf0] sm:$0xff] %v255_v30  ;;  %258 = vst [vmem:[%s1464_s8 + $0xf8] sm:$0xff] %v257_v31  ;;  %v261_v33 = vld [vmem:[%s1459_s7 + $0x208] sm:$0xff] }
  0x29   : > { %260 = vst [vmem:[%s1464_s8 + $0x100] sm:$0xff] %v259_v32  ;;  %v263_v34 = vld [vmem:[%s1459_s7 + $0x220] sm:$0xff]  ;;  %v265_v35 = vld [vmem:[%s1459_s7 + $0x228] sm:$0xff]  ;;  %262 = vst [vmem:[%s1464_s8 + $0x108] sm:$0xff] %v261_v33 }
  0x2a   : > { %264 = vst [vmem:[%s1464_s8 + $0x110] sm:$0xff] %v263_v34  ;;  %266 = vst [vmem:[%s1464_s8 + $0x118] sm:$0xff] %v265_v35  ;;  %v267_v36 = vld [vmem:[%s1459_s7 + $0x240] sm:$0xff]  ;;  %v269_v37 = vld [vmem:[%s1459_s7 + $0x248] sm:$0xff] }
  0x2b   : > { %v271_v38 = vld [vmem:[%s1459_s7 + $0x260] sm:$0xff]  ;;  %268 = vst [vmem:[%s1464_s8 + $0x120] sm:$0xff] %v267_v36  ;;  %270 = vst [vmem:[%s1464_s8 + $0x128] sm:$0xff] %v269_v37  ;;  %v273_v39 = vld [vmem:[%s1459_s7 + $0x268] sm:$0xff] }
  0x2c   : > { %272 = vst [vmem:[%s1464_s8 + $0x130] sm:$0xff] %v271_v38  ;;  %v275_v40 = vld [vmem:[%s1459_s7 + $0x280] sm:$0xff]  ;;  %v277_v41 = vld [vmem:[%s1459_s7 + $0x288] sm:$0xff]  ;;  %274 = vst [vmem:[%s1464_s8 + $0x138] sm:$0xff] %v273_v39 }
  0x2d   : > { %276 = vst [vmem:[%s1464_s8 + $0x140] sm:$0xff] %v275_v40  ;;  %278 = vst [vmem:[%s1464_s8 + $0x148] sm:$0xff] %v277_v41  ;;  %v279_v42 = vld [vmem:[%s1459_s7 + $0x2a0] sm:$0xff]  ;;  %v281_v43 = vld [vmem:[%s1459_s7 + $0x2a8] sm:$0xff] }
  0x2e   : > { %v283_v44 = vld [vmem:[%s1459_s7 + $0x2c0] sm:$0xff]  ;;  %280 = vst [vmem:[%s1464_s8 + $0x150] sm:$0xff] %v279_v42  ;;  %282 = vst [vmem:[%s1464_s8 + $0x158] sm:$0xff] %v281_v43  ;;  %v285_v45 = vld [vmem:[%s1459_s7 + $0x2c8] sm:$0xff] }
  0x2f   : > { %284 = vst [vmem:[%s1464_s8 + $0x160] sm:$0xff] %v283_v44  ;;  %v287_v46 = vld [vmem:[%s1459_s7 + $0x2e0] sm:$0xff]  ;;  %v289_v47 = vld [vmem:[%s1459_s7 + $0x2e8] sm:$0xff]  ;;  %286 = vst [vmem:[%s1464_s8 + $0x168] sm:$0xff] %v285_v45 }
  0x30   : > { %288 = vst [vmem:[%s1464_s8 + $0x170] sm:$0xff] %v287_v46  ;;  %290 = vst [vmem:[%s1464_s8 + $0x178] sm:$0xff] %v289_v47  ;;  %v291_v48 = vld [vmem:[%s1459_s7 + $0x300] sm:$0xff]  ;;  %v293_v49 = vld [vmem:[%s1459_s7 + $0x308] sm:$0xff] }
  0x31   : > { %v295_v50 = vld [vmem:[%s1459_s7 + $0x320] sm:$0xff]  ;;  %292 = vst [vmem:[%s1464_s8 + $0x180] sm:$0xff] %v291_v48  ;;  %294 = vst [vmem:[%s1464_s8 + $0x188] sm:$0xff] %v293_v49  ;;  %v297_v51 = vld [vmem:[%s1459_s7 + $0x328] sm:$0xff] }
  0x32   : > { %296 = vst [vmem:[%s1464_s8 + $0x190] sm:$0xff] %v295_v50  ;;  %v299_v52 = vld [vmem:[%s1459_s7 + $0x340] sm:$0xff]  ;;  %v301_v53 = vld [vmem:[%s1459_s7 + $0x348] sm:$0xff]  ;;  %298 = vst [vmem:[%s1464_s8 + $0x198] sm:$0xff] %v297_v51 }
  0x33   : > { %300 = vst [vmem:[%s1464_s8 + $0x1a0] sm:$0xff] %v299_v52  ;;  %302 = vst [vmem:[%s1464_s8 + $0x1a8] sm:$0xff] %v301_v53  ;;  %v303_v54 = vld [vmem:[%s1459_s7 + $0x360] sm:$0xff]  ;;  %v305_v55 = vld [vmem:[%s1459_s7 + $0x368] sm:$0xff] }
  0x34   : > { %v307_v56 = vld [vmem:[%s1459_s7 + $0x380] sm:$0xff]  ;;  %304 = vst [vmem:[%s1464_s8 + $0x1b0] sm:$0xff] %v303_v54  ;;  %306 = vst [vmem:[%s1464_s8 + $0x1b8] sm:$0xff] %v305_v55  ;;  %v309_v57 = vld [vmem:[%s1459_s7 + $0x388] sm:$0xff] }
  0x35   : > { %308 = vst [vmem:[%s1464_s8 + $0x1c0] sm:$0xff] %v307_v56  ;;  %v311_v58 = vld [vmem:[%s1459_s7 + $0x3a0] sm:$0xff]  ;;  %v313_v59 = vld [vmem:[%s1459_s7 + $0x3a8] sm:$0xff]  ;;  %310 = vst [vmem:[%s1464_s8 + $0x1c8] sm:$0xff] %v309_v57 }
  0x36   : > { %312 = vst [vmem:[%s1464_s8 + $0x1d0] sm:$0xff] %v311_v58  ;;  %314 = vst [vmem:[%s1464_s8 + $0x1d8] sm:$0xff] %v313_v59  ;;  %v315_v60 = vld [vmem:[%s1459_s7 + $0x3c0] sm:$0xff]  ;;  %v317_v61 = vld [vmem:[%s1459_s7 + $0x3c8] sm:$0xff] }
  0x37   : > { %v319_v62 = vld [vmem:[%s1459_s7 + $0x3e0] sm:$0xff]  ;;  %316 = vst [vmem:[%s1464_s8 + $0x1e0] sm:$0xff] %v315_v60  ;;  %318 = vst [vmem:[%s1464_s8 + $0x1e8] sm:$0xff] %v317_v61  ;;  %v321_v63 = vld [vmem:[%s1459_s7 + $0x3e8] sm:$0xff] }
  0x38   : > { %320 = vst [vmem:[%s1464_s8 + $0x1f0] sm:$0xff] %v319_v62  ;;  %322 = vst [vmem:[%s1464_s8 + $0x1f8] sm:$0xff] %v321_v63 }
  0x39 PF: > { %p1087_p7 = scmp.ge.s32.totalorder %s1377_s18, 1  ;;  %p335_p8 = scmp.lt.s32.totalorder %s1377_s18, 19 }
  0x3b   : > { %p336_p9 = pnand %p1087_p7, %p335_p8 }
  0x3c   : > { %s342_s9 = sand.u32 (!%p336_p9), 1, %s1353_s12   ;;  %s1089_s10 = sshll.u32 (!%p336_p9), %s1361_s14, 1 }
  0x3d   : > { %339 = sbr.rel (%p336_p9) target bundleno = 372 (0x174), region = 51  ;;  %s1088_s11 = sshll.u32 (!%p336_p9), %s342_s9, 9 }
  0x3e   : > { %p385_p10 = scmp.lt.s32.totalorder (!%p336_p9), %s1089_s10, 17  ;;  %s1091_s21 = sshll.u32 (!%p336_p9), %s1365_s15, 2 }
  0x3f   : > { %p395_p11 = scmp.lt.s32.totalorder (!%p336_p9), %s1091_s21, 7  ;;  %s1609_s15 = scalar_lea.vmem (!%p336_p9), [#allocation3], %s1088_s11 }
  0x40   : > { %p1094_p12 = scmp.ne.s32.totalorder (!%p336_p9), %s1361_s14, 0 }
  0x44   : > { %s1718_s10 = smov (!%p385_p10, %s1089_s10), 17  ;;  %s1720_s21 = smov (!%p395_p11, %s1091_s21), 7 }
  0x45   : > { %s1090_s22 = sshll.u32 %s1718_s10, 2  ;;  %s397_s29 = scalar_lea.vmem %s1703_s2, %s1720_s21  ;;  %v415_v0 = vlaneseq (!%p1094_p12) }
  0x46   : > { %s1599_s26 = scalar_lea.vmem %s1701_s0, %s1090_s22  ;;  %s1093_s30 = sshll.u32 %s1720_s21, 2  ;;  %v413_v2 = vld [vmem:[%s397_s29] sm:$0xf] (!%p1094_p12) }
  0x47   : > { %s1607_s5 = scalar_lea.vmem %s1704_s3, %s1093_s30  ;;  %412 = sbr.rel (%p1094_p12) target bundleno = 79 (0x4f), region = 59  ;;  %v416_v1 = vshrl.u32 (!%p1094_p12), %v415_v0, 7 }
  0x49   : > { %v417_v3 = vsub.s32 (!%p1094_p12), 0, %v416_v1  ;;  %v421_v4 = vsub.s32 (!%p1094_p12), 1, %v416_v1  ;;  %v425_v5 = vsub.s32 (!%p1094_p12), 2, %v416_v1  ;;  %v429_v6 = vsub.s32 (!%p1094_p12), 3, %v416_v1 }
  0x4b   : > { %v418_v7 = vrot.slane (!%p1094_p12), %v413_v2, %v417_v3  ;;  %v422_v8 = vrot.slane (!%p1094_p12), %v413_v2, %v421_v4  ;;  %v426_v9 = vrot.slane (!%p1094_p12), %v413_v2, %v425_v5  ;;  %v430_v10 = vrot.slane (!%p1094_p12), %v413_v2, %v429_v6 }
  0x4d   : > { %435 = vst [vmem:[#allocation2] sm:$0xff] (!%p1094_p12), %v418_v7  ;;  %436 = vst [vmem:[#allocation2 + $0x8] sm:$0xff] (!%p1094_p12), %v422_v8 }
  0x4e   : > { %437 = vst [vmem:[#allocation2 + $0x10] sm:$0xff] %v426_v9  ;;  %438 = vst [vmem:[#allocation2 + $0x18] sm:$0xff] %v430_v10 }
  0x4f PF: > { %v1225_v11 = vld [vmem:[%s1609_s15 + $0x4] ss:$16 sps:$4 sm:$0xff]   ;;  %v1227_v12 = vld [vmem:[%s1609_s15 + $0xc] ss:$16 sps:$4 sm:$0xff]   ;;  %v1229_v13 = vld [vmem:[%s1609_s15] ss:$16 sps:$4 sm:$0xff]  }
  0x50   : > { %835 = vmatprep.subr.bf16.mxu0 %v1225_v11  ;;  %v1230_v14 = vld [vmem:[%s1609_s15 + $0x8] ss:$16 sps:$4 sm:$0xff]   ;;  %876 = vmatprep.subr.bf16.mxu1 %v1227_v12  ;;  %v1231_v15 = vld [vmem:[%s1609_s15 + $0x24] ss:$16 sps:$4 sm:$0xff]   ;;  %v1233_v16 = vld [vmem:[%s1609_s15 + $0x2c] ss:$16 sps:$4 sm:$0xff]  }
  0x51   : > { %836 = vmatpush1.bf16.msra.mxu0 %v1229_v13  ;;  %877 = vmatpush1.bf16.msra.mxu1 %v1230_v14  ;;  %v1235_v17 = vld [vmem:[%s1609_s15 + $0x20] ss:$16 sps:$4 sm:$0xff]   ;;  %v1236_v18 = vld [vmem:[%s1609_s15 + $0x28] ss:$16 sps:$4 sm:$0xff]   ;;  %v1237_v19 = vld [vmem:[%s1609_s15 + $0x44] ss:$16 sps:$4 sm:$0xff]  }
  0x52   : > { %837 = vmatprep.subr.bf16.mxu0 %v1231_v15  ;;  %878 = vmatprep.subr.bf16.mxu1 %v1233_v16  ;;  %v1239_v20 = vld [vmem:[%s1609_s15 + $0x4c] ss:$16 sps:$4 sm:$0xff]   ;;  %v1241_v21 = vld [vmem:[%s1609_s15 + $0x40] ss:$16 sps:$4 sm:$0xff]   ;;  %v1242_v22 = vld [vmem:[%s1609_s15 + $0x48] ss:$16 sps:$4 sm:$0xff]  }
  0x53   : > { %v1243_v23 = vld [vmem:[%s1609_s15 + $0x64] ss:$16 sps:$4 sm:$0xff]   ;;  %v1245_v24 = vld [vmem:[%s1609_s15 + $0x6c] ss:$16 sps:$4 sm:$0xff]   ;;  %v1247_v25 = vld [vmem:[%s1609_s15 + $0x60] ss:$16 sps:$4 sm:$0xff]  }
  0x54   : > { %v1248_v26 = vld [vmem:[%s1609_s15 + $0x68] ss:$16 sps:$4 sm:$0xff]   ;;  %v1249_v27 = vld [vmem:[%s1609_s15 + $0x84] ss:$16 sps:$4 sm:$0xff]   ;;  %v1251_v28 = vld [vmem:[%s1609_s15 + $0x8c] ss:$16 sps:$4 sm:$0xff]  }
  0x55   : > { %838 = vmatpush1.bf16.msra.mxu0 %v1235_v17  ;;  %879 = vmatpush1.bf16.msra.mxu1 %v1236_v18  ;;  %v1253_v29 = vld [vmem:[%s1609_s15 + $0x80] ss:$16 sps:$4 sm:$0xff]   ;;  %v1254_v30 = vld [vmem:[%s1609_s15 + $0x88] ss:$16 sps:$4 sm:$0xff]   ;;  %v1255_v31 = vld [vmem:[%s1609_s15 + $0xa4] ss:$16 sps:$4 sm:$0xff]  }
  0x56   : > { %839 = vmatprep.subr.bf16.mxu0 %v1237_v19  ;;  %880 = vmatprep.subr.bf16.mxu1 %v1239_v20  ;;  %v1257_v32 = vld [vmem:[%s1609_s15 + $0xac] ss:$16 sps:$4 sm:$0xff]   ;;  %v1259_v33 = vld [vmem:[%s1609_s15 + $0xa0] ss:$16 sps:$4 sm:$0xff]   ;;  %v1260_v34 = vld [vmem:[%s1609_s15 + $0xa8] ss:$16 sps:$4 sm:$0xff]  }
  0x57   : > { %v1261_v35 = vld [vmem:[%s1609_s15 + $0xc4] ss:$16 sps:$4 sm:$0xff]   ;;  %v1263_v36 = vld [vmem:[%s1609_s15 + $0xcc] ss:$16 sps:$4 sm:$0xff]   ;;  %v1265_v37 = vld [vmem:[%s1609_s15 + $0xc0] ss:$16 sps:$4 sm:$0xff]  }
  0x58   : > { %v1266_v38 = vld [vmem:[%s1609_s15 + $0xc8] ss:$16 sps:$4 sm:$0xff]   ;;  %v1267_v39 = vld [vmem:[%s1609_s15 + $0xe4] ss:$16 sps:$4 sm:$0xff]   ;;  %v1269_v40 = vld [vmem:[%s1609_s15 + $0xec] ss:$16 sps:$4 sm:$0xff]  }
  0x59   : > { %840 = vmatpush1.bf16.msra.mxu0 %v1241_v21  ;;  %881 = vmatpush1.bf16.msra.mxu1 %v1242_v22  ;;  %v1271_v41 = vld [vmem:[%s1609_s15 + $0xe0] ss:$16 sps:$4 sm:$0xff]   ;;  %v1272_v42 = vld [vmem:[%s1609_s15 + $0xe8] ss:$16 sps:$4 sm:$0xff]   ;;  %v1273_v43 = vld [vmem:[%s1609_s15 + $0x104] ss:$16 sps:$4 sm:$0xff]  }
  0x5a   : > { %841 = vmatprep.subr.bf16.mxu0 %v1243_v23  ;;  %882 = vmatprep.subr.bf16.mxu1 %v1245_v24  ;;  %v1275_v44 = vld [vmem:[%s1609_s15 + $0x10c] ss:$16 sps:$4 sm:$0xff]   ;;  %v1277_v45 = vld [vmem:[%s1609_s15 + $0x100] ss:$16 sps:$4 sm:$0xff]   ;;  %v1278_v46 = vld [vmem:[%s1609_s15 + $0x108] ss:$16 sps:$4 sm:$0xff]  }
  0x5b   : > { %v1279_v47 = vld [vmem:[%s1609_s15 + $0x124] ss:$16 sps:$4 sm:$0xff]   ;;  %v1281_v48 = vld [vmem:[%s1609_s15 + $0x12c] ss:$16 sps:$4 sm:$0xff]   ;;  %v1283_v49 = vld [vmem:[%s1609_s15 + $0x120] ss:$16 sps:$4 sm:$0xff]  }
  0x5c   : > { %v1284_v50 = vld [vmem:[%s1609_s15 + $0x128] ss:$16 sps:$4 sm:$0xff]   ;;  %v1285_v51 = vld [vmem:[%s1609_s15 + $0x144] ss:$16 sps:$4 sm:$0xff]   ;;  %v1287_v52 = vld [vmem:[%s1609_s15 + $0x14c] ss:$16 sps:$4 sm:$0xff]  }
  0x5d   : > { %842 = vmatpush1.bf16.msra.mxu0 %v1247_v25  ;;  %883 = vmatpush1.bf16.msra.mxu1 %v1248_v26  ;;  %v1289_v53 = vld [vmem:[%s1609_s15 + $0x140] ss:$16 sps:$4 sm:$0xff]   ;;  %v1290_v54 = vld [vmem:[%s1609_s15 + $0x148] ss:$16 sps:$4 sm:$0xff]   ;;  %v1291_v55 = vld [vmem:[%s1609_s15 + $0x164] ss:$16 sps:$4 sm:$0xff]  }
  0x5e   : > { %843 = vmatprep.subr.bf16.mxu0 %v1249_v27  ;;  %884 = vmatprep.subr.bf16.mxu1 %v1251_v28  ;;  %v1293_v56 = vld [vmem:[%s1609_s15 + $0x16c] ss:$16 sps:$4 sm:$0xff]   ;;  %v443_v57 = vld [vmem:[%s1599_s26] sm:$0xff]  ;;  %v1296_v60 = vld [vmem:[%s1609_s15 + $0x168] ss:$16 sps:$4 sm:$0xff]   ;;  %p1161_p13 = scmp.ne.s32.totalorder %s1361_s14, 8 }
  0x5f   : > { %v1096_v58 = vcombine.high %v443_v57, %v443_v57  ;;  %v1295_v59 = vld [vmem:[%s1609_s15 + $0x160] ss:$16 sps:$4 sm:$0xff]   ;;  %v1297_v61 = vld [vmem:[%s1609_s15 + $0x184] ss:$16 sps:$4 sm:$0xff]   ;;  %v1299_v62 = vld [vmem:[%s1609_s15 + $0x18c] ss:$16 sps:$4 sm:$0xff]   ;;  %v1095_v13 = vcombine.low %v443_v57, %v443_v57 }
  0x60   : > { %v1301_v63 = vld [vmem:[%s1609_s15 + $0x180] ss:$16 sps:$4 sm:$0xff]   ;;  %v1302_v0 = vld [vmem:[%s1609_s15 + $0x188] ss:$16 sps:$4 sm:$0xff]   ;;  %v1303_v1 = vld [vmem:[%s1609_s15 + $0x1a4] ss:$16 sps:$4 sm:$0xff]  }
  0x61   : > { %844 = vmatpush1.bf16.msra.mxu0 %v1253_v29  ;;  %885 = vmatpush1.bf16.msra.mxu1 %v1254_v30  ;;  %v1305_v2 = vld [vmem:[%s1609_s15 + $0x1ac] ss:$16 sps:$4 sm:$0xff]   ;;  %v1307_v3 = vld [vmem:[%s1609_s15 + $0x1a0] ss:$16 sps:$4 sm:$0xff]   ;;  %v1308_v4 = vld [vmem:[%s1609_s15 + $0x1a8] ss:$16 sps:$4 sm:$0xff]  }
  0x62   : > { %845 = vmatprep.subr.bf16.mxu0 %v1255_v31  ;;  %886 = vmatprep.subr.bf16.mxu1 %v1257_v32  ;;  %v1309_v5 = vld [vmem:[%s1609_s15 + $0x1c4] ss:$16 sps:$4 sm:$0xff]   ;;  %v1311_v6 = vld [vmem:[%s1609_s15 + $0x1cc] ss:$16 sps:$4 sm:$0xff]   ;;  %v1313_v7 = vld [vmem:[%s1609_s15 + $0x1c0] ss:$16 sps:$4 sm:$0xff]  }
  0x63   : > { %867 = vmatprep.mubr.bf16.mxu0 %v1096_v58  ;;  %908 = vmatprep.mubr.bf16.mxu1 %v1096_v58  ;;  %v1314_v8 = vld [vmem:[%s1609_s15 + $0x1c8] ss:$16 sps:$4 sm:$0xff]   ;;  %v1315_v9 = vld [vmem:[%s1609_s15 + $0x1e4] ss:$16 sps:$4 sm:$0xff]   ;;  %v1317_v10 = vld [vmem:[%s1609_s15 + $0x1ec] ss:$16 sps:$4 sm:$0xff]  }
  0x64   : > { %v1319_v11 = vld [vmem:[%s1609_s15 + $0x1e0] ss:$16 sps:$4 sm:$0xff]   ;;  %v1320_v12 = vld [vmem:[%s1609_s15 + $0x1e8] ss:$16 sps:$4 sm:$0xff]  }
  0x65   : > { %846 = vmatpush1.bf16.msra.mxu0 %v1259_v33  ;;  %887 = vmatpush1.bf16.msra.mxu1 %v1260_v34  ;;  %v439_v14 = vld [vmem:[#allocation2] sm:$0xff]  ;;  %v441_v15 = vld [vmem:[#allocation2 + $0x10] sm:$0xff]  ;;  %v440_v16 = vld [vmem:[#allocation2 + $0x8] sm:$0xff] }
  0x66   : > { %847 = vmatprep.subr.bf16.mxu0 %v1261_v35  ;;  %888 = vmatprep.subr.bf16.mxu1 %v1263_v36  ;;  %v442_v17 = vld [vmem:[#allocation2 + $0x18] sm:$0xff] }
  0x69   : > { %848 = vmatpush1.bf16.msra.mxu0 %v1265_v37  ;;  %889 = vmatpush1.bf16.msra.mxu1 %v1266_v38 }
  0x6a   : > { %849 = vmatprep.subr.bf16.mxu0 %v1267_v39  ;;  %890 = vmatprep.subr.bf16.mxu1 %v1269_v40 }
  0x6d   : > { %850 = vmatpush1.bf16.msra.mxu0 %v1271_v41  ;;  %891 = vmatpush1.bf16.msra.mxu1 %v1272_v42 }
  0x6e   : > { %851 = vmatprep.subr.bf16.mxu0 %v1273_v43  ;;  %892 = vmatprep.subr.bf16.mxu1 %v1275_v44 }
  0x71   : > { %852 = vmatpush1.bf16.msra.mxu0 %v1277_v45  ;;  %893 = vmatpush1.bf16.msra.mxu1 %v1278_v46 }
  0x72   : > { %853 = vmatprep.subr.bf16.mxu0 %v1279_v47  ;;  %894 = vmatprep.subr.bf16.mxu1 %v1281_v48 }
  0x75   : > { %854 = vmatpush1.bf16.msra.mxu0 %v1283_v49  ;;  %895 = vmatpush1.bf16.msra.mxu1 %v1284_v50 }
  0x76   : > { %855 = vmatprep.subr.bf16.mxu0 %v1285_v51  ;;  %896 = vmatprep.subr.bf16.mxu1 %v1287_v52 }
  0x79   : > { %856 = vmatpush1.bf16.msra.mxu0 %v1289_v53  ;;  %897 = vmatpush1.bf16.msra.mxu1 %v1290_v54 }
  0x7a   : > { %857 = vmatprep.subr.bf16.mxu0 %v1291_v55  ;;  %898 = vmatprep.subr.bf16.mxu1 %v1293_v56 }
  0x7d   : > { %858 = vmatpush1.bf16.msra.mxu0 %v1295_v59  ;;  %899 = vmatpush1.bf16.msra.mxu1 %v1296_v60 }
  0x7e   : > { %859 = vmatprep.subr.bf16.mxu0 %v1297_v61  ;;  %900 = vmatprep.subr.bf16.mxu1 %v1299_v62 }
  0x81   : > { %860 = vmatpush1.bf16.msra.mxu0 %v1301_v63  ;;  %901 = vmatpush1.bf16.msra.mxu1 %v1302_v0 }
  0x82   : > { %861 = vmatprep.subr.bf16.mxu0 %v1303_v1  ;;  %902 = vmatprep.subr.bf16.mxu1 %v1305_v2 }
  0x85   : > { %862 = vmatpush1.bf16.msra.mxu0 %v1307_v3  ;;  %903 = vmatpush1.bf16.msra.mxu1 %v1308_v4 }
  0x86   : > { %863 = vmatprep.subr.bf16.mxu0 %v1309_v5  ;;  %904 = vmatprep.subr.bf16.mxu1 %v1311_v6 }
  0x89   : > { %864 = vmatpush1.bf16.msra.mxu0 %v1313_v7  ;;  %905 = vmatpush1.bf16.msra.mxu1 %v1314_v8 }
  0x8a   : > { %865 = vmatprep.subr.bf16.mxu0 %v1315_v9  ;;  %906 = vmatprep.subr.bf16.mxu1 %v1317_v10 }
  0x8d   : > { %866 = vmatpush1.bf16.msra.mxu0 %v1319_v11  ;;  %907 = vmatpush1.bf16.msra.mxu1 %v1320_v12 }
  0x90   : > { %868 = vmatmul.mubr.bf16.vlgmr.msra.gmra.mrb[0].mxu0 %v1095_v13  ;;  %909 = vmatmul.mubr.bf16.vlgmr.msra.gmra.mrb[0].mxu1 %v1095_v13 }
 0x161   : > { %928 = sbr.rel (%p1161_p13) target bundleno = 372 (0x174), region = 63 }
 0x163   : > { %v869_v18 = vpop.f32.mrb[0].mxu0  ;;  %v910_v19 = vpop.f32.mrb[0].mxu1 }
 0x164   : > { %v917_v20 = vadd.f32 %v869_v18, %v439_v14  ;;  %v919_v21 = vadd.f32 %v910_v19, %v441_v15  ;;  %v871_v22 = vpop.f32.mrb[1].mxu0  ;;  %v912_v23 = vpop.f32.mrb[1].mxu1 }
 0x165   : > { %v918_v24 = vadd.f32 %v871_v22, %v440_v16  ;;  %v920_v25 = vadd.f32 %v912_v23, %v442_v17  ;;  %v873_v26 = vpop.f32.mrb[2].mxu0  ;;  %v914_v27 = vpop.f32.mrb[2].mxu1 }
 0x166   : > { %921 = vst [vmem:[#allocation2] sm:$0xff] %v917_v20  ;;  %923 = vst [vmem:[#allocation2 + $0x10] sm:$0xff] %v919_v21  ;;  %v874_v28 = vpop.f32.mrb[3].mxu0  ;;  %v915_v29 = vpop.f32.mrb[3].mxu1 }
 0x167   : > { %922 = vst [vmem:[#allocation2 + $0x8] sm:$0xff] %v918_v24  ;;  %924 = vst [vmem:[#allocation2 + $0x18] sm:$0xff] %v920_v25 }
 0x16d   : > { %v929_v30 = vld [vmem:[#allocation2] sm:$0xff]  ;;  %v931_v32 = vld [vmem:[#allocation2 + $0x10] sm:$0xff] }
 0x16e   : > { %v930_v31 = vld [vmem:[#allocation2 + $0x8] sm:$0xff]  ;;  %v933_v33 = vmax.f32 %v929_v30, 0.0  ;;  %v932_v35 = vld [vmem:[#allocation2 + $0x18] sm:$0xff]  ;;  %v935_v36 = vmax.f32 %v931_v32, 0.0 }
 0x16f   : > { %v934_v34 = vmax.f32 %v930_v31, 0.0  ;;  %v936_v37 = vmax.f32 %v932_v35, 0.0 }
 0x171   : > { %v1167_v38 = vpack.c.bf16 %v934_v34, %v933_v33  ;;  %v1168_v39 = vpack.c.bf16 %v936_v37, %v935_v36 }
 0x173   : > { %953 = vst [vmem:[%s1607_s5] sm:$0xff] %v1167_v38  ;;  %954 = vst [vmem:[%s1607_s5 + $0x8] sm:$0xff] %v1168_v39 }
 0x174 PF: > { %s13_s18 = sadd.s32 1, %s1377_s18   ;;  %s1705_s12 = smov %s1357_s13 }
 0x175   : > { %p10_p0 = scmp.ge.s32.totalorder %s13_s18, 20   ;;  %s1706_s13 = smov %s1450_s25 }
 0x176   : > { %s1707_s14 = smov %s1369_s16  ;;  %s1708_s15 = smov %s1373_s17 }
 0x177   : > { %s1709_s16 = smov %s1712_s19  ;;  %s1710_s17 = smov %s1716_s20 }
 0x178   :  { %12 = sbr.rel (!%p10_p0) target bundleno = 4 (0x4), region = 104 }

// kernel: ae_vgg16_forward.15
= control target key start
LH: loop header
LB: loop body
LE: loop exit
PB: predicated region body
PF: predicated region fallthrough
CT: control target
= control target key end

     0   :  { %s1066_s12 = smov 0   ;;  %s1068_s13 = smov 0   ;;  %s1271_s0 = inlined_call_operand.vmem [shape: bf16[8,1280], index: 0, kind: input, shape index: {}]   ;;  %s1272_s1 = inlined_call_operand.vmem [shape: bf16[1280,512], index: 1, kind: input, shape index: {}]   ;;  %s1273_s2 = inlined_call_operand.vmem [shape: f32[1,512], index: 2, kind: input, shape index: {}]   ;;  %s1274_s3 = inlined_call_operand.vmem [shape: bf16[8,512], index: 3, kind: output, shape index: {}]  }
   0x1   :  { %s1070_s14 = smov 0   ;;  %s1072_s15 = smov 0  }
   0x2   :  { %s1074_s16 = smov 0   ;;  %s1076_s17 = smov 0  }
   0x3   :  { %s1078_s18 = smov 0  }
   0x4 LB: > { %s25_s19 = sadd.s32 1, %s1036_s16  ;;  %s28_s20 = sadd.s32 1, %s1040_s17  ;;  %s1044_s18 = sphi %s1078_s18, %s13_s18   ;;  %s1040_s17 = sphi %s1076_s17, %s1280_s17   ;;  %s1036_s16 = sphi %s1074_s16, %s1279_s16   ;;  %s1032_s15 = sphi %s1072_s15, %s1278_s15   ;;  %s1028_s14 = sphi %s1070_s14, %s1277_s14   ;;  %s1024_s13 = sphi %s1068_s13, %s1276_s13   ;;  %s1020_s12 = sphi %s1066_s12, %s1275_s12  }
   0x5   : > { %p26_p0 = scmp.ge.s32.totalorder %s25_s19, 5  ;;  %p76_p1 = scmp.ne.s32.totalorder %s1024_s13, %s1020_s12 }
   0x6   : > { %p77_p2 = scmp.eq.s32.totalorder %s1044_s18, 0  ;;  %s69_s24 = sadd.s32 1, %s1024_s13 }
   0x7   : > { %s1282_s19 = smov (%p26_p0, %s25_s19), 0  ;;  %s1284_s20 = smov (!%p26_p0, %s28_s20), %s1040_s17 }
   0x8   : > { %p78_p3 = por %p77_p2, %p76_p1  ;;  %p30_p4 = scmp.ge.s32.totalorder %s1284_s20, 2 }
   0x9   : > { %s64_s21 = ssub.s32 %s1036_s16, %s1282_s19  ;;  %p830_p6 = scmp.ge.s32.totalorder %s1044_s18, 10 }
   0xa   : > { %s1286_s20 = smov (%p30_p4, %s1284_s20), 0 }
   0xb   : > { %s65_s22 = ssub.s32 %s1040_s17, %s1286_s20  ;;  %156 = sbr.rel (%p830_p6) target bundleno = 41 (0x29), region = 16 }
   0xc   : > { %s66_s23 = sor.u32 %s65_s22, %s64_s21 }
   0xd   : > { %p67_p5 = scmp.eq.s32.totalorder %s66_s23, 0 }
   0xf   : > { %s1117_s25 = scalar_select %p67_p5, %s1024_s13, %s69_s24  }
  0x12   : > { %172 = sbr.rel (!%p78_p3) target bundleno = 41 (0x29), region = 24  ;;  %s174_s26 = sand.u32 (%p78_p3), 1, %s1024_s13  }
  0x13   : > { %s833_s27 = sshll.u32 (%p78_p3), %s1040_s17, 1  ;;  %s831_s28 = sshll.u32 (%p78_p3), %s174_s26, 8 }
  0x14   : > { %s882_s29 = sshll.u32 (%p78_p3), %s1036_s16, 7  ;;  %s1131_s8 = scalar_lea.vmem (%p78_p3), [#allocation3], %s831_s28 }
  0x15   : > { %s180_s30 = sadd.s32 (%p78_p3), %s882_s29, %s833_s27 }
  0x16   : > { %s835_s4 = sshll.u32 (%p78_p3), %s180_s30, 2 }
  0x17   : > { %s1126_s7 = scalar_lea.vmem (%p78_p3), %s1272_s1, %s835_s4 }
  0x18   : > { %v272_v0 = vld [vmem:[%s1126_s7] sm:$0xff] (%p78_p3)  ;;  %v274_v1 = vld [vmem:[%s1126_s7 + $0x10] sm:$0xff] (%p78_p3) }
  0x19   : > { %v276_v2 = vld [vmem:[%s1126_s7 + $0x20] sm:$0xff]  ;;  %273 = vst [vmem:[%s1131_s8] sm:$0xff] %v272_v0  ;;  %275 = vst [vmem:[%s1131_s8 + $0x8] sm:$0xff] %v274_v1  ;;  %v278_v3 = vld [vmem:[%s1126_s7 + $0x30] sm:$0xff] }
  0x1a   : > { %277 = vst [vmem:[%s1131_s8 + $0x10] sm:$0xff] %v276_v2  ;;  %v280_v4 = vld [vmem:[%s1126_s7 + $0x40] sm:$0xff]  ;;  %v282_v5 = vld [vmem:[%s1126_s7 + $0x50] sm:$0xff]  ;;  %279 = vst [vmem:[%s1131_s8 + $0x18] sm:$0xff] %v278_v3 }
  0x1b   : > { %281 = vst [vmem:[%s1131_s8 + $0x20] sm:$0xff] %v280_v4  ;;  %283 = vst [vmem:[%s1131_s8 + $0x28] sm:$0xff] %v282_v5  ;;  %v284_v6 = vld [vmem:[%s1126_s7 + $0x60] sm:$0xff]  ;;  %v286_v7 = vld [vmem:[%s1126_s7 + $0x70] sm:$0xff] }
  0x1c   : > { %v288_v8 = vld [vmem:[%s1126_s7 + $0x80] sm:$0xff]  ;;  %285 = vst [vmem:[%s1131_s8 + $0x30] sm:$0xff] %v284_v6  ;;  %287 = vst [vmem:[%s1131_s8 + $0x38] sm:$0xff] %v286_v7  ;;  %v290_v9 = vld [vmem:[%s1126_s7 + $0x90] sm:$0xff] }
  0x1d   : > { %289 = vst [vmem:[%s1131_s8 + $0x40] sm:$0xff] %v288_v8  ;;  %v292_v10 = vld [vmem:[%s1126_s7 + $0xa0] sm:$0xff]  ;;  %v294_v11 = vld [vmem:[%s1126_s7 + $0xb0] sm:$0xff]  ;;  %291 = vst [vmem:[%s1131_s8 + $0x48] sm:$0xff] %v290_v9 }
  0x1e   : > { %293 = vst [vmem:[%s1131_s8 + $0x50] sm:$0xff] %v292_v10  ;;  %295 = vst [vmem:[%s1131_s8 + $0x58] sm:$0xff] %v294_v11  ;;  %v296_v12 = vld [vmem:[%s1126_s7 + $0xc0] sm:$0xff]  ;;  %v298_v13 = vld [vmem:[%s1126_s7 + $0xd0] sm:$0xff] }
  0x1f   : > { %v300_v14 = vld [vmem:[%s1126_s7 + $0xe0] sm:$0xff]  ;;  %297 = vst [vmem:[%s1131_s8 + $0x60] sm:$0xff] %v296_v12  ;;  %299 = vst [vmem:[%s1131_s8 + $0x68] sm:$0xff] %v298_v13  ;;  %v302_v15 = vld [vmem:[%s1126_s7 + $0xf0] sm:$0xff] }
  0x20   : > { %301 = vst [vmem:[%s1131_s8 + $0x70] sm:$0xff] %v300_v14  ;;  %v304_v16 = vld [vmem:[%s1126_s7 + $0x100] sm:$0xff]  ;;  %v306_v17 = vld [vmem:[%s1126_s7 + $0x110] sm:$0xff]  ;;  %303 = vst [vmem:[%s1131_s8 + $0x78] sm:$0xff] %v302_v15 }
  0x21   : > { %305 = vst [vmem:[%s1131_s8 + $0x80] sm:$0xff] %v304_v16  ;;  %307 = vst [vmem:[%s1131_s8 + $0x88] sm:$0xff] %v306_v17  ;;  %v308_v18 = vld [vmem:[%s1126_s7 + $0x120] sm:$0xff]  ;;  %v310_v19 = vld [vmem:[%s1126_s7 + $0x130] sm:$0xff] }
  0x22   : > { %v312_v20 = vld [vmem:[%s1126_s7 + $0x140] sm:$0xff]  ;;  %309 = vst [vmem:[%s1131_s8 + $0x90] sm:$0xff] %v308_v18  ;;  %311 = vst [vmem:[%s1131_s8 + $0x98] sm:$0xff] %v310_v19  ;;  %v314_v21 = vld [vmem:[%s1126_s7 + $0x150] sm:$0xff] }
  0x23   : > { %313 = vst [vmem:[%s1131_s8 + $0xa0] sm:$0xff] %v312_v20  ;;  %v316_v22 = vld [vmem:[%s1126_s7 + $0x160] sm:$0xff]  ;;  %v318_v23 = vld [vmem:[%s1126_s7 + $0x170] sm:$0xff]  ;;  %315 = vst [vmem:[%s1131_s8 + $0xa8] sm:$0xff] %v314_v21 }
  0x24   : > { %317 = vst [vmem:[%s1131_s8 + $0xb0] sm:$0xff] %v316_v22  ;;  %319 = vst [vmem:[%s1131_s8 + $0xb8] sm:$0xff] %v318_v23  ;;  %v320_v24 = vld [vmem:[%s1126_s7 + $0x180] sm:$0xff]  ;;  %v322_v25 = vld [vmem:[%s1126_s7 + $0x190] sm:$0xff] }
  0x25   : > { %v324_v26 = vld [vmem:[%s1126_s7 + $0x1a0] sm:$0xff]  ;;  %321 = vst [vmem:[%s1131_s8 + $0xc0] sm:$0xff] %v320_v24  ;;  %323 = vst [vmem:[%s1131_s8 + $0xc8] sm:$0xff] %v322_v25  ;;  %v326_v27 = vld [vmem:[%s1126_s7 + $0x1b0] sm:$0xff] }
  0x26   : > { %325 = vst [vmem:[%s1131_s8 + $0xd0] sm:$0xff] %v324_v26  ;;  %v328_v28 = vld [vmem:[%s1126_s7 + $0x1c0] sm:$0xff]  ;;  %v330_v29 = vld [vmem:[%s1126_s7 + $0x1d0] sm:$0xff]  ;;  %327 = vst [vmem:[%s1131_s8 + $0xd8] sm:$0xff] %v326_v27 }
  0x27   : > { %329 = vst [vmem:[%s1131_s8 + $0xe0] sm:$0xff] %v328_v28  ;;  %331 = vst [vmem:[%s1131_s8 + $0xe8] sm:$0xff] %v330_v29  ;;  %v332_v30 = vld [vmem:[%s1126_s7 + $0x1e0] sm:$0xff]  ;;  %v334_v31 = vld [vmem:[%s1126_s7 + $0x1f0] sm:$0xff] }
  0x28   : > { %333 = vst [vmem:[%s1131_s8 + $0xf0] sm:$0xff] %v332_v30  ;;  %335 = vst [vmem:[%s1131_s8 + $0xf8] sm:$0xff] %v334_v31 }
  0x29 PF: > { %p836_p7 = scmp.ge.s32.totalorder %s1044_s18, 1  ;;  %p348_p8 = scmp.lt.s32.totalorder %s1044_s18, 11 }
  0x2b   : > { %p349_p9 = pnand %p836_p7, %p348_p8 }
  0x2c   : > { %s355_s9 = sand.u32 (!%p349_p9), 1, %s1020_s12   ;;  %s838_s10 = sshll.u32 (!%p349_p9), %s1028_s14, 1 }
  0x2d   : > { %352 = sbr.rel (%p349_p9) target bundleno = 355 (0x163), region = 66  ;;  %s837_s11 = sshll.u32 (!%p349_p9), %s355_s9, 8 }
  0x2e   : > { %p398_p10 = scmp.lt.s32.totalorder (!%p349_p9), %s838_s10, 9  ;;  %s840_s21 = sshll.u32 (!%p349_p9), %s1032_s15, 1 }
  0x2f   : > { %p408_p11 = scmp.lt.s32.totalorder (!%p349_p9), %s840_s21, 3  ;;  %s1212_s15 = scalar_lea.vmem (!%p349_p9), [#allocation3], %s837_s11 }
  0x30   : > { %p843_p12 = scmp.ne.s32.totalorder (!%p349_p9), %s1028_s14, 0 }
  0x34   : > { %s1288_s10 = smov (!%p398_p10, %s838_s10), 9  ;;  %s1290_s21 = smov (!%p408_p11, %s840_s21), 3 }
  0x35   : > { %s839_s22 = sshll.u32 %s1288_s10, 2  ;;  %s410_s29 = scalar_lea.vmem %s1273_s2, %s1290_s21  ;;  %v428_v32 = vlaneseq (!%p843_p12) }
  0x36   : > { %s1202_s26 = scalar_lea.vmem %s1271_s0, %s839_s22  ;;  %s842_s30 = sshll.u32 %s1290_s21, 2  ;;  %v426_v34 = vld [vmem:[%s410_s29] sm:$0x3] (!%p843_p12) }
  0x37   : > { %s1210_s5 = scalar_lea.vmem %s1274_s3, %s842_s30  ;;  %425 = sbr.rel (%p843_p12) target bundleno = 62 (0x3e), region = 74  ;;  %v429_v33 = vshrl.u32 (!%p843_p12), %v428_v32, 7 }
  0x39   : > { %v430_v35 = vsub.s32 (!%p843_p12), 0, %v429_v33  ;;  %v434_v36 = vsub.s32 (!%p843_p12), 1, %v429_v33 }
  0x3b   : > { %v431_v37 = vrot.slane (!%p843_p12), %v426_v34, %v430_v35  ;;  %v435_v38 = vrot.slane (!%p843_p12), %v426_v34, %v434_v36 }
  0x3d   : > { %438 = vst [vmem:[#allocation2] sm:$0xff] (!%p843_p12), %v431_v37  ;;  %439 = vst [vmem:[#allocation2 + $0x8] sm:$0xff] (!%p843_p12), %v435_v38 }
  0x3e PF: > { %v940_v39 = vld [vmem:[%s1212_s15 + $0x4] ss:$8 sps:$4 sm:$0xff]   ;;  %v942_v40 = vld [vmem:[%s1212_s15] ss:$8 sps:$4 sm:$0xff]   ;;  %v943_v41 = vld [vmem:[%s1212_s15 + $0x14] ss:$8 sps:$4 sm:$0xff]  }
  0x3f   : > { %642 = vmatprep.subr.bf16.mxu0 %v940_v39  ;;  %v945_v42 = vld [vmem:[%s1212_s15 + $0x10] ss:$8 sps:$4 sm:$0xff]   ;;  %v946_v43 = vld [vmem:[%s1212_s15 + $0x24] ss:$8 sps:$4 sm:$0xff]   ;;  %v948_v44 = vld [vmem:[%s1212_s15 + $0x20] ss:$8 sps:$4 sm:$0xff]  }
  0x40   : > { %643 = vmatpush1.bf16.msra.mxu0 %v942_v40  ;;  %v949_v45 = vld [vmem:[%s1212_s15 + $0x34] ss:$8 sps:$4 sm:$0xff]   ;;  %v951_v46 = vld [vmem:[%s1212_s15 + $0x30] ss:$8 sps:$4 sm:$0xff]   ;;  %v952_v47 = vld [vmem:[%s1212_s15 + $0x44] ss:$8 sps:$4 sm:$0xff]  }
  0x41   : > { %644 = vmatprep.subr.bf16.mxu0 %v943_v41  ;;  %v954_v48 = vld [vmem:[%s1212_s15 + $0x40] ss:$8 sps:$4 sm:$0xff]   ;;  %v955_v49 = vld [vmem:[%s1212_s15 + $0x54] ss:$8 sps:$4 sm:$0xff]   ;;  %v957_v50 = vld [vmem:[%s1212_s15 + $0x50] ss:$8 sps:$4 sm:$0xff]  }
  0x42   : > { %v958_v51 = vld [vmem:[%s1212_s15 + $0x64] ss:$8 sps:$4 sm:$0xff]   ;;  %v442_v52 = vld [vmem:[%s1202_s26] sm:$0xff]  ;;  %v960_v54 = vld [vmem:[%s1212_s15 + $0x60] ss:$8 sps:$4 sm:$0xff]   ;;  %p878_p13 = scmp.ne.s32.totalorder %s1028_s14, 4 }
  0x43   : > { %v845_v53 = vcombine.high %v442_v52, %v442_v52  ;;  %v961_v55 = vld [vmem:[%s1212_s15 + $0x74] ss:$8 sps:$4 sm:$0xff]   ;;  %v963_v56 = vld [vmem:[%s1212_s15 + $0x70] ss:$8 sps:$4 sm:$0xff]   ;;  %v964_v57 = vld [vmem:[%s1212_s15 + $0x84] ss:$8 sps:$4 sm:$0xff]   ;;  %v844_v9 = vcombine.low %v442_v52, %v442_v52 }
  0x44   : > { %645 = vmatpush1.bf16.msra.mxu0 %v945_v42  ;;  %v966_v58 = vld [vmem:[%s1212_s15 + $0x80] ss:$8 sps:$4 sm:$0xff]   ;;  %v967_v59 = vld [vmem:[%s1212_s15 + $0x94] ss:$8 sps:$4 sm:$0xff]   ;;  %v969_v60 = vld [vmem:[%s1212_s15 + $0x90] ss:$8 sps:$4 sm:$0xff]  }
  0x45   : > { %646 = vmatprep.subr.bf16.mxu0 %v946_v43  ;;  %674 = vmatprep.mubr.bf16.mxu0 %v845_v53  ;;  %v970_v61 = vld [vmem:[%s1212_s15 + $0xa4] ss:$8 sps:$4 sm:$0xff]   ;;  %v972_v62 = vld [vmem:[%s1212_s15 + $0xa0] ss:$8 sps:$4 sm:$0xff]   ;;  %v973_v63 = vld [vmem:[%s1212_s15 + $0xb4] ss:$8 sps:$4 sm:$0xff]  }
  0x46   : > { %v975_v0 = vld [vmem:[%s1212_s15 + $0xb0] ss:$8 sps:$4 sm:$0xff]   ;;  %v976_v1 = vld [vmem:[%s1212_s15 + $0xc4] ss:$8 sps:$4 sm:$0xff]   ;;  %v978_v2 = vld [vmem:[%s1212_s15 + $0xc0] ss:$8 sps:$4 sm:$0xff]  }
  0x47   : > { %v979_v3 = vld [vmem:[%s1212_s15 + $0xd4] ss:$8 sps:$4 sm:$0xff]   ;;  %v981_v4 = vld [vmem:[%s1212_s15 + $0xd0] ss:$8 sps:$4 sm:$0xff]   ;;  %v982_v5 = vld [vmem:[%s1212_s15 + $0xe4] ss:$8 sps:$4 sm:$0xff]  }
  0x48   : > { %647 = vmatpush1.bf16.msra.mxu0 %v948_v44  ;;  %v984_v6 = vld [vmem:[%s1212_s15 + $0xe0] ss:$8 sps:$4 sm:$0xff]   ;;  %v985_v7 = vld [vmem:[%s1212_s15 + $0xf4] ss:$8 sps:$4 sm:$0xff]   ;;  %v987_v8 = vld [vmem:[%s1212_s15 + $0xf0] ss:$8 sps:$4 sm:$0xff]  }
  0x49   : > { %648 = vmatprep.subr.bf16.mxu0 %v949_v45  ;;  %v440_v10 = vld [vmem:[#allocation2] sm:$0xff]  ;;  %v441_v11 = vld [vmem:[#allocation2 + $0x8] sm:$0xff] }
  0x4c   : > { %649 = vmatpush1.bf16.msra.mxu0 %v951_v46 }
  0x4d   : > { %650 = vmatprep.subr.bf16.mxu0 %v952_v47 }
  0x50   : > { %651 = vmatpush1.bf16.msra.mxu0 %v954_v48 }
  0x51   : > { %652 = vmatprep.subr.bf16.mxu0 %v955_v49 }
  0x54   : > { %653 = vmatpush1.bf16.msra.mxu0 %v957_v50 }
  0x55   : > { %654 = vmatprep.subr.bf16.mxu0 %v958_v51 }
  0x58   : > { %655 = vmatpush1.bf16.msra.mxu0 %v960_v54 }
  0x59   : > { %656 = vmatprep.subr.bf16.mxu0 %v961_v55 }
  0x5c   : > { %657 = vmatpush1.bf16.msra.mxu0 %v963_v56 }
  0x5d   : > { %658 = vmatprep.subr.bf16.mxu0 %v964_v57 }
  0x60   : > { %659 = vmatpush1.bf16.msra.mxu0 %v966_v58 }
  0x61   : > { %660 = vmatprep.subr.bf16.mxu0 %v967_v59 }
  0x64   : > { %661 = vmatpush1.bf16.msra.mxu0 %v969_v60 }
  0x65   : > { %662 = vmatprep.subr.bf16.mxu0 %v970_v61 }
  0x68   : > { %663 = vmatpush1.bf16.msra.mxu0 %v972_v62 }
  0x69   : > { %664 = vmatprep.subr.bf16.mxu0 %v973_v63 }
  0x6c   : > { %665 = vmatpush1.bf16.msra.mxu0 %v975_v0 }
  0x6d   : > { %666 = vmatprep.subr.bf16.mxu0 %v976_v1 }
  0x70   : > { %667 = vmatpush1.bf16.msra.mxu0 %v978_v2 }
  0x71   : > { %668 = vmatprep.subr.bf16.mxu0 %v979_v3 }
  0x74   : > { %669 = vmatpush1.bf16.msra.mxu0 %v981_v4 }
  0x75   : > { %670 = vmatprep.subr.bf16.mxu0 %v982_v5 }
  0x78   : > { %671 = vmatpush1.bf16.msra.mxu0 %v984_v6 }
  0x79   : > { %672 = vmatprep.subr.bf16.mxu0 %v985_v7 }
  0x7c   : > { %673 = vmatpush1.bf16.msra.mxu0 %v987_v8 }
  0x7f   : > { %675 = vmatmul.mubr.bf16.vlgmr.msra.gmra.mrb[0].mxu0 %v844_v9 }
 0x150   : > { %690 = sbr.rel (%p878_p13) target bundleno = 355 (0x163), region = 78 }
 0x152   : > { %v676_v12 = vpop.f32.mrb[0].mxu0 }
 0x153   : > { %v683_v13 = vadd.f32 %v676_v12, %v440_v10  ;;  %v678_v14 = vpop.f32.mrb[1].mxu0 }
 0x154   : > { %v684_v15 = vadd.f32 %v678_v14, %v441_v11  ;;  %v680_v16 = vpop.f32.mrb[2].mxu0 }
 0x155   : > { %685 = vst [vmem:[#allocation2] sm:$0xff] %v683_v13  ;;  %v681_v17 = vpop.f32.mrb[3].mxu0 }
 0x156   : > { %686 = vst [vmem:[#allocation2 + $0x8] sm:$0xff] %v684_v15 }
 0x15c   : > { %v691_v18 = vld [vmem:[#allocation2] sm:$0xff] }
 0x15d   : > { %v692_v19 = vld [vmem:[#allocation2 + $0x8] sm:$0xff]  ;;  %v693_v20 = vmax.f32 %v691_v18, 0.0 }
 0x15e   : > { %v694_v21 = vmax.f32 %v692_v19, 0.0 }
 0x160   : > { %v883_v22 = vpack.c.bf16 %v694_v21, %v693_v20 }
 0x162   : > { %703 = vst [vmem:[%s1210_s5] sm:$0xff] %v883_v22 }
 0x163 PF: > { %s13_s18 = sadd.s32 1, %s1044_s18   ;;  %s1275_s12 = smov %s1024_s13 }
 0x164   : > { %p10_p0 = scmp.ge.s32.totalorder %s13_s18, 12   ;;  %s1276_s13 = smov %s1117_s25 }
 0x165   : > { %s1277_s14 = smov %s1036_s16  ;;  %s1278_s15 = smov %s1040_s17 }
 0x166   : > { %s1279_s16 = smov %s1282_s19  ;;  %s1280_s17 = smov %s1286_s20 }
 0x167   :  { %12 = sbr.rel (!%p10_p0) target bundleno = 4 (0x4), region = 119 }

// kernel: ae_vgg16_forward.13
= control target key start
LH: loop header
LB: loop body
LE: loop exit
PB: predicated region body
PF: predicated region fallthrough
CT: control target
= control target key end

     0   :  { %s9799_s1 = inlined_call_operand.vmem [shape: bf16[512,1024], index: 1, kind: input, shape index: {}]   ;;  %s9800_s0 = inlined_call_operand.vmem [shape: bf16[8,512], index: 0, kind: input, shape index: {}]   ;;  %s9801_s3 = inlined_call_operand.vmem [shape: bf16[1024,256], index: 3, kind: input, shape index: {}]   ;;  %s9802_s2 = inlined_call_operand.vmem [shape: f32[1,1024], index: 2, kind: input, shape index: {}]   ;;  %s9803_s5 = inlined_call_operand.vmem [shape: bf16[256,1024], index: 5, kind: input, shape index: {}]   ;;  %s9804_s4 = inlined_call_operand.vmem [shape: f32[1,256], index: 4, kind: input, shape index: {}]   ;;  %s9805_s9 = inlined_call_operand.vmem [shape: f32[8,256], index: 9, kind: output, shape index: {0}]   ;;  %s9806_s7 = inlined_call_operand.vmem [shape: bf16[1024,512], index: 7, kind: input, shape index: {}]   ;;  %s9807_s6 = inlined_call_operand.vmem [shape: f32[1,1024], index: 6, kind: input, shape index: {}]   ;;  %s9808_s8 = inlined_call_operand.vmem [shape: f32[1,512], index: 8, kind: input, shape index: {}]   ;;  %s9809_s10 = inlined_call_operand.vmem [shape: bf16[8,512], index: 10, kind: output, shape index: {1}]  }
   0x1   :  { %v36_v0 = vld [vmem:[%s9799_s1] sm:$0xff]  ;;  %v37_v2 = vld [vmem:[%s9799_s1 + $0x8] sm:$0xff] }
   0x2   :  { %v40_v1 = vld [vmem:[%s9799_s1 + $0x20] sm:$0xff]  ;;  %v41_v4 = vld [vmem:[%s9799_s1 + $0x28] sm:$0xff] }
   0x3   :  { %v5831_v3 = vcombine.high %v36_v0, %v40_v1  ;;  %v5830_v5 = vcombine.low %v36_v0, %v40_v1  ;;  %v44_v6 = vld [vmem:[%s9799_s1 + $0x40] sm:$0xff]  ;;  %v5833_v8 = vcombine.high %v37_v2, %v41_v4  ;;  %v5832_v9 = vcombine.low %v37_v2, %v41_v4  ;;  %v45_v11 = vld [vmem:[%s9799_s1 + $0x48] sm:$0xff] }
   0x4   :  { %v48_v7 = vld [vmem:[%s9799_s1 + $0x60] sm:$0xff]  ;;  %v49_v12 = vld [vmem:[%s9799_s1 + $0x68] sm:$0xff] }
   0x5   :  { %v5839_v10 = vcombine.high %v44_v6, %v48_v7  ;;  %v52_v13 = vld [vmem:[%s9799_s1 + $0x80] sm:$0xff]  ;;  %1628 = vmatprep.subr.bf16.mxu0 %v5831_v3  ;;  %v5841_v14 = vcombine.high %v45_v11, %v49_v12  ;;  %v53_v16 = vld [vmem:[%s9799_s1 + $0x88] sm:$0xff]  ;;  %1710 = vmatprep.subr.bf16.mxu1 %v5833_v8  ;;  %v5838_v18 = vcombine.low %v44_v6, %v48_v7 }
   0x6   :  { %v56_v15 = vld [vmem:[%s9799_s1 + $0xa0] sm:$0xff]  ;;  %v57_v17 = vld [vmem:[%s9799_s1 + $0xa8] sm:$0xff]  ;;  %1629 = vmatpush1.bf16.msra.mxu0 %v5830_v5  ;;  %1711 = vmatpush1.bf16.msra.mxu1 %v5832_v9  ;;  %v5840_v19 = vcombine.low %v45_v11, %v49_v12 }
   0x7   :  { %1630 = vmatprep.subr.bf16.mxu0 %v5839_v10  ;;  %v5847_v20 = vcombine.high %v52_v13, %v56_v15  ;;  %1712 = vmatprep.subr.bf16.mxu1 %v5841_v14  ;;  %v5849_v21 = vcombine.high %v53_v16, %v57_v17  ;;  %v60_v22 = vld [vmem:[%s9799_s1 + $0xc0] sm:$0xff]  ;;  %v61_v24 = vld [vmem:[%s9799_s1 + $0xc8] sm:$0xff]  ;;  %v5846_v26 = vcombine.low %v52_v13, %v56_v15 }
   0x8   :  { %v64_v23 = vld [vmem:[%s9799_s1 + $0xe0] sm:$0xff]  ;;  %v65_v25 = vld [vmem:[%s9799_s1 + $0xe8] sm:$0xff]  ;;  %v5848_v27 = vcombine.low %v53_v16, %v57_v17 }
   0x9   :  { %v5855_v28 = vcombine.high %v60_v22, %v64_v23  ;;  %v5857_v29 = vcombine.high %v61_v24, %v65_v25  ;;  %v68_v30 = vld [vmem:[%s9799_s1 + $0x100] sm:$0xff]  ;;  %v69_v32 = vld [vmem:[%s9799_s1 + $0x108] sm:$0xff]  ;;  %v5854_v34 = vcombine.low %v60_v22, %v64_v23  ;;  %v5856_v35 = vcombine.low %v61_v24, %v65_v25 }
   0xa   :  { %1631 = vmatpush1.bf16.msra.mxu0 %v5838_v18  ;;  %1713 = vmatpush1.bf16.msra.mxu1 %v5840_v19  ;;  %v72_v31 = vld [vmem:[%s9799_s1 + $0x120] sm:$0xff]  ;;  %v73_v33 = vld [vmem:[%s9799_s1 + $0x128] sm:$0xff] }
   0xb   :  { %1632 = vmatprep.subr.bf16.mxu0 %v5847_v20  ;;  %1714 = vmatprep.subr.bf16.mxu1 %v5849_v21  ;;  %v5863_v36 = vcombine.high %v68_v30, %v72_v31  ;;  %v5865_v37 = vcombine.high %v69_v32, %v73_v33  ;;  %v76_v38 = vld [vmem:[%s9799_s1 + $0x140] sm:$0xff]  ;;  %v77_v40 = vld [vmem:[%s9799_s1 + $0x148] sm:$0xff]  ;;  %v5862_v42 = vcombine.low %v68_v30, %v72_v31 }
   0xc   :  { %v80_v39 = vld [vmem:[%s9799_s1 + $0x160] sm:$0xff]  ;;  %v81_v41 = vld [vmem:[%s9799_s1 + $0x168] sm:$0xff]  ;;  %v5864_v43 = vcombine.low %v69_v32, %v73_v33 }
   0xd   :  { %v5871_v44 = vcombine.high %v76_v38, %v80_v39  ;;  %v5873_v45 = vcombine.high %v77_v40, %v81_v41  ;;  %v84_v46 = vld [vmem:[%s9799_s1 + $0x180] sm:$0xff]  ;;  %v85_v48 = vld [vmem:[%s9799_s1 + $0x188] sm:$0xff]  ;;  %v5870_v50 = vcombine.low %v76_v38, %v80_v39  ;;  %v5872_v51 = vcombine.low %v77_v40, %v81_v41 }
   0xe   :  { %1633 = vmatpush1.bf16.msra.mxu0 %v5846_v26  ;;  %1715 = vmatpush1.bf16.msra.mxu1 %v5848_v27  ;;  %v88_v47 = vld [vmem:[%s9799_s1 + $0x1a0] sm:$0xff]  ;;  %v89_v49 = vld [vmem:[%s9799_s1 + $0x1a8] sm:$0xff] }
   0xf   :  { %1634 = vmatprep.subr.bf16.mxu0 %v5855_v28  ;;  %1716 = vmatprep.subr.bf16.mxu1 %v5857_v29  ;;  %v5879_v52 = vcombine.high %v84_v46, %v88_v47  ;;  %v7430_v53 = vld [vmem:[%s9800_s0] sm:$0xff]  ;;  %v5881_v54 = vcombine.high %v85_v48, %v89_v49  ;;  %v93_v58 = vld [vmem:[%s9799_s1 + $0x1c8] sm:$0xff]  ;;  %v5878_v60 = vcombine.low %v84_v46, %v88_v47 }
  0x10   :  { %v92_v55 = vld [vmem:[%s9799_s1 + $0x1c0] sm:$0xff]  ;;  %v7440_v57 = vcombine.high %v7430_v53, %v7430_v53  ;;  %v97_v59 = vld [vmem:[%s9799_s1 + $0x1e8] sm:$0xff]  ;;  %v5880_v61 = vcombine.low %v85_v48, %v89_v49 }
  0x11   :  { %v96_v56 = vld [vmem:[%s9799_s1 + $0x1e0] sm:$0xff]  ;;  %v5889_v63 = vcombine.high %v93_v58, %v97_v59  ;;  %v101_v2 = vld [vmem:[%s9799_s1 + $0x208] sm:$0xff]  ;;  %v5888_v5 = vcombine.low %v93_v58, %v97_v59 }
  0x12   :  { %1635 = vmatpush1.bf16.msra.mxu0 %v5854_v34  ;;  %1717 = vmatpush1.bf16.msra.mxu1 %v5856_v35  ;;  %v5887_v62 = vcombine.high %v92_v55, %v96_v56  ;;  %v100_v0 = vld [vmem:[%s9799_s1 + $0x200] sm:$0xff]  ;;  %v105_v3 = vld [vmem:[%s9799_s1 + $0x228] sm:$0xff]  ;;  %v5886_v4 = vcombine.low %v92_v55, %v96_v56 }
  0x13   :  { %1636 = vmatprep.subr.bf16.mxu0 %v5863_v36  ;;  %1718 = vmatprep.subr.bf16.mxu1 %v5865_v37  ;;  %v104_v1 = vld [vmem:[%s9799_s1 + $0x220] sm:$0xff]  ;;  %v5897_v7 = vcombine.high %v101_v2, %v105_v3  ;;  %v109_v10 = vld [vmem:[%s9799_s1 + $0x248] sm:$0xff]  ;;  %v5896_v13 = vcombine.low %v101_v2, %v105_v3 }
  0x14   :  { %1660 = vmatprep.mubr.bf16.mxu0 %v7440_v57  ;;  %1742 = vmatprep.mubr.bf16.mxu1 %v7440_v57  ;;  %v5895_v6 = vcombine.high %v100_v0, %v104_v1  ;;  %v108_v8 = vld [vmem:[%s9799_s1 + $0x240] sm:$0xff]  ;;  %v113_v11 = vld [vmem:[%s9799_s1 + $0x268] sm:$0xff]  ;;  %v5894_v12 = vcombine.low %v100_v0, %v104_v1 }
  0x15   :  { %v112_v9 = vld [vmem:[%s9799_s1 + $0x260] sm:$0xff]  ;;  %v5905_v15 = vcombine.high %v109_v10, %v113_v11  ;;  %v117_v18 = vld [vmem:[%s9799_s1 + $0x288] sm:$0xff]  ;;  %v5904_v21 = vcombine.low %v109_v10, %v113_v11 }
  0x16   :  { %1637 = vmatpush1.bf16.msra.mxu0 %v5862_v42  ;;  %1719 = vmatpush1.bf16.msra.mxu1 %v5864_v43  ;;  %v5903_v14 = vcombine.high %v108_v8, %v112_v9  ;;  %v116_v16 = vld [vmem:[%s9799_s1 + $0x280] sm:$0xff]  ;;  %v121_v19 = vld [vmem:[%s9799_s1 + $0x2a8] sm:$0xff]  ;;  %v5902_v20 = vcombine.low %v108_v8, %v112_v9 }
  0x17   :  { %1638 = vmatprep.subr.bf16.mxu0 %v5871_v44  ;;  %1720 = vmatprep.subr.bf16.mxu1 %v5873_v45  ;;  %v120_v17 = vld [vmem:[%s9799_s1 + $0x2a0] sm:$0xff]  ;;  %v5913_v23 = vcombine.high %v117_v18, %v121_v19  ;;  %v125_v26 = vld [vmem:[%s9799_s1 + $0x2c8] sm:$0xff]  ;;  %v5912_v29 = vcombine.low %v117_v18, %v121_v19 }
  0x18   :  { %v5911_v22 = vcombine.high %v116_v16, %v120_v17  ;;  %v124_v24 = vld [vmem:[%s9799_s1 + $0x2c0] sm:$0xff]  ;;  %v129_v27 = vld [vmem:[%s9799_s1 + $0x2e8] sm:$0xff]  ;;  %v5910_v28 = vcombine.low %v116_v16, %v120_v17 }
  0x19   :  { %v128_v25 = vld [vmem:[%s9799_s1 + $0x2e0] sm:$0xff]  ;;  %v5921_v31 = vcombine.high %v125_v26, %v129_v27  ;;  %v133_v34 = vld [vmem:[%s9799_s1 + $0x308] sm:$0xff]  ;;  %v5920_v37 = vcombine.low %v125_v26, %v129_v27 }
  0x1a   :  { %1639 = vmatpush1.bf16.msra.mxu0 %v5870_v50  ;;  %1721 = vmatpush1.bf16.msra.mxu1 %v5872_v51  ;;  %v5919_v30 = vcombine.high %v124_v24, %v128_v25  ;;  %v132_v32 = vld [vmem:[%s9799_s1 + $0x300] sm:$0xff]  ;;  %v137_v35 = vld [vmem:[%s9799_s1 + $0x328] sm:$0xff]  ;;  %v5918_v36 = vcombine.low %v124_v24, %v128_v25 }
  0x1b   :  { %1640 = vmatprep.subr.bf16.mxu0 %v5879_v52  ;;  %1722 = vmatprep.subr.bf16.mxu1 %v5881_v54  ;;  %v136_v33 = vld [vmem:[%s9799_s1 + $0x320] sm:$0xff]  ;;  %v5929_v39 = vcombine.high %v133_v34, %v137_v35  ;;  %v141_v42 = vld [vmem:[%s9799_s1 + $0x348] sm:$0xff]  ;;  %v5928_v45 = vcombine.low %v133_v34, %v137_v35 }
  0x1c   :  { %v5927_v38 = vcombine.high %v132_v32, %v136_v33  ;;  %v140_v40 = vld [vmem:[%s9799_s1 + $0x340] sm:$0xff]  ;;  %v145_v43 = vld [vmem:[%s9799_s1 + $0x368] sm:$0xff]  ;;  %v5926_v44 = vcombine.low %v132_v32, %v136_v33 }
  0x1d   :  { %v144_v41 = vld [vmem:[%s9799_s1 + $0x360] sm:$0xff]  ;;  %v5937_v47 = vcombine.high %v141_v42, %v145_v43  ;;  %v149_v50 = vld [vmem:[%s9799_s1 + $0x388] sm:$0xff]  ;;  %v5936_v54 = vcombine.low %v141_v42, %v145_v43 }
  0x1e   :  { %1641 = vmatpush1.bf16.msra.mxu0 %v5878_v60  ;;  %1723 = vmatpush1.bf16.msra.mxu1 %v5880_v61  ;;  %v5935_v46 = vcombine.high %v140_v40, %v144_v41  ;;  %v148_v48 = vld [vmem:[%s9799_s1 + $0x380] sm:$0xff]  ;;  %v153_v51 = vld [vmem:[%s9799_s1 + $0x3a8] sm:$0xff]  ;;  %v5934_v52 = vcombine.low %v140_v40, %v144_v41 }
  0x1f   :  { %1642 = vmatprep.subr.bf16.mxu0 %v5887_v62  ;;  %1724 = vmatprep.subr.bf16.mxu1 %v5889_v63  ;;  %v152_v49 = vld [vmem:[%s9799_s1 + $0x3a0] sm:$0xff]  ;;  %v5945_v56 = vcombine.high %v149_v50, %v153_v51  ;;  %v157_v60 = vld [vmem:[%s9799_s1 + $0x3c8] sm:$0xff]  ;;  %v5944_v63 = vcombine.low %v149_v50, %v153_v51 }
  0x20   :  { %v5943_v55 = vcombine.high %v148_v48, %v152_v49  ;;  %v156_v58 = vld [vmem:[%s9799_s1 + $0x3c0] sm:$0xff]  ;;  %v161_v61 = vld [vmem:[%s9799_s1 + $0x3e8] sm:$0xff]  ;;  %v5942_v62 = vcombine.low %v148_v48, %v152_v49 }
  0x21   :  { %v160_v59 = vld [vmem:[%s9799_s1 + $0x3e0] sm:$0xff]  ;;  %v5953_v1 = vcombine.high %v157_v60, %v161_v61 }
  0x22   :  { %1643 = vmatpush1.bf16.msra.mxu0 %v5886_v4  ;;  %1725 = vmatpush1.bf16.msra.mxu1 %v5888_v5  ;;  %v5951_v0 = vcombine.high %v156_v58, %v160_v59  ;;  %v164_v2 = vld [vmem:[%s9799_s1 + $0x400] sm:$0xff]  ;;  %v165_v4 = vld [vmem:[%s9799_s1 + $0x408] sm:$0xff] }
  0x23   :  { %1644 = vmatprep.subr.bf16.mxu0 %v5895_v6  ;;  %1726 = vmatprep.subr.bf16.mxu1 %v5897_v7  ;;  %v168_v3 = vld [vmem:[%s9799_s1 + $0x420] sm:$0xff]  ;;  %v169_v5 = vld [vmem:[%s9799_s1 + $0x428] sm:$0xff]  ;;  %v5950_v6 = vcombine.low %v156_v58, %v160_v59  ;;  %v5952_v7 = vcombine.low %v157_v60, %v161_v61 }
  0x24   :  { %v5959_v8 = vcombine.high %v164_v2, %v168_v3  ;;  %v5961_v9 = vcombine.high %v165_v4, %v169_v5  ;;  %v172_v10 = vld [vmem:[%s9799_s1 + $0x440] sm:$0xff]  ;;  %v5958_v16 = vcombine.low %v164_v2, %v168_v3  ;;  %v5960_v17 = vcombine.low %v165_v4, %v169_v5 }
  0x25   :  { %v176_v11 = vld [vmem:[%s9799_s1 + $0x460] sm:$0xff] }
  0x26   :  { %1645 = vmatpush1.bf16.msra.mxu0 %v5894_v12  ;;  %1727 = vmatpush1.bf16.msra.mxu1 %v5896_v13  ;;  %v7566_v12 = vcombine.low %v7430_v53, %v7430_v53  ;;  %v173_v13 = vld [vmem:[%s9799_s1 + $0x448] sm:$0xff]  ;;  %v5967_v53 = vcombine.high %v172_v10, %v176_v11  ;;  %v180_v19 = vld [vmem:[%s9799_s1 + $0x480] sm:$0xff]  ;;  %v5966_v24 = vcombine.low %v172_v10, %v176_v11 }
  0x27   :  { %1646 = vmatprep.subr.bf16.mxu0 %v5903_v14  ;;  %1728 = vmatprep.subr.bf16.mxu1 %v5905_v15  ;;  %v177_v14 = vld [vmem:[%s9799_s1 + $0x468] sm:$0xff] }
  0x28   :  { %v7577_v15 = vld [vmem:[%s9800_s0 + $0x8] sm:$0xff]  ;;  %v5969_v18 = vcombine.high %v173_v13, %v177_v14  ;;  %v5968_v25 = vcombine.low %v173_v13, %v177_v14 }
  0x2a   :  { %1647 = vmatpush1.bf16.msra.mxu0 %v5902_v20  ;;  %1729 = vmatpush1.bf16.msra.mxu1 %v5904_v21  ;;  %v184_v20 = vld [vmem:[%s9799_s1 + $0x4a0] sm:$0xff]  ;;  %v7587_v21 = vcombine.high %v7577_v15, %v7577_v15 }
  0x2b   :  { %1648 = vmatprep.subr.bf16.mxu0 %v5911_v22  ;;  %1730 = vmatprep.subr.bf16.mxu1 %v5913_v23  ;;  %v181_v22 = vld [vmem:[%s9799_s1 + $0x488] sm:$0xff]  ;;  %v5975_v26 = vcombine.high %v180_v19, %v184_v20  ;;  %v5974_v32 = vcombine.low %v180_v19, %v184_v20 }
  0x2c   :  { %v185_v23 = vld [vmem:[%s9799_s1 + $0x4a8] sm:$0xff] }
  0x2d   :  { %v5977_v27 = vcombine.high %v181_v22, %v185_v23  ;;  %v5976_v33 = vcombine.low %v181_v22, %v185_v23 }
  0x2e   :  { %1649 = vmatpush1.bf16.msra.mxu0 %v5910_v28  ;;  %1731 = vmatpush1.bf16.msra.mxu1 %v5912_v29  ;;  %v188_v28 = vld [vmem:[%s9799_s1 + $0x4c0] sm:$0xff] }
  0x2f   :  { %1650 = vmatprep.subr.bf16.mxu0 %v5919_v30  ;;  %1732 = vmatprep.subr.bf16.mxu1 %v5921_v31  ;;  %v192_v29 = vld [vmem:[%s9799_s1 + $0x4e0] sm:$0xff]  ;;  %v189_v30 = vld [vmem:[%s9799_s1 + $0x4c8] sm:$0xff] }
  0x30   :  { %v193_v31 = vld [vmem:[%s9799_s1 + $0x4e8] sm:$0xff]  ;;  %v5983_v34 = vcombine.high %v188_v28, %v192_v29  ;;  %v5982_v40 = vcombine.low %v188_v28, %v192_v29 }
  0x31   :  { %v5985_v35 = vcombine.high %v189_v30, %v193_v31  ;;  %v5984_v41 = vcombine.low %v189_v30, %v193_v31 }
  0x32   :  { %1651 = vmatpush1.bf16.msra.mxu0 %v5918_v36  ;;  %1733 = vmatpush1.bf16.msra.mxu1 %v5920_v37  ;;  %v196_v36 = vld [vmem:[%s9799_s1 + $0x500] sm:$0xff] }
  0x33   :  { %1652 = vmatprep.subr.bf16.mxu0 %v5927_v38  ;;  %1734 = vmatprep.subr.bf16.mxu1 %v5929_v39  ;;  %v200_v37 = vld [vmem:[%s9799_s1 + $0x520] sm:$0xff]  ;;  %v197_v38 = vld [vmem:[%s9799_s1 + $0x508] sm:$0xff] }
  0x34   :  { %v201_v39 = vld [vmem:[%s9799_s1 + $0x528] sm:$0xff]  ;;  %v5991_v42 = vcombine.high %v196_v36, %v200_v37  ;;  %v5990_v48 = vcombine.low %v196_v36, %v200_v37 }
  0x35   :  { %v5993_v43 = vcombine.high %v197_v38, %v201_v39  ;;  %v5992_v49 = vcombine.low %v197_v38, %v201_v39 }
  0x36   :  { %1653 = vmatpush1.bf16.msra.mxu0 %v5926_v44  ;;  %1735 = vmatpush1.bf16.msra.mxu1 %v5928_v45  ;;  %v204_v44 = vld [vmem:[%s9799_s1 + $0x540] sm:$0xff] }
  0x37   :  { %1654 = vmatprep.subr.bf16.mxu0 %v5935_v46  ;;  %1736 = vmatprep.subr.bf16.mxu1 %v5937_v47  ;;  %v208_v45 = vld [vmem:[%s9799_s1 + $0x560] sm:$0xff]  ;;  %v205_v46 = vld [vmem:[%s9799_s1 + $0x548] sm:$0xff] }
  0x38   :  { %v209_v47 = vld [vmem:[%s9799_s1 + $0x568] sm:$0xff]  ;;  %v5999_v50 = vcombine.high %v204_v44, %v208_v45  ;;  %v5998_v58 = vcombine.low %v204_v44, %v208_v45 }
  0x39   :  { %v6001_v51 = vcombine.high %v205_v46, %v209_v47  ;;  %v6000_v59 = vcombine.low %v205_v46, %v209_v47 }
  0x3a   :  { %1655 = vmatpush1.bf16.msra.mxu0 %v5934_v52  ;;  %1737 = vmatpush1.bf16.msra.mxu1 %v5936_v54  ;;  %v212_v52 = vld [vmem:[%s9799_s1 + $0x580] sm:$0xff] }
  0x3b   :  { %1656 = vmatprep.subr.bf16.mxu0 %v5943_v55  ;;  %1738 = vmatprep.subr.bf16.mxu1 %v5945_v56  ;;  %v216_v54 = vld [vmem:[%s9799_s1 + $0x5a0] sm:$0xff]  ;;  %v213_v55 = vld [vmem:[%s9799_s1 + $0x588] sm:$0xff] }
  0x3c   :  { %v217_v56 = vld [vmem:[%s9799_s1 + $0x5a8] sm:$0xff]  ;;  %v6007_v60 = vcombine.high %v212_v52, %v216_v54  ;;  %v6006_v2 = vcombine.low %v212_v52, %v216_v54 }
  0x3d   :  { %v6009_v61 = vcombine.high %v213_v55, %v217_v56  ;;  %v6008_v3 = vcombine.low %v213_v55, %v217_v56 }
  0x3e   :  { %1657 = vmatpush1.bf16.msra.mxu0 %v5942_v62  ;;  %1739 = vmatpush1.bf16.msra.mxu1 %v5944_v63  ;;  %v220_v62 = vld [vmem:[%s9799_s1 + $0x5c0] sm:$0xff] }
  0x3f   :  { %1658 = vmatprep.subr.bf16.mxu0 %v5951_v0  ;;  %1740 = vmatprep.subr.bf16.mxu1 %v5953_v1  ;;  %v224_v63 = vld [vmem:[%s9799_s1 + $0x5e0] sm:$0xff]  ;;  %v221_v0 = vld [vmem:[%s9799_s1 + $0x5c8] sm:$0xff] }
  0x40   :  { %v225_v1 = vld [vmem:[%s9799_s1 + $0x5e8] sm:$0xff]  ;;  %v6015_v4 = vcombine.high %v220_v62, %v224_v63  ;;  %v6014_v10 = vcombine.low %v220_v62, %v224_v63 }
  0x41   :  { %v6017_v5 = vcombine.high %v221_v0, %v225_v1  ;;  %v6016_v11 = vcombine.low %v221_v0, %v225_v1 }
  0x42   :  { %1659 = vmatpush1.bf16.msra.mxu0 %v5950_v6  ;;  %1741 = vmatpush1.bf16.msra.mxu1 %v5952_v7  ;;  %v228_v6 = vld [vmem:[%s9799_s1 + $0x600] sm:$0xff] }
  0x43   :  { %1669 = vmatprep.subr.bf16.mxu0 %v5959_v8  ;;  %1751 = vmatprep.subr.bf16.mxu1 %v5961_v9  ;;  %v232_v7 = vld [vmem:[%s9799_s1 + $0x620] sm:$0xff]  ;;  %v229_v8 = vld [vmem:[%s9799_s1 + $0x608] sm:$0xff] }
  0x44   :  { %v233_v9 = vld [vmem:[%s9799_s1 + $0x628] sm:$0xff]  ;;  %v6023_v13 = vcombine.high %v228_v6, %v232_v7  ;;  %v6022_v19 = vcombine.low %v228_v6, %v232_v7 }
  0x45   :  { %1661 = vmatmul.mubr.bf16.vlgmr.msra.gmra.mrb[0].mxu0 %v7566_v12  ;;  %1743 = vmatmul.mubr.bf16.vlgmr.msra.gmra.mrb[0].mxu1 %v7566_v12  ;;  %v6025_v14 = vcombine.high %v229_v8, %v233_v9  ;;  %v6024_v20 = vcombine.low %v229_v8, %v233_v9 }
  0x46   :  { %1670 = vmatpush1.bf16.msra.mxu0 %v5958_v16  ;;  %1752 = vmatpush1.bf16.msra.mxu1 %v5960_v17  ;;  %v236_v16 = vld [vmem:[%s9799_s1 + $0x640] sm:$0xff] }
  0x47   :  { %1671 = vmatprep.subr.bf16.mxu0 %v5967_v53  ;;  %1753 = vmatprep.subr.bf16.mxu1 %v5969_v18  ;;  %v240_v17 = vld [vmem:[%s9799_s1 + $0x660] sm:$0xff]  ;;  %v237_v53 = vld [vmem:[%s9799_s1 + $0x648] sm:$0xff] }
  0x48   :  { %1701 = vmatprep.mubr.bf16.mxu0 %v7587_v21  ;;  %1783 = vmatprep.mubr.bf16.mxu1 %v7587_v21  ;;  %v241_v18 = vld [vmem:[%s9799_s1 + $0x668] sm:$0xff]  ;;  %v6031_v22 = vcombine.high %v236_v16, %v240_v17  ;;  %v6030_v28 = vcombine.low %v236_v16, %v240_v17 }
  0x49   :  { %v6033_v23 = vcombine.high %v237_v53, %v241_v18  ;;  %v6032_v29 = vcombine.low %v237_v53, %v241_v18 }
  0x4a   :  { %1672 = vmatpush1.bf16.msra.mxu0 %v5966_v24  ;;  %1754 = vmatpush1.bf16.msra.mxu1 %v5968_v25  ;;  %v244_v24 = vld [vmem:[%s9799_s1 + $0x680] sm:$0xff] }
  0x4b   :  { %1673 = vmatprep.subr.bf16.mxu0 %v5975_v26  ;;  %1755 = vmatprep.subr.bf16.mxu1 %v5977_v27  ;;  %v248_v25 = vld [vmem:[%s9799_s1 + $0x6a0] sm:$0xff]  ;;  %v245_v26 = vld [vmem:[%s9799_s1 + $0x688] sm:$0xff] }
  0x4c   :  { %v249_v27 = vld [vmem:[%s9799_s1 + $0x6a8] sm:$0xff]  ;;  %v6039_v30 = vcombine.high %v244_v24, %v248_v25  ;;  %v6038_v36 = vcombine.low %v244_v24, %v248_v25  ;;  %v51_v24 = vld [vmem:[%s9799_s1 + $0x78] sm:$0xff] }
  0x4d   :  { %v6041_v31 = vcombine.high %v245_v26, %v249_v27  ;;  %v6040_v37 = vcombine.low %v245_v26, %v249_v27 }
  0x4e   :  { %1674 = vmatpush1.bf16.msra.mxu0 %v5974_v32  ;;  %1756 = vmatpush1.bf16.msra.mxu1 %v5976_v33  ;;  %v252_v32 = vld [vmem:[%s9799_s1 + $0x6c0] sm:$0xff] }
  0x4f   :  { %1675 = vmatprep.subr.bf16.mxu0 %v5983_v34  ;;  %1757 = vmatprep.subr.bf16.mxu1 %v5985_v35  ;;  %v256_v33 = vld [vmem:[%s9799_s1 + $0x6e0] sm:$0xff]  ;;  %v253_v34 = vld [vmem:[%s9799_s1 + $0x6c8] sm:$0xff] }
  0x50   :  { %v257_v35 = vld [vmem:[%s9799_s1 + $0x6e8] sm:$0xff]  ;;  %v6047_v38 = vcombine.high %v252_v32, %v256_v33  ;;  %v6046_v44 = vcombine.low %v252_v32, %v256_v33 }
  0x51   :  { %v6049_v39 = vcombine.high %v253_v34, %v257_v35  ;;  %v6048_v45 = vcombine.low %v253_v34, %v257_v35  ;;  %v62_v35 = vld [vmem:[%s9799_s1 + $0xd0] sm:$0xff] }
  0x52   :  { %1676 = vmatpush1.bf16.msra.mxu0 %v5982_v40  ;;  %1758 = vmatpush1.bf16.msra.mxu1 %v5984_v41  ;;  %v260_v40 = vld [vmem:[%s9799_s1 + $0x700] sm:$0xff] }
  0x53   :  { %1677 = vmatprep.subr.bf16.mxu0 %v5991_v42  ;;  %1759 = vmatprep.subr.bf16.mxu1 %v5993_v43  ;;  %v264_v41 = vld [vmem:[%s9799_s1 + $0x720] sm:$0xff]  ;;  %v261_v42 = vld [vmem:[%s9799_s1 + $0x708] sm:$0xff] }
  0x54   :  { %v265_v43 = vld [vmem:[%s9799_s1 + $0x728] sm:$0xff]  ;;  %v6055_v46 = vcombine.high %v260_v40, %v264_v41  ;;  %v6054_v52 = vcombine.low %v260_v40, %v264_v41  ;;  %v70_v41 = vld [vmem:[%s9799_s1 + $0x110] sm:$0xff] }
  0x55   :  { %v6057_v47 = vcombine.high %v261_v42, %v265_v43  ;;  %v6056_v54 = vcombine.low %v261_v42, %v265_v43  ;;  %v74_v42 = vld [vmem:[%s9799_s1 + $0x130] sm:$0xff] }
  0x56   :  { %1678 = vmatpush1.bf16.msra.mxu0 %v5990_v48  ;;  %1760 = vmatpush1.bf16.msra.mxu1 %v5992_v49  ;;  %v268_v48 = vld [vmem:[%s9799_s1 + $0x740] sm:$0xff] }
  0x57   :  { %1679 = vmatprep.subr.bf16.mxu0 %v5999_v50  ;;  %1761 = vmatprep.subr.bf16.mxu1 %v6001_v51  ;;  %v272_v49 = vld [vmem:[%s9799_s1 + $0x760] sm:$0xff]  ;;  %v269_v50 = vld [vmem:[%s9799_s1 + $0x748] sm:$0xff] }
  0x58   :  { %v273_v51 = vld [vmem:[%s9799_s1 + $0x768] sm:$0xff]  ;;  %v6063_v55 = vcombine.high %v268_v48, %v272_v49  ;;  %v6062_v62 = vcombine.low %v268_v48, %v272_v49  ;;  %v78_v48 = vld [vmem:[%s9799_s1 + $0x150] sm:$0xff] }
  0x59   :  { %v6065_v56 = vcombine.high %v269_v50, %v273_v51  ;;  %v6064_v63 = vcombine.low %v269_v50, %v273_v51  ;;  %v82_v49 = vld [vmem:[%s9799_s1 + $0x170] sm:$0xff]  ;;  %v5867_v51 = vcombine.high %v70_v41, %v74_v42 }
  0x5a   :  { %1680 = vmatpush1.bf16.msra.mxu0 %v5998_v58  ;;  %1762 = vmatpush1.bf16.msra.mxu1 %v6000_v59  ;;  %v276_v58 = vld [vmem:[%s9799_s1 + $0x780] sm:$0xff] }
  0x5b   :  { %1681 = vmatprep.subr.bf16.mxu0 %v6007_v60  ;;  %1763 = vmatprep.subr.bf16.mxu1 %v6009_v61  ;;  %v280_v59 = vld [vmem:[%s9799_s1 + $0x7a0] sm:$0xff]  ;;  %v277_v60 = vld [vmem:[%s9799_s1 + $0x788] sm:$0xff] }
  0x5c   :  { %v281_v61 = vld [vmem:[%s9799_s1 + $0x7a8] sm:$0xff]  ;;  %v6071_v0 = vcombine.high %v276_v58, %v280_v59  ;;  %v6070_v6 = vcombine.low %v276_v58, %v280_v59  ;;  %v86_v58 = vld [vmem:[%s9799_s1 + $0x190] sm:$0xff] }
  0x5d   :  { %v6073_v1 = vcombine.high %v277_v60, %v281_v61  ;;  %v6072_v7 = vcombine.low %v277_v60, %v281_v61  ;;  %v90_v59 = vld [vmem:[%s9799_s1 + $0x1b0] sm:$0xff]  ;;  %v5875_v61 = vcombine.high %v78_v48, %v82_v49 }
  0x5e   :  { %1682 = vmatpush1.bf16.msra.mxu0 %v6006_v2  ;;  %1764 = vmatpush1.bf16.msra.mxu1 %v6008_v3  ;;  %v284_v2 = vld [vmem:[%s9799_s1 + $0x7c0] sm:$0xff] }
  0x5f   :  { %1683 = vmatprep.subr.bf16.mxu0 %v6015_v4  ;;  %1765 = vmatprep.subr.bf16.mxu1 %v6017_v5  ;;  %v288_v3 = vld [vmem:[%s9799_s1 + $0x7e0] sm:$0xff]  ;;  %v285_v4 = vld [vmem:[%s9799_s1 + $0x7c8] sm:$0xff] }
  0x60   :  { %v289_v5 = vld [vmem:[%s9799_s1 + $0x7e8] sm:$0xff]  ;;  %v6079_v8 = vcombine.high %v284_v2, %v288_v3  ;;  %v6078_v16 = vcombine.low %v284_v2, %v288_v3  ;;  %v94_v2 = vld [vmem:[%s9799_s1 + $0x1d0] sm:$0xff] }
  0x61   :  { %v6081_v9 = vcombine.high %v285_v4, %v289_v5  ;;  %v6080_v17 = vcombine.low %v285_v4, %v289_v5  ;;  %v98_v3 = vld [vmem:[%s9799_s1 + $0x1f0] sm:$0xff]  ;;  %v5883_v5 = vcombine.high %v86_v58, %v90_v59 }
  0x62   :  { %1684 = vmatpush1.bf16.msra.mxu0 %v6014_v10  ;;  %1766 = vmatpush1.bf16.msra.mxu1 %v6016_v11  ;;  %v38_v10 = vld [vmem:[%s9799_s1 + $0x10] sm:$0xff] }
  0x63   :  { %1685 = vmatprep.subr.bf16.mxu0 %v6023_v13  ;;  %1767 = vmatprep.subr.bf16.mxu1 %v6025_v14  ;;  %v42_v11 = vld [vmem:[%s9799_s1 + $0x30] sm:$0xff]  ;;  %v39_v13 = vld [vmem:[%s9799_s1 + $0x18] sm:$0xff] }
  0x64   :  { %v43_v14 = vld [vmem:[%s9799_s1 + $0x38] sm:$0xff]  ;;  %v5835_v53 = vcombine.high %v38_v10, %v42_v11  ;;  %v5834_v25 = vcombine.low %v38_v10, %v42_v11  ;;  %v102_v10 = vld [vmem:[%s9799_s1 + $0x210] sm:$0xff] }
  0x65   :  { %v5837_v18 = vcombine.high %v39_v13, %v43_v14  ;;  %v5836_v26 = vcombine.low %v39_v13, %v43_v14  ;;  %v106_v11 = vld [vmem:[%s9799_s1 + $0x230] sm:$0xff]  ;;  %v5891_v14 = vcombine.high %v94_v2, %v98_v3 }
  0x66   :  { %1686 = vmatpush1.bf16.msra.mxu0 %v6022_v19  ;;  %1768 = vmatpush1.bf16.msra.mxu1 %v6024_v20  ;;  %v46_v19 = vld [vmem:[%s9799_s1 + $0x50] sm:$0xff] }
  0x67   :  { %1687 = vmatprep.subr.bf16.mxu0 %v6031_v22  ;;  %1769 = vmatprep.subr.bf16.mxu1 %v6033_v23  ;;  %v50_v20 = vld [vmem:[%s9799_s1 + $0x70] sm:$0xff]  ;;  %v7775_v22 = vcombine.low %v7577_v15, %v7577_v15  ;;  %v47_v23 = vld [vmem:[%s9799_s1 + $0x58] sm:$0xff] }
  0x68   :  { %v5843_v27 = vcombine.high %v46_v19, %v50_v20  ;;  %v54_v15 = vld [vmem:[%s9799_s1 + $0x90] sm:$0xff]  ;;  %v5842_v32 = vcombine.low %v46_v19, %v50_v20  ;;  %v5844_v33 = vcombine.low %v47_v23, %v51_v24 }
  0x69   :  { %v110_v19 = vld [vmem:[%s9799_s1 + $0x250] sm:$0xff] }
  0x6a   :  { %1688 = vmatpush1.bf16.msra.mxu0 %v6030_v28  ;;  %1770 = vmatpush1.bf16.msra.mxu1 %v6032_v29  ;;  %v5845_v28 = vcombine.high %v47_v23, %v51_v24  ;;  %v58_v29 = vld [vmem:[%s9799_s1 + $0xb0] sm:$0xff]  ;;  %v5899_v24 = vcombine.high %v102_v10, %v106_v11 }
  0x6b   :  { %1689 = vmatprep.subr.bf16.mxu0 %v6039_v30  ;;  %1771 = vmatprep.subr.bf16.mxu1 %v6041_v31  ;;  %v55_v30 = vld [vmem:[%s9799_s1 + $0x98] sm:$0xff]  ;;  %v5851_v34 = vcombine.high %v54_v15, %v58_v29  ;;  %v5850_v40 = vcombine.low %v54_v15, %v58_v29  ;;  %v114_v20 = vld [vmem:[%s9799_s1 + $0x270] sm:$0xff] }
  0x6c   :  { %v59_v31 = vld [vmem:[%s9799_s1 + $0xb8] sm:$0xff]  ;;  %v118_v15 = vld [vmem:[%s9799_s1 + $0x290] sm:$0xff] }
  0x6d   :  { %v5852_v43 = vcombine.low %v55_v30, %v59_v31  ;;  %v122_v29 = vld [vmem:[%s9799_s1 + $0x2b0] sm:$0xff] }
  0x6e   :  { %1690 = vmatpush1.bf16.msra.mxu0 %v6038_v36  ;;  %1772 = vmatpush1.bf16.msra.mxu1 %v6040_v37  ;;  %v5853_v36 = vcombine.high %v55_v30, %v59_v31  ;;  %v66_v37 = vld [vmem:[%s9799_s1 + $0xf0] sm:$0xff]  ;;  %v5907_v31 = vcombine.high %v110_v19, %v114_v20 }
  0x6f   :  { %1691 = vmatprep.subr.bf16.mxu0 %v6047_v38  ;;  %1773 = vmatprep.subr.bf16.mxu1 %v6049_v39  ;;  %v63_v38 = vld [vmem:[%s9799_s1 + $0xd8] sm:$0xff] }
  0x70   :  { %v67_v39 = vld [vmem:[%s9799_s1 + $0xf8] sm:$0xff] }
  0x71   :  { %v5860_v50 = vcombine.low %v63_v38, %v67_v39 }
  0x72   :  { %1692 = vmatpush1.bf16.msra.mxu0 %v6046_v44  ;;  %1774 = vmatpush1.bf16.msra.mxu1 %v6048_v45  ;;  %v5859_v44 = vcombine.high %v62_v35, %v66_v37  ;;  %v71_v45 = vld [vmem:[%s9799_s1 + $0x118] sm:$0xff] }
  0x73   :  { %1693 = vmatprep.subr.bf16.mxu0 %v6055_v46  ;;  %1775 = vmatprep.subr.bf16.mxu1 %v6057_v47  ;;  %v5861_v46 = vcombine.high %v63_v38, %v67_v39  ;;  %v5858_v47 = vcombine.low %v62_v35, %v66_v37  ;;  %v5906_v35 = vcombine.low %v110_v19, %v114_v20  ;;  %v130_v37 = vld [vmem:[%s9799_s1 + $0x2f0] sm:$0xff]  ;;  %v167_v19 = vld [vmem:[%s9799_s1 + $0x418] sm:$0xff] }
  0x74   :  { %v5915_v39 = vcombine.high %v118_v15, %v122_v29  ;;  %v171_v20 = vld [vmem:[%s9799_s1 + $0x438] sm:$0xff] }
  0x76   :  { %1694 = vmatpush1.bf16.msra.mxu0 %v6054_v52  ;;  %1776 = vmatpush1.bf16.msra.mxu1 %v6056_v54  ;;  %v79_v52 = vld [vmem:[%s9799_s1 + $0x158] sm:$0xff] }
  0x77   :  { %1695 = vmatprep.subr.bf16.mxu0 %v6063_v55  ;;  %1777 = vmatprep.subr.bf16.mxu1 %v6065_v56  ;;  %v83_v54 = vld [vmem:[%s9799_s1 + $0x178] sm:$0xff]  ;;  %v5866_v56 = vcombine.low %v70_v41, %v74_v42 }
  0x78   :  { %v5876_v4 = vcombine.low %v79_v52, %v83_v54  ;;  %v131_v41 = vld [vmem:[%s9799_s1 + $0x2f8] sm:$0xff] }
  0x7a   :  { %1696 = vmatpush1.bf16.msra.mxu0 %v6062_v62  ;;  %1778 = vmatpush1.bf16.msra.mxu1 %v6064_v63  ;;  %v87_v62 = vld [vmem:[%s9799_s1 + $0x198] sm:$0xff] }
  0x7b   :  { %1697 = vmatprep.subr.bf16.mxu0 %v6071_v0  ;;  %1779 = vmatprep.subr.bf16.mxu1 %v6073_v1  ;;  %v91_v63 = vld [vmem:[%s9799_s1 + $0x1b8] sm:$0xff]  ;;  %v5877_v0 = vcombine.high %v79_v52, %v83_v54  ;;  %v5874_v1 = vcombine.low %v78_v48, %v82_v49  ;;  %v146_v52 = vld [vmem:[%s9799_s1 + $0x370] sm:$0xff] }
  0x7c   :  { %v5884_v13 = vcombine.low %v87_v62, %v91_v63  ;;  %v139_v48 = vld [vmem:[%s9799_s1 + $0x338] sm:$0xff] }
  0x7e   :  { %1698 = vmatpush1.bf16.msra.mxu0 %v6070_v6  ;;  %1780 = vmatpush1.bf16.msra.mxu1 %v6072_v7  ;;  %v95_v6 = vld [vmem:[%s9799_s1 + $0x1d8] sm:$0xff] }
  0x7f   :  { %1699 = vmatprep.subr.bf16.mxu0 %v6079_v8  ;;  %1781 = vmatprep.subr.bf16.mxu1 %v6081_v9  ;;  %v99_v7 = vld [vmem:[%s9799_s1 + $0x1f8] sm:$0xff]  ;;  %v5885_v8 = vcombine.high %v87_v62, %v91_v63  ;;  %v5882_v9 = vcombine.low %v86_v58, %v90_v59  ;;  %v154_v62 = vld [vmem:[%s9799_s1 + $0x3b0] sm:$0xff] }
  0x80   :  { %v5892_v23 = vcombine.low %v95_v6, %v99_v7  ;;  %v147_v58 = vld [vmem:[%s9799_s1 + $0x378] sm:$0xff] }
  0x82   :  { %1700 = vmatpush1.bf16.msra.mxu0 %v6078_v16  ;;  %1782 = vmatpush1.bf16.msra.mxu1 %v6080_v17  ;;  %v103_v16 = vld [vmem:[%s9799_s1 + $0x218] sm:$0xff] }
  0x83   :  { %1792 = vmatprep.subr.bf16.mxu0 %v5835_v53  ;;  %1874 = vmatprep.subr.bf16.mxu1 %v5837_v18  ;;  %v107_v17 = vld [vmem:[%s9799_s1 + $0x238] sm:$0xff]  ;;  %v5893_v53 = vcombine.high %v95_v6, %v99_v7  ;;  %v5890_v18 = vcombine.low %v94_v2, %v98_v3  ;;  %v162_v6 = vld [vmem:[%s9799_s1 + $0x3f0] sm:$0xff] }
  0x84   :  { %v5900_v30 = vcombine.low %v103_v16, %v107_v17  ;;  %v155_v2 = vld [vmem:[%s9799_s1 + $0x3b8] sm:$0xff] }
  0x85   :  { %1702 = vmatmul.mubr.bf16.vlgmr.msra.gmra.mrb[0].mxu0 %v7775_v22  ;;  %1784 = vmatmul.mubr.bf16.vlgmr.msra.gmra.mrb[0].mxu1 %v7775_v22 }
  0x86   :  { %1793 = vmatpush1.bf16.msra.mxu0 %v5834_v25  ;;  %1875 = vmatpush1.bf16.msra.mxu1 %v5836_v26  ;;  %v111_v25 = vld [vmem:[%s9799_s1 + $0x258] sm:$0xff] }
  0x87   :  { %1794 = vmatprep.subr.bf16.mxu0 %v5843_v27  ;;  %1876 = vmatprep.subr.bf16.mxu1 %v5845_v28  ;;  %v115_v26 = vld [vmem:[%s9799_s1 + $0x278] sm:$0xff]  ;;  %v5901_v27 = vcombine.high %v103_v16, %v107_v17  ;;  %v5898_v28 = vcombine.low %v102_v10, %v106_v11 }
  0x88   :  { %1824 = vmatprep.mubr.bf16.mxu0 %v7440_v57  ;;  %1906 = vmatprep.mubr.bf16.mxu1 %v7440_v57  ;;  %v75_v57 = vld [vmem:[%s9799_s1 + $0x138] sm:$0xff]  ;;  %v5908_v38 = vcombine.low %v111_v25, %v115_v26 }
  0x89   :  { %v5869_v55 = vcombine.high %v71_v45, %v75_v57  ;;  %v5868_v60 = vcombine.low %v71_v45, %v75_v57  ;;  %v138_v45 = vld [vmem:[%s9799_s1 + $0x330] sm:$0xff]  ;;  %v163_v10 = vld [vmem:[%s9799_s1 + $0x3f8] sm:$0xff] }
  0x8a   :  { %1795 = vmatpush1.bf16.msra.mxu0 %v5842_v32  ;;  %1877 = vmatpush1.bf16.msra.mxu1 %v5844_v33  ;;  %v119_v32 = vld [vmem:[%s9799_s1 + $0x298] sm:$0xff] }
  0x8b   :  { %1796 = vmatprep.subr.bf16.mxu0 %v5851_v34  ;;  %1878 = vmatprep.subr.bf16.mxu1 %v5853_v36  ;;  %v123_v33 = vld [vmem:[%s9799_s1 + $0x2b8] sm:$0xff]  ;;  %v5909_v34 = vcombine.high %v111_v25, %v115_v26  ;;  %v126_v36 = vld [vmem:[%s9799_s1 + $0x2d0] sm:$0xff]  ;;  %v5965_v26 = vcombine.high %v167_v19, %v171_v20 }
  0x8c   :  { %v5917_v42 = vcombine.high %v119_v32, %v123_v33  ;;  %v5916_v57 = vcombine.low %v119_v32, %v123_v33 }
  0x8e   :  { %1797 = vmatpush1.bf16.msra.mxu0 %v5850_v40  ;;  %1879 = vmatpush1.bf16.msra.mxu1 %v5852_v43  ;;  %v127_v40 = vld [vmem:[%s9799_s1 + $0x2d8] sm:$0xff]  ;;  %v5914_v43 = vcombine.low %v118_v15, %v122_v29 }
  0x8f   :  { %1798 = vmatprep.subr.bf16.mxu0 %v5859_v44  ;;  %1880 = vmatprep.subr.bf16.mxu1 %v5861_v46  ;;  %v134_v44 = vld [vmem:[%s9799_s1 + $0x310] sm:$0xff]  ;;  %v5923_v46 = vcombine.high %v126_v36, %v130_v37  ;;  %v5925_v49 = vcombine.high %v127_v40, %v131_v41  ;;  %v5924_v54 = vcombine.low %v127_v40, %v131_v41  ;;  %v175_v15 = vld [vmem:[%s9799_s1 + $0x458] sm:$0xff] }
  0x90   :  { %v179_v29 = vld [vmem:[%s9799_s1 + $0x478] sm:$0xff] }
  0x91   :  { %v5973_v33 = vcombine.high %v175_v15, %v179_v29 }
  0x92   :  { %1799 = vmatpush1.bf16.msra.mxu0 %v5858_v47  ;;  %1881 = vmatpush1.bf16.msra.mxu1 %v5860_v50  ;;  %v135_v47 = vld [vmem:[%s9799_s1 + $0x318] sm:$0xff]  ;;  %v5922_v50 = vcombine.low %v126_v36, %v130_v37 }
  0x93   :  { %1800 = vmatprep.subr.bf16.mxu0 %v5867_v51  ;;  %1882 = vmatprep.subr.bf16.mxu1 %v5869_v55  ;;  %v142_v51 = vld [vmem:[%s9799_s1 + $0x350] sm:$0xff]  ;;  %v5931_v55 = vcombine.high %v134_v44, %v138_v45  ;;  %v5933_v59 = vcombine.high %v135_v47, %v139_v48  ;;  %v5932_v63 = vcombine.low %v135_v47, %v139_v48  ;;  %v183_v36 = vld [vmem:[%s9799_s1 + $0x498] sm:$0xff] }
  0x94   :  { %v187_v37 = vld [vmem:[%s9799_s1 + $0x4b8] sm:$0xff]  ;;  %v198_v48 = vld [vmem:[%s9799_s1 + $0x510] sm:$0xff] }
  0x95   :  { %v5981_v41 = vcombine.high %v183_v36, %v187_v37 }
  0x96   :  { %1801 = vmatpush1.bf16.msra.mxu0 %v5866_v56  ;;  %1883 = vmatpush1.bf16.msra.mxu1 %v5868_v60  ;;  %v143_v56 = vld [vmem:[%s9799_s1 + $0x358] sm:$0xff]  ;;  %v5930_v60 = vcombine.low %v134_v44, %v138_v45 }
  0x97   :  { %1802 = vmatprep.subr.bf16.mxu0 %v5875_v61  ;;  %1884 = vmatprep.subr.bf16.mxu1 %v5877_v0  ;;  %v150_v61 = vld [vmem:[%s9799_s1 + $0x390] sm:$0xff]  ;;  %v5939_v0 = vcombine.high %v142_v51, %v146_v52  ;;  %v5941_v3 = vcombine.high %v143_v56, %v147_v58  ;;  %v5940_v7 = vcombine.low %v143_v56, %v147_v58  ;;  %v195_v44 = vld [vmem:[%s9799_s1 + $0x4f8] sm:$0xff] }
  0x98   :  { %v206_v56 = vld [vmem:[%s9799_s1 + $0x550] sm:$0xff] }
  0x99   :  { %v210_v58 = vld [vmem:[%s9799_s1 + $0x570] sm:$0xff] }
  0x9a   :  { %1803 = vmatpush1.bf16.msra.mxu0 %v5874_v1  ;;  %1885 = vmatpush1.bf16.msra.mxu1 %v5876_v4  ;;  %v151_v1 = vld [vmem:[%s9799_s1 + $0x398] sm:$0xff]  ;;  %v5938_v4 = vcombine.low %v142_v51, %v146_v52 }
  0x9b   :  { %1804 = vmatprep.subr.bf16.mxu0 %v5883_v5  ;;  %1886 = vmatprep.subr.bf16.mxu1 %v5885_v8  ;;  %v158_v5 = vld [vmem:[%s9799_s1 + $0x3d0] sm:$0xff]  ;;  %v5947_v8 = vcombine.high %v150_v61, %v154_v62  ;;  %v5949_v11 = vcombine.high %v151_v1, %v155_v2 }
  0x9c   :  { %v5955_v16 = vcombine.high %v158_v5, %v162_v6 }
  0x9e   :  { %1805 = vmatpush1.bf16.msra.mxu0 %v5882_v9  ;;  %1887 = vmatpush1.bf16.msra.mxu1 %v5884_v13  ;;  %v159_v9 = vld [vmem:[%s9799_s1 + $0x3d8] sm:$0xff]  ;;  %v5946_v13 = vcombine.low %v150_v61, %v154_v62 }
  0x9f   :  { %1806 = vmatprep.subr.bf16.mxu0 %v5891_v14  ;;  %1888 = vmatprep.subr.bf16.mxu1 %v5893_v53  ;;  %v5948_v14 = vcombine.low %v151_v1, %v155_v2  ;;  %v5957_v17 = vcombine.high %v159_v9, %v163_v10  ;;  %v166_v53 = vld [vmem:[%s9799_s1 + $0x410] sm:$0xff] }
  0xa0   :  { %v214_v1 = vld [vmem:[%s9799_s1 + $0x590] sm:$0xff] }
  0xa1   :  { %v218_v2 = vld [vmem:[%s9799_s1 + $0x5b0] sm:$0xff] }
  0xa2   :  { %1807 = vmatpush1.bf16.msra.mxu0 %v5890_v18  ;;  %1889 = vmatpush1.bf16.msra.mxu1 %v5892_v23  ;;  %v170_v18 = vld [vmem:[%s9799_s1 + $0x430] sm:$0xff]  ;;  %v5954_v23 = vcombine.low %v158_v5, %v162_v6  ;;  %v6002_v5 = vcombine.low %v206_v56, %v210_v58 }
  0xa3   :  { %1808 = vmatprep.subr.bf16.mxu0 %v5899_v24  ;;  %1890 = vmatprep.subr.bf16.mxu1 %v5901_v27  ;;  %v5956_v24 = vcombine.low %v159_v9, %v163_v10  ;;  %v5963_v25 = vcombine.high %v166_v53, %v170_v18  ;;  %v174_v27 = vld [vmem:[%s9799_s1 + $0x450] sm:$0xff] }
  0xa4   :  { %v222_v9 = vld [vmem:[%s9799_s1 + $0x5d0] sm:$0xff] }
  0xa5   :  { %v226_v10 = vld [vmem:[%s9799_s1 + $0x5f0] sm:$0xff] }
  0xa6   :  { %1809 = vmatpush1.bf16.msra.mxu0 %v5898_v28  ;;  %1891 = vmatpush1.bf16.msra.mxu1 %v5900_v30  ;;  %v178_v28 = vld [vmem:[%s9799_s1 + $0x470] sm:$0xff]  ;;  %v5962_v30 = vcombine.low %v166_v53, %v170_v18 }
  0xa7   :  { %1810 = vmatprep.subr.bf16.mxu0 %v5907_v31  ;;  %1892 = vmatprep.subr.bf16.mxu1 %v5909_v34  ;;  %v5964_v31 = vcombine.low %v167_v19, %v171_v20  ;;  %v5971_v32 = vcombine.high %v174_v27, %v178_v28  ;;  %v182_v34 = vld [vmem:[%s9799_s1 + $0x490] sm:$0xff]  ;;  %v231_v20 = vld [vmem:[%s9799_s1 + $0x618] sm:$0xff] }
  0xa8   :  { %v230_v18 = vld [vmem:[%s9799_s1 + $0x610] sm:$0xff] }
  0xa9   :  { %v234_v19 = vld [vmem:[%s9799_s1 + $0x630] sm:$0xff] }
  0xaa   :  { %1811 = vmatpush1.bf16.msra.mxu0 %v5906_v35  ;;  %1893 = vmatpush1.bf16.msra.mxu1 %v5908_v38  ;;  %v186_v35 = vld [vmem:[%s9799_s1 + $0x4b0] sm:$0xff]  ;;  %v5970_v38 = vcombine.low %v174_v27, %v178_v28 }
  0xab   :  { %1812 = vmatprep.subr.bf16.mxu0 %v5915_v39  ;;  %1894 = vmatprep.subr.bf16.mxu1 %v5917_v42  ;;  %v5972_v39 = vcombine.low %v175_v15, %v179_v29  ;;  %v5979_v40 = vcombine.high %v182_v34, %v186_v35  ;;  %v190_v42 = vld [vmem:[%s9799_s1 + $0x4d0] sm:$0xff]  ;;  %v5978_v45 = vcombine.low %v182_v34, %v186_v35  ;;  %v239_v29 = vld [vmem:[%s9799_s1 + $0x658] sm:$0xff] }
  0xac   :  { %v238_v28 = vld [vmem:[%s9799_s1 + $0x650] sm:$0xff] }
  0xad   :  { %v242_v15 = vld [vmem:[%s9799_s1 + $0x670] sm:$0xff] }
  0xae   :  { %1813 = vmatpush1.bf16.msra.mxu0 %v5914_v43  ;;  %1895 = vmatpush1.bf16.msra.mxu1 %v5916_v57  ;;  %v194_v43 = vld [vmem:[%s9799_s1 + $0x4f0] sm:$0xff]  ;;  %v5980_v57 = vcombine.low %v183_v36, %v187_v37  ;;  %v247_v37 = vld [vmem:[%s9799_s1 + $0x698] sm:$0xff] }
  0xaf   :  { %1814 = vmatprep.subr.bf16.mxu0 %v5923_v46  ;;  %1896 = vmatprep.subr.bf16.mxu1 %v5925_v49  ;;  %v5987_v46 = vcombine.high %v190_v42, %v194_v43  ;;  %v202_v49 = vld [vmem:[%s9799_s1 + $0x530] sm:$0xff]  ;;  %v5986_v51 = vcombine.low %v190_v42, %v194_v43 }
  0xb0   :  { %v5994_v61 = vcombine.low %v198_v48, %v202_v49  ;;  %v246_v35 = vld [vmem:[%s9799_s1 + $0x690] sm:$0xff] }
  0xb1   :  { %v250_v36 = vld [vmem:[%s9799_s1 + $0x6b0] sm:$0xff] }
  0xb2   :  { %1815 = vmatpush1.bf16.msra.mxu0 %v5922_v50  ;;  %1897 = vmatpush1.bf16.msra.mxu1 %v5924_v54  ;;  %v203_v50 = vld [vmem:[%s9799_s1 + $0x538] sm:$0xff]  ;;  %v5995_v54 = vcombine.high %v198_v48, %v202_v49  ;;  %v254_v43 = vld [vmem:[%s9799_s1 + $0x6d0] sm:$0xff] }
  0xb3   :  { %1816 = vmatprep.subr.bf16.mxu0 %v5931_v55  ;;  %1898 = vmatprep.subr.bf16.mxu1 %v5933_v59  ;;  %v207_v59 = vld [vmem:[%s9799_s1 + $0x558] sm:$0xff]  ;;  %v262_v49 = vld [vmem:[%s9799_s1 + $0x710] sm:$0xff] }
  0xb6   :  { %1817 = vmatpush1.bf16.msra.mxu0 %v5930_v60  ;;  %1899 = vmatpush1.bf16.msra.mxu1 %v5932_v63  ;;  %v211_v60 = vld [vmem:[%s9799_s1 + $0x578] sm:$0xff]  ;;  %v6003_v63 = vcombine.high %v206_v56, %v210_v58  ;;  %v270_v58 = vld [vmem:[%s9799_s1 + $0x750] sm:$0xff] }
  0xb7   :  { %1818 = vmatprep.subr.bf16.mxu0 %v5939_v0  ;;  %1900 = vmatprep.subr.bf16.mxu1 %v5941_v3  ;;  %v6005_v0 = vcombine.high %v207_v59, %v211_v60  ;;  %v215_v3 = vld [vmem:[%s9799_s1 + $0x598] sm:$0xff]  ;;  %v6004_v6 = vcombine.low %v207_v59, %v211_v60  ;;  %v274_v59 = vld [vmem:[%s9799_s1 + $0x770] sm:$0xff] }
  0xb8   :  { %v271_v60 = vld [vmem:[%s9799_s1 + $0x758] sm:$0xff] }
  0xba   :  { %1819 = vmatpush1.bf16.msra.mxu0 %v5938_v4  ;;  %1901 = vmatpush1.bf16.msra.mxu1 %v5940_v7  ;;  %v219_v4 = vld [vmem:[%s9799_s1 + $0x5b8] sm:$0xff]  ;;  %v6011_v7 = vcombine.high %v214_v1, %v218_v2 }
  0xbb   :  { %1820 = vmatprep.subr.bf16.mxu0 %v5947_v8  ;;  %1902 = vmatprep.subr.bf16.mxu1 %v5949_v11  ;;  %v6013_v8 = vcombine.high %v215_v3, %v219_v4  ;;  %v223_v11 = vld [vmem:[%s9799_s1 + $0x5d8] sm:$0xff] }
  0xbe   :  { %1821 = vmatpush1.bf16.msra.mxu0 %v5946_v13  ;;  %1903 = vmatpush1.bf16.msra.mxu1 %v5948_v14  ;;  %v227_v13 = vld [vmem:[%s9799_s1 + $0x5f8] sm:$0xff]  ;;  %v6010_v14 = vcombine.low %v214_v1, %v218_v2  ;;  %v278_v2 = vld [vmem:[%s9799_s1 + $0x790] sm:$0xff] }
  0xbf   :  { %1822 = vmatprep.subr.bf16.mxu0 %v5955_v16  ;;  %1904 = vmatprep.subr.bf16.mxu1 %v5957_v17  ;;  %v6012_v16 = vcombine.low %v215_v3, %v219_v4  ;;  %v6019_v17 = vcombine.high %v222_v9, %v226_v10  ;;  %v6021_v53 = vcombine.high %v223_v11, %v227_v13  ;;  %v282_v3 = vld [vmem:[%s9799_s1 + $0x7b0] sm:$0xff]  ;;  %v279_v4 = vld [vmem:[%s9799_s1 + $0x798] sm:$0xff] }
  0xc2   :  { %1823 = vmatpush1.bf16.msra.mxu0 %v5954_v23  ;;  %1905 = vmatpush1.bf16.msra.mxu1 %v5956_v24  ;;  %v235_v23 = vld [vmem:[%s9799_s1 + $0x638] sm:$0xff]  ;;  %v6018_v24 = vcombine.low %v222_v9, %v226_v10  ;;  %v286_v10 = vld [vmem:[%s9799_s1 + $0x7d0] sm:$0xff] }
  0xc3   :  { %1833 = vmatprep.subr.bf16.mxu0 %v5963_v25  ;;  %1915 = vmatprep.subr.bf16.mxu1 %v5965_v26  ;;  %v6020_v25 = vcombine.low %v223_v11, %v227_v13  ;;  %v6027_v26 = vcombine.high %v230_v18, %v234_v19  ;;  %v6029_v27 = vcombine.high %v231_v20, %v235_v23  ;;  %v290_v11 = vld [vmem:[%s9799_s1 + $0x7f0] sm:$0xff]  ;;  %v287_v13 = vld [vmem:[%s9799_s1 + $0x7d8] sm:$0xff] }
  0xc5   :  { %1825 = vmatmul.mubr.bf16.vlgmr.msra.gmra.mrb[4].mxu0 %v7566_v12  ;;  %1907 = vmatmul.mubr.bf16.vlgmr.msra.gmra.mrb[4].mxu1 %v7566_v12  ;;  %v191_v12 = vld [vmem:[%s9799_s1 + $0x4d8] sm:$0xff] }
  0xc6   :  { %1834 = vmatpush1.bf16.msra.mxu0 %v5962_v30  ;;  %1916 = vmatpush1.bf16.msra.mxu1 %v5964_v31  ;;  %v5989_v47 = vcombine.high %v191_v12, %v195_v44  ;;  %v5988_v52 = vcombine.low %v191_v12, %v195_v44  ;;  %v243_v30 = vld [vmem:[%s9799_s1 + $0x678] sm:$0xff]  ;;  %v6026_v31 = vcombine.low %v230_v18, %v234_v19  ;;  %v258_v12 = vld [vmem:[%s9799_s1 + $0x6f0] sm:$0xff] }
  0xc7   :  { %1835 = vmatprep.subr.bf16.mxu0 %v5971_v32  ;;  %1917 = vmatprep.subr.bf16.mxu1 %v5973_v33  ;;  %v6028_v32 = vcombine.low %v231_v20, %v235_v23  ;;  %v6035_v33 = vcombine.high %v238_v28, %v242_v15  ;;  %v6037_v34 = vcombine.high %v239_v29, %v243_v30  ;;  %v255_v44 = vld [vmem:[%s9799_s1 + $0x6d8] sm:$0xff]  ;;  %v6674_v23 = vld [vmem:[%s9801_s3 + $0x4] ss:$8 sps:$4 sm:$0xff]  }
  0xc8   :  { %1865 = vmatprep.mubr.bf16.mxu0 %v7587_v21  ;;  %1947 = vmatprep.mubr.bf16.mxu1 %v7587_v21  ;;  %v199_v21 = vld [vmem:[%s9799_s1 + $0x518] sm:$0xff]  ;;  %v6082_v19 = vcombine.low %v286_v10, %v290_v11 }
  0xc9   :  { %v5997_v55 = vcombine.high %v199_v21, %v203_v50  ;;  %v5996_v62 = vcombine.low %v199_v21, %v203_v50  ;;  %v266_v21 = vld [vmem:[%s9799_s1 + $0x730] sm:$0xff]  ;;  %v263_v50 = vld [vmem:[%s9799_s1 + $0x718] sm:$0xff] }
  0xca   :  { %1836 = vmatpush1.bf16.msra.mxu0 %v5970_v38  ;;  %1918 = vmatpush1.bf16.msra.mxu1 %v5972_v39  ;;  %v251_v38 = vld [vmem:[%s9799_s1 + $0x6b8] sm:$0xff]  ;;  %v6034_v39 = vcombine.low %v238_v28, %v242_v15  ;;  %v6678_v28 = vld [vmem:[%s9801_s3 + $0x20] ss:$8 sps:$4 sm:$0xff]  }
  0xcb   :  { %1837 = vmatprep.subr.bf16.mxu0 %v5979_v40  ;;  %1919 = vmatprep.subr.bf16.mxu1 %v5981_v41  ;;  %v6036_v40 = vcombine.low %v239_v29, %v243_v30  ;;  %v6043_v41 = vcombine.high %v246_v35, %v250_v36  ;;  %v6045_v42 = vcombine.high %v247_v37, %v251_v38  ;;  %v6681_v15 = vld [vmem:[%s9801_s3 + $0x30] ss:$8 sps:$4 sm:$0xff]   ;;  %v6686_v29 = vld [vmem:[%s9801_s3 + $0x44] ss:$8 sps:$4 sm:$0xff]   ;;  %v6684_v30 = vld [vmem:[%s9801_s3 + $0x40] ss:$8 sps:$4 sm:$0xff]  }
  0xce   :  { %1838 = vmatpush1.bf16.msra.mxu0 %v5978_v45  ;;  %1920 = vmatpush1.bf16.msra.mxu1 %v5980_v57  ;;  %v259_v45 = vld [vmem:[%s9799_s1 + $0x6f8] sm:$0xff]  ;;  %v6042_v57 = vcombine.low %v246_v35, %v250_v36 }
  0xcf   :  { %1839 = vmatprep.subr.bf16.mxu0 %v5987_v46  ;;  %1921 = vmatprep.subr.bf16.mxu1 %v5989_v47  ;;  %v6044_v46 = vcombine.low %v247_v37, %v251_v38  ;;  %v6051_v47 = vcombine.high %v254_v43, %v258_v12  ;;  %v6053_v48 = vcombine.high %v255_v44, %v259_v45  ;;  %v6695_v35 = vld [vmem:[%s9801_s3 + $0x74] ss:$8 sps:$4 sm:$0xff]   ;;  %v6693_v36 = vld [vmem:[%s9801_s3 + $0x70] ss:$8 sps:$4 sm:$0xff]   ;;  %v6698_v37 = vld [vmem:[%s9801_s3 + $0x84] ss:$8 sps:$4 sm:$0xff]  }
  0xd0   :  { %v6696_v38 = vld [vmem:[%s9801_s3 + $0x80] ss:$8 sps:$4 sm:$0xff]  }
  0xd2   :  { %1840 = vmatpush1.bf16.msra.mxu0 %v5986_v51  ;;  %1922 = vmatpush1.bf16.msra.mxu1 %v5988_v52  ;;  %v267_v51 = vld [vmem:[%s9799_s1 + $0x738] sm:$0xff]  ;;  %v6050_v52 = vcombine.low %v254_v43, %v258_v12 }
  0xd3   :  { %1841 = vmatprep.subr.bf16.mxu0 %v5995_v54  ;;  %1923 = vmatprep.subr.bf16.mxu1 %v5997_v55  ;;  %v6052_v54 = vcombine.low %v255_v44, %v259_v45  ;;  %v6059_v55 = vcombine.high %v262_v49, %v266_v21  ;;  %v6061_v56 = vcombine.high %v263_v50, %v267_v51  ;;  %v6707_v43 = vld [vmem:[%s9801_s3 + $0xb4] ss:$8 sps:$4 sm:$0xff]   ;;  %v6705_v12 = vld [vmem:[%s9801_s3 + $0xb0] ss:$8 sps:$4 sm:$0xff]   ;;  %v6710_v44 = vld [vmem:[%s9801_s3 + $0xc4] ss:$8 sps:$4 sm:$0xff]  }
  0xd4   :  { %v6708_v45 = vld [vmem:[%s9801_s3 + $0xc0] ss:$8 sps:$4 sm:$0xff]  }
  0xd6   :  { %1842 = vmatpush1.bf16.msra.mxu0 %v5994_v61  ;;  %1924 = vmatpush1.bf16.msra.mxu1 %v5996_v62  ;;  %v275_v61 = vld [vmem:[%s9799_s1 + $0x778] sm:$0xff]  ;;  %v6058_v62 = vcombine.low %v262_v49, %v266_v21 }
  0xd7   :  { %1843 = vmatprep.subr.bf16.mxu0 %v6003_v63  ;;  %1925 = vmatprep.subr.bf16.mxu1 %v6005_v0  ;;  %v6060_v63 = vcombine.low %v263_v50, %v267_v51  ;;  %v6067_v0 = vcombine.high %v270_v58, %v274_v59  ;;  %v6069_v1 = vcombine.high %v271_v60, %v275_v61  ;;  %v6719_v49 = vld [vmem:[%s9801_s3 + $0xf4] ss:$8 sps:$4 sm:$0xff]   ;;  %v6717_v21 = vld [vmem:[%s9801_s3 + $0xf0] ss:$8 sps:$4 sm:$0xff]   ;;  %v6722_v50 = vld [vmem:[%s9801_s3 + $0x104] ss:$8 sps:$4 sm:$0xff]   ;;  %v294_v51 = vlaneseq }
  0xda   :  { %1844 = vmatpush1.bf16.msra.mxu0 %v6002_v5  ;;  %1926 = vmatpush1.bf16.msra.mxu1 %v6004_v6  ;;  %v283_v5 = vld [vmem:[%s9799_s1 + $0x7b8] sm:$0xff]  ;;  %v6066_v6 = vcombine.low %v270_v58, %v274_v59 }
  0xdb   :  { %1845 = vmatprep.subr.bf16.mxu0 %v6011_v7  ;;  %1927 = vmatprep.subr.bf16.mxu1 %v6013_v8  ;;  %v6068_v7 = vcombine.low %v271_v60, %v275_v61  ;;  %v6075_v8 = vcombine.high %v278_v2, %v282_v3  ;;  %v6077_v9 = vcombine.high %v279_v4, %v283_v5 }
  0xde   :  { %1846 = vmatpush1.bf16.msra.mxu0 %v6010_v14  ;;  %1928 = vmatpush1.bf16.msra.mxu1 %v6012_v16  ;;  %v291_v14 = vld [vmem:[%s9799_s1 + $0x7f8] sm:$0xff]  ;;  %v6074_v16 = vcombine.low %v278_v2, %v282_v3 }
  0xdf   :  { %1847 = vmatprep.subr.bf16.mxu0 %v6019_v17  ;;  %1929 = vmatprep.subr.bf16.mxu1 %v6021_v53  ;;  %v6076_v17 = vcombine.low %v279_v4, %v283_v5  ;;  %v6083_v53 = vcombine.high %v286_v10, %v290_v11  ;;  %v6085_v18 = vcombine.high %v287_v13, %v291_v14 }
  0xe0   :  { %v6084_v20 = vcombine.low %v287_v13, %v291_v14  ;;  %v6720_v14 = vld [vmem:[%s9801_s3 + $0x100] ss:$8 sps:$4 sm:$0xff]  }
  0xe2   :  { %1848 = vmatpush1.bf16.msra.mxu0 %v6018_v24  ;;  %1930 = vmatpush1.bf16.msra.mxu1 %v6020_v25  ;;  %v6672_v24 = vld [vmem:[%s9801_s3] ss:$8 sps:$4 sm:$0xff]   ;;  %v6677_v25 = vld [vmem:[%s9801_s3 + $0x14] ss:$8 sps:$4 sm:$0xff]  }
  0xe3   :  { %1849 = vmatprep.subr.bf16.mxu0 %v6027_v26  ;;  %1931 = vmatprep.subr.bf16.mxu1 %v6029_v27  ;;  %v6675_v26 = vld [vmem:[%s9801_s3 + $0x10] ss:$8 sps:$4 sm:$0xff]   ;;  %v6680_v27 = vld [vmem:[%s9801_s3 + $0x24] ss:$8 sps:$4 sm:$0xff]  }
  0xe6   :  { %1850 = vmatpush1.bf16.msra.mxu0 %v6026_v31  ;;  %1932 = vmatpush1.bf16.msra.mxu1 %v6028_v32  ;;  %v6689_v31 = vld [vmem:[%s9801_s3 + $0x54] ss:$8 sps:$4 sm:$0xff]   ;;  %v6687_v32 = vld [vmem:[%s9801_s3 + $0x50] ss:$8 sps:$4 sm:$0xff]  }
  0xe7   :  { %1851 = vmatprep.subr.bf16.mxu0 %v6035_v33  ;;  %1933 = vmatprep.subr.bf16.mxu1 %v6037_v34  ;;  %v6692_v33 = vld [vmem:[%s9801_s3 + $0x64] ss:$8 sps:$4 sm:$0xff]   ;;  %v6690_v34 = vld [vmem:[%s9801_s3 + $0x60] ss:$8 sps:$4 sm:$0xff]  }
  0xea   :  { %1852 = vmatpush1.bf16.msra.mxu0 %v6034_v39  ;;  %1934 = vmatpush1.bf16.msra.mxu1 %v6036_v40  ;;  %v6701_v39 = vld [vmem:[%s9801_s3 + $0x94] ss:$8 sps:$4 sm:$0xff]   ;;  %v6699_v40 = vld [vmem:[%s9801_s3 + $0x90] ss:$8 sps:$4 sm:$0xff]  }
  0xeb   :  { %1853 = vmatprep.subr.bf16.mxu0 %v6043_v41  ;;  %1935 = vmatprep.subr.bf16.mxu1 %v6045_v42  ;;  %v6704_v41 = vld [vmem:[%s9801_s3 + $0xa4] ss:$8 sps:$4 sm:$0xff]   ;;  %v6702_v42 = vld [vmem:[%s9801_s3 + $0xa0] ss:$8 sps:$4 sm:$0xff]  }
  0xee   :  { %1854 = vmatpush1.bf16.msra.mxu0 %v6042_v57  ;;  %1936 = vmatpush1.bf16.msra.mxu1 %v6044_v46  ;;  %v6713_v57 = vld [vmem:[%s9801_s3 + $0xd4] ss:$8 sps:$4 sm:$0xff]   ;;  %v6711_v46 = vld [vmem:[%s9801_s3 + $0xd0] ss:$8 sps:$4 sm:$0xff]  }
  0xef   :  { %1855 = vmatprep.subr.bf16.mxu0 %v6051_v47  ;;  %1937 = vmatprep.subr.bf16.mxu1 %v6053_v48  ;;  %v6716_v47 = vld [vmem:[%s9801_s3 + $0xe4] ss:$8 sps:$4 sm:$0xff]   ;;  %v6714_v48 = vld [vmem:[%s9801_s3 + $0xe0] ss:$8 sps:$4 sm:$0xff]  }
  0xf2   :  { %1856 = vmatpush1.bf16.msra.mxu0 %v6050_v52  ;;  %1938 = vmatpush1.bf16.msra.mxu1 %v6052_v54  ;;  %v8252_v52 = vshrl.u32 %v294_v51, 7  ;;  %v6773_v51 = vld [vmem:[%s9801_s3 + $0x214] ss:$8 sps:$4 sm:$0xff]  }
  0xf3   :  { %1857 = vmatprep.subr.bf16.mxu0 %v6059_v55  ;;  %1939 = vmatprep.subr.bf16.mxu1 %v6061_v56  ;;  %v8260_v55 = vld [vmem:[%s9802_s2] sm:$0xff] }
  0xf4   :  { %v8255_v54 = vsub.s32 0, %v8252_v52  ;;  %v8263_v56 = vsub.s32 1, %v8252_v52  ;;  %v8266_v58 = vsub.s32 3, %v8252_v52 }
  0xf6   :  { %1858 = vmatpush1.bf16.msra.mxu0 %v6058_v62  ;;  %1940 = vmatpush1.bf16.msra.mxu1 %v6060_v63  ;;  %v297_v59 = vrot.slane %v8260_v55, %v8255_v54  ;;  %v301_v60 = vrot.slane %v8260_v55, %v8263_v56  ;;  %v309_v61 = vrot.slane %v8260_v55, %v8266_v58 }
  0xf7   :  { %1859 = vmatprep.subr.bf16.mxu0 %v6067_v0  ;;  %1941 = vmatprep.subr.bf16.mxu1 %v6069_v1 }
  0xfa   :  { %1860 = vmatpush1.bf16.msra.mxu0 %v6066_v6  ;;  %1942 = vmatpush1.bf16.msra.mxu1 %v6068_v7 }
  0xfb   :  { %1861 = vmatprep.subr.bf16.mxu0 %v6075_v8  ;;  %1943 = vmatprep.subr.bf16.mxu1 %v6077_v9 }
  0xfe   :  { %1862 = vmatpush1.bf16.msra.mxu0 %v6074_v16  ;;  %1944 = vmatpush1.bf16.msra.mxu1 %v6076_v17  ;;  %v6725_v17 = vld [vmem:[%s9801_s3 + $0x114] ss:$8 sps:$4 sm:$0xff]  }
  0xff   :  { %1863 = vmatprep.subr.bf16.mxu0 %v6083_v53  ;;  %1945 = vmatprep.subr.bf16.mxu1 %v6085_v18  ;;  %v6723_v18 = vld [vmem:[%s9801_s3 + $0x110] ss:$8 sps:$4 sm:$0xff]  }
 0x102   :  { %1864 = vmatpush1.bf16.msra.mxu0 %v6082_v19  ;;  %1946 = vmatpush1.bf16.msra.mxu1 %v6084_v20  ;;  %v6728_v19 = vld [vmem:[%s9801_s3 + $0x124] ss:$8 sps:$4 sm:$0xff]   ;;  %v6726_v20 = vld [vmem:[%s9801_s3 + $0x120] ss:$8 sps:$4 sm:$0xff]  }
 0x103   :  { %2752 = vmatprep.subr.bf16.mxu0 %v6674_v23  ;;  %v6731_v23 = vld [vmem:[%s9801_s3 + $0x134] ss:$8 sps:$4 sm:$0xff]  }
 0x105   :  { %1866 = vmatmul.mubr.bf16.vlgmr.msra.gmra.mrb[4].mxu0 %v7775_v22  ;;  %1948 = vmatmul.mubr.bf16.vlgmr.msra.gmra.mrb[4].mxu1 %v7775_v22  ;;  %v6683_v22 = vld [vmem:[%s9801_s3 + $0x34] ss:$8 sps:$4 sm:$0xff]  }
 0x106   :  { %2753 = vmatpush1.bf16.msra.mxu0 %v6672_v24  ;;  %v6729_v24 = vld [vmem:[%s9801_s3 + $0x130] ss:$8 sps:$4 sm:$0xff]  }
 0x107   :  { %2754 = vmatprep.subr.bf16.mxu0 %v6677_v25  ;;  %v6734_v25 = vld [vmem:[%s9801_s3 + $0x144] ss:$8 sps:$4 sm:$0xff]  }
 0x10a   :  { %2755 = vmatpush1.bf16.msra.mxu0 %v6675_v26  ;;  %v6732_v26 = vld [vmem:[%s9801_s3 + $0x140] ss:$8 sps:$4 sm:$0xff]  }
 0x10b   :  { %2756 = vmatprep.subr.bf16.mxu0 %v6680_v27  ;;  %v6737_v27 = vld [vmem:[%s9801_s3 + $0x154] ss:$8 sps:$4 sm:$0xff]  }
 0x10e   :  { %2757 = vmatpush1.bf16.msra.mxu0 %v6678_v28  ;;  %v6735_v28 = vld [vmem:[%s9801_s3 + $0x150] ss:$8 sps:$4 sm:$0xff]  }
 0x10f   :  { %2758 = vmatprep.subr.bf16.mxu0 %v6683_v22  ;;  %v6740_v22 = vld [vmem:[%s9801_s3 + $0x164] ss:$8 sps:$4 sm:$0xff]  }
 0x112   :  { %2759 = vmatpush1.bf16.msra.mxu0 %v6681_v15  ;;  %v6738_v15 = vld [vmem:[%s9801_s3 + $0x160] ss:$8 sps:$4 sm:$0xff]  }
 0x113   :  { %2760 = vmatprep.subr.bf16.mxu0 %v6686_v29  ;;  %v6743_v29 = vld [vmem:[%s9801_s3 + $0x174] ss:$8 sps:$4 sm:$0xff]  }
 0x116   :  { %2761 = vmatpush1.bf16.msra.mxu0 %v6684_v30  ;;  %v6741_v30 = vld [vmem:[%s9801_s3 + $0x170] ss:$8 sps:$4 sm:$0xff]  }
 0x117   :  { %2762 = vmatprep.subr.bf16.mxu0 %v6689_v31  ;;  %v6746_v31 = vld [vmem:[%s9801_s3 + $0x184] ss:$8 sps:$4 sm:$0xff]  }
 0x11a   :  { %2763 = vmatpush1.bf16.msra.mxu0 %v6687_v32  ;;  %v6744_v32 = vld [vmem:[%s9801_s3 + $0x180] ss:$8 sps:$4 sm:$0xff]  }
 0x11b   :  { %2764 = vmatprep.subr.bf16.mxu0 %v6692_v33  ;;  %v6749_v33 = vld [vmem:[%s9801_s3 + $0x194] ss:$8 sps:$4 sm:$0xff]  }
 0x11e   :  { %2765 = vmatpush1.bf16.msra.mxu0 %v6690_v34  ;;  %v6747_v34 = vld [vmem:[%s9801_s3 + $0x190] ss:$8 sps:$4 sm:$0xff]  }
 0x11f   :  { %2766 = vmatprep.subr.bf16.mxu0 %v6695_v35  ;;  %v6752_v35 = vld [vmem:[%s9801_s3 + $0x1a4] ss:$8 sps:$4 sm:$0xff]  }
 0x122   :  { %2767 = vmatpush1.bf16.msra.mxu0 %v6693_v36  ;;  %v8337_v36 = vsub.s32 2, %v8252_v52 }
 0x123   :  { %2768 = vmatprep.subr.bf16.mxu0 %v6698_v37  ;;  %v6750_v37 = vld [vmem:[%s9801_s3 + $0x1a0] ss:$8 sps:$4 sm:$0xff]  }
 0x126   :  { %2769 = vmatpush1.bf16.msra.mxu0 %v6696_v38  ;;  %v6755_v38 = vld [vmem:[%s9801_s3 + $0x1b4] ss:$8 sps:$4 sm:$0xff]  }
 0x127   :  { %2770 = vmatprep.subr.bf16.mxu0 %v6701_v39  ;;  %v305_v39 = vrot.slane %v8260_v55, %v8337_v36 }
 0x12a   :  { %2771 = vmatpush1.bf16.msra.mxu0 %v6699_v40  ;;  %v6753_v40 = vld [vmem:[%s9801_s3 + $0x1b0] ss:$8 sps:$4 sm:$0xff]  }
 0x12b   :  { %2772 = vmatprep.subr.bf16.mxu0 %v6704_v41  ;;  %v6758_v41 = vld [vmem:[%s9801_s3 + $0x1c4] ss:$8 sps:$4 sm:$0xff]  }
 0x12e   :  { %2773 = vmatpush1.bf16.msra.mxu0 %v6702_v42 }
 0x12f   :  { %2774 = vmatprep.subr.bf16.mxu0 %v6707_v43  ;;  %v6756_v43 = vld [vmem:[%s9801_s3 + $0x1c0] ss:$8 sps:$4 sm:$0xff]  }
 0x132   :  { %2775 = vmatpush1.bf16.msra.mxu0 %v6705_v12  ;;  %v6761_v12 = vld [vmem:[%s9801_s3 + $0x1d4] ss:$8 sps:$4 sm:$0xff]  }
 0x133   :  { %2776 = vmatprep.subr.bf16.mxu0 %v6710_v44  ;;  %v6759_v44 = vld [vmem:[%s9801_s3 + $0x1d0] ss:$8 sps:$4 sm:$0xff]  }
 0x136   :  { %2777 = vmatpush1.bf16.msra.mxu0 %v6708_v45  ;;  %v6764_v45 = vld [vmem:[%s9801_s3 + $0x1e4] ss:$8 sps:$4 sm:$0xff]  }
 0x137   :  { %2778 = vmatprep.subr.bf16.mxu0 %v6713_v57  ;;  %v6762_v57 = vld [vmem:[%s9801_s3 + $0x1e0] ss:$8 sps:$4 sm:$0xff]  }
 0x13a   :  { %2779 = vmatpush1.bf16.msra.mxu0 %v6711_v46  ;;  %v6767_v46 = vld [vmem:[%s9801_s3 + $0x1f4] ss:$8 sps:$4 sm:$0xff]  }
 0x13b   :  { %2780 = vmatprep.subr.bf16.mxu0 %v6716_v47  ;;  %v6765_v47 = vld [vmem:[%s9801_s3 + $0x1f0] ss:$8 sps:$4 sm:$0xff]  }
 0x13e   :  { %2781 = vmatpush1.bf16.msra.mxu0 %v6714_v48  ;;  %v6770_v48 = vld [vmem:[%s9801_s3 + $0x204] ss:$8 sps:$4 sm:$0xff]  }
 0x13f   :  { %2782 = vmatprep.subr.bf16.mxu0 %v6719_v49 }
 0x142   :  { %2783 = vmatpush1.bf16.msra.mxu0 %v6717_v21  ;;  %v6768_v21 = vld [vmem:[%s9801_s3 + $0x200] ss:$8 sps:$4 sm:$0xff]  }
 0x143   :  { %2793 = vmatprep.subr.bf16.mxu0 %v6722_v50 }
 0x158   :  { %v1703_v62 = vpop.f32.mrb[0].mxu0  ;;  %v8274_v0 = vpop.f32.mrb[0].mxu1 }
 0x159   :  { %v6602_v63 = vadd.f32 %v1703_v62, %v297_v59  ;;  %v1705_v1 = vpop.f32.mrb[1].mxu0  ;;  %v1787_v3 = vpop.f32.mrb[1].mxu1  ;;  %v6604_v42 = vadd.f32 %v8274_v0, %v305_v39  ;;  %v6771_v59 = vld [vmem:[%s9801_s3 + $0x210] ss:$8 sps:$4 sm:$0xff]   ;;  %v2928_v62 = vld [vmem:[%s9803_s5 + $0x40] sm:$0xff] }
 0x15a   :  { %v6603_v2 = vadd.f32 %v1705_v1, %v301_v60  ;;  %v1707_v4 = vpop.f32.mrb[2].mxu0  ;;  %v6605_v5 = vadd.f32 %v1787_v3, %v309_v61  ;;  %v1789_v6 = vpop.f32.mrb[2].mxu1  ;;  %v2920_v60 = vld [vmem:[%s9803_s5] sm:$0xff] }
 0x15b   :  { %v1708_v7 = vpop.f32.mrb[3].mxu0  ;;  %7248 = vtanh.f32 %v6602_v63  ;;  %v1790_v8 = vpop.f32.mrb[3].mxu1  ;;  %v2924_v61 = vld [vmem:[%s9803_s5 + $0x20] sm:$0xff] }
 0x15c   :  { %7250 = vtanh.f32 %v6603_v2  ;;  %v6776_v63 = vld [vmem:[%s9801_s3 + $0x224] ss:$8 sps:$4 sm:$0xff]   ;;  %v6214_v0 = vcombine.low %v2920_v60, %v2924_v61  ;;  %v6215_v1 = vcombine.high %v2920_v60, %v2924_v61  ;;  %v6774_v6 = vld [vmem:[%s9801_s3 + $0x220] ss:$8 sps:$4 sm:$0xff]   ;;  %v6779_v8 = vld [vmem:[%s9801_s3 + $0x234] ss:$8 sps:$4 sm:$0xff]  }
 0x15d   :  { %7252 = vtanh.f32 %v6605_v5  ;;  %v2932_v2 = vld [vmem:[%s9803_s5 + $0x60] sm:$0xff] }
 0x15e   :  { %7254 = vtanh.f32 %v6604_v42  ;;  %v6223_v3 = vcombine.high %v2928_v62, %v2932_v2  ;;  %v2936_v4 = vld [vmem:[%s9803_s5 + $0x80] sm:$0xff]  ;;  %3730 = vmatprep.subr.bf16.mxu1 %v6215_v1  ;;  %v6222_v7 = vcombine.low %v2928_v62, %v2932_v2  ;;  %v6803_v62 = vld [vmem:[%s9801_s3 + $0x2b4] ss:$8 sps:$4 sm:$0xff]   ;;  %v316_v1 = vsub.s32 5, %v8252_v52 }
 0x15f   :  { %v2940_v5 = vld [vmem:[%s9803_s5 + $0xa0] sm:$0xff]  ;;  %3731 = vmatpush1.bf16.msra.mxu1 %v6214_v0 }
 0x160   :  { %3732 = vmatprep.subr.bf16.mxu1 %v6223_v3  ;;  %v2984_v42 = vld [vmem:[%s9803_s5 + $0x200] sm:$0xff] }
 0x161   :  { %v6798_v60 = vld [vmem:[%s9801_s3 + $0x2a0] ss:$8 sps:$4 sm:$0xff]  }
 0x162   :  { %v3008_v2 = vld [vmem:[%s9803_s5 + $0x2c0] sm:$0xff] }
 0x163   :  { %3733 = vmatpush1.bf16.msra.mxu1 %v6222_v7  ;;  %v3012_v3 = vld [vmem:[%s9803_s5 + $0x2e0] sm:$0xff] }
 0x165   :  { %v7249_v9 = vpop.eup %7248 }
 0x166   :  { %v7251_v10 = vpop.eup %7250  ;;  %v1964_v16 = vpack.c.bf16 %v7249_v9, %v7249_v9  ;;  %v6231_v9 = vcombine.high %v2936_v4, %v2940_v5 }
 0x167   :  { %v7253_v11 = vpop.eup %7252  ;;  %v1965_v13 = vpack.c.bf16 %v7251_v10, %v7251_v10  ;;  %v2944_v10 = vld [vmem:[%s9803_s5 + $0xc0] sm:$0xff] }
 0x168   :  { %v1967_v53 = vpack.c.bf16 %v7253_v11, %v7253_v11  ;;  %v7255_v49 = vpop.eup %7254  ;;  %v2948_v11 = vld [vmem:[%s9803_s5 + $0xe0] sm:$0xff]  ;;  %3734 = vmatprep.subr.bf16.mxu1 %v6231_v9  ;;  %v6303_v9 = vcombine.high %v3008_v2, %v3012_v3 }
 0x169   :  { %2784 = vmatprep.mubr.bf16.mxu0 %v1965_v13  ;;  %v1966_v50 = vpack.c.bf16 %v7255_v49, %v7255_v49  ;;  %v6777_v13 = vld [vmem:[%s9801_s3 + $0x230] ss:$8 sps:$4 sm:$0xff]  }
 0x16a   :  { %2785 = vmatmul.mubr.bf16.vlgmr.msra.gmra.mrb[8].mxu0 %v1964_v16  ;;  %v6782_v16 = vld [vmem:[%s9801_s3 + $0x244] ss:$8 sps:$4 sm:$0xff]  }
 0x16b   :  { %2794 = vmatpush1.bf16.msra.mxu0 %v6720_v14  ;;  %2825 = vmatprep.mubr.bf16.mxu0 %v1967_v53  ;;  %v6230_v14 = vcombine.low %v2936_v4, %v2940_v5  ;;  %v2952_v53 = vld [vmem:[%s9803_s5 + $0x100] sm:$0xff]  ;;  %v324_v4 = vsub.s32 7, %v8252_v52  ;;  %v6801_v5 = vld [vmem:[%s9801_s3 + $0x2b0] ss:$8 sps:$4 sm:$0xff]  }
 0x16c   :  { %2795 = vmatprep.subr.bf16.mxu0 %v6725_v17  ;;  %v6239_v17 = vcombine.high %v2944_v10, %v2948_v11 }
 0x16d   :  { %3735 = vmatpush1.bf16.msra.mxu1 %v6230_v14  ;;  %v325_v14 = vrot.slane %v8260_v55, %v324_v4 }
 0x16e   :  { %3736 = vmatprep.subr.bf16.mxu1 %v6239_v17  ;;  %v6804_v17 = vld [vmem:[%s9801_s3 + $0x2c0] ss:$8 sps:$4 sm:$0xff]  }
 0x16f   :  { %2796 = vmatpush1.bf16.msra.mxu0 %v6723_v18  ;;  %v2956_v18 = vld [vmem:[%s9803_s5 + $0x120] sm:$0xff] }
 0x170   :  { %2797 = vmatprep.subr.bf16.mxu0 %v6728_v19  ;;  %v6780_v19 = vld [vmem:[%s9801_s3 + $0x240] ss:$8 sps:$4 sm:$0xff]  }
 0x173   :  { %2798 = vmatpush1.bf16.msra.mxu0 %v6726_v20  ;;  %v6238_v20 = vcombine.low %v2944_v10, %v2948_v11  ;;  %v317_v10 = vrot.slane %v8260_v55, %v316_v1  ;;  %v3016_v11 = vld [vmem:[%s9803_s5 + $0x300] sm:$0xff] }
 0x174   :  { %2799 = vmatprep.subr.bf16.mxu0 %v6731_v23  ;;  %v6785_v23 = vld [vmem:[%s9801_s3 + $0x254] ss:$8 sps:$4 sm:$0xff]  }
 0x175   :  { %3737 = vmatpush1.bf16.msra.mxu1 %v6238_v20 }
 0x177   :  { %2800 = vmatpush1.bf16.msra.mxu0 %v6729_v24  ;;  %v6247_v24 = vcombine.high %v2952_v53, %v2956_v18 }
 0x178   :  { %2801 = vmatprep.subr.bf16.mxu0 %v6734_v25  ;;  %v2960_v25 = vld [vmem:[%s9803_s5 + $0x140] sm:$0xff] }
 0x179   :  { %3738 = vmatprep.subr.bf16.mxu1 %v6247_v24 }
 0x17b   :  { %2802 = vmatpush1.bf16.msra.mxu0 %v6732_v26  ;;  %v2964_v26 = vld [vmem:[%s9803_s5 + $0x160] sm:$0xff] }
 0x17c   :  { %2803 = vmatprep.subr.bf16.mxu0 %v6737_v27  ;;  %v6783_v27 = vld [vmem:[%s9801_s3 + $0x250] ss:$8 sps:$4 sm:$0xff]  }
 0x17f   :  { %2804 = vmatpush1.bf16.msra.mxu0 %v6735_v28  ;;  %v6246_v28 = vcombine.low %v2952_v53, %v2956_v18  ;;  %v6302_v53 = vcombine.low %v3008_v2, %v3012_v3  ;;  %v6828_v2 = vld [vmem:[%s9801_s3 + $0x340] ss:$8 sps:$4 sm:$0xff]   ;;  %v6833_v3 = vld [vmem:[%s9801_s3 + $0x354] ss:$8 sps:$4 sm:$0xff]  }
 0x180   :  { %2805 = vmatprep.subr.bf16.mxu0 %v6740_v22  ;;  %v6788_v22 = vld [vmem:[%s9801_s3 + $0x264] ss:$8 sps:$4 sm:$0xff]  }
 0x181   :  { %3739 = vmatpush1.bf16.msra.mxu1 %v6246_v28  ;;  %v3024_v28 = vld [vmem:[%s9803_s5 + $0x340] sm:$0xff] }
 0x183   :  { %2806 = vmatpush1.bf16.msra.mxu0 %v6738_v15  ;;  %v6255_v15 = vcombine.high %v2960_v25, %v2964_v26 }
 0x184   :  { %2807 = vmatprep.subr.bf16.mxu0 %v6743_v29  ;;  %v2968_v29 = vld [vmem:[%s9803_s5 + $0x180] sm:$0xff] }
 0x185   :  { %3740 = vmatprep.subr.bf16.mxu1 %v6255_v15 }
 0x187   :  { %2808 = vmatpush1.bf16.msra.mxu0 %v6741_v30  ;;  %v2972_v30 = vld [vmem:[%s9803_s5 + $0x1a0] sm:$0xff] }
 0x188   :  { %2809 = vmatprep.subr.bf16.mxu0 %v6746_v31  ;;  %v6786_v31 = vld [vmem:[%s9801_s3 + $0x260] ss:$8 sps:$4 sm:$0xff]   ;;  %v6262_v39 = vcombine.low %v2968_v29, %v2972_v30 }
 0x18b   :  { %2810 = vmatpush1.bf16.msra.mxu0 %v6744_v32  ;;  %v6254_v32 = vcombine.low %v2960_v25, %v2964_v26 }
 0x18c   :  { %2811 = vmatprep.subr.bf16.mxu0 %v6749_v33  ;;  %v6791_v33 = vld [vmem:[%s9801_s3 + $0x274] ss:$8 sps:$4 sm:$0xff]  }
 0x18d   :  { %3741 = vmatpush1.bf16.msra.mxu1 %v6254_v32  ;;  %v6807_v32 = vld [vmem:[%s9801_s3 + $0x2d0] ss:$8 sps:$4 sm:$0xff]  }
 0x18f   :  { %2812 = vmatpush1.bf16.msra.mxu0 %v6747_v34  ;;  %v6263_v34 = vcombine.high %v2968_v29, %v2972_v30 }
 0x190   :  { %2813 = vmatprep.subr.bf16.mxu0 %v6752_v35  ;;  %v2976_v35 = vld [vmem:[%s9803_s5 + $0x1c0] sm:$0xff] }
 0x191   :  { %3742 = vmatprep.subr.bf16.mxu1 %v6263_v34  ;;  %v6812_v34 = vld [vmem:[%s9801_s3 + $0x2e4] ss:$8 sps:$4 sm:$0xff]  }
 0x192   :  { %3743 = vmatpush1.bf16.msra.mxu1 %v6262_v39  ;;  %v6810_v39 = vld [vmem:[%s9801_s3 + $0x2e0] ss:$8 sps:$4 sm:$0xff]  }
 0x193   :  { %2814 = vmatpush1.bf16.msra.mxu0 %v6750_v37  ;;  %v2980_v37 = vld [vmem:[%s9803_s5 + $0x1e0] sm:$0xff] }
 0x194   :  { %2815 = vmatprep.subr.bf16.mxu0 %v6755_v38  ;;  %v6789_v38 = vld [vmem:[%s9801_s3 + $0x270] ss:$8 sps:$4 sm:$0xff]  }
 0x197   :  { %2816 = vmatpush1.bf16.msra.mxu0 %v6753_v40  ;;  %v6794_v40 = vld [vmem:[%s9801_s3 + $0x284] ss:$8 sps:$4 sm:$0xff]  }
 0x198   :  { %2817 = vmatprep.subr.bf16.mxu0 %v6758_v41  ;;  %v6271_v41 = vcombine.high %v2976_v35, %v2980_v37 }
 0x19a   :  { %3744 = vmatprep.subr.bf16.mxu1 %v6271_v41  ;;  %v6815_v41 = vld [vmem:[%s9801_s3 + $0x2f4] ss:$8 sps:$4 sm:$0xff]  }
 0x19b   :  { %2818 = vmatpush1.bf16.msra.mxu0 %v6756_v43  ;;  %v2988_v43 = vld [vmem:[%s9803_s5 + $0x220] sm:$0xff] }
 0x19c   :  { %2819 = vmatprep.subr.bf16.mxu0 %v6761_v12  ;;  %v6792_v12 = vld [vmem:[%s9801_s3 + $0x280] ss:$8 sps:$4 sm:$0xff]   ;;  %v6278_v49 = vcombine.low %v2984_v42, %v2988_v43 }
 0x19f   :  { %2820 = vmatpush1.bf16.msra.mxu0 %v6759_v44  ;;  %v6270_v44 = vcombine.low %v2976_v35, %v2980_v37  ;;  %v3032_v37 = vld [vmem:[%s9803_s5 + $0x380] sm:$0xff] }
 0x1a0   :  { %2821 = vmatprep.subr.bf16.mxu0 %v6764_v45  ;;  %v6797_v45 = vld [vmem:[%s9801_s3 + $0x294] ss:$8 sps:$4 sm:$0xff]  }
 0x1a1   :  { %3745 = vmatpush1.bf16.msra.mxu1 %v6270_v44  ;;  %v6818_v44 = vld [vmem:[%s9801_s3 + $0x304] ss:$8 sps:$4 sm:$0xff]  }
 0x1a3   :  { %2822 = vmatpush1.bf16.msra.mxu0 %v6762_v57  ;;  %v6279_v57 = vcombine.high %v2984_v42, %v2988_v43  ;;  %v6813_v43 = vld [vmem:[%s9801_s3 + $0x2f0] ss:$8 sps:$4 sm:$0xff]  }
 0x1a4   :  { %2823 = vmatprep.subr.bf16.mxu0 %v6767_v46  ;;  %v2992_v46 = vld [vmem:[%s9803_s5 + $0x240] sm:$0xff] }
 0x1a5   :  { %3746 = vmatprep.subr.bf16.mxu1 %v6279_v57 }
 0x1a6   :  { %3747 = vmatpush1.bf16.msra.mxu1 %v6278_v49 }
 0x1a7   :  { %2824 = vmatpush1.bf16.msra.mxu0 %v6765_v47  ;;  %v2996_v47 = vld [vmem:[%s9803_s5 + $0x260] sm:$0xff] }
 0x1a8   :  { %2834 = vmatprep.subr.bf16.mxu0 %v6770_v48  ;;  %v6795_v48 = vld [vmem:[%s9801_s3 + $0x290] ss:$8 sps:$4 sm:$0xff]   ;;  %v6286_v61 = vcombine.low %v2992_v46, %v2996_v47 }
 0x1aa   :  { %2826 = vmatmul.mubr.bf16.vlgmr.msra.gmra.mrb[8].mxu0 %v1966_v50  ;;  %v6287_v50 = vcombine.high %v2992_v46, %v2996_v47 }
 0x1ab   :  { %2835 = vmatpush1.bf16.msra.mxu0 %v6768_v21  ;;  %v6800_v21 = vld [vmem:[%s9801_s3 + $0x2a4] ss:$8 sps:$4 sm:$0xff]  }
 0x1ac   :  { %2836 = vmatprep.subr.bf16.mxu0 %v6773_v51  ;;  %v3000_v51 = vld [vmem:[%s9803_s5 + $0x280] sm:$0xff]  ;;  %3748 = vmatprep.subr.bf16.mxu1 %v6287_v50 }
 0x1ad   :  { %3749 = vmatpush1.bf16.msra.mxu1 %v6286_v61  ;;  %v6827_v61 = vld [vmem:[%s9801_s3 + $0x334] ss:$8 sps:$4 sm:$0xff]  }
 0x1af   :  { %2837 = vmatpush1.bf16.msra.mxu0 %v6771_v59  ;;  %v3004_v59 = vld [vmem:[%s9803_s5 + $0x2a0] sm:$0xff] }
 0x1b0   :  { %2838 = vmatprep.subr.bf16.mxu0 %v6776_v63  ;;  %v312_v63 = vsub.s32 4, %v8252_v52  ;;  %v6295_v0 = vcombine.high %v3000_v51, %v3004_v59 }
 0x1b2   :  { %v313_v7 = vrot.slane %v8260_v55, %v312_v63  ;;  %3750 = vmatprep.subr.bf16.mxu1 %v6295_v0  ;;  %v6830_v0 = vld [vmem:[%s9801_s3 + $0x344] ss:$8 sps:$4 sm:$0xff]  }
 0x1b3   :  { %2839 = vmatpush1.bf16.msra.mxu0 %v6774_v6  ;;  %v6294_v6 = vcombine.low %v3000_v51, %v3004_v59  ;;  %v6819_v51 = vld [vmem:[%s9801_s3 + $0x310] ss:$8 sps:$4 sm:$0xff]   ;;  %v6824_v59 = vld [vmem:[%s9801_s3 + $0x324] ss:$8 sps:$4 sm:$0xff]  }
 0x1b4   :  { %2840 = vmatprep.subr.bf16.mxu0 %v6779_v8  ;;  %v6806_v8 = vld [vmem:[%s9801_s3 + $0x2c4] ss:$8 sps:$4 sm:$0xff]  }
 0x1b5   :  { %3751 = vmatpush1.bf16.msra.mxu1 %v6294_v6  ;;  %v6836_v6 = vld [vmem:[%s9801_s3 + $0x364] ss:$8 sps:$4 sm:$0xff]  }
 0x1b6   :  { %3752 = vmatprep.subr.bf16.mxu1 %v6303_v9  ;;  %v6837_v9 = vld [vmem:[%s9801_s3 + $0x370] ss:$8 sps:$4 sm:$0xff]  }
 0x1b7   :  { %2841 = vmatpush1.bf16.msra.mxu0 %v6777_v13  ;;  %v3020_v13 = vld [vmem:[%s9803_s5 + $0x320] sm:$0xff] }
 0x1b8   :  { %2842 = vmatprep.subr.bf16.mxu0 %v6782_v16  ;;  %v6311_v24 = vcombine.high %v3016_v11, %v3020_v13 }
 0x1b9   :  { %3753 = vmatpush1.bf16.msra.mxu1 %v6302_v53  ;;  %v6846_v53 = vld [vmem:[%s9801_s3 + $0x3a0] ss:$8 sps:$4 sm:$0xff]  }
 0x1ba   :  { %3754 = vmatprep.subr.bf16.mxu1 %v6311_v24  ;;  %v6854_v24 = vld [vmem:[%s9801_s3 + $0x3c4] ss:$8 sps:$4 sm:$0xff]  }
 0x1bb   :  { %2843 = vmatpush1.bf16.msra.mxu0 %v6780_v19 }
 0x1bc   :  { %2844 = vmatprep.subr.bf16.mxu0 %v6785_v23  ;;  %v6809_v23 = vld [vmem:[%s9801_s3 + $0x2d4] ss:$8 sps:$4 sm:$0xff]  }
 0x1bf   :  { %2845 = vmatpush1.bf16.msra.mxu0 %v6783_v27 }
 0x1c0   :  { %2846 = vmatprep.subr.bf16.mxu0 %v6788_v22  ;;  %v3028_v22 = vld [vmem:[%s9803_s5 + $0x360] sm:$0xff] }
 0x1c1   :  { %v6319_v35 = vcombine.high %v3024_v28, %v3028_v22 }
 0x1c3   :  { %2847 = vmatpush1.bf16.msra.mxu0 %v6786_v31 }
 0x1c4   :  { %2848 = vmatprep.subr.bf16.mxu0 %v6791_v33  ;;  %v6310_v33 = vcombine.low %v3016_v11, %v3020_v13  ;;  %v6840_v11 = vld [vmem:[%s9801_s3 + $0x380] ss:$8 sps:$4 sm:$0xff]   ;;  %v6845_v13 = vld [vmem:[%s9801_s3 + $0x394] ss:$8 sps:$4 sm:$0xff]  }
 0x1c6   :  { %3755 = vmatpush1.bf16.msra.mxu1 %v6310_v33 }
 0x1c7   :  { %2849 = vmatpush1.bf16.msra.mxu0 %v6789_v38  ;;  %v3036_v38 = vld [vmem:[%s9803_s5 + $0x3a0] sm:$0xff]  ;;  %3756 = vmatprep.subr.bf16.mxu1 %v6319_v35  ;;  %v2921_v35 = vld [vmem:[%s9803_s5 + $0x8] sm:$0xff] }
 0x1c8   :  { %2850 = vmatprep.subr.bf16.mxu0 %v6794_v40  ;;  %v6318_v40 = vcombine.low %v3024_v28, %v3028_v22  ;;  %v6327_v42 = vcombine.high %v3032_v37, %v3036_v38  ;;  %v6858_v28 = vld [vmem:[%s9801_s3 + $0x3e0] ss:$8 sps:$4 sm:$0xff]   ;;  %v6863_v22 = vld [vmem:[%s9801_s3 + $0x3f4] ss:$8 sps:$4 sm:$0xff]  }
 0x1ca   :  { %3757 = vmatpush1.bf16.msra.mxu1 %v6318_v40  ;;  %v2100_v40 = vld [vmem:[%s9804_s4] sm:$0x3] }
 0x1cb   :  { %2851 = vmatpush1.bf16.msra.mxu0 %v6792_v12  ;;  %v6326_v12 = vcombine.low %v3032_v37, %v3036_v38  ;;  %3758 = vmatprep.subr.bf16.mxu1 %v6327_v42  ;;  %v2925_v37 = vld [vmem:[%s9803_s5 + $0x28] sm:$0xff]  ;;  %v2109_v42 = vrot.slane %v2100_v40, %v8263_v56 }
 0x1cc   :  { %2852 = vmatprep.subr.bf16.mxu0 %v6797_v45  ;;  %v6217_v38 = vcombine.high %v2921_v35, %v2925_v37 }
 0x1ce   :  { %3759 = vmatpush1.bf16.msra.mxu1 %v6326_v12 }
 0x1cf   :  { %2853 = vmatpush1.bf16.msra.mxu0 %v6795_v48  ;;  %v6816_v48 = vld [vmem:[%s9801_s3 + $0x300] ss:$8 sps:$4 sm:$0xff]  }
 0x1d0   :  { %2854 = vmatprep.subr.bf16.mxu0 %v6800_v21  ;;  %v6821_v21 = vld [vmem:[%s9801_s3 + $0x314] ss:$8 sps:$4 sm:$0xff]  }
 0x1d3   :  { %2855 = vmatpush1.bf16.msra.mxu0 %v6798_v60  ;;  %v6822_v60 = vld [vmem:[%s9801_s3 + $0x320] ss:$8 sps:$4 sm:$0xff]  }
 0x1d4   :  { %2856 = vmatprep.subr.bf16.mxu0 %v6803_v62  ;;  %v6825_v62 = vld [vmem:[%s9801_s3 + $0x330] ss:$8 sps:$4 sm:$0xff]  }
 0x1d7   :  { %2857 = vmatpush1.bf16.msra.mxu0 %v6801_v5  ;;  %v6831_v5 = vld [vmem:[%s9801_s3 + $0x350] ss:$8 sps:$4 sm:$0xff]  }
 0x1d8   :  { %v1867_v16 = vpop.f32.mrb[4].mxu0  ;;  %v8543_v19 = vpop.f32.mrb[4].mxu1  ;;  %2858 = vmatprep.subr.bf16.mxu0 %v6806_v8  ;;  %v6839_v8 = vld [vmem:[%s9801_s3 + $0x374] ss:$8 sps:$4 sm:$0xff]  }
 0x1d9   :  { %v6606_v18 = vadd.f32 %v1867_v16, %v313_v7  ;;  %v1869_v20 = vpop.f32.mrb[5].mxu0  ;;  %v1951_v26 = vpop.f32.mrb[5].mxu1  ;;  %v6834_v7 = vld [vmem:[%s9801_s3 + $0x360] ss:$8 sps:$4 sm:$0xff]   ;;  %v6848_v16 = vld [vmem:[%s9801_s3 + $0x3a4] ss:$8 sps:$4 sm:$0xff]  }
 0x1da   :  { %v6607_v25 = vadd.f32 %v1869_v20, %v317_v10  ;;  %v1871_v27 = vpop.f32.mrb[6].mxu0  ;;  %v6609_v15 = vadd.f32 %v1951_v26, %v325_v14  ;;  %v1953_v29 = vpop.f32.mrb[6].mxu1  ;;  %v6842_v10 = vld [vmem:[%s9801_s3 + $0x384] ss:$8 sps:$4 sm:$0xff]   ;;  %v6843_v14 = vld [vmem:[%s9801_s3 + $0x390] ss:$8 sps:$4 sm:$0xff]  }
 0x1db   :  { %v1872_v30 = vpop.f32.mrb[7].mxu0  ;;  %7256 = vtanh.f32 %v6606_v18  ;;  %2859 = vmatpush1.bf16.msra.mxu0 %v6804_v17  ;;  %v1954_v31 = vpop.f32.mrb[7].mxu1  ;;  %v320_v17 = vsub.s32 6, %v8252_v52  ;;  %v6851_v18 = vld [vmem:[%s9801_s3 + $0x3b4] ss:$8 sps:$4 sm:$0xff]  }
 0x1dc   :  { %7258 = vtanh.f32 %v6607_v25  ;;  %2860 = vmatprep.subr.bf16.mxu0 %v6809_v23  ;;  %v6849_v23 = vld [vmem:[%s9801_s3 + $0x3b0] ss:$8 sps:$4 sm:$0xff]   ;;  %v6852_v26 = vld [vmem:[%s9801_s3 + $0x3c0] ss:$8 sps:$4 sm:$0xff]   ;;  %v7214_v52 = vld [vmem:[%s9806_s7 + $0x7a4] ss:$16 sps:$4 sm:$0xff]  }
 0x1dd   :  { %7260 = vtanh.f32 %v6609_v15  ;;  %v321_v20 = vrot.slane %v8260_v55, %v320_v17  ;;  %v6857_v55 = vld [vmem:[%s9801_s3 + $0x3d4] ss:$8 sps:$4 sm:$0xff]   ;;  %v6855_v27 = vld [vmem:[%s9801_s3 + $0x3d0] ss:$8 sps:$4 sm:$0xff]   ;;  %v3040_v31 = vld [vmem:[%s9803_s5 + $0x3c0] sm:$0xff] }
 0x1de   :  { %v6861_v15 = vld [vmem:[%s9801_s3 + $0x3f0] ss:$8 sps:$4 sm:$0xff]  }
 0x1df   :  { %2861 = vmatpush1.bf16.msra.mxu0 %v6807_v32  ;;  %v6608_v25 = vadd.f32 %v8543_v19, %v321_v20  ;;  %v6860_v19 = vld [vmem:[%s9801_s3 + $0x3e4] ss:$8 sps:$4 sm:$0xff]  }
 0x1e0   :  { %2862 = vmatprep.subr.bf16.mxu0 %v6812_v34  ;;  %v3044_v32 = vld [vmem:[%s9803_s5 + $0x3e0] sm:$0xff]  ;;  %v2977_v20 = vld [vmem:[%s9803_s5 + $0x1c8] sm:$0xff] }
 0x1e1   :  { %7262 = vtanh.f32 %v6608_v25  ;;  %v6335_v33 = vcombine.high %v3040_v31, %v3044_v32  ;;  %v6334_v34 = vcombine.low %v3040_v31, %v3044_v32  ;;  %v3005_v31 = vld [vmem:[%s9803_s5 + $0x2a8] sm:$0xff] }
 0x1e3   :  { %2863 = vmatpush1.bf16.msra.mxu0 %v6810_v39  ;;  %3760 = vmatprep.subr.bf16.mxu1 %v6335_v33  ;;  %v6216_v39 = vcombine.low %v2921_v35, %v2925_v37  ;;  %v3013_v35 = vld [vmem:[%s9803_s5 + $0x2e8] sm:$0xff]  ;;  %v6866_v37 = vld [vmem:[%s9806_s7 + $0x4] ss:$16 sps:$4 sm:$0xff]  }
 0x1e4   :  { %2864 = vmatprep.subr.bf16.mxu0 %v6815_v41  ;;  %3761 = vmatpush1.bf16.msra.mxu1 %v6334_v34  ;;  %v2105_v41 = vrot.slane %v2100_v40, %v8255_v54  ;;  %v3009_v34 = vld [vmem:[%s9803_s5 + $0x2c8] sm:$0xff] }
 0x1e5   :  { %v7257_v45 = vpop.eup %7256  ;;  %3771 = vmatprep.subr.bf16.mxu1 %v6217_v38  ;;  %v6864_v38 = vld [vmem:[%s9806_s7] ss:$16 sps:$4 sm:$0xff]   ;;  %v3017_v40 = vld [vmem:[%s9803_s5 + $0x308] sm:$0xff] }
 0x1e6   :  { %v7259_v57 = vpop.eup %7258  ;;  %v1968_v49 = vpack.c.bf16 %v7257_v45, %v7257_v45 }
 0x1e7   :  { %v7261_v46 = vpop.eup %7260  ;;  %v1969_v47 = vpack.c.bf16 %v7259_v57, %v7259_v57  ;;  %2865 = vmatpush1.bf16.msra.mxu0 %v6813_v43 }
 0x1e8   :  { %2875 = vmatprep.subr.bf16.mxu0 %v6818_v44  ;;  %v1971_v50 = vpack.c.bf16 %v7261_v46, %v7261_v46  ;;  %v2929_v46 = vld [vmem:[%s9803_s5 + $0x48] sm:$0xff] }
 0x1e9   :  { %2866 = vmatprep.mubr.bf16.mxu0 %v1969_v47  ;;  %v2933_v47 = vld [vmem:[%s9803_s5 + $0x68] sm:$0xff] }
 0x1ea   :  { %2867 = vmatmul.mubr.bf16.vlgmr.msra.gmra.mrb[8].mxu0 %v1968_v49 }
 0x1eb   :  { %2876 = vmatpush1.bf16.msra.mxu0 %v6816_v48  ;;  %2907 = vmatprep.mubr.bf16.mxu0 %v1971_v50  ;;  %v7263_v29 = vpop.eup %7262  ;;  %v6225_v50 = vcombine.high %v2929_v46, %v2933_v47 }
 0x1ec   :  { %2877 = vmatprep.subr.bf16.mxu0 %v6821_v21  ;;  %v1970_v30 = vpack.c.bf16 %v7263_v29, %v7263_v29 }
 0x1ef   :  { %2878 = vmatpush1.bf16.msra.mxu0 %v6819_v51  ;;  %v2937_v51 = vld [vmem:[%s9803_s5 + $0x88] sm:$0xff] }
 0x1f0   :  { %2879 = vmatprep.subr.bf16.mxu0 %v6824_v59  ;;  %v2941_v59 = vld [vmem:[%s9803_s5 + $0xa8] sm:$0xff] }
 0x1f3   :  { %2880 = vmatpush1.bf16.msra.mxu0 %v6822_v60  ;;  %v6224_v60 = vcombine.low %v2929_v46, %v2933_v47  ;;  %v6872_v47 = vld [vmem:[%s9806_s7 + $0x44] ss:$16 sps:$4 sm:$0xff]  }
 0x1f4   :  { %2881 = vmatprep.subr.bf16.mxu0 %v6827_v61  ;;  %v6233_v61 = vcombine.high %v2937_v51, %v2941_v59 }
 0x1f7   :  { %2882 = vmatpush1.bf16.msra.mxu0 %v6825_v62  ;;  %v2945_v62 = vld [vmem:[%s9803_s5 + $0xc8] sm:$0xff] }
 0x1f8   :  { %2883 = vmatprep.subr.bf16.mxu0 %v6830_v0  ;;  %v2949_v0 = vld [vmem:[%s9803_s5 + $0xe8] sm:$0xff] }
 0x1fb   :  { %2884 = vmatpush1.bf16.msra.mxu0 %v6828_v2  ;;  %v6232_v2 = vcombine.low %v2937_v51, %v2941_v59  ;;  %v3033_v51 = vld [vmem:[%s9803_s5 + $0x388] sm:$0xff] }
 0x1fc   :  { %2885 = vmatprep.subr.bf16.mxu0 %v6833_v3  ;;  %v6241_v3 = vcombine.high %v2945_v62, %v2949_v0  ;;  %v3037_v59 = vld [vmem:[%s9803_s5 + $0x3a8] sm:$0xff] }
 0x1ff   :  { %2886 = vmatpush1.bf16.msra.mxu0 %v6831_v5  ;;  %v2953_v5 = vld [vmem:[%s9803_s5 + $0x108] sm:$0xff] }
 0x200   :  { %2887 = vmatprep.subr.bf16.mxu0 %v6836_v6  ;;  %v2957_v6 = vld [vmem:[%s9803_s5 + $0x128] sm:$0xff] }
 0x203   :  { %2888 = vmatpush1.bf16.msra.mxu0 %v6834_v7  ;;  %v6240_v7 = vcombine.low %v2945_v62, %v2949_v0  ;;  %v6873_v62 = vld [vmem:[%s9806_s7 + $0x60] ss:$16 sps:$4 sm:$0xff]  }
 0x204   :  { %2889 = vmatprep.subr.bf16.mxu0 %v6839_v8  ;;  %v6249_v8 = vcombine.high %v2953_v5, %v2957_v6 }
 0x207   :  { %2890 = vmatpush1.bf16.msra.mxu0 %v6837_v9  ;;  %v2961_v9 = vld [vmem:[%s9803_s5 + $0x148] sm:$0xff] }
 0x208   :  { %2891 = vmatprep.subr.bf16.mxu0 %v6842_v10  ;;  %v2965_v10 = vld [vmem:[%s9803_s5 + $0x168] sm:$0xff] }
 0x20b   :  { %2892 = vmatpush1.bf16.msra.mxu0 %v6840_v11  ;;  %v6248_v11 = vcombine.low %v2953_v5, %v2957_v6  ;;  %v6329_v5 = vcombine.high %v3033_v51, %v3037_v59  ;;  %v6878_v6 = vld [vmem:[%s9806_s7 + $0x84] ss:$16 sps:$4 sm:$0xff]  }
 0x20c   :  { %2893 = vmatprep.subr.bf16.mxu0 %v6845_v13  ;;  %v6257_v13 = vcombine.high %v2961_v9, %v2965_v10 }
 0x20f   :  { %2894 = vmatpush1.bf16.msra.mxu0 %v6843_v14  ;;  %v2969_v14 = vld [vmem:[%s9803_s5 + $0x188] sm:$0xff] }
 0x210   :  { %2895 = vmatprep.subr.bf16.mxu0 %v6848_v16  ;;  %v2973_v16 = vld [vmem:[%s9803_s5 + $0x1a8] sm:$0xff] }
 0x213   :  { %2896 = vmatpush1.bf16.msra.mxu0 %v6846_v53  ;;  %v6256_v53 = vcombine.low %v2961_v9, %v2965_v10  ;;  %v2922_v9 = vld [vmem:[%s9803_s5 + $0x10] sm:$0xff] }
 0x214   :  { %2897 = vmatprep.subr.bf16.mxu0 %v6851_v18  ;;  %v6265_v18 = vcombine.high %v2969_v14, %v2973_v16  ;;  %v2926_v10 = vld [vmem:[%s9803_s5 + $0x30] sm:$0xff] }
 0x217   :  { %2898 = vmatpush1.bf16.msra.mxu0 %v6849_v23  ;;  %v2981_v23 = vld [vmem:[%s9803_s5 + $0x1e8] sm:$0xff] }
 0x218   :  { %2899 = vmatprep.subr.bf16.mxu0 %v6854_v24  ;;  %v6264_v24 = vcombine.low %v2969_v14, %v2973_v16  ;;  %v6273_v25 = vcombine.high %v2977_v20, %v2981_v23  ;;  %v6879_v14 = vld [vmem:[%s9806_s7 + $0xa0] ss:$16 sps:$4 sm:$0xff]  }
 0x21b   :  { %2900 = vmatpush1.bf16.msra.mxu0 %v6852_v26  ;;  %v2985_v26 = vld [vmem:[%s9803_s5 + $0x208] sm:$0xff] }
 0x21c   :  { %2901 = vmatprep.subr.bf16.mxu0 %v6857_v55  ;;  %v2989_v55 = vld [vmem:[%s9803_s5 + $0x228] sm:$0xff] }
 0x21f   :  { %2902 = vmatpush1.bf16.msra.mxu0 %v6855_v27  ;;  %v6272_v27 = vcombine.low %v2977_v20, %v2981_v23  ;;  %v6219_v20 = vcombine.high %v2922_v9, %v2926_v10  ;;  %v6884_v23 = vld [vmem:[%s9806_s7 + $0xc4] ss:$16 sps:$4 sm:$0xff]  }
 0x220   :  { %2903 = vmatprep.subr.bf16.mxu0 %v6860_v19  ;;  %v6281_v19 = vcombine.high %v2985_v26, %v2989_v55 }
 0x223   :  { %2904 = vmatpush1.bf16.msra.mxu0 %v6858_v28  ;;  %v2993_v28 = vld [vmem:[%s9803_s5 + $0x248] sm:$0xff] }
 0x224   :  { %2905 = vmatprep.subr.bf16.mxu0 %v6863_v22  ;;  %v2997_v22 = vld [vmem:[%s9803_s5 + $0x268] sm:$0xff] }
 0x225   :  { %v6289_v29 = vcombine.high %v2993_v28, %v2997_v22  ;;  %v6288_v32 = vcombine.low %v2993_v28, %v2997_v22  ;;  %v6888_v28 = vld [vmem:[%s9806_s7 + $0xe0] ss:$16 sps:$4 sm:$0xff]  }
 0x227   :  { %2906 = vmatpush1.bf16.msra.mxu0 %v6861_v15  ;;  %v6280_v15 = vcombine.low %v2985_v26, %v2989_v55  ;;  %v2938_v55 = vld [vmem:[%s9803_s5 + $0x90] sm:$0xff] }
 0x228   :  { %5468 = vmatprep.subr.bf16.mxu0 %v6866_v37 }
 0x22a   :  { %2908 = vmatmul.mubr.bf16.vlgmr.msra.gmra.mrb[8].mxu0 %v1970_v30  ;;  %v3001_v30 = vld [vmem:[%s9803_s5 + $0x288] sm:$0xff] }
 0x22b   :  { %v6297_v33 = vcombine.high %v3001_v30, %v3005_v31  ;;  %5469 = vmatpush1.bf16.msra.mxu0 %v6864_v38  ;;  %v6900_v38 = vld [vmem:[%s9806_s7 + $0x120] ss:$16 sps:$4 sm:$0xff]  }
 0x2fd   :  { %v2909_v43 = vpop.f32.mrb[8].mxu0 }
 0x2fe   :  { %v6610_v12 = vadd.f32 %v2909_v43, %v2105_v41  ;;  %v2911_v44 = vpop.f32.mrb[9].mxu0  ;;  %v3021_v41 = vld [vmem:[%s9803_s5 + $0x328] sm:$0xff]  ;;  %v6869_v43 = vld [vmem:[%s9806_s7 + $0x24] ss:$16 sps:$4 sm:$0xff]  }
 0x2ff   :  { %v6611_v45 = vadd.f32 %v2911_v44, %v2109_v42  ;;  %v2913_v57 = vpop.f32.mrb[10].mxu0  ;;  %v6305_v42 = vcombine.high %v3009_v34, %v3013_v35  ;;  %v6304_v44 = vcombine.low %v3009_v34, %v3013_v35  ;;  %5470 = vmatprep.subr.bf16.mxu0 %v6869_v43  ;;  %v6313_v46 = vcombine.high %v3017_v40, %v3021_v41  ;;  %v2954_v34 = vld [vmem:[%s9803_s5 + $0x110] sm:$0xff] }
 0x300   :  { %2916 = vst [vmem:[%s9805_s9] sm:$0xff] %v6610_v12  ;;  %v2914_v48 = vpop.f32.mrb[11].mxu0  ;;  %v8707_v21 = vpack.c.bf16 %v6610_v12, %v6610_v12  ;;  %v6867_v12 = vld [vmem:[%s9806_s7 + $0x20] ss:$16 sps:$4 sm:$0xff]   ;;  %v3029_v57 = vld [vmem:[%s9803_s5 + $0x368] sm:$0xff] }
 0x301   :  { %2917 = vst [vmem:[%s9805_s9 + $0x8] sm:$0xff] %v6611_v45  ;;  %v8705_v49 = vpack.c.bf16 %v6611_v45, %v6611_v45  ;;  %v3025_v45 = vld [vmem:[%s9803_s5 + $0x348] sm:$0xff]  ;;  %5471 = vmatpush1.bf16.msra.mxu0 %v6867_v12  ;;  %v6870_v48 = vld [vmem:[%s9806_s7 + $0x40] ss:$16 sps:$4 sm:$0xff]  }
 0x302   :  { %5472 = vmatprep.subr.bf16.mxu0 %v6872_v47  ;;  %v6320_v0 = vcombine.low %v3025_v45, %v3029_v57  ;;  %v2958_v35 = vld [vmem:[%s9803_s5 + $0x130] sm:$0xff] }
 0x303   :  { %3762 = vmatprep.mubr.bf16.mxu1 %v8705_v49  ;;  %v6251_v43 = vcombine.high %v2954_v34, %v2958_v35  ;;  %v6906_v12 = vld [vmem:[%s9806_s7 + $0x140] ss:$16 sps:$4 sm:$0xff]  }
 0x304   :  { %3763 = vmatmul.mubr.bf16.vlgmr.msra.gmra.mrb[8].mxu1 %v8707_v21 }
 0x305   :  { %3772 = vmatpush1.bf16.msra.mxu1 %v6216_v39  ;;  %3803 = vmatprep.mubr.bf16.mxu1 %v8705_v49  ;;  %v6296_v39 = vcombine.low %v3001_v30, %v3005_v31  ;;  %v6894_v31 = vld [vmem:[%s9806_s7 + $0x100] ss:$16 sps:$4 sm:$0xff]  }
 0x306   :  { %3773 = vmatprep.subr.bf16.mxu1 %v6225_v50  ;;  %v6312_v50 = vcombine.low %v3017_v40, %v3021_v41  ;;  %5473 = vmatpush1.bf16.msra.mxu0 %v6870_v48  ;;  %v2962_v41 = vld [vmem:[%s9803_s5 + $0x150] sm:$0xff] }
 0x307   :  { %v6912_v48 = vld [vmem:[%s9806_s7 + $0x160] ss:$16 sps:$4 sm:$0xff]  }
 0x309   :  { %3774 = vmatpush1.bf16.msra.mxu1 %v6224_v60  ;;  %v6321_v60 = vcombine.high %v3025_v45, %v3029_v57  ;;  %v6250_v45 = vcombine.low %v2954_v34, %v2958_v35  ;;  %v2970_v57 = vld [vmem:[%s9803_s5 + $0x190] sm:$0xff] }
 0x30a   :  { %3775 = vmatprep.subr.bf16.mxu1 %v6233_v61  ;;  %v6875_v61 = vld [vmem:[%s9806_s7 + $0x64] ss:$16 sps:$4 sm:$0xff]  }
 0x30b   :  { %5474 = vmatprep.subr.bf16.mxu0 %v6875_v61  ;;  %v2982_v61 = vld [vmem:[%s9803_s5 + $0x1f0] sm:$0xff] }
 0x30c   :  { %5475 = vmatpush1.bf16.msra.mxu0 %v6873_v62  ;;  %v6920_v62 = vld [vmem:[%s9806_s7 + $0x184] ss:$16 sps:$4 sm:$0xff]  }
 0x30d   :  { %3776 = vmatpush1.bf16.msra.mxu1 %v6232_v2  ;;  %v3041_v2 = vld [vmem:[%s9803_s5 + $0x3c8] sm:$0xff]  ;;  %5476 = vmatprep.subr.bf16.mxu0 %v6878_v6  ;;  %v2990_v6 = vld [vmem:[%s9803_s5 + $0x230] sm:$0xff] }
 0x30e   :  { %3777 = vmatprep.subr.bf16.mxu1 %v6241_v3  ;;  %v3045_v3 = vld [vmem:[%s9803_s5 + $0x3e8] sm:$0xff]  ;;  %v3030_v34 = vld [vmem:[%s9803_s5 + $0x370] sm:$0xff] }
 0x30f   :  { %v6336_v16 = vcombine.low %v3041_v2, %v3045_v3 }
 0x311   :  { %3778 = vmatpush1.bf16.msra.mxu1 %v6240_v7  ;;  %v6876_v7 = vld [vmem:[%s9806_s7 + $0x80] ss:$16 sps:$4 sm:$0xff]  }
 0x312   :  { %3779 = vmatprep.subr.bf16.mxu1 %v6249_v8  ;;  %v6328_v8 = vcombine.low %v3033_v51, %v3037_v59  ;;  %5477 = vmatpush1.bf16.msra.mxu0 %v6876_v7  ;;  %v6926_v7 = vld [vmem:[%s9806_s7 + $0x1a4] ss:$16 sps:$4 sm:$0xff]  }
 0x315   :  { %3780 = vmatpush1.bf16.msra.mxu1 %v6248_v11  ;;  %v6337_v11 = vcombine.high %v3041_v2, %v3045_v3 }
 0x316   :  { %3781 = vmatprep.subr.bf16.mxu1 %v6257_v13  ;;  %v6881_v13 = vld [vmem:[%s9806_s7 + $0xa4] ss:$16 sps:$4 sm:$0xff]  }
 0x317   :  { %5478 = vmatprep.subr.bf16.mxu0 %v6881_v13  ;;  %v2998_v13 = vld [vmem:[%s9803_s5 + $0x270] sm:$0xff] }
 0x318   :  { %5479 = vmatpush1.bf16.msra.mxu0 %v6879_v14  ;;  %v6932_v14 = vld [vmem:[%s9806_s7 + $0x1c4] ss:$16 sps:$4 sm:$0xff]  }
 0x319   :  { %3782 = vmatpush1.bf16.msra.mxu1 %v6256_v53  ;;  %v2930_v53 = vld [vmem:[%s9803_s5 + $0x50] sm:$0xff]  ;;  %5480 = vmatprep.subr.bf16.mxu0 %v6884_v23 }
 0x31a   :  { %3783 = vmatprep.subr.bf16.mxu1 %v6265_v18  ;;  %v2934_v18 = vld [vmem:[%s9803_s5 + $0x70] sm:$0xff] }
 0x31b   :  { %v6227_v26 = vcombine.high %v2930_v53, %v2934_v18  ;;  %v6226_v22 = vcombine.low %v2930_v53, %v2934_v18  ;;  %v3006_v23 = vld [vmem:[%s9803_s5 + $0x2b0] sm:$0xff] }
 0x31d   :  { %3784 = vmatpush1.bf16.msra.mxu1 %v6264_v24  ;;  %v6882_v24 = vld [vmem:[%s9806_s7 + $0xc0] ss:$16 sps:$4 sm:$0xff]  }
 0x31e   :  { %3785 = vmatprep.subr.bf16.mxu1 %v6273_v25  ;;  %v6218_v25 = vcombine.low %v2922_v9, %v2926_v10  ;;  %5481 = vmatpush1.bf16.msra.mxu0 %v6882_v24  ;;  %v6938_v24 = vld [vmem:[%s9806_s7 + $0x1e4] ss:$16 sps:$4 sm:$0xff]  }
 0x321   :  { %3786 = vmatpush1.bf16.msra.mxu1 %v6272_v27  ;;  %v2942_v27 = vld [vmem:[%s9803_s5 + $0xb0] sm:$0xff] }
 0x322   :  { %3787 = vmatprep.subr.bf16.mxu1 %v6281_v19  ;;  %v6890_v19 = vld [vmem:[%s9806_s7 + $0xe4] ss:$16 sps:$4 sm:$0xff]   ;;  %v6235_v30 = vcombine.high %v2938_v55, %v2942_v27 }
 0x323   :  { %5482 = vmatprep.subr.bf16.mxu0 %v6890_v19  ;;  %v3014_v19 = vld [vmem:[%s9803_s5 + $0x2f0] sm:$0xff] }
 0x324   :  { %5483 = vmatpush1.bf16.msra.mxu0 %v6888_v28  ;;  %v6944_v28 = vld [vmem:[%s9806_s7 + $0x204] ss:$16 sps:$4 sm:$0xff]  }
 0x325   :  { %3788 = vmatpush1.bf16.msra.mxu1 %v6280_v15  ;;  %v2946_v15 = vld [vmem:[%s9803_s5 + $0xd0] sm:$0xff] }
 0x326   :  { %3789 = vmatprep.subr.bf16.mxu1 %v6289_v29  ;;  %v2950_v29 = vld [vmem:[%s9803_s5 + $0xf0] sm:$0xff] }
 0x327   :  { %v6243_v37 = vcombine.high %v2946_v15, %v2950_v29  ;;  %v6242_v40 = vcombine.low %v2946_v15, %v2950_v29  ;;  %v3018_v29 = vld [vmem:[%s9803_s5 + $0x310] sm:$0xff] }
 0x329   :  { %3790 = vmatpush1.bf16.msra.mxu1 %v6288_v32  ;;  %v6896_v32 = vld [vmem:[%s9806_s7 + $0x104] ss:$16 sps:$4 sm:$0xff]  }
 0x32a   :  { %3791 = vmatprep.subr.bf16.mxu1 %v6297_v33  ;;  %5484 = vmatprep.subr.bf16.mxu0 %v6896_v32  ;;  %v6234_v33 = vcombine.low %v2938_v55, %v2942_v27  ;;  %v3010_v27 = vld [vmem:[%s9803_s5 + $0x2d0] sm:$0xff] }
 0x32b   :  { %5485 = vmatpush1.bf16.msra.mxu0 %v6894_v31  ;;  %v6307_v15 = vcombine.high %v3010_v27, %v3014_v19  ;;  %v6306_v31 = vcombine.low %v3010_v27, %v3014_v19  ;;  %v2991_v27 = vld [vmem:[%s9803_s5 + $0x238] sm:$0xff] }
 0x32d   :  { %3792 = vmatpush1.bf16.msra.mxu1 %v6296_v39  ;;  %v6902_v39 = vld [vmem:[%s9806_s7 + $0x124] ss:$16 sps:$4 sm:$0xff]  }
 0x32e   :  { %3793 = vmatprep.subr.bf16.mxu1 %v6305_v42  ;;  %5486 = vmatprep.subr.bf16.mxu0 %v6902_v39  ;;  %v2966_v42 = vld [vmem:[%s9803_s5 + $0x170] sm:$0xff] }
 0x32f   :  { %5487 = vmatpush1.bf16.msra.mxu0 %v6900_v38  ;;  %v6259_v47 = vcombine.high %v2962_v41, %v2966_v42  ;;  %v6258_v51 = vcombine.low %v2962_v41, %v2966_v42  ;;  %v3034_v38 = vld [vmem:[%s9803_s5 + $0x390] sm:$0xff] }
 0x330   :  { %v3038_v39 = vld [vmem:[%s9803_s5 + $0x3b0] sm:$0xff] }
 0x331   :  { %3794 = vmatpush1.bf16.msra.mxu1 %v6304_v44  ;;  %v6908_v44 = vld [vmem:[%s9806_s7 + $0x144] ss:$16 sps:$4 sm:$0xff]   ;;  %v6331_v41 = vcombine.high %v3034_v38, %v3038_v39 }
 0x332   :  { %3795 = vmatprep.subr.bf16.mxu1 %v6313_v46  ;;  %5488 = vmatprep.subr.bf16.mxu0 %v6908_v44  ;;  %v2974_v46 = vld [vmem:[%s9803_s5 + $0x1b0] sm:$0xff] }
 0x333   :  { %5489 = vmatpush1.bf16.msra.mxu0 %v6906_v12  ;;  %v6267_v59 = vcombine.high %v2970_v57, %v2974_v46  ;;  %v6266_v2 = vcombine.low %v2970_v57, %v2974_v46  ;;  %v3042_v42 = vld [vmem:[%s9803_s5 + $0x3d0] sm:$0xff]  ;;  %v6330_v12 = vcombine.low %v3034_v38, %v3038_v39  ;;  %v2927_v57 = vld [vmem:[%s9803_s5 + $0x38] sm:$0xff] }
 0x335   :  { %3796 = vmatpush1.bf16.msra.mxu1 %v6312_v50  ;;  %v6914_v50 = vld [vmem:[%s9806_s7 + $0x164] ss:$16 sps:$4 sm:$0xff]  }
 0x336   :  { %3797 = vmatprep.subr.bf16.mxu1 %v6321_v60  ;;  %5490 = vmatprep.subr.bf16.mxu0 %v6914_v50  ;;  %v2978_v60 = vld [vmem:[%s9803_s5 + $0x1d0] sm:$0xff]  ;;  %v2935_v50 = vld [vmem:[%s9803_s5 + $0x78] sm:$0xff] }
 0x337   :  { %5491 = vmatpush1.bf16.msra.mxu0 %v6912_v48  ;;  %v6275_v3 = vcombine.high %v2978_v60, %v2982_v61  ;;  %v6274_v9 = vcombine.low %v2978_v60, %v2982_v61  ;;  %v2931_v48 = vld [vmem:[%s9803_s5 + $0x58] sm:$0xff] }
 0x338   :  { %5492 = vmatprep.subr.bf16.mxu0 %v6920_v62  ;;  %v2939_v60 = vld [vmem:[%s9803_s5 + $0x98] sm:$0xff]  ;;  %v6228_v62 = vcombine.low %v2931_v48, %v2935_v50 }
 0x339   :  { %3798 = vmatpush1.bf16.msra.mxu1 %v6320_v0  ;;  %v6918_v0 = vld [vmem:[%s9806_s7 + $0x180] ss:$16 sps:$4 sm:$0xff]   ;;  %v2943_v61 = vld [vmem:[%s9803_s5 + $0xb8] sm:$0xff] }
 0x33a   :  { %3799 = vmatprep.subr.bf16.mxu1 %v6329_v5  ;;  %v2986_v5 = vld [vmem:[%s9803_s5 + $0x210] sm:$0xff] }
 0x33b   :  { %5493 = vmatpush1.bf16.msra.mxu0 %v6918_v0  ;;  %v6283_v10 = vcombine.high %v2986_v5, %v2990_v6  ;;  %v6282_v53 = vcombine.low %v2986_v5, %v2990_v6  ;;  %v6237_v0 = vcombine.high %v2939_v60, %v2943_v61  ;;  %v6236_v5 = vcombine.low %v2939_v60, %v2943_v61 }
 0x33c   :  { %5494 = vmatprep.subr.bf16.mxu0 %v6926_v7  ;;  %v2955_v7 = vld [vmem:[%s9803_s5 + $0x118] sm:$0xff] }
 0x33d   :  { %3800 = vmatpush1.bf16.msra.mxu1 %v6328_v8  ;;  %v6924_v8 = vld [vmem:[%s9806_s7 + $0x1a0] ss:$16 sps:$4 sm:$0xff]  }
 0x33e   :  { %3801 = vmatprep.subr.bf16.mxu1 %v6337_v11  ;;  %v2994_v11 = vld [vmem:[%s9803_s5 + $0x250] sm:$0xff] }
 0x33f   :  { %5495 = vmatpush1.bf16.msra.mxu0 %v6924_v8  ;;  %v6291_v18 = vcombine.high %v2994_v11, %v2998_v13 }
 0x340   :  { %5496 = vmatprep.subr.bf16.mxu0 %v6932_v14 }
 0x341   :  { %3802 = vmatpush1.bf16.msra.mxu1 %v6336_v16  ;;  %v6930_v16 = vld [vmem:[%s9806_s7 + $0x1c0] ss:$16 sps:$4 sm:$0xff]  }
 0x342   :  { %3812 = vmatprep.subr.bf16.mxu1 %v6219_v20  ;;  %v3002_v20 = vld [vmem:[%s9803_s5 + $0x290] sm:$0xff] }
 0x343   :  { %5497 = vmatpush1.bf16.msra.mxu0 %v6930_v16  ;;  %v6299_v55 = vcombine.high %v3002_v20, %v3006_v23  ;;  %v2971_v16 = vld [vmem:[%s9803_s5 + $0x198] sm:$0xff] }
 0x344   :  { %3804 = vmatmul.mubr.bf16.vlgmr.msra.gmra.mrb[12].mxu1 %v8707_v21  ;;  %5498 = vmatprep.subr.bf16.mxu0 %v6938_v24  ;;  %v2983_v24 = vld [vmem:[%s9803_s5 + $0x1f8] sm:$0xff] }
 0x345   :  { %3813 = vmatpush1.bf16.msra.mxu1 %v6218_v25  ;;  %3844 = vmatprep.mubr.bf16.mxu1 %v8705_v49  ;;  %v6936_v25 = vld [vmem:[%s9806_s7 + $0x1e0] ss:$16 sps:$4 sm:$0xff]  }
 0x346   :  { %3814 = vmatprep.subr.bf16.mxu1 %v6227_v26  ;;  %v6290_v26 = vcombine.low %v2994_v11, %v2998_v13  ;;  %v2967_v11 = vld [vmem:[%s9803_s5 + $0x178] sm:$0xff] }
 0x347   :  { %5499 = vmatpush1.bf16.msra.mxu0 %v6936_v25 }
 0x348   :  { %5509 = vmatprep.subr.bf16.mxu0 %v6944_v28 }
 0x349   :  { %3815 = vmatpush1.bf16.msra.mxu1 %v6226_v22  ;;  %v6298_v22 = vcombine.low %v3002_v20, %v3006_v23  ;;  %v2979_v23 = vld [vmem:[%s9803_s5 + $0x1d8] sm:$0xff] }
 0x34a   :  { %3816 = vmatprep.subr.bf16.mxu1 %v6235_v30  ;;  %v3022_v30 = vld [vmem:[%s9803_s5 + $0x330] sm:$0xff]  ;;  %v6276_v19 = vcombine.low %v2979_v23, %v2983_v24 }
 0x34b   :  { %v6315_v32 = vcombine.high %v3018_v29, %v3022_v30  ;;  %v6314_v35 = vcombine.low %v3018_v29, %v3022_v30 }
 0x34d   :  { %3817 = vmatpush1.bf16.msra.mxu1 %v6234_v33  ;;  %v3026_v33 = vld [vmem:[%s9803_s5 + $0x350] sm:$0xff] }
 0x34e   :  { %3818 = vmatprep.subr.bf16.mxu1 %v6243_v37  ;;  %v6323_v37 = vcombine.high %v3026_v33, %v3030_v34 }
 0x351   :  { %3819 = vmatpush1.bf16.msra.mxu1 %v6242_v40  ;;  %v6322_v40 = vcombine.low %v3026_v33, %v3030_v34 }
 0x352   :  { %3820 = vmatprep.subr.bf16.mxu1 %v6251_v43  ;;  %v3046_v43 = vld [vmem:[%s9803_s5 + $0x3f0] sm:$0xff] }
 0x353   :  { %v6339_v44 = vcombine.high %v3042_v42, %v3046_v43  ;;  %v6338_v46 = vcombine.low %v3042_v42, %v3046_v43 }
 0x355   :  { %3821 = vmatpush1.bf16.msra.mxu1 %v6250_v45  ;;  %v2923_v45 = vld [vmem:[%s9803_s5 + $0x18] sm:$0xff] }
 0x356   :  { %3822 = vmatprep.subr.bf16.mxu1 %v6259_v47  ;;  %v6221_v47 = vcombine.high %v2923_v45, %v2927_v57 }
 0x359   :  { %3823 = vmatpush1.bf16.msra.mxu1 %v6258_v51  ;;  %v6220_v51 = vcombine.low %v2923_v45, %v2927_v57 }
 0x35a   :  { %3824 = vmatprep.subr.bf16.mxu1 %v6267_v59  ;;  %v6229_v59 = vcombine.high %v2931_v48, %v2935_v50 }
 0x35d   :  { %3825 = vmatpush1.bf16.msra.mxu1 %v6266_v2  ;;  %v2947_v2 = vld [vmem:[%s9803_s5 + $0xd8] sm:$0xff] }
 0x35e   :  { %3826 = vmatprep.subr.bf16.mxu1 %v6275_v3  ;;  %v2951_v3 = vld [vmem:[%s9803_s5 + $0xf8] sm:$0xff] }
 0x35f   :  { %v6245_v6 = vcombine.high %v2947_v2, %v2951_v3  ;;  %v6244_v8 = vcombine.low %v2947_v2, %v2951_v3  ;;  %v6885_v2 = vld [vmem:[%s9806_s7 + $0x8] ss:$16 sps:$4 sm:$0xff]   ;;  %v6893_v3 = vld [vmem:[%s9806_s7 + $0x2c] ss:$16 sps:$4 sm:$0xff]  }
 0x361   :  { %3827 = vmatpush1.bf16.msra.mxu1 %v6274_v9 }
 0x362   :  { %3828 = vmatprep.subr.bf16.mxu1 %v6283_v10  ;;  %v2963_v10 = vld [vmem:[%s9803_s5 + $0x158] sm:$0xff] }
 0x363   :  { %v6261_v14 = vcombine.high %v2963_v10, %v2967_v11 }
 0x365   :  { %3829 = vmatpush1.bf16.msra.mxu1 %v6282_v53  ;;  %v2975_v53 = vld [vmem:[%s9803_s5 + $0x1b8] sm:$0xff] }
 0x366   :  { %3830 = vmatprep.subr.bf16.mxu1 %v6291_v18  ;;  %v6260_v18 = vcombine.low %v2963_v10, %v2967_v11  ;;  %v6269_v20 = vcombine.high %v2971_v16, %v2975_v53  ;;  %v6268_v25 = vcombine.low %v2971_v16, %v2975_v53  ;;  %v9125_v10 = vld [vmem:[%s9807_s6] sm:$0xff]  ;;  %v6917_v11 = vld [vmem:[%s9806_s7 + $0xac] ss:$16 sps:$4 sm:$0xff]  }
 0x367   :  { %v3057_v16 = vrot.slane %v9125_v10, %v8263_v56  ;;  %v6923_v53 = vld [vmem:[%s9806_s7 + $0xcc] ss:$16 sps:$4 sm:$0xff]  }
 0x369   :  { %3831 = vmatpush1.bf16.msra.mxu1 %v6290_v26  ;;  %v6277_v26 = vcombine.high %v2979_v23, %v2983_v24 }
 0x36a   :  { %3832 = vmatprep.subr.bf16.mxu1 %v6299_v55  ;;  %v2987_v55 = vld [vmem:[%s9803_s5 + $0x218] sm:$0xff] }
 0x36b   :  { %v6285_v28 = vcombine.high %v2987_v55, %v2991_v27  ;;  %v6284_v29 = vcombine.low %v2987_v55, %v2991_v27  ;;  %v6929_v27 = vld [vmem:[%s9806_s7 + $0xec] ss:$16 sps:$4 sm:$0xff]  }
 0x36d   :  { %3833 = vmatpush1.bf16.msra.mxu1 %v6298_v22  ;;  %v2995_v22 = vld [vmem:[%s9803_s5 + $0x258] sm:$0xff] }
 0x36e   :  { %3834 = vmatprep.subr.bf16.mxu1 %v6307_v15  ;;  %v2999_v15 = vld [vmem:[%s9803_s5 + $0x278] sm:$0xff] }
 0x36f   :  { %v6293_v30 = vcombine.high %v2995_v22, %v2999_v15  ;;  %v6292_v33 = vcombine.low %v2995_v22, %v2999_v15  ;;  %v6933_v22 = vld [vmem:[%s9806_s7 + $0x108] ss:$16 sps:$4 sm:$0xff]   ;;  %v6941_v15 = vld [vmem:[%s9806_s7 + $0x12c] ss:$16 sps:$4 sm:$0xff]  }
 0x371   :  { %3835 = vmatpush1.bf16.msra.mxu1 %v6306_v31  ;;  %v3003_v31 = vld [vmem:[%s9803_s5 + $0x298] sm:$0xff] }
 0x372   :  { %3836 = vmatprep.subr.bf16.mxu1 %v6315_v32  ;;  %v3007_v32 = vld [vmem:[%s9803_s5 + $0x2b8] sm:$0xff] }
 0x373   :  { %v6301_v34 = vcombine.high %v3003_v31, %v3007_v32  ;;  %v6300_v38 = vcombine.low %v3003_v31, %v3007_v32  ;;  %v6939_v31 = vld [vmem:[%s9806_s7 + $0x128] ss:$16 sps:$4 sm:$0xff]  }
 0x375   :  { %3837 = vmatpush1.bf16.msra.mxu1 %v6314_v35  ;;  %v3011_v35 = vld [vmem:[%s9803_s5 + $0x2d8] sm:$0xff] }
 0x376   :  { %3838 = vmatprep.subr.bf16.mxu1 %v6323_v37  ;;  %v3015_v37 = vld [vmem:[%s9803_s5 + $0x2f8] sm:$0xff] }
 0x377   :  { %v6309_v39 = vcombine.high %v3011_v35, %v3015_v37  ;;  %v6308_v42 = vcombine.low %v3011_v35, %v3015_v37  ;;  %v6950_v37 = vld [vmem:[%s9806_s7 + $0x224] ss:$16 sps:$4 sm:$0xff]  }
 0x379   :  { %3839 = vmatpush1.bf16.msra.mxu1 %v6322_v40  ;;  %v3019_v40 = vld [vmem:[%s9803_s5 + $0x318] sm:$0xff] }
 0x37a   :  { %3840 = vmatprep.subr.bf16.mxu1 %v6331_v41  ;;  %v3023_v41 = vld [vmem:[%s9803_s5 + $0x338] sm:$0xff] }
 0x37b   :  { %v6317_v43 = vcombine.high %v3019_v40, %v3023_v41  ;;  %v6316_v45 = vcombine.low %v3019_v40, %v3023_v41  ;;  %v6953_v40 = vld [vmem:[%s9806_s7 + $0x16c] ss:$16 sps:$4 sm:$0xff]   ;;  %v6956_v41 = vld [vmem:[%s9806_s7 + $0x244] ss:$16 sps:$4 sm:$0xff]  }
 0x37d   :  { %3841 = vmatpush1.bf16.msra.mxu1 %v6330_v12  ;;  %v3027_v12 = vld [vmem:[%s9803_s5 + $0x358] sm:$0xff] }
 0x37e   :  { %3842 = vmatprep.subr.bf16.mxu1 %v6339_v44  ;;  %v3031_v44 = vld [vmem:[%s9803_s5 + $0x378] sm:$0xff] }
 0x37f   :  { %v6325_v57 = vcombine.high %v3027_v12, %v3031_v44  ;;  %v6324_v48 = vcombine.low %v3027_v12, %v3031_v44  ;;  %v6959_v12 = vld [vmem:[%s9806_s7 + $0x18c] ss:$16 sps:$4 sm:$0xff]   ;;  %v6962_v44 = vld [vmem:[%s9806_s7 + $0x264] ss:$16 sps:$4 sm:$0xff]  }
 0x381   :  { %3843 = vmatpush1.bf16.msra.mxu1 %v6338_v46  ;;  %v3035_v46 = vld [vmem:[%s9803_s5 + $0x398] sm:$0xff] }
 0x382   :  { %3853 = vmatprep.subr.bf16.mxu1 %v6221_v47  ;;  %v3039_v47 = vld [vmem:[%s9803_s5 + $0x3b8] sm:$0xff] }
 0x383   :  { %v6333_v50 = vcombine.high %v3035_v46, %v3039_v47  ;;  %v6332_v60 = vcombine.low %v3035_v46, %v3039_v47  ;;  %v6965_v46 = vld [vmem:[%s9806_s7 + $0x1ac] ss:$16 sps:$4 sm:$0xff]   ;;  %v6968_v47 = vld [vmem:[%s9806_s7 + $0x284] ss:$16 sps:$4 sm:$0xff]  }
 0x384   :  { %3845 = vmatmul.mubr.bf16.vlgmr.msra.gmra.mrb[16].mxu1 %v8707_v21 }
 0x385   :  { %3854 = vmatpush1.bf16.msra.mxu1 %v6220_v51  ;;  %3885 = vmatprep.mubr.bf16.mxu1 %v8705_v49  ;;  %v2959_v49 = vld [vmem:[%s9803_s5 + $0x138] sm:$0xff] }
 0x386   :  { %3855 = vmatprep.subr.bf16.mxu1 %v6229_v59  ;;  %v6253_v9 = vcombine.high %v2955_v7, %v2959_v49  ;;  %v6252_v13 = vcombine.low %v2955_v7, %v2959_v49  ;;  %v3043_v51 = vld [vmem:[%s9803_s5 + $0x3d8] sm:$0xff] }
 0x387   :  { %v3047_v59 = vld [vmem:[%s9803_s5 + $0x3f8] sm:$0xff] }
 0x388   :  { %v6341_v61 = vcombine.high %v3043_v51, %v3047_v59  ;;  %v6897_v7 = vld [vmem:[%s9806_s7 + $0x48] ss:$16 sps:$4 sm:$0xff]  }
 0x389   :  { %3856 = vmatpush1.bf16.msra.mxu1 %v6228_v62  ;;  %v6340_v62 = vcombine.low %v3043_v51, %v3047_v59  ;;  %v6903_v49 = vld [vmem:[%s9806_s7 + $0x68] ss:$16 sps:$4 sm:$0xff]   ;;  %v6971_v51 = vld [vmem:[%s9806_s7 + $0x1cc] ss:$16 sps:$4 sm:$0xff]   ;;  %v6974_v59 = vld [vmem:[%s9806_s7 + $0x2a4] ss:$16 sps:$4 sm:$0xff]  }
 0x38a   :  { %3857 = vmatprep.subr.bf16.mxu1 %v6237_v0  ;;  %v6887_v0 = vld [vmem:[%s9806_s7 + $0xc] ss:$16 sps:$4 sm:$0xff]  }
 0x38d   :  { %3858 = vmatpush1.bf16.msra.mxu1 %v6236_v5  ;;  %v6891_v5 = vld [vmem:[%s9806_s7 + $0x28] ss:$16 sps:$4 sm:$0xff]  }
 0x38e   :  { %3859 = vmatprep.subr.bf16.mxu1 %v6245_v6  ;;  %v6899_v6 = vld [vmem:[%s9806_s7 + $0x4c] ss:$16 sps:$4 sm:$0xff]  }
 0x391   :  { %3860 = vmatpush1.bf16.msra.mxu1 %v6244_v8  ;;  %v6911_v8 = vld [vmem:[%s9806_s7 + $0x8c] ss:$16 sps:$4 sm:$0xff]  }
 0x392   :  { %3861 = vmatprep.subr.bf16.mxu1 %v6253_v9  ;;  %v6909_v9 = vld [vmem:[%s9806_s7 + $0x88] ss:$16 sps:$4 sm:$0xff]  }
 0x395   :  { %3862 = vmatpush1.bf16.msra.mxu1 %v6252_v13  ;;  %v3053_v13 = vrot.slane %v9125_v10, %v8255_v54 }
 0x396   :  { %3863 = vmatprep.subr.bf16.mxu1 %v6261_v14  ;;  %v6915_v14 = vld [vmem:[%s9806_s7 + $0xa8] ss:$16 sps:$4 sm:$0xff]  }
 0x399   :  { %3864 = vmatpush1.bf16.msra.mxu1 %v6260_v18 }
 0x39a   :  { %3865 = vmatprep.subr.bf16.mxu1 %v6269_v20 }
 0x39d   :  { %3866 = vmatpush1.bf16.msra.mxu1 %v6268_v25 }
 0x39e   :  { %3867 = vmatprep.subr.bf16.mxu1 %v6277_v26  ;;  %v6921_v26 = vld [vmem:[%s9806_s7 + $0xc8] ss:$16 sps:$4 sm:$0xff]  }
 0x3a1   :  { %3868 = vmatpush1.bf16.msra.mxu1 %v6276_v19  ;;  %v6927_v19 = vld [vmem:[%s9806_s7 + $0xe8] ss:$16 sps:$4 sm:$0xff]  }
 0x3a2   :  { %3869 = vmatprep.subr.bf16.mxu1 %v6285_v28  ;;  %v6935_v28 = vld [vmem:[%s9806_s7 + $0x10c] ss:$16 sps:$4 sm:$0xff]  }
 0x3a5   :  { %3870 = vmatpush1.bf16.msra.mxu1 %v6284_v29 }
 0x3a6   :  { %3871 = vmatprep.subr.bf16.mxu1 %v6293_v30 }
 0x3a9   :  { %3872 = vmatpush1.bf16.msra.mxu1 %v6292_v33  ;;  %v6942_v33 = vld [vmem:[%s9806_s7 + $0x200] ss:$16 sps:$4 sm:$0xff]  }
 0x3aa   :  { %3873 = vmatprep.subr.bf16.mxu1 %v6301_v34  ;;  %v6947_v34 = vld [vmem:[%s9806_s7 + $0x14c] ss:$16 sps:$4 sm:$0xff]  }
 0x3ad   :  { %3874 = vmatpush1.bf16.msra.mxu1 %v6300_v38  ;;  %v6945_v38 = vld [vmem:[%s9806_s7 + $0x148] ss:$16 sps:$4 sm:$0xff]  }
 0x3ae   :  { %3875 = vmatprep.subr.bf16.mxu1 %v6309_v39  ;;  %v6948_v39 = vld [vmem:[%s9806_s7 + $0x220] ss:$16 sps:$4 sm:$0xff]  }
 0x3b1   :  { %3876 = vmatpush1.bf16.msra.mxu1 %v6308_v42  ;;  %v6951_v42 = vld [vmem:[%s9806_s7 + $0x168] ss:$16 sps:$4 sm:$0xff]  }
 0x3b2   :  { %3877 = vmatprep.subr.bf16.mxu1 %v6317_v43  ;;  %v6954_v43 = vld [vmem:[%s9806_s7 + $0x240] ss:$16 sps:$4 sm:$0xff]  }
 0x3b5   :  { %3878 = vmatpush1.bf16.msra.mxu1 %v6316_v45  ;;  %v6957_v45 = vld [vmem:[%s9806_s7 + $0x188] ss:$16 sps:$4 sm:$0xff]  }
 0x3b6   :  { %3879 = vmatprep.subr.bf16.mxu1 %v6325_v57  ;;  %v6960_v57 = vld [vmem:[%s9806_s7 + $0x260] ss:$16 sps:$4 sm:$0xff]  }
 0x3b9   :  { %3880 = vmatpush1.bf16.msra.mxu1 %v6324_v48  ;;  %v6963_v48 = vld [vmem:[%s9806_s7 + $0x1a8] ss:$16 sps:$4 sm:$0xff]  }
 0x3ba   :  { %3881 = vmatprep.subr.bf16.mxu1 %v6333_v50  ;;  %v6966_v50 = vld [vmem:[%s9806_s7 + $0x280] ss:$16 sps:$4 sm:$0xff]  }
 0x3bd   :  { %3882 = vmatpush1.bf16.msra.mxu1 %v6332_v60  ;;  %v6969_v60 = vld [vmem:[%s9806_s7 + $0x1c8] ss:$16 sps:$4 sm:$0xff]  }
 0x3be   :  { %3883 = vmatprep.subr.bf16.mxu1 %v6341_v61  ;;  %v6972_v61 = vld [vmem:[%s9806_s7 + $0x2a0] ss:$16 sps:$4 sm:$0xff]  }
 0x3c1   :  { %3884 = vmatpush1.bf16.msra.mxu1 %v6340_v62  ;;  %v6977_v62 = vld [vmem:[%s9806_s7 + $0x1ec] ss:$16 sps:$4 sm:$0xff]  }
 0x3c2   :  { %5632 = vmatprep.subr.bf16.mxu1 %v6887_v0  ;;  %v6980_v0 = vld [vmem:[%s9806_s7 + $0x2c4] ss:$16 sps:$4 sm:$0xff]  }
 0x3c4   :  { %3886 = vmatmul.mubr.bf16.vlgmr.msra.gmra.mrb[20].mxu1 %v8707_v21  ;;  %v6905_v21 = vld [vmem:[%s9806_s7 + $0x6c] ss:$16 sps:$4 sm:$0xff]  }
 0x3c5   :  { %5633 = vmatpush1.bf16.msra.mxu1 %v6885_v2  ;;  %v6975_v2 = vld [vmem:[%s9806_s7 + $0x1e8] ss:$16 sps:$4 sm:$0xff]  }
 0x3c6   :  { %5634 = vmatprep.subr.bf16.mxu1 %v6893_v3  ;;  %v6978_v3 = vld [vmem:[%s9806_s7 + $0x2c0] ss:$16 sps:$4 sm:$0xff]  }
 0x3c9   :  { %5635 = vmatpush1.bf16.msra.mxu1 %v6891_v5  ;;  %v6983_v5 = vld [vmem:[%s9806_s7 + $0x20c] ss:$16 sps:$4 sm:$0xff]  }
 0x3ca   :  { %5636 = vmatprep.subr.bf16.mxu1 %v6899_v6  ;;  %v6986_v6 = vld [vmem:[%s9806_s7 + $0x2e4] ss:$16 sps:$4 sm:$0xff]  }
 0x3cd   :  { %5637 = vmatpush1.bf16.msra.mxu1 %v6897_v7  ;;  %v6981_v7 = vld [vmem:[%s9806_s7 + $0x208] ss:$16 sps:$4 sm:$0xff]  }
 0x3ce   :  { %5638 = vmatprep.subr.bf16.mxu1 %v6905_v21  ;;  %v6984_v21 = vld [vmem:[%s9806_s7 + $0x2e0] ss:$16 sps:$4 sm:$0xff]  }
 0x3d1   :  { %5639 = vmatpush1.bf16.msra.mxu1 %v6903_v49  ;;  %v6989_v49 = vld [vmem:[%s9806_s7 + $0x22c] ss:$16 sps:$4 sm:$0xff]  }
 0x3d2   :  { %5640 = vmatprep.subr.bf16.mxu1 %v6911_v8  ;;  %v6992_v8 = vld [vmem:[%s9806_s7 + $0x304] ss:$16 sps:$4 sm:$0xff]  }
 0x3d5   :  { %5641 = vmatpush1.bf16.msra.mxu1 %v6909_v9  ;;  %v6987_v9 = vld [vmem:[%s9806_s7 + $0x228] ss:$16 sps:$4 sm:$0xff]  }
 0x3d6   :  { %5642 = vmatprep.subr.bf16.mxu1 %v6917_v11  ;;  %v6990_v11 = vld [vmem:[%s9806_s7 + $0x300] ss:$16 sps:$4 sm:$0xff]  }
 0x3d7   :  { %v3764_v18 = vpop.f32.mrb[8].mxu1 }
 0x3d8   :  { %v3765_v20 = vadd.f32 %v3764_v18, %v3053_v13  ;;  %v3766_v23 = vpop.f32.mrb[9].mxu1  ;;  %v6995_v13 = vld [vmem:[%s9806_s7 + $0x24c] ss:$16 sps:$4 sm:$0xff]  }
 0x3d9   :  { %v3767_v24 = vadd.f32 %v3766_v23, %v3057_v16  ;;  %5643 = vmatpush1.bf16.msra.mxu1 %v6915_v14  ;;  %v3768_v25 = vpop.f32.mrb[10].mxu1  ;;  %v6998_v14 = vld [vmem:[%s9806_s7 + $0x324] ss:$16 sps:$4 sm:$0xff]   ;;  %v6993_v16 = vld [vmem:[%s9806_s7 + $0x248] ss:$16 sps:$4 sm:$0xff]  }
 0x3da   :  { %7264 = vtanh.f32 %v3765_v20  ;;  %v3769_v55 = vpop.f32.mrb[11].mxu1  ;;  %5644 = vmatprep.subr.bf16.mxu1 %v6923_v53  ;;  %v6996_v53 = vld [vmem:[%s9806_s7 + $0x320] ss:$16 sps:$4 sm:$0xff]   ;;  %v7001_v18 = vld [vmem:[%s9806_s7 + $0x26c] ss:$16 sps:$4 sm:$0xff]  }
 0x3db   :  { %7266 = vtanh.f32 %v3767_v24  ;;  %v7004_v20 = vld [vmem:[%s9806_s7 + $0x344] ss:$16 sps:$4 sm:$0xff]   ;;  %v6999_v23 = vld [vmem:[%s9806_s7 + $0x268] ss:$16 sps:$4 sm:$0xff]   ;;  %v7002_v24 = vld [vmem:[%s9806_s7 + $0x340] ss:$16 sps:$4 sm:$0xff]  }
 0x3dc   :  { %v7007_v25 = vld [vmem:[%s9806_s7 + $0x28c] ss:$16 sps:$4 sm:$0xff]   ;;  %v7005_v55 = vld [vmem:[%s9806_s7 + $0x288] ss:$16 sps:$4 sm:$0xff]  }
 0x3dd   :  { %5645 = vmatpush1.bf16.msra.mxu1 %v6921_v26  ;;  %v7010_v26 = vld [vmem:[%s9806_s7 + $0x364] ss:$16 sps:$4 sm:$0xff]  }
 0x3de   :  { %5646 = vmatprep.subr.bf16.mxu1 %v6929_v27  ;;  %v7008_v27 = vld [vmem:[%s9806_s7 + $0x360] ss:$16 sps:$4 sm:$0xff]  }
 0x3e1   :  { %5647 = vmatpush1.bf16.msra.mxu1 %v6927_v19  ;;  %v7013_v19 = vld [vmem:[%s9806_s7 + $0x2ac] ss:$16 sps:$4 sm:$0xff]  }
 0x3e2   :  { %5648 = vmatprep.subr.bf16.mxu1 %v6935_v28  ;;  %v7016_v28 = vld [vmem:[%s9806_s7 + $0x384] ss:$16 sps:$4 sm:$0xff]  }
 0x3e4   :  { %v7265_v29 = vpop.eup %7264 }
 0x3e5   :  { %v7267_v30 = vpop.eup %7266  ;;  %5649 = vmatpush1.bf16.msra.mxu1 %v6933_v22  ;;  %v3902_v35 = vpack.c.bf16 %v7265_v29, %v7265_v29  ;;  %v3061_v22 = vrot.slane %v9125_v10, %v8337_v36  ;;  %v7011_v29 = vld [vmem:[%s9806_s7 + $0x2a8] ss:$16 sps:$4 sm:$0xff]  }
 0x3e6   :  { %v3903_v32 = vpack.c.bf16 %v7267_v30, %v7267_v30  ;;  %5650 = vmatprep.subr.bf16.mxu1 %v6941_v15  ;;  %v3065_v15 = vrot.slane %v9125_v10, %v8266_v58  ;;  %v7014_v30 = vld [vmem:[%s9806_s7 + $0x380] ss:$16 sps:$4 sm:$0xff]  }
 0x3e8   :  { %5500 = vmatprep.mubr.bf16.mxu0 %v3903_v32  ;;  %5664 = vmatprep.mubr.bf16.mxu1 %v3903_v32 }
 0x3e9   :  { %5651 = vmatpush1.bf16.msra.mxu1 %v6939_v31  ;;  %5501 = vmatmul.mubr.bf16.vlgmr.msra.gmra.mrb[12].mxu0 %v3902_v35  ;;  %v7019_v31 = vld [vmem:[%s9806_s7 + $0x2cc] ss:$16 sps:$4 sm:$0xff]  }
 0x3ea   :  { %5510 = vmatpush1.bf16.msra.mxu0 %v6942_v33  ;;  %5652 = vmatprep.subr.bf16.mxu1 %v6947_v34  ;;  %v7022_v33 = vld [vmem:[%s9806_s7 + $0x3a4] ss:$16 sps:$4 sm:$0xff]  }
 0x3eb   :  { %5511 = vmatprep.subr.bf16.mxu0 %v6950_v37 }
 0x3ed   :  { %5653 = vmatpush1.bf16.msra.mxu1 %v6945_v38 }
 0x3ee   :  { %5512 = vmatpush1.bf16.msra.mxu0 %v6948_v39  ;;  %5654 = vmatprep.subr.bf16.mxu1 %v6953_v40  ;;  %v7017_v39 = vld [vmem:[%s9806_s7 + $0x2c8] ss:$16 sps:$4 sm:$0xff]  }
 0x3ef   :  { %5513 = vmatprep.subr.bf16.mxu0 %v6956_v41  ;;  %v7020_v41 = vld [vmem:[%s9806_s7 + $0x3a0] ss:$16 sps:$4 sm:$0xff]  }
 0x3f1   :  { %5655 = vmatpush1.bf16.msra.mxu1 %v6951_v42  ;;  %v7025_v42 = vld [vmem:[%s9806_s7 + $0x2ec] ss:$16 sps:$4 sm:$0xff]  }
 0x3f2   :  { %5514 = vmatpush1.bf16.msra.mxu0 %v6954_v43  ;;  %5656 = vmatprep.subr.bf16.mxu1 %v6959_v12  ;;  %v7028_v43 = vld [vmem:[%s9806_s7 + $0x3c4] ss:$16 sps:$4 sm:$0xff]   ;;  %v7023_v12 = vld [vmem:[%s9806_s7 + $0x2e8] ss:$16 sps:$4 sm:$0xff]  }
 0x3f3   :  { %5515 = vmatprep.subr.bf16.mxu0 %v6962_v44  ;;  %v7026_v44 = vld [vmem:[%s9806_s7 + $0x3c0] ss:$16 sps:$4 sm:$0xff]  }
 0x3f5   :  { %5657 = vmatpush1.bf16.msra.mxu1 %v6957_v45  ;;  %v7031_v45 = vld [vmem:[%s9806_s7 + $0x30c] ss:$16 sps:$4 sm:$0xff]  }
 0x3f6   :  { %5516 = vmatpush1.bf16.msra.mxu0 %v6960_v57  ;;  %5658 = vmatprep.subr.bf16.mxu1 %v6965_v46  ;;  %v7034_v57 = vld [vmem:[%s9806_s7 + $0x3e4] ss:$16 sps:$4 sm:$0xff]   ;;  %v7029_v46 = vld [vmem:[%s9806_s7 + $0x308] ss:$16 sps:$4 sm:$0xff]  }
 0x3f7   :  { %5517 = vmatprep.subr.bf16.mxu0 %v6968_v47  ;;  %v7032_v47 = vld [vmem:[%s9806_s7 + $0x3e0] ss:$16 sps:$4 sm:$0xff]  }
 0x3f9   :  { %5659 = vmatpush1.bf16.msra.mxu1 %v6963_v48  ;;  %v7037_v48 = vld [vmem:[%s9806_s7 + $0x32c] ss:$16 sps:$4 sm:$0xff]  }
 0x3fa   :  { %5518 = vmatpush1.bf16.msra.mxu0 %v6966_v50  ;;  %5660 = vmatprep.subr.bf16.mxu1 %v6971_v51  ;;  %v7040_v50 = vld [vmem:[%s9806_s7 + $0x404] ss:$16 sps:$4 sm:$0xff]  }
 0x3fb   :  { %5519 = vmatprep.subr.bf16.mxu0 %v6974_v59 }
 0x3fd   :  { %5661 = vmatpush1.bf16.msra.mxu1 %v6969_v60  ;;  %v7035_v60 = vld [vmem:[%s9806_s7 + $0x328] ss:$16 sps:$4 sm:$0xff]  }
 0x3fe   :  { %5520 = vmatpush1.bf16.msra.mxu0 %v6972_v61  ;;  %5662 = vmatprep.subr.bf16.mxu1 %v6977_v62  ;;  %v7038_v62 = vld [vmem:[%s9806_s7 + $0x400] ss:$16 sps:$4 sm:$0xff]  }
 0x3ff   :  { %5521 = vmatprep.subr.bf16.mxu0 %v6980_v0  ;;  %v7043_v0 = vld [vmem:[%s9806_s7 + $0x34c] ss:$16 sps:$4 sm:$0xff]  }
 0x401   :  { %5663 = vmatpush1.bf16.msra.mxu1 %v6975_v2 }
 0x402   :  { %5522 = vmatpush1.bf16.msra.mxu0 %v6978_v3  ;;  %5673 = vmatprep.subr.bf16.mxu1 %v6983_v5  ;;  %v7046_v3 = vld [vmem:[%s9806_s7 + $0x424] ss:$16 sps:$4 sm:$0xff]   ;;  %v7041_v5 = vld [vmem:[%s9806_s7 + $0x348] ss:$16 sps:$4 sm:$0xff]  }
 0x403   :  { %5523 = vmatprep.subr.bf16.mxu0 %v6986_v6  ;;  %v7044_v6 = vld [vmem:[%s9806_s7 + $0x420] ss:$16 sps:$4 sm:$0xff]  }
 0x404   :  { %5665 = vmatmul.mubr.bf16.vlgmr.msra.gmra.mrb[24].mxu1 %v3902_v35 }
 0x405   :  { %5674 = vmatpush1.bf16.msra.mxu1 %v6981_v7  ;;  %v7049_v7 = vld [vmem:[%s9806_s7 + $0x36c] ss:$16 sps:$4 sm:$0xff]  }
 0x406   :  { %5524 = vmatpush1.bf16.msra.mxu0 %v6984_v21  ;;  %5675 = vmatprep.subr.bf16.mxu1 %v6989_v49  ;;  %v7052_v21 = vld [vmem:[%s9806_s7 + $0x444] ss:$16 sps:$4 sm:$0xff]   ;;  %v7047_v49 = vld [vmem:[%s9806_s7 + $0x368] ss:$16 sps:$4 sm:$0xff]  }
 0x407   :  { %5525 = vmatprep.subr.bf16.mxu0 %v6992_v8  ;;  %v7050_v8 = vld [vmem:[%s9806_s7 + $0x440] ss:$16 sps:$4 sm:$0xff]  }
 0x409   :  { %5676 = vmatpush1.bf16.msra.mxu1 %v6987_v9  ;;  %v7055_v9 = vld [vmem:[%s9806_s7 + $0x38c] ss:$16 sps:$4 sm:$0xff]  }
 0x40a   :  { %5526 = vmatpush1.bf16.msra.mxu0 %v6990_v11  ;;  %5677 = vmatprep.subr.bf16.mxu1 %v6995_v13  ;;  %v7058_v11 = vld [vmem:[%s9806_s7 + $0x464] ss:$16 sps:$4 sm:$0xff]   ;;  %v7053_v13 = vld [vmem:[%s9806_s7 + $0x388] ss:$16 sps:$4 sm:$0xff]  }
 0x40b   :  { %5527 = vmatprep.subr.bf16.mxu0 %v6998_v14  ;;  %v7056_v14 = vld [vmem:[%s9806_s7 + $0x460] ss:$16 sps:$4 sm:$0xff]  }
 0x40d   :  { %5678 = vmatpush1.bf16.msra.mxu1 %v6993_v16  ;;  %v7061_v16 = vld [vmem:[%s9806_s7 + $0x3ac] ss:$16 sps:$4 sm:$0xff]  }
 0x40e   :  { %5528 = vmatpush1.bf16.msra.mxu0 %v6996_v53  ;;  %5679 = vmatprep.subr.bf16.mxu1 %v7001_v18  ;;  %v7064_v53 = vld [vmem:[%s9806_s7 + $0x484] ss:$16 sps:$4 sm:$0xff]   ;;  %v7059_v18 = vld [vmem:[%s9806_s7 + $0x3a8] ss:$16 sps:$4 sm:$0xff]  }
 0x40f   :  { %5529 = vmatprep.subr.bf16.mxu0 %v7004_v20  ;;  %v7062_v20 = vld [vmem:[%s9806_s7 + $0x480] ss:$16 sps:$4 sm:$0xff]  }
 0x411   :  { %5680 = vmatpush1.bf16.msra.mxu1 %v6999_v23  ;;  %v7067_v23 = vld [vmem:[%s9806_s7 + $0x3cc] ss:$16 sps:$4 sm:$0xff]  }
 0x412   :  { %5530 = vmatpush1.bf16.msra.mxu0 %v7002_v24  ;;  %5681 = vmatprep.subr.bf16.mxu1 %v7007_v25  ;;  %v7070_v24 = vld [vmem:[%s9806_s7 + $0x4a4] ss:$16 sps:$4 sm:$0xff]   ;;  %v7065_v25 = vld [vmem:[%s9806_s7 + $0x3c8] ss:$16 sps:$4 sm:$0xff]  }
 0x413   :  { %5531 = vmatprep.subr.bf16.mxu0 %v7010_v26  ;;  %v7068_v26 = vld [vmem:[%s9806_s7 + $0x4a0] ss:$16 sps:$4 sm:$0xff]  }
 0x415   :  { %5682 = vmatpush1.bf16.msra.mxu1 %v7005_v55  ;;  %v7073_v55 = vld [vmem:[%s9806_s7 + $0x3ec] ss:$16 sps:$4 sm:$0xff]  }
 0x416   :  { %5532 = vmatpush1.bf16.msra.mxu0 %v7008_v27  ;;  %5683 = vmatprep.subr.bf16.mxu1 %v7013_v19  ;;  %v7076_v27 = vld [vmem:[%s9806_s7 + $0x4c4] ss:$16 sps:$4 sm:$0xff]   ;;  %v7071_v19 = vld [vmem:[%s9806_s7 + $0x3e8] ss:$16 sps:$4 sm:$0xff]  }
 0x417   :  { %v3805_v32 = vpop.f32.mrb[12].mxu1  ;;  %5533 = vmatprep.subr.bf16.mxu0 %v7016_v28  ;;  %v7074_v28 = vld [vmem:[%s9806_s7 + $0x4c0] ss:$16 sps:$4 sm:$0xff]  }
 0x418   :  { %v3806_v34 = vadd.f32 %v3805_v32, %v3061_v22  ;;  %v3807_v35 = vpop.f32.mrb[13].mxu1  ;;  %v7079_v22 = vld [vmem:[%s9806_s7 + $0x40c] ss:$16 sps:$4 sm:$0xff]   ;;  %v7088_v32 = vld [vmem:[%s9806_s7 + $0x504] ss:$16 sps:$4 sm:$0xff]  }
 0x419   :  { %v3808_v37 = vadd.f32 %v3807_v35, %v3065_v15  ;;  %v3809_v38 = vpop.f32.mrb[14].mxu1  ;;  %5684 = vmatpush1.bf16.msra.mxu1 %v7011_v29  ;;  %v7082_v15 = vld [vmem:[%s9806_s7 + $0x4e4] ss:$16 sps:$4 sm:$0xff]   ;;  %v7077_v29 = vld [vmem:[%s9806_s7 + $0x408] ss:$16 sps:$4 sm:$0xff]  }
 0x41a   :  { %7268 = vtanh.f32 %v3806_v34  ;;  %v3810_v40 = vpop.f32.mrb[15].mxu1  ;;  %5534 = vmatpush1.bf16.msra.mxu0 %v7014_v30  ;;  %5685 = vmatprep.subr.bf16.mxu1 %v7019_v31  ;;  %v7080_v30 = vld [vmem:[%s9806_s7 + $0x4e0] ss:$16 sps:$4 sm:$0xff]   ;;  %v7085_v31 = vld [vmem:[%s9806_s7 + $0x42c] ss:$16 sps:$4 sm:$0xff]  }
 0x41b   :  { %7270 = vtanh.f32 %v3808_v37  ;;  %5535 = vmatprep.subr.bf16.mxu0 %v7022_v33  ;;  %v7083_v33 = vld [vmem:[%s9806_s7 + $0x428] ss:$16 sps:$4 sm:$0xff]   ;;  %v7086_v34 = vld [vmem:[%s9806_s7 + $0x500] ss:$16 sps:$4 sm:$0xff]   ;;  %v7091_v35 = vld [vmem:[%s9806_s7 + $0x44c] ss:$16 sps:$4 sm:$0xff]  }
 0x41c   :  { %v7094_v37 = vld [vmem:[%s9806_s7 + $0x524] ss:$16 sps:$4 sm:$0xff]   ;;  %v7089_v38 = vld [vmem:[%s9806_s7 + $0x448] ss:$16 sps:$4 sm:$0xff]   ;;  %v7097_v40 = vld [vmem:[%s9806_s7 + $0x46c] ss:$16 sps:$4 sm:$0xff]  }
 0x41d   :  { %5686 = vmatpush1.bf16.msra.mxu1 %v7017_v39  ;;  %v7092_v39 = vld [vmem:[%s9806_s7 + $0x520] ss:$16 sps:$4 sm:$0xff]  }
 0x41e   :  { %5536 = vmatpush1.bf16.msra.mxu0 %v7020_v41  ;;  %5687 = vmatprep.subr.bf16.mxu1 %v7025_v42  ;;  %v7100_v41 = vld [vmem:[%s9806_s7 + $0x544] ss:$16 sps:$4 sm:$0xff]   ;;  %v7095_v42 = vld [vmem:[%s9806_s7 + $0x468] ss:$16 sps:$4 sm:$0xff]  }
 0x41f   :  { %5537 = vmatprep.subr.bf16.mxu0 %v7028_v43  ;;  %v7098_v43 = vld [vmem:[%s9806_s7 + $0x540] ss:$16 sps:$4 sm:$0xff]  }
 0x421   :  { %5688 = vmatpush1.bf16.msra.mxu1 %v7023_v12  ;;  %v7103_v12 = vld [vmem:[%s9806_s7 + $0x48c] ss:$16 sps:$4 sm:$0xff]  }
 0x422   :  { %5538 = vmatpush1.bf16.msra.mxu0 %v7026_v44  ;;  %5689 = vmatprep.subr.bf16.mxu1 %v7031_v45  ;;  %v7106_v44 = vld [vmem:[%s9806_s7 + $0x564] ss:$16 sps:$4 sm:$0xff]   ;;  %v7101_v45 = vld [vmem:[%s9806_s7 + $0x488] ss:$16 sps:$4 sm:$0xff]  }
 0x423   :  { %5539 = vmatprep.subr.bf16.mxu0 %v7034_v57  ;;  %v7104_v57 = vld [vmem:[%s9806_s7 + $0x560] ss:$16 sps:$4 sm:$0xff]  }
 0x424   :  { %v7269_v51 = vpop.eup %7268 }
 0x425   :  { %v7271_v59 = vpop.eup %7270  ;;  %5690 = vmatpush1.bf16.msra.mxu1 %v7029_v46  ;;  %v3904_v2 = vpack.c.bf16 %v7269_v51, %v7269_v51  ;;  %v7109_v46 = vld [vmem:[%s9806_s7 + $0x4ac] ss:$16 sps:$4 sm:$0xff]   ;;  %v7107_v51 = vld [vmem:[%s9806_s7 + $0x4a8] ss:$16 sps:$4 sm:$0xff]  }
 0x426   :  { %v3905_v61 = vpack.c.bf16 %v7271_v59, %v7271_v59  ;;  %5540 = vmatpush1.bf16.msra.mxu0 %v7032_v47  ;;  %5691 = vmatprep.subr.bf16.mxu1 %v7037_v48  ;;  %v7112_v47 = vld [vmem:[%s9806_s7 + $0x584] ss:$16 sps:$4 sm:$0xff]   ;;  %v3069_v48 = vrot.slane %v9125_v10, %v312_v63  ;;  %v7110_v59 = vld [vmem:[%s9806_s7 + $0x580] ss:$16 sps:$4 sm:$0xff]  }
 0x427   :  { %5550 = vmatprep.subr.bf16.mxu0 %v7040_v50  ;;  %v3073_v50 = vrot.slane %v9125_v10, %v316_v1  ;;  %v7118_v1 = vld [vmem:[%s9806_s7 + $0x5a4] ss:$16 sps:$4 sm:$0xff]  }
 0x428   :  { %5541 = vmatprep.mubr.bf16.mxu0 %v3905_v61  ;;  %5705 = vmatprep.mubr.bf16.mxu1 %v3905_v61 }
 0x429   :  { %5542 = vmatmul.mubr.bf16.vlgmr.msra.gmra.mrb[12].mxu0 %v3904_v2  ;;  %5692 = vmatpush1.bf16.msra.mxu1 %v7035_v60  ;;  %v7115_v60 = vld [vmem:[%s9806_s7 + $0x4cc] ss:$16 sps:$4 sm:$0xff]  }
 0x42a   :  { %5551 = vmatpush1.bf16.msra.mxu0 %v7038_v62  ;;  %5693 = vmatprep.subr.bf16.mxu1 %v7043_v0 }
 0x42b   :  { %5552 = vmatprep.subr.bf16.mxu0 %v7046_v3  ;;  %v7113_v3 = vld [vmem:[%s9806_s7 + $0x4c8] ss:$16 sps:$4 sm:$0xff]  }
 0x42d   :  { %5694 = vmatpush1.bf16.msra.mxu1 %v7041_v5 }
 0x42e   :  { %5553 = vmatpush1.bf16.msra.mxu0 %v7044_v6  ;;  %5695 = vmatprep.subr.bf16.mxu1 %v7049_v7  ;;  %v7116_v6 = vld [vmem:[%s9806_s7 + $0x5a0] ss:$16 sps:$4 sm:$0xff]   ;;  %v7121_v7 = vld [vmem:[%s9806_s7 + $0x4ec] ss:$16 sps:$4 sm:$0xff]  }
 0x42f   :  { %5554 = vmatprep.subr.bf16.mxu0 %v7052_v21  ;;  %v7124_v21 = vld [vmem:[%s9806_s7 + $0x5c4] ss:$16 sps:$4 sm:$0xff]  }
 0x431   :  { %5696 = vmatpush1.bf16.msra.mxu1 %v7047_v49  ;;  %v7119_v49 = vld [vmem:[%s9806_s7 + $0x4e8] ss:$16 sps:$4 sm:$0xff]  }
 0x432   :  { %5555 = vmatpush1.bf16.msra.mxu0 %v7050_v8  ;;  %5697 = vmatprep.subr.bf16.mxu1 %v7055_v9  ;;  %v7122_v8 = vld [vmem:[%s9806_s7 + $0x5c0] ss:$16 sps:$4 sm:$0xff]   ;;  %v7127_v9 = vld [vmem:[%s9806_s7 + $0x50c] ss:$16 sps:$4 sm:$0xff]  }
 0x433   :  { %5556 = vmatprep.subr.bf16.mxu0 %v7058_v11  ;;  %v7130_v11 = vld [vmem:[%s9806_s7 + $0x5e4] ss:$16 sps:$4 sm:$0xff]  }
 0x435   :  { %5698 = vmatpush1.bf16.msra.mxu1 %v7053_v13  ;;  %v7125_v13 = vld [vmem:[%s9806_s7 + $0x508] ss:$16 sps:$4 sm:$0xff]  }
 0x436   :  { %5557 = vmatpush1.bf16.msra.mxu0 %v7056_v14  ;;  %5699 = vmatprep.subr.bf16.mxu1 %v7061_v16  ;;  %v7128_v14 = vld [vmem:[%s9806_s7 + $0x5e0] ss:$16 sps:$4 sm:$0xff]   ;;  %v7133_v16 = vld [vmem:[%s9806_s7 + $0x52c] ss:$16 sps:$4 sm:$0xff]  }
 0x437   :  { %5558 = vmatprep.subr.bf16.mxu0 %v7064_v53  ;;  %v7136_v53 = vld [vmem:[%s9806_s7 + $0x604] ss:$16 sps:$4 sm:$0xff]  }
 0x439   :  { %5700 = vmatpush1.bf16.msra.mxu1 %v7059_v18 }
 0x43a   :  { %5559 = vmatpush1.bf16.msra.mxu0 %v7062_v20  ;;  %5701 = vmatprep.subr.bf16.mxu1 %v7067_v23  ;;  %v7131_v23 = vld [vmem:[%s9806_s7 + $0x528] ss:$16 sps:$4 sm:$0xff]  }
 0x43b   :  { %5560 = vmatprep.subr.bf16.mxu0 %v7070_v24 }
 0x43d   :  { %5702 = vmatpush1.bf16.msra.mxu1 %v7065_v25  ;;  %v7134_v25 = vld [vmem:[%s9806_s7 + $0x600] ss:$16 sps:$4 sm:$0xff]  }
 0x43e   :  { %5561 = vmatpush1.bf16.msra.mxu0 %v7068_v26  ;;  %5703 = vmatprep.subr.bf16.mxu1 %v7073_v55  ;;  %v7139_v26 = vld [vmem:[%s9806_s7 + $0x54c] ss:$16 sps:$4 sm:$0xff]  }
 0x43f   :  { %5562 = vmatprep.subr.bf16.mxu0 %v7076_v27  ;;  %v7142_v27 = vld [vmem:[%s9806_s7 + $0x624] ss:$16 sps:$4 sm:$0xff]  }
 0x441   :  { %5704 = vmatpush1.bf16.msra.mxu1 %v7071_v19  ;;  %v7137_v19 = vld [vmem:[%s9806_s7 + $0x548] ss:$16 sps:$4 sm:$0xff]  }
 0x442   :  { %5563 = vmatpush1.bf16.msra.mxu0 %v7074_v28  ;;  %5714 = vmatprep.subr.bf16.mxu1 %v7079_v22  ;;  %v7140_v28 = vld [vmem:[%s9806_s7 + $0x620] ss:$16 sps:$4 sm:$0xff]   ;;  %v7145_v22 = vld [vmem:[%s9806_s7 + $0x56c] ss:$16 sps:$4 sm:$0xff]  }
 0x443   :  { %5564 = vmatprep.subr.bf16.mxu0 %v7082_v15  ;;  %v7148_v15 = vld [vmem:[%s9806_s7 + $0x644] ss:$16 sps:$4 sm:$0xff]  }
 0x444   :  { %5706 = vmatmul.mubr.bf16.vlgmr.msra.gmra.mrb[24].mxu1 %v3904_v2 }
 0x445   :  { %5715 = vmatpush1.bf16.msra.mxu1 %v7077_v29  ;;  %v7143_v29 = vld [vmem:[%s9806_s7 + $0x568] ss:$16 sps:$4 sm:$0xff]  }
 0x446   :  { %5565 = vmatpush1.bf16.msra.mxu0 %v7080_v30  ;;  %5716 = vmatprep.subr.bf16.mxu1 %v7085_v31  ;;  %v7146_v30 = vld [vmem:[%s9806_s7 + $0x640] ss:$16 sps:$4 sm:$0xff]   ;;  %v7151_v31 = vld [vmem:[%s9806_s7 + $0x58c] ss:$16 sps:$4 sm:$0xff]  }
 0x447   :  { %5566 = vmatprep.subr.bf16.mxu0 %v7088_v32  ;;  %v7154_v32 = vld [vmem:[%s9806_s7 + $0x664] ss:$16 sps:$4 sm:$0xff]  }
 0x449   :  { %5717 = vmatpush1.bf16.msra.mxu1 %v7083_v33  ;;  %v7149_v33 = vld [vmem:[%s9806_s7 + $0x588] ss:$16 sps:$4 sm:$0xff]  }
 0x44a   :  { %5567 = vmatpush1.bf16.msra.mxu0 %v7086_v34  ;;  %5718 = vmatprep.subr.bf16.mxu1 %v7091_v35  ;;  %v7152_v34 = vld [vmem:[%s9806_s7 + $0x660] ss:$16 sps:$4 sm:$0xff]   ;;  %v7157_v35 = vld [vmem:[%s9806_s7 + $0x5ac] ss:$16 sps:$4 sm:$0xff]  }
 0x44b   :  { %5568 = vmatprep.subr.bf16.mxu0 %v7094_v37  ;;  %v7160_v37 = vld [vmem:[%s9806_s7 + $0x684] ss:$16 sps:$4 sm:$0xff]  }
 0x44d   :  { %5719 = vmatpush1.bf16.msra.mxu1 %v7089_v38  ;;  %v7155_v38 = vld [vmem:[%s9806_s7 + $0x5a8] ss:$16 sps:$4 sm:$0xff]  }
 0x44e   :  { %5569 = vmatpush1.bf16.msra.mxu0 %v7092_v39  ;;  %5720 = vmatprep.subr.bf16.mxu1 %v7097_v40  ;;  %v7158_v39 = vld [vmem:[%s9806_s7 + $0x680] ss:$16 sps:$4 sm:$0xff]   ;;  %v7163_v40 = vld [vmem:[%s9806_s7 + $0x5cc] ss:$16 sps:$4 sm:$0xff]  }
 0x44f   :  { %5570 = vmatprep.subr.bf16.mxu0 %v7100_v41  ;;  %v7166_v41 = vld [vmem:[%s9806_s7 + $0x6a4] ss:$16 sps:$4 sm:$0xff]  }
 0x451   :  { %5721 = vmatpush1.bf16.msra.mxu1 %v7095_v42  ;;  %v7161_v42 = vld [vmem:[%s9806_s7 + $0x5c8] ss:$16 sps:$4 sm:$0xff]  }
 0x452   :  { %5571 = vmatpush1.bf16.msra.mxu0 %v7098_v43  ;;  %5722 = vmatprep.subr.bf16.mxu1 %v7103_v12  ;;  %v7164_v43 = vld [vmem:[%s9806_s7 + $0x6a0] ss:$16 sps:$4 sm:$0xff]   ;;  %v7169_v12 = vld [vmem:[%s9806_s7 + $0x5ec] ss:$16 sps:$4 sm:$0xff]  }
 0x453   :  { %5572 = vmatprep.subr.bf16.mxu0 %v7106_v44  ;;  %v7172_v44 = vld [vmem:[%s9806_s7 + $0x6c4] ss:$16 sps:$4 sm:$0xff]  }
 0x455   :  { %5723 = vmatpush1.bf16.msra.mxu1 %v7101_v45  ;;  %v7167_v45 = vld [vmem:[%s9806_s7 + $0x5e8] ss:$16 sps:$4 sm:$0xff]  }
 0x456   :  { %5573 = vmatpush1.bf16.msra.mxu0 %v7104_v57  ;;  %5724 = vmatprep.subr.bf16.mxu1 %v7109_v46  ;;  %v7170_v57 = vld [vmem:[%s9806_s7 + $0x6c0] ss:$16 sps:$4 sm:$0xff]   ;;  %v7175_v46 = vld [vmem:[%s9806_s7 + $0x60c] ss:$16 sps:$4 sm:$0xff]  }
 0x457   :  { %v3846_v63 = vpop.f32.mrb[16].mxu1  ;;  %5574 = vmatprep.subr.bf16.mxu0 %v7112_v47  ;;  %v7178_v47 = vld [vmem:[%s9806_s7 + $0x6e4] ss:$16 sps:$4 sm:$0xff]  }
 0x458   :  { %v3847_v61 = vadd.f32 %v3846_v63, %v3069_v48  ;;  %v3848_v62 = vpop.f32.mrb[17].mxu1  ;;  %v7173_v48 = vld [vmem:[%s9806_s7 + $0x608] ss:$16 sps:$4 sm:$0xff]   ;;  %v7182_v63 = vld [vmem:[%s9806_s7 + $0x700] ss:$16 sps:$4 sm:$0xff]  }
 0x459   :  { %v3849_v0 = vadd.f32 %v3848_v62, %v3073_v50  ;;  %v3850_v2 = vpop.f32.mrb[18].mxu1  ;;  %5725 = vmatpush1.bf16.msra.mxu1 %v7107_v51  ;;  %v7176_v50 = vld [vmem:[%s9806_s7 + $0x6e0] ss:$16 sps:$4 sm:$0xff]   ;;  %v7181_v51 = vld [vmem:[%s9806_s7 + $0x62c] ss:$16 sps:$4 sm:$0xff]  }
 0x45a   :  { %7272 = vtanh.f32 %v3847_v61  ;;  %v3851_v5 = vpop.f32.mrb[19].mxu1  ;;  %5575 = vmatpush1.bf16.msra.mxu0 %v7110_v59  ;;  %5726 = vmatprep.subr.bf16.mxu1 %v7115_v60  ;;  %v7184_v59 = vld [vmem:[%s9806_s7 + $0x704] ss:$16 sps:$4 sm:$0xff]   ;;  %v7179_v60 = vld [vmem:[%s9806_s7 + $0x628] ss:$16 sps:$4 sm:$0xff]  }
 0x45b   :  { %7274 = vtanh.f32 %v3849_v0  ;;  %5576 = vmatprep.subr.bf16.mxu0 %v7118_v1  ;;  %v7187_v1 = vld [vmem:[%s9806_s7 + $0x64c] ss:$16 sps:$4 sm:$0xff]   ;;  %v7190_v61 = vld [vmem:[%s9806_s7 + $0x724] ss:$16 sps:$4 sm:$0xff]   ;;  %v7185_v62 = vld [vmem:[%s9806_s7 + $0x648] ss:$16 sps:$4 sm:$0xff]  }
 0x45c   :  { %v7188_v0 = vld [vmem:[%s9806_s7 + $0x720] ss:$16 sps:$4 sm:$0xff]   ;;  %v7193_v2 = vld [vmem:[%s9806_s7 + $0x66c] ss:$16 sps:$4 sm:$0xff]   ;;  %v7191_v5 = vld [vmem:[%s9806_s7 + $0x668] ss:$16 sps:$4 sm:$0xff]  }
 0x45d   :  { %5727 = vmatpush1.bf16.msra.mxu1 %v7113_v3  ;;  %v7196_v3 = vld [vmem:[%s9806_s7 + $0x744] ss:$16 sps:$4 sm:$0xff]  }
 0x45e   :  { %5577 = vmatpush1.bf16.msra.mxu0 %v7116_v6  ;;  %5728 = vmatprep.subr.bf16.mxu1 %v7121_v7  ;;  %v7194_v6 = vld [vmem:[%s9806_s7 + $0x740] ss:$16 sps:$4 sm:$0xff]   ;;  %v7199_v7 = vld [vmem:[%s9806_s7 + $0x68c] ss:$16 sps:$4 sm:$0xff]  }
 0x45f   :  { %5578 = vmatprep.subr.bf16.mxu0 %v7124_v21  ;;  %v7202_v21 = vld [vmem:[%s9806_s7 + $0x764] ss:$16 sps:$4 sm:$0xff]  }
 0x461   :  { %5729 = vmatpush1.bf16.msra.mxu1 %v7119_v49  ;;  %v7197_v49 = vld [vmem:[%s9806_s7 + $0x688] ss:$16 sps:$4 sm:$0xff]  }
 0x462   :  { %5579 = vmatpush1.bf16.msra.mxu0 %v7122_v8  ;;  %5730 = vmatprep.subr.bf16.mxu1 %v7127_v9  ;;  %v7200_v8 = vld [vmem:[%s9806_s7 + $0x760] ss:$16 sps:$4 sm:$0xff]   ;;  %v7205_v9 = vld [vmem:[%s9806_s7 + $0x6ac] ss:$16 sps:$4 sm:$0xff]  }
 0x463   :  { %5580 = vmatprep.subr.bf16.mxu0 %v7130_v11  ;;  %v7208_v11 = vld [vmem:[%s9806_s7 + $0x784] ss:$16 sps:$4 sm:$0xff]  }
 0x464   :  { %v7273_v18 = vpop.eup %7272 }
 0x465   :  { %v7275_v20 = vpop.eup %7274  ;;  %5731 = vmatpush1.bf16.msra.mxu1 %v7125_v13  ;;  %v3906_v55 = vpack.c.bf16 %v7273_v18, %v7273_v18  ;;  %v3077_v13 = vrot.slane %v9125_v10, %v320_v17  ;;  %v7211_v18 = vld [vmem:[%s9806_s7 + $0x6cc] ss:$16 sps:$4 sm:$0xff]  }
 0x466   :  { %v3907_v24 = vpack.c.bf16 %v7275_v20, %v7275_v20  ;;  %5581 = vmatpush1.bf16.msra.mxu0 %v7128_v14  ;;  %5732 = vmatprep.subr.bf16.mxu1 %v7133_v16  ;;  %v3081_v14 = vrot.slane %v9125_v10, %v324_v4  ;;  %v7203_v16 = vld [vmem:[%s9806_s7 + $0x6a8] ss:$16 sps:$4 sm:$0xff]  }
 0x467   :  { %5591 = vmatprep.subr.bf16.mxu0 %v7136_v53  ;;  %v7206_v53 = vld [vmem:[%s9806_s7 + $0x780] ss:$16 sps:$4 sm:$0xff]  }
 0x468   :  { %5582 = vmatprep.mubr.bf16.mxu0 %v3907_v24  ;;  %5746 = vmatprep.mubr.bf16.mxu1 %v3907_v24  ;;  %v7209_v24 = vld [vmem:[%s9806_s7 + $0x6c8] ss:$16 sps:$4 sm:$0xff]  }
 0x469   :  { %5583 = vmatmul.mubr.bf16.vlgmr.msra.gmra.mrb[12].mxu0 %v3906_v55  ;;  %5733 = vmatpush1.bf16.msra.mxu1 %v7131_v23 }
 0x46a   :  { %5592 = vmatpush1.bf16.msra.mxu0 %v7134_v25  ;;  %5734 = vmatprep.subr.bf16.mxu1 %v7139_v26  ;;  %v7212_v26 = vld [vmem:[%s9806_s7 + $0x7a0] ss:$16 sps:$4 sm:$0xff]  }
 0x46b   :  { %5593 = vmatprep.subr.bf16.mxu0 %v7142_v27  ;;  %v7220_v27 = vld [vmem:[%s9806_s7 + $0x7c4] ss:$16 sps:$4 sm:$0xff]  }
 0x46d   :  { %5735 = vmatpush1.bf16.msra.mxu1 %v7137_v19  ;;  %v7215_v19 = vld [vmem:[%s9806_s7 + $0x6e8] ss:$16 sps:$4 sm:$0xff]  }
 0x46e   :  { %5594 = vmatpush1.bf16.msra.mxu0 %v7140_v28  ;;  %5736 = vmatprep.subr.bf16.mxu1 %v7145_v22  ;;  %v7218_v28 = vld [vmem:[%s9806_s7 + $0x7c0] ss:$16 sps:$4 sm:$0xff]   ;;  %v7223_v22 = vld [vmem:[%s9806_s7 + $0x70c] ss:$16 sps:$4 sm:$0xff]  }
 0x46f   :  { %5595 = vmatprep.subr.bf16.mxu0 %v7148_v15  ;;  %v7226_v15 = vld [vmem:[%s9806_s7 + $0x7e4] ss:$16 sps:$4 sm:$0xff]  }
 0x471   :  { %5737 = vmatpush1.bf16.msra.mxu1 %v7143_v29  ;;  %v7221_v29 = vld [vmem:[%s9806_s7 + $0x708] ss:$16 sps:$4 sm:$0xff]  }
 0x472   :  { %5596 = vmatpush1.bf16.msra.mxu0 %v7146_v30  ;;  %5738 = vmatprep.subr.bf16.mxu1 %v7151_v31  ;;  %v7224_v30 = vld [vmem:[%s9806_s7 + $0x7e0] ss:$16 sps:$4 sm:$0xff]   ;;  %v7229_v31 = vld [vmem:[%s9806_s7 + $0x72c] ss:$16 sps:$4 sm:$0xff]  }
 0x473   :  { %5597 = vmatprep.subr.bf16.mxu0 %v7154_v32 }
 0x475   :  { %5739 = vmatpush1.bf16.msra.mxu1 %v7149_v33 }
 0x476   :  { %5598 = vmatpush1.bf16.msra.mxu0 %v7152_v34  ;;  %5740 = vmatprep.subr.bf16.mxu1 %v7157_v35  ;;  %v7227_v34 = vld [vmem:[%s9806_s7 + $0x728] ss:$16 sps:$4 sm:$0xff]  }
 0x477   :  { %5599 = vmatprep.subr.bf16.mxu0 %v7160_v37  ;;  %v7232_v37 = vld [vmem:[%s9806_s7 + $0x74c] ss:$16 sps:$4 sm:$0xff]  }
 0x479   :  { %5741 = vmatpush1.bf16.msra.mxu1 %v7155_v38 }
 0x47a   :  { %5600 = vmatpush1.bf16.msra.mxu0 %v7158_v39  ;;  %5742 = vmatprep.subr.bf16.mxu1 %v7163_v40  ;;  %v7230_v39 = vld [vmem:[%s9806_s7 + $0x748] ss:$16 sps:$4 sm:$0xff]   ;;  %v7235_v40 = vld [vmem:[%s9806_s7 + $0x76c] ss:$16 sps:$4 sm:$0xff]  }
 0x47b   :  { %5601 = vmatprep.subr.bf16.mxu0 %v7166_v41  ;;  %v7233_v41 = vld [vmem:[%s9806_s7 + $0x768] ss:$16 sps:$4 sm:$0xff]  }
 0x47d   :  { %5743 = vmatpush1.bf16.msra.mxu1 %v7161_v42  ;;  %v7238_v42 = vld [vmem:[%s9806_s7 + $0x78c] ss:$16 sps:$4 sm:$0xff]  }
 0x47e   :  { %5602 = vmatpush1.bf16.msra.mxu0 %v7164_v43  ;;  %5744 = vmatprep.subr.bf16.mxu1 %v7169_v12  ;;  %v7236_v43 = vld [vmem:[%s9806_s7 + $0x788] ss:$16 sps:$4 sm:$0xff]   ;;  %v7241_v12 = vld [vmem:[%s9806_s7 + $0x7ac] ss:$16 sps:$4 sm:$0xff]  }
 0x47f   :  { %5603 = vmatprep.subr.bf16.mxu0 %v7172_v44  ;;  %v7239_v44 = vld [vmem:[%s9806_s7 + $0x7a8] ss:$16 sps:$4 sm:$0xff]  }
 0x481   :  { %5745 = vmatpush1.bf16.msra.mxu1 %v7167_v45  ;;  %v7244_v45 = vld [vmem:[%s9806_s7 + $0x7cc] ss:$16 sps:$4 sm:$0xff]  }
 0x482   :  { %5604 = vmatpush1.bf16.msra.mxu0 %v7170_v57  ;;  %5755 = vmatprep.subr.bf16.mxu1 %v7175_v46  ;;  %v7242_v57 = vld [vmem:[%s9806_s7 + $0x7c8] ss:$16 sps:$4 sm:$0xff]   ;;  %v7247_v46 = vld [vmem:[%s9806_s7 + $0x7ec] ss:$16 sps:$4 sm:$0xff]  }
 0x483   :  { %5605 = vmatprep.subr.bf16.mxu0 %v7178_v47  ;;  %v7245_v47 = vld [vmem:[%s9806_s7 + $0x7e8] ss:$16 sps:$4 sm:$0xff]  }
 0x484   :  { %5747 = vmatmul.mubr.bf16.vlgmr.msra.gmra.mrb[24].mxu1 %v3906_v55  ;;  %v7217_v55 = vld [vmem:[%s9806_s7 + $0x6ec] ss:$16 sps:$4 sm:$0xff]  }
 0x485   :  { %5756 = vmatpush1.bf16.msra.mxu1 %v7173_v48  ;;  %v4166_v48 = vld [vmem:[%s9808_s8] sm:$0xf] }
 0x486   :  { %5606 = vmatpush1.bf16.msra.mxu0 %v7176_v50  ;;  %5757 = vmatprep.subr.bf16.mxu1 %v7181_v51  ;;  %v4171_v50 = vrot.slane %v4166_v48, %v8255_v54  ;;  %v4175_v51 = vrot.slane %v4166_v48, %v8263_v56  ;;  %v4183_v54 = vrot.slane %v4166_v48, %v8266_v58 }
 0x487   :  { %5607 = vmatprep.subr.bf16.mxu0 %v7184_v59 }
 0x489   :  { %5758 = vmatpush1.bf16.msra.mxu1 %v7179_v60 }
 0x48a   :  { %5608 = vmatpush1.bf16.msra.mxu0 %v7182_v63  ;;  %5759 = vmatprep.subr.bf16.mxu1 %v7187_v1 }
 0x48b   :  { %5609 = vmatprep.subr.bf16.mxu0 %v7190_v61 }
 0x48d   :  { %5760 = vmatpush1.bf16.msra.mxu1 %v7185_v62 }
 0x48e   :  { %5610 = vmatpush1.bf16.msra.mxu0 %v7188_v0  ;;  %5761 = vmatprep.subr.bf16.mxu1 %v7193_v2 }
 0x48f   :  { %5611 = vmatprep.subr.bf16.mxu0 %v7196_v3 }
 0x491   :  { %5762 = vmatpush1.bf16.msra.mxu1 %v7191_v5  ;;  %v4179_v5 = vrot.slane %v4166_v48, %v8337_v36 }
 0x492   :  { %5612 = vmatpush1.bf16.msra.mxu0 %v7194_v6  ;;  %5763 = vmatprep.subr.bf16.mxu1 %v7199_v7 }
 0x493   :  { %5613 = vmatprep.subr.bf16.mxu0 %v7202_v21 }
 0x495   :  { %5764 = vmatpush1.bf16.msra.mxu1 %v7197_v49 }
 0x496   :  { %5614 = vmatpush1.bf16.msra.mxu0 %v7200_v8  ;;  %5765 = vmatprep.subr.bf16.mxu1 %v7205_v9 }
 0x497   :  { %v3887_v17 = vpop.f32.mrb[20].mxu1  ;;  %5615 = vmatprep.subr.bf16.mxu0 %v7208_v11 }
 0x498   :  { %v3888_v4 = vadd.f32 %v3887_v17, %v3077_v13  ;;  %v3889_v10 = vpop.f32.mrb[21].mxu1 }
 0x499   :  { %v3890_v20 = vadd.f32 %v3889_v10, %v3081_v14  ;;  %v3891_v23 = vpop.f32.mrb[22].mxu1  ;;  %5766 = vmatpush1.bf16.msra.mxu1 %v7203_v16 }
 0x49a   :  { %7276 = vtanh.f32 %v3888_v4  ;;  %v3892_v25 = vpop.f32.mrb[23].mxu1  ;;  %5616 = vmatpush1.bf16.msra.mxu0 %v7206_v53  ;;  %5767 = vmatprep.subr.bf16.mxu1 %v7211_v18 }
 0x49b   :  { %7278 = vtanh.f32 %v3890_v20  ;;  %5617 = vmatprep.subr.bf16.mxu0 %v7214_v52 }
 0x49d   :  { %5768 = vmatpush1.bf16.msra.mxu1 %v7209_v24 }
 0x49e   :  { %5618 = vmatpush1.bf16.msra.mxu0 %v7212_v26  ;;  %5769 = vmatprep.subr.bf16.mxu1 %v7217_v55 }
 0x49f   :  { %5619 = vmatprep.subr.bf16.mxu0 %v7220_v27 }
 0x4a1   :  { %5770 = vmatpush1.bf16.msra.mxu1 %v7215_v19 }
 0x4a2   :  { %5620 = vmatpush1.bf16.msra.mxu0 %v7218_v28  ;;  %5771 = vmatprep.subr.bf16.mxu1 %v7223_v22 }
 0x4a3   :  { %5621 = vmatprep.subr.bf16.mxu0 %v7226_v15 }
 0x4a4   :  { %v7277_v32 = vpop.eup %7276 }
 0x4a5   :  { %v7279_v33 = vpop.eup %7278  ;;  %5772 = vmatpush1.bf16.msra.mxu1 %v7221_v29  ;;  %v3908_v38 = vpack.c.bf16 %v7277_v32, %v7277_v32 }
 0x4a6   :  { %v3909_v35 = vpack.c.bf16 %v7279_v33, %v7279_v33  ;;  %5622 = vmatpush1.bf16.msra.mxu0 %v7224_v30  ;;  %5773 = vmatprep.subr.bf16.mxu1 %v7229_v31 }
 0x4a8   :  { %5623 = vmatprep.mubr.bf16.mxu0 %v3909_v35  ;;  %5787 = vmatprep.mubr.bf16.mxu1 %v3909_v35 }
 0x4a9   :  { %5624 = vmatmul.mubr.bf16.vlgmr.msra.gmra.mrb[12].mxu0 %v3908_v38  ;;  %5774 = vmatpush1.bf16.msra.mxu1 %v7227_v34 }
 0x4aa   :  { %5775 = vmatprep.subr.bf16.mxu1 %v7232_v37 }
 0x4ad   :  { %5776 = vmatpush1.bf16.msra.mxu1 %v7230_v39 }
 0x4ae   :  { %5777 = vmatprep.subr.bf16.mxu1 %v7235_v40 }
 0x4b1   :  { %5778 = vmatpush1.bf16.msra.mxu1 %v7233_v41 }
 0x4b2   :  { %5779 = vmatprep.subr.bf16.mxu1 %v7238_v42 }
 0x4b5   :  { %5780 = vmatpush1.bf16.msra.mxu1 %v7236_v43 }
 0x4b6   :  { %5781 = vmatprep.subr.bf16.mxu1 %v7241_v12 }
 0x4b9   :  { %5782 = vmatpush1.bf16.msra.mxu1 %v7239_v44 }
 0x4ba   :  { %5783 = vmatprep.subr.bf16.mxu1 %v7244_v45 }
 0x4bd   :  { %5784 = vmatpush1.bf16.msra.mxu1 %v7242_v57 }
 0x4be   :  { %5785 = vmatprep.subr.bf16.mxu1 %v7247_v46 }
 0x4c1   :  { %5786 = vmatpush1.bf16.msra.mxu1 %v7245_v47 }
 0x4c4   :  { %5788 = vmatmul.mubr.bf16.vlgmr.msra.gmra.mrb[24].mxu1 %v3908_v38 }
 0x57c   :  { %v5625_v59 = vpop.f32.mrb[12].mxu0 }
 0x57d   :  { %v6612_v60 = vadd.f32 %v5625_v59, %v4171_v50  ;;  %v5627_v63 = vpop.f32.mrb[13].mxu0 }
 0x57e   :  { %v6613_v1 = vadd.f32 %v5627_v63, %v4175_v51  ;;  %v5629_v61 = vpop.f32.mrb[14].mxu0 }
 0x57f   :  { %7280 = vtanh.f32 %v6612_v60  ;;  %v5630_v62 = vpop.f32.mrb[15].mxu0 }
 0x580   :  { %7282 = vtanh.f32 %v6613_v1 }
 0x589   :  { %v7281_v0 = vpop.eup %7280 }
 0x58a   :  { %v7283_v2 = vpop.eup %7282 }
 0x58b   :  { %v6600_v3 = vpack.c.bf16 %v7283_v2, %v7281_v0 }
 0x58d   :  { %5816 = vst [vmem:[%s9809_s10] sm:$0xff] %v6600_v3 }
 0x597   :  { %v5789_v56 = vpop.f32.mrb[24].mxu1 }
 0x598   :  { %v6614_v6 = vadd.f32 %v5789_v56, %v4179_v5  ;;  %v5791_v7 = vpop.f32.mrb[25].mxu1 }
 0x599   :  { %v6615_v21 = vadd.f32 %v5791_v7, %v4183_v54  ;;  %v5793_v49 = vpop.f32.mrb[26].mxu1 }
 0x59a   :  { %7284 = vtanh.f32 %v6614_v6  ;;  %v5794_v8 = vpop.f32.mrb[27].mxu1 }
 0x59b   :  { %7286 = vtanh.f32 %v6615_v21 }
 0x5a4   :  { %v7285_v9 = vpop.eup %7284 }
 0x5a5   :  { %v7287_v11 = vpop.eup %7286 }
 0x5a6   :  { %v6601_v13 = vpack.c.bf16 %v7287_v11, %v7285_v9 }
 0x5a8   :  { %5817 = vst [vmem:[%s9809_s10 + $0x8] sm:$0xff] %v6601_v13 }

// kernel: ae_vgg16_forward.16
= control target key start
LH: loop header
LB: loop body
LE: loop exit
PB: predicated region body
PF: predicated region fallthrough
CT: control target
= control target key end

     0   :  { %s1465_s0 = inlined_call_operand.vmem [shape: bf16[32,768], index: 0, kind: input, shape index: {}]   ;;  %s1466_s1 = inlined_call_operand.vmem [shape: bf16[768,256], index: 1, kind: input, shape index: {}]   ;;  %s1467_s2 = inlined_call_operand.vmem [shape: f32[1,256], index: 2, kind: input, shape index: {}]   ;;  %s1468_s3 = inlined_call_operand.vmem [shape: bf16[32,256], index: 3, kind: output, shape index: {}]  }
   0x1   :  { %1470 = sst [smem:[#allocation7_spill]] %s1465_s0 }
   0x2   :  { %1471 = sst [smem:[#allocation8_spill]] %s1466_s1 }
   0x3   :  { %s1200_s12 = smov 0   ;;  %s1202_s13 = smov 0  }
   0x4   :  { %s1204_s14 = smov 0   ;;  %s1206_s15 = smov 0  }
   0x5   :  { %s1208_s16 = smov 0   ;;  %s1210_s17 = smov 0  }
   0x6   :  { %s1212_s18 = smov 0   ;;  %s1214_s19 = smov 0  }
   0x7   :  { %s1216_s20 = smov 0   ;;  %s1218_s21 = smov 0  }
   0x8   :  { %s1220_s22 = smov 0  }
   0x9 LB: > { %s875_s23 = sadd.s32 4294967295, %s1178_s22   ;;  %s25_s24 = sadd.s32 1, %s1170_s20  ;;  %s1178_s22 = sphi %s1220_s22, %s13_s22   ;;  %s1174_s21 = sphi %s1218_s21, %s1488_s21   ;;  %s1170_s20 = sphi %s1216_s20, %s1487_s20   ;;  %s1166_s19 = sphi %s1214_s19, %s1486_s19   ;;  %s1162_s18 = sphi %s1212_s18, %s1485_s18   ;;  %s1158_s17 = sphi %s1210_s17, %s1484_s17   ;;  %s1154_s16 = sphi %s1208_s16, %s1483_s16   ;;  %s1150_s15 = sphi %s1206_s15, %s1482_s15   ;;  %s1146_s14 = sphi %s1204_s14, %s1481_s14   ;;  %s1142_s13 = sphi %s1202_s13, %s1480_s13   ;;  %s1138_s12 = sphi %s1200_s12, %s1479_s12  }
   0xa   : > { %p26_p0 = scmp.ge.s32.totalorder %s25_s24, 3  ;;  %s28_s25 = sadd.s32 1, %s1174_s21 }
   0xb   : > { %s41_s26 = sadd.s32 1, %s1158_s17  ;;  %p48_p1 = scmp.ne.s32.totalorder %s1158_s17, %s1154_s16 }
   0xc   : > { %s1490_s24 = smov (%p26_p0, %s25_s24), 0  ;;  %s1492_s25 = smov (!%p26_p0, %s28_s25), %s1174_s21 }
   0xd   : > { %s37_s27 = ssub.s32 %s1170_s20, %s1490_s24  ;;  %p49_p2 = scmp.eq.s32.totalorder %s1178_s22, 0 }
   0xe   : > { %p30_p3 = scmp.ge.s32.totalorder %s1492_s25, 2  ;;  %p39_p4 = scmp.eq.s32.totalorder %s37_s27, 0 }
   0xf   : > { %p1267_p5 = por %p49_p2, %p48_p1  ;;  %s69_s29 = sadd.s32 1, %s1150_s15 }
  0x10   : > { %s1494_s25 = smov (%p30_p3, %s1492_s25), 0  ;;  %p76_p6 = scmp.ne.s32.totalorder %s1150_s15, %s1146_s14 }
  0x11   : > { %1473 = sst [smem:[#allocation6_spill]] %s1494_s25  ;;  %s65_s4 = ssub.s32 %s1174_s21, %s1494_s25 }
  0x12   : > { %s1275_s30 = scalar_select %p39_p4, %s1158_s17, %s41_s26  }
  0x13   : > { %s66_s5 = sor.u32 %s65_s4, %s37_s27  ;;  %p121_p7 = scmp.eq.s32.totalorder %s65_s4, 0 }
  0x14   : > { %p67_p8 = scmp.eq.s32.totalorder %s66_s5, 0  ;;  %p1281_p9 = por %p76_p6, %p49_p2 }
  0x15   : > { %s123_s7 = sadd.s32 1, %s1142_s13  ;;  %p133_p10 = scmp.ne.s32.totalorder %s1142_s13, %s1138_s12 }
  0x16   : > { %s1289_s8 = scalar_select %p67_p8, %s1150_s15, %s69_s29  }
  0x17   : > { %s1292_s9 = scalar_select %p121_p7, %s1142_s13, %s123_s7  }
  0x18   : > { %p134_p11 = scmp.eq.s32.totalorder %s875_s23, 5  ;;  %p878_p13 = scmp.ge.s32.totalorder %s1178_s22, 6 }
  0x1a   : > { %p1294_p12 = por %p134_p11, %p133_p10  ;;  %156 = sbr.rel (%p878_p13) target bundleno = 76 (0x4c), region = 16 }
  0x21   : > { %159 = sbr.rel (!%p1267_p5) target bundleno = 45 (0x2d), region = 20  ;;  %s161_s11 = sand.u32 (%p1267_p5), 1, %s1158_s17  }
  0x22   : > { %s921_s26 = sshll.u32 (%p1267_p5), %s1170_s20, 3  ;;  %s879_s27 = sshll.u32 (%p1267_p5), %s161_s11, 5 }
  0x23   : > { %s1476_s0 = sld [smem:[#allocation7_spill]] (%p1267_p5)  ;;  %s163_s23 = scalar_lea.vmem (%p1267_p5), [#allocation3], %s879_s27 }
  0x29   : > { %s169_s5 = scalar_lea.vmem %s1476_s0, %s921_s26 }
  0x2a   : > { %v203_v0 = vld [vmem:[%s169_s5] sm:$0xff]  ;;  %v205_v1 = vld [vmem:[%s169_s5 + $0x18] sm:$0xff]  ;;  %v207_v2 = vld [vmem:[%s169_s5 + $0x30] sm:$0xff] }
  0x2b   : > { %204 = vst [vmem:[%s163_s23] sm:$0xff] %v203_v0  ;;  %206 = vst [vmem:[%s163_s23 + $0x8] sm:$0xff] %v205_v1  ;;  %v209_v3 = vld [vmem:[%s169_s5 + $0x48] sm:$0xff] }
  0x2c   : > { %208 = vst [vmem:[%s163_s23 + $0x10] sm:$0xff] %v207_v2  ;;  %210 = vst [vmem:[%s163_s23 + $0x18] sm:$0xff] %v209_v3 }
  0x2d PF: > { %216 = sbr.rel (!%p1281_p9) target bundleno = 76 (0x4c), region = 58  ;;  %s218_s28 = sand.u32 (%p1281_p9), 1, %s1150_s15  }
  0x2e   : > { %s922_s7 = sshll.u32 (%p1281_p9), %s1170_s20, 6  ;;  %s882_s11 = sshll.u32 (%p1281_p9), %s218_s28, 7 }
  0x2f   : > { %s223_s26 = sadd.s32 (%p1281_p9), %s1174_s21, %s922_s7  ;;  %s1477_s1 = sld [smem:[#allocation8_spill]] (%p1281_p9) }
  0x30   : > { %s885_s29 = sshll.u32 (%p1281_p9), %s223_s26, 2  ;;  %s1319_s6 = scalar_lea.vmem (%p1281_p9), [#allocation4], %s882_s11 }
  0x35   : > { %s1314_s27 = scalar_lea.vmem %s1477_s1, %s885_s29 }
  0x36   : > { %v241_v4 = vld [vmem:[%s1314_s27] sm:$0xf]  ;;  %v243_v5 = vld [vmem:[%s1314_s27 + $0x8] sm:$0xf]  ;;  %v245_v6 = vld [vmem:[%s1314_s27 + $0x10] sm:$0xf] }
  0x37   : > { %242 = vst [vmem:[%s1319_s6] sm:$0xf] %v241_v4  ;;  %244 = vst [vmem:[%s1319_s6 + $0x4] sm:$0xf] %v243_v5  ;;  %v247_v7 = vld [vmem:[%s1314_s27 + $0x18] sm:$0xf] }
  0x38   : > { %246 = vst [vmem:[%s1319_s6 + $0x8] sm:$0xf] %v245_v6  ;;  %v249_v8 = vld [vmem:[%s1314_s27 + $0x20] sm:$0xf]  ;;  %v251_v9 = vld [vmem:[%s1314_s27 + $0x28] sm:$0xf] }
  0x39   : > { %248 = vst [vmem:[%s1319_s6 + $0xc] sm:$0xf] %v247_v7  ;;  %250 = vst [vmem:[%s1319_s6 + $0x10] sm:$0xf] %v249_v8  ;;  %v253_v10 = vld [vmem:[%s1314_s27 + $0x30] sm:$0xf] }
  0x3a   : > { %252 = vst [vmem:[%s1319_s6 + $0x14] sm:$0xf] %v251_v9  ;;  %v255_v11 = vld [vmem:[%s1314_s27 + $0x38] sm:$0xf]  ;;  %v257_v12 = vld [vmem:[%s1314_s27 + $0x40] sm:$0xf] }
  0x3b   : > { %254 = vst [vmem:[%s1319_s6 + $0x18] sm:$0xf] %v253_v10  ;;  %256 = vst [vmem:[%s1319_s6 + $0x1c] sm:$0xf] %v255_v11  ;;  %v259_v13 = vld [vmem:[%s1314_s27 + $0x48] sm:$0xf] }
  0x3c   : > { %258 = vst [vmem:[%s1319_s6 + $0x20] sm:$0xf] %v257_v12  ;;  %v261_v14 = vld [vmem:[%s1314_s27 + $0x50] sm:$0xf]  ;;  %v263_v15 = vld [vmem:[%s1314_s27 + $0x58] sm:$0xf] }
  0x3d   : > { %260 = vst [vmem:[%s1319_s6 + $0x24] sm:$0xf] %v259_v13  ;;  %262 = vst [vmem:[%s1319_s6 + $0x28] sm:$0xf] %v261_v14  ;;  %v265_v16 = vld [vmem:[%s1314_s27 + $0x60] sm:$0xf] }
  0x3e   : > { %264 = vst [vmem:[%s1319_s6 + $0x2c] sm:$0xf] %v263_v15  ;;  %v267_v17 = vld [vmem:[%s1314_s27 + $0x68] sm:$0xf]  ;;  %v269_v18 = vld [vmem:[%s1314_s27 + $0x70] sm:$0xf] }
  0x3f   : > { %266 = vst [vmem:[%s1319_s6 + $0x30] sm:$0xf] %v265_v16  ;;  %268 = vst [vmem:[%s1319_s6 + $0x34] sm:$0xf] %v267_v17  ;;  %v271_v19 = vld [vmem:[%s1314_s27 + $0x78] sm:$0xf] }
  0x40   : > { %270 = vst [vmem:[%s1319_s6 + $0x38] sm:$0xf] %v269_v18  ;;  %v273_v20 = vld [vmem:[%s1314_s27 + $0x80] sm:$0xf]  ;;  %v275_v21 = vld [vmem:[%s1314_s27 + $0x88] sm:$0xf] }
  0x41   : > { %272 = vst [vmem:[%s1319_s6 + $0x3c] sm:$0xf] %v271_v19  ;;  %274 = vst [vmem:[%s1319_s6 + $0x40] sm:$0xf] %v273_v20  ;;  %v277_v22 = vld [vmem:[%s1314_s27 + $0x90] sm:$0xf] }
  0x42   : > { %276 = vst [vmem:[%s1319_s6 + $0x44] sm:$0xf] %v275_v21  ;;  %v279_v23 = vld [vmem:[%s1314_s27 + $0x98] sm:$0xf]  ;;  %v281_v24 = vld [vmem:[%s1314_s27 + $0xa0] sm:$0xf] }
  0x43   : > { %278 = vst [vmem:[%s1319_s6 + $0x48] sm:$0xf] %v277_v22  ;;  %280 = vst [vmem:[%s1319_s6 + $0x4c] sm:$0xf] %v279_v23  ;;  %v283_v25 = vld [vmem:[%s1314_s27 + $0xa8] sm:$0xf] }
  0x44   : > { %282 = vst [vmem:[%s1319_s6 + $0x50] sm:$0xf] %v281_v24  ;;  %v285_v26 = vld [vmem:[%s1314_s27 + $0xb0] sm:$0xf]  ;;  %v287_v27 = vld [vmem:[%s1314_s27 + $0xb8] sm:$0xf] }
  0x45   : > { %284 = vst [vmem:[%s1319_s6 + $0x54] sm:$0xf] %v283_v25  ;;  %286 = vst [vmem:[%s1319_s6 + $0x58] sm:$0xf] %v285_v26  ;;  %v289_v28 = vld [vmem:[%s1314_s27 + $0xc0] sm:$0xf] }
  0x46   : > { %288 = vst [vmem:[%s1319_s6 + $0x5c] sm:$0xf] %v287_v27  ;;  %v291_v29 = vld [vmem:[%s1314_s27 + $0xc8] sm:$0xf]  ;;  %v293_v30 = vld [vmem:[%s1314_s27 + $0xd0] sm:$0xf] }
  0x47   : > { %290 = vst [vmem:[%s1319_s6 + $0x60] sm:$0xf] %v289_v28  ;;  %292 = vst [vmem:[%s1319_s6 + $0x64] sm:$0xf] %v291_v29  ;;  %v295_v31 = vld [vmem:[%s1314_s27 + $0xd8] sm:$0xf] }
  0x48   : > { %294 = vst [vmem:[%s1319_s6 + $0x68] sm:$0xf] %v293_v30  ;;  %v297_v32 = vld [vmem:[%s1314_s27 + $0xe0] sm:$0xf]  ;;  %v299_v33 = vld [vmem:[%s1314_s27 + $0xe8] sm:$0xf] }
  0x49   : > { %296 = vst [vmem:[%s1319_s6 + $0x6c] sm:$0xf] %v295_v31  ;;  %298 = vst [vmem:[%s1319_s6 + $0x70] sm:$0xf] %v297_v32  ;;  %v301_v34 = vld [vmem:[%s1314_s27 + $0xf0] sm:$0xf] }
  0x4a   : > { %300 = vst [vmem:[%s1319_s6 + $0x74] sm:$0xf] %v299_v33  ;;  %v303_v35 = vld [vmem:[%s1314_s27 + $0xf8] sm:$0xf]  ;;  %302 = vst [vmem:[%s1319_s6 + $0x78] sm:$0xf] %v301_v34 }
  0x4b   : > { %304 = vst [vmem:[%s1319_s6 + $0x7c] sm:$0xf] %v303_v35 }
  0x4c PF: > { %p886_p0 = scmp.ge.s32.totalorder %s1178_s22, 1  ;;  %p396_p1 = scmp.lt.s32.totalorder %s1178_s22, 7 }
  0x4e   : > { %p397_p2 = pnand %p886_p0, %p396_p1 }
  0x4f   : > { %s403_s0 = sand.u32 (!%p397_p2), 1, %s1154_s16   ;;  %s410_s5 = sand.u32 (!%p397_p2), 1, %s1146_s14  }
  0x50   : > { %400 = sbr.rel (%p397_p2) target bundleno = 369 (0x171), region = 103  ;;  %s887_s23 = sshll.u32 (!%p397_p2), %s403_s0, 5 }
  0x51   : > { %s888_s28 = sshll.u32 (!%p397_p2), %s410_s5, 7  ;;  %s436_s7 = sand.u32 (!%p397_p2), 1, %s1138_s12  }
  0x52   : > { %p442_p3 = scmp.lt.s32.totalorder (!%p397_p2), %s1166_s19, 1  ;;  %s889_s11 = sshll.u32 (!%p397_p2), %s436_s7, 4 }
  0x53   : > { %s1392_s6 = scalar_lea.vmem (!%p397_p2), [#allocation3], %s887_s23  ;;  %s1394_s1 = scalar_lea.vmem (!%p397_p2), [#allocation4], %s888_s28 }
  0x54   : > { %s1396_s25 = scalar_lea.vmem (!%p397_p2), [#allocation5], %s889_s11  ;;  %p890_p4 = scmp.ne.s32.totalorder (!%p397_p2), %s1162_s18, 0 }
  0x57   : > { %s443_s26 = scalar_select %p442_p3, %s1166_s19, 1 }
  0x58   : > { %450 = sbr.rel (%p890_p4) target bundleno = 95 (0x5f), region = 115 }
  0x59   : > { %s444_s27 = scalar_lea.vmem %s1467_s2, %s443_s26 }
  0x5a   : > { %v891_v36 = vld [vmem:[%s444_s27] ss:$0 sm:$0xff] (!%p890_p4) }
  0x5b   : > { %458 = vst [vmem:[#allocation2] sm:$0xff] (!%p890_p4), %v891_v36  ;;  %459 = vst [vmem:[#allocation2 + $0x8] sm:$0xff] (!%p890_p4), %v891_v36 }
  0x5c   : > { %460 = vst [vmem:[#allocation2 + $0x10] sm:$0xff] (!%p890_p4), %v891_v36  ;;  %461 = vst [vmem:[#allocation2 + $0x18] sm:$0xff] (!%p890_p4), %v891_v36 }
  0x5f PF: > { %v1070_v37 = vld [vmem:[%s1394_s1 + $0x40] sm:$0xff]   ;;  %v1072_v39 = vld [vmem:[%s1394_s1 + $0x48] sm:$0xff]   ;;  %v1074_v41 = vld [vmem:[%s1394_s1 + $0x50] sm:$0xff]   ;;  %p912_p5 = scmp.ne.s32.totalorder %s1162_s18, 2 }
  0x60   : > { %v1071_v38 = vld [vmem:[%s1394_s1] sm:$0xff]   ;;  %938 = vmatprep.subr.bf16.mxu0 %v1070_v37  ;;  %966 = vmatprep.subr.bf16.mxu1 %v1070_v37  ;;  %v1073_v40 = vld [vmem:[%s1394_s1 + $0x8] sm:$0xff]   ;;  %v1075_v42 = vld [vmem:[%s1394_s1 + $0x10] sm:$0xff]  }
  0x61   : > { %939 = vmatpush3.bf16.msra.mxu0 %v1071_v38  ;;  %974 = vmatpush3.bf16.msra.mxu1 %v1071_v38  ;;  %v1076_v43 = vld [vmem:[%s1394_s1 + $0x58] sm:$0xff]   ;;  %v1078_v45 = vld [vmem:[%s1394_s1 + $0x60] sm:$0xff]   ;;  %v1080_v47 = vld [vmem:[%s1394_s1 + $0x68] sm:$0xff]  }
  0x62   : > { %940 = vmatprep.subr.bf16.mxu0 %v1072_v39  ;;  %967 = vmatprep.subr.bf16.mxu1 %v1072_v39  ;;  %v1077_v44 = vld [vmem:[%s1394_s1 + $0x18] sm:$0xff]   ;;  %v1079_v46 = vld [vmem:[%s1394_s1 + $0x20] sm:$0xff]   ;;  %v1081_v50 = vld [vmem:[%s1394_s1 + $0x28] sm:$0xff]  }
  0x63   : > { %v1088_v48 = vld [vmem:[%s1392_s6 + $0x4] ss:$8 sps:$4 sm:$0xff]   ;;  %v1091_v49 = vld [vmem:[%s1392_s6 + $0x14] ss:$8 sps:$4 sm:$0xff]   ;;  %v1086_v55 = vld [vmem:[%s1392_s6] ss:$8 sps:$4 sm:$0xff]  }
  0x64   : > { %v1082_v51 = vld [vmem:[%s1394_s1 + $0x70] sm:$0xff]   ;;  %650 = vmatprep.mubr.bf16.mxu0 %v1088_v48  ;;  %658 = vmatprep.mubr.bf16.mxu1 %v1091_v49  ;;  %v1084_v53 = vld [vmem:[%s1394_s1 + $0x78] sm:$0xff]   ;;  %v462_v59 = vld [vmem:[#allocation2] sm:$0xff] }
  0x65   : > { %941 = vmatpush3.bf16.msra.mxu0 %v1073_v40  ;;  %975 = vmatpush3.bf16.msra.mxu1 %v1073_v40  ;;  %v1083_v52 = vld [vmem:[%s1394_s1 + $0x30] sm:$0xff]   ;;  %v1085_v54 = vld [vmem:[%s1394_s1 + $0x38] sm:$0xff]   ;;  %v463_v3 = vld [vmem:[#allocation2 + $0x8] sm:$0xff] }
  0x66   : > { %942 = vmatprep.subr.bf16.mxu0 %v1074_v41  ;;  %968 = vmatprep.subr.bf16.mxu1 %v1074_v41  ;;  %v1089_v56 = vld [vmem:[%s1392_s6 + $0x10] ss:$8 sps:$4 sm:$0xff]  }
  0x67   : > { %v464_v61 = vld [vmem:[#allocation2 + $0x10] sm:$0xff]  ;;  %v465_v5 = vld [vmem:[#allocation2 + $0x18] sm:$0xff] }
  0x69   : > { %943 = vmatpush3.bf16.msra.mxu0 %v1075_v42  ;;  %976 = vmatpush3.bf16.msra.mxu1 %v1075_v42 }
  0x6a   : > { %944 = vmatprep.subr.bf16.mxu0 %v1076_v43  ;;  %969 = vmatprep.subr.bf16.mxu1 %v1076_v43 }
  0x6d   : > { %945 = vmatpush3.bf16.msra.mxu0 %v1077_v44  ;;  %977 = vmatpush3.bf16.msra.mxu1 %v1077_v44 }
  0x6e   : > { %946 = vmatprep.subr.bf16.mxu0 %v1078_v45  ;;  %970 = vmatprep.subr.bf16.mxu1 %v1078_v45 }
  0x71   : > { %947 = vmatpush3.bf16.msra.mxu0 %v1079_v46  ;;  %978 = vmatpush3.bf16.msra.mxu1 %v1079_v46 }
  0x72   : > { %948 = vmatprep.subr.bf16.mxu0 %v1080_v47  ;;  %971 = vmatprep.subr.bf16.mxu1 %v1080_v47 }
  0x75   : > { %949 = vmatpush3.bf16.msra.mxu0 %v1081_v50  ;;  %979 = vmatpush3.bf16.msra.mxu1 %v1081_v50 }
  0x76   : > { %950 = vmatprep.subr.bf16.mxu0 %v1082_v51  ;;  %972 = vmatprep.subr.bf16.mxu1 %v1082_v51 }
  0x79   : > { %951 = vmatpush3.bf16.msra.mxu0 %v1083_v52  ;;  %980 = vmatpush3.bf16.msra.mxu1 %v1083_v52 }
  0x7a   : > { %952 = vmatprep.subr.bf16.mxu0 %v1084_v53  ;;  %973 = vmatprep.subr.bf16.mxu1 %v1084_v53 }
  0x7d   : > { %953 = vmatpush3.bf16.msra.mxu0 %v1085_v54  ;;  %981 = vmatpush3.bf16.msra.mxu1 %v1085_v54 }
  0x80   : > { %651 = vmatmul.mubr.bf16.vlgmr.msra.gmra.mrb[0].mxu0 %v1086_v55  ;;  %659 = vmatmul.mubr.bf16.vlgmr.msra.gmra.mrb[0].mxu1 %v1089_v56 }
 0x153   : > { %v954_v57 = vpop.f32.mrb[0].mxu0  ;;  %v960_v58 = vpop.f32.mrb[0].mxu1 }
 0x154   : > { %v955_v60 = vpop.f32.mrb[1].mxu0  ;;  %v961_v62 = vpop.f32.mrb[1].mxu1 }
 0x155   : > { %v956_v63 = vadd.f32 %v955_v60, %v954_v57  ;;  %v962_v0 = vadd.f32 %v961_v62, %v960_v58  ;;  %v957_v1 = vpop.f32.mrb[2].mxu0  ;;  %v963_v2 = vpop.f32.mrb[2].mxu1  ;;  %678 = sbr.rel (%p912_p5) target bundleno = 360 (0x168), region = 119 }
 0x156   : > { %v958_v4 = vpop.f32.mrb[3].mxu0  ;;  %v964_v6 = vpop.f32.mrb[3].mxu1 }
 0x157   : > { %v667_v7 = vadd.f32 %v956_v63, %v462_v59  ;;  %v669_v8 = vadd.f32 %v962_v0, %v464_v61  ;;  %v959_v9 = vadd.f32 %v958_v4, %v957_v1  ;;  %v965_v10 = vadd.f32 %v964_v6, %v963_v2 }
 0x159   : > { %671 = vst [vmem:[#allocation2] sm:$0xff] %v667_v7  ;;  %673 = vst [vmem:[#allocation2 + $0x10] sm:$0xff] %v669_v8  ;;  %v668_v11 = vadd.f32 %v959_v9, %v463_v3  ;;  %v670_v12 = vadd.f32 %v965_v10, %v465_v5 }
 0x15b   : > { %672 = vst [vmem:[#allocation2 + $0x8] sm:$0xff] %v668_v11  ;;  %674 = vst [vmem:[#allocation2 + $0x18] sm:$0xff] %v670_v12 }
 0x160   : > { %v679_v13 = vld [vmem:[#allocation2] sm:$0xff]  ;;  %v681_v15 = vld [vmem:[#allocation2 + $0x10] sm:$0xff] }
 0x161   : > { %v683_v16 = vmax.f32 %v679_v13, 0.0  ;;  %v685_v19 = vmax.f32 %v681_v15, 0.0 }
 0x162   : > { %v680_v14 = vld [vmem:[#allocation2 + $0x8] sm:$0xff]  ;;  %v682_v18 = vld [vmem:[#allocation2 + $0x18] sm:$0xff] }
 0x163   : > { %v684_v17 = vmax.f32 %v680_v14, 0.0  ;;  %v686_v20 = vmax.f32 %v682_v18, 0.0 }
 0x165   : > { %v930_v21 = vpack.c.bf16 %v684_v17, %v683_v16  ;;  %v935_v22 = vpack.c.bf16 %v686_v20, %v685_v19 }
 0x167   : > { %931 = vst [vmem:[%s1396_s25] sm:$0xff] %v930_v21   ;;  %937 = vst [vmem:[%s1396_s25 + $0x8] sm:$0xff] %v935_v22  }
 0x168 PF: > { %713 = sbr.rel (!%p1294_p12) target bundleno = 369 (0x171), region = 123  ;;  %s918_s1 = sshll.u32 (%p1294_p12), %s1166_s19, 2 }
 0x169   : > { %s718_s16 = scalar_lea.vmem (%p1294_p12), %s1468_s3, %s918_s1 }
 0x16e   : > { %v734_v23 = vld [vmem:[%s1396_s25] sm:$0xf] (%p1294_p12)  ;;  %v736_v24 = vld [vmem:[%s1396_s25 + $0x4] sm:$0xf] (%p1294_p12)  ;;  %v738_v25 = vld [vmem:[%s1396_s25 + $0x8] sm:$0xf] (%p1294_p12) }
 0x16f   : > { %v740_v26 = vld [vmem:[%s1396_s25 + $0xc] sm:$0xf]  ;;  %735 = vst [vmem:[%s718_s16] sm:$0xf] %v734_v23  ;;  %737 = vst [vmem:[%s718_s16 + $0x8] sm:$0xf] %v736_v24 }
 0x170   : > { %739 = vst [vmem:[%s718_s16 + $0x10] sm:$0xf] %v738_v25  ;;  %741 = vst [vmem:[%s718_s16 + $0x18] sm:$0xf] %v740_v26 }
 0x171 PF: > { %s13_s22 = sadd.s32 1, %s1178_s22   ;;  %s1478_s10 = sld [smem:[#allocation6_spill]] }
 0x172   : > { %p10_p6 = scmp.ge.s32.totalorder %s13_s22, 8   ;;  %s1479_s12 = smov %s1142_s13 }
 0x173   : > { %s1480_s13 = smov %s1292_s9  ;;  %s1481_s14 = smov %s1150_s15 }
 0x174   : > { %s1482_s15 = smov %s1289_s8  ;;  %s1483_s16 = smov %s1158_s17 }
 0x175   : > { %s1484_s17 = smov %s1275_s30  ;;  %s1485_s18 = smov %s1170_s20 }
 0x176   : > { %s1486_s19 = smov %s1174_s21  ;;  %s1487_s20 = smov %s1490_s24 }
 0x177   : > { %s1488_s21 = smov %s1478_s10  ;;  %12 = sbr.rel (!%p10_p6) target bundleno = 9 (0x9), region = 206 }

// kernel: ae_vgg16_forward.17
= control target key start
LH: loop header
LB: loop body
LE: loop exit
PB: predicated region body
PF: predicated region fallthrough
CT: control target
= control target key end

     0   :  { %s1081_s12 = smov 0   ;;  %s1083_s13 = smov 0   ;;  %s1220_s0 = inlined_call_operand.vmem [shape: bf16[128,384], index: 0, kind: input, shape index: {}]   ;;  %s1221_s1 = inlined_call_operand.vmem [shape: bf16[384,128], index: 1, kind: input, shape index: {}]   ;;  %s1222_s2 = inlined_call_operand.vmem [shape: f32[1,128], index: 2, kind: input, shape index: {}]   ;;  %s1223_s3 = inlined_call_operand.vmem [shape: f32[128,128], index: 3, kind: output, shape index: {}]  }
   0x1   :  { %s1085_s14 = smov 0  }
   0x2 LB: > { %s32_s15 = sadd.s32 1, %s1055_s13  ;;  %p852_p0 = scmp.ge.s32.totalorder %s1059_s14, 1  ;;  %s1059_s14 = sphi %s1085_s14, %s13_s14   ;;  %s1055_s13 = sphi %s1083_s13, %s1225_s13   ;;  %s1051_s12 = sphi %s1081_s12, %s1224_s12  }
   0x3   : > { %p34_p1 = scmp.ge.s32.totalorder %s32_s15, 2  ;;  %p191_p2 = scmp.lt.s32.totalorder %s1059_s14, 3 }
   0x5   : > { %s1227_s15 = smov (%p34_p1, %s32_s15), 0  ;;  %p192_p3 = pnand %p852_p0, %p191_p2 }
   0x6   : > { %v997_v0 = vld [vmem:[%s1221_s1 + $0x40] sm:$0xff] (!%p192_p3)   ;;  %v1000_v3 = vld [vmem:[%s1221_s1 + $0x48] sm:$0xff] (!%p192_p3)   ;;  %v1003_v6 = vld [vmem:[%s1221_s1 + $0x50] sm:$0xff] (!%p192_p3)   ;;  %s853_s5 = sshll.u32 (!%p192_p3), %s1051_s12, 3 }
   0x7   : > { %195 = sbr.rel (%p192_p3) target bundleno = 285 (0x11d), region = 32  ;;  %v998_v1 = vld [vmem:[%s1221_s1] sm:$0xff] (!%p192_p3)   ;;  %896 = vmatprep.subr.bf16.mxu0 (!%p192_p3), %v997_v0  ;;  %v1001_v4 = vld [vmem:[%s1221_s1 + $0x8] sm:$0xff] (!%p192_p3)   ;;  %v1004_v7 = vld [vmem:[%s1221_s1 + $0x10] sm:$0xff] (!%p192_p3)   ;;  %p236_p4 = scmp.lt.s32.totalorder (!%p192_p3), %s853_s5, 15 }
   0x8   : > { %v999_v2 = vld [vmem:[%s1221_s1 + $0x80] sm:$0xff] (!%p192_p3)   ;;  %897 = vmatpush3.bf16.msra.mxu0 (!%p192_p3), %v998_v1  ;;  %v1002_v5 = vld [vmem:[%s1221_s1 + $0x88] sm:$0xff] (!%p192_p3)   ;;  %v1005_v8 = vld [vmem:[%s1221_s1 + $0x90] sm:$0xff] (!%p192_p3)  }
   0x9   : > { %948 = vmatprep.subr.bf16.mxu1 (!%p192_p3), %v999_v2  ;;  %898 = vmatprep.subr.bf16.mxu0 (!%p192_p3), %v1000_v3  ;;  %v1006_v9 = vld [vmem:[%s1221_s1 + $0x58] sm:$0xff] (!%p192_p3)   ;;  %v1009_v12 = vld [vmem:[%s1221_s1 + $0x60] sm:$0xff] (!%p192_p3)   ;;  %v1012_v15 = vld [vmem:[%s1221_s1 + $0x68] sm:$0xff] (!%p192_p3)  }
   0xa   : > { %949 = vmatpush3.bf16.msra.mxu1 (!%p192_p3), %v999_v2  ;;  %v1007_v10 = vld [vmem:[%s1221_s1 + $0x18] sm:$0xff] (!%p192_p3)   ;;  %v1011_v13 = vld [vmem:[%s1221_s1 + $0xa0] sm:$0xff] (!%p192_p3)   ;;  %v1014_v16 = vld [vmem:[%s1221_s1 + $0xa8] sm:$0xff] (!%p192_p3)  }
   0xb   : > { %950 = vmatprep.subr.bf16.mxu1 (!%p192_p3), %v1002_v5  ;;  %v1008_v11 = vld [vmem:[%s1221_s1 + $0x98] sm:$0xff] (!%p192_p3)   ;;  %v1010_v14 = vld [vmem:[%s1221_s1 + $0x20] sm:$0xff] (!%p192_p3)   ;;  %v1013_v17 = vld [vmem:[%s1221_s1 + $0x28] sm:$0xff] (!%p192_p3)  }
   0xc   : > { %899 = vmatpush3.bf16.msra.mxu0 (!%p192_p3), %v1001_v4  ;;  %v1015_v18 = vld [vmem:[%s1221_s1 + $0x70] sm:$0xff] (!%p192_p3)   ;;  %v1018_v21 = vld [vmem:[%s1221_s1 + $0x78] sm:$0xff] (!%p192_p3)   ;;  %v857_v42 = vld [vmem:[%s1222_s2] ss:$0 sm:$0xff] (!%p192_p3) }
   0xd   : > { %900 = vmatprep.subr.bf16.mxu0 (!%p192_p3), %v1003_v6  ;;  %v1016_v19 = vld [vmem:[%s1221_s1 + $0x30] sm:$0xff] (!%p192_p3)   ;;  %v1020_v22 = vld [vmem:[%s1221_s1 + $0xb8] sm:$0xff] (!%p192_p3)  }
   0xe   : > { %951 = vmatpush3.bf16.msra.mxu1 %v1002_v5  ;;  %s1229_s5 = smov (!%p236_p4, %s853_s5), 15  ;;  %v1017_v20 = vld [vmem:[%s1221_s1 + $0xb0] sm:$0xff]   ;;  %v1019_v25 = vld [vmem:[%s1221_s1 + $0x38] sm:$0xff]  }
   0xf   : > { %952 = vmatprep.subr.bf16.mxu1 %v1005_v8  ;;  %s972_s27 = smul.u32 12, %s1229_s5  ;;  %s856_s22 = sshll.u32 %s1229_s5, 3 }
  0x10   : > { %901 = vmatpush3.bf16.msra.mxu0 %v1004_v7 }
  0x11   : > { %902 = vmatprep.subr.bf16.mxu0 %v1006_v9  ;;  %s1171_s16 = scalar_lea.vmem %s1220_s0, %s972_s27  ;;  %s1201_s27 = scalar_lea.vmem %s1223_s3, %s856_s22 }
  0x12   : > { %953 = vmatpush3.bf16.msra.mxu1 %v1005_v8  ;;  %v1023_v23 = vld [vmem:[%s1171_s16 + $0x4] ss:$12 sps:$4 sm:$0xff]   ;;  %v1024_v24 = vld [vmem:[%s1171_s16 + $0x8] ss:$12 sps:$4 sm:$0xff]   ;;  %v1021_v26 = vld [vmem:[%s1171_s16] ss:$12 sps:$4 sm:$0xff]  }
  0x13   : > { %954 = vmatprep.subr.bf16.mxu1 %v1008_v11  ;;  %599 = vmatprep.mubr.bf16.mxu0 %v1023_v23  ;;  %v1026_v27 = vld [vmem:[%s1171_s16 + $0x1c] ss:$12 sps:$4 sm:$0xff]   ;;  %v1025_v28 = vld [vmem:[%s1171_s16 + $0x20] ss:$12 sps:$4 sm:$0xff]   ;;  %v1032_v29 = vld [vmem:[%s1171_s16 + $0x38] ss:$12 sps:$4 sm:$0xff]  }
  0x14   : > { %903 = vmatpush3.bf16.msra.mxu0 %v1007_v10  ;;  %964 = vmatprep.mubr.bf16.mxu1 %v1024_v24  ;;  %v1028_v30 = vld [vmem:[%s1171_s16 + $0x18] ss:$12 sps:$4 sm:$0xff]   ;;  %v1029_v31 = vld [vmem:[%s1171_s16 + $0x34] ss:$12 sps:$4 sm:$0xff]   ;;  %v1033_v32 = vld [vmem:[%s1171_s16 + $0x50] ss:$12 sps:$4 sm:$0xff]  }
  0x15   : > { %904 = vmatprep.subr.bf16.mxu0 %v1009_v12  ;;  %v1031_v33 = vld [vmem:[%s1171_s16 + $0x30] ss:$12 sps:$4 sm:$0xff]   ;;  %v1034_v34 = vld [vmem:[%s1171_s16 + $0x4c] ss:$12 sps:$4 sm:$0xff]   ;;  %v1036_v35 = vld [vmem:[%s1171_s16 + $0x48] ss:$12 sps:$4 sm:$0xff]  }
  0x16   : > { %955 = vmatpush3.bf16.msra.mxu1 %v1008_v11 }
  0x17   : > { %956 = vmatprep.subr.bf16.mxu1 %v1011_v13 }
  0x18   : > { %905 = vmatpush3.bf16.msra.mxu0 %v1010_v14 }
  0x19   : > { %906 = vmatprep.subr.bf16.mxu0 %v1012_v15 }
  0x1a   : > { %957 = vmatpush3.bf16.msra.mxu1 %v1011_v13 }
  0x1b   : > { %958 = vmatprep.subr.bf16.mxu1 %v1014_v16 }
  0x1c   : > { %907 = vmatpush3.bf16.msra.mxu0 %v1013_v17 }
  0x1d   : > { %908 = vmatprep.subr.bf16.mxu0 %v1015_v18 }
  0x1e   : > { %959 = vmatpush3.bf16.msra.mxu1 %v1014_v16 }
  0x1f   : > { %960 = vmatprep.subr.bf16.mxu1 %v1017_v20 }
  0x20   : > { %909 = vmatpush3.bf16.msra.mxu0 %v1016_v19 }
  0x21   : > { %910 = vmatprep.subr.bf16.mxu0 %v1018_v21 }
  0x22   : > { %961 = vmatpush3.bf16.msra.mxu1 %v1017_v20 }
  0x23   : > { %962 = vmatprep.subr.bf16.mxu1 %v1020_v22 }
  0x24   : > { %911 = vmatpush3.bf16.msra.mxu0 %v1019_v25 }
  0x26   : > { %963 = vmatpush3.bf16.msra.mxu1 %v1020_v22 }
  0x27   : > { %600 = vmatmul.mubr.bf16.vlgmr.msra.gmra.mrb[0].mxu0 %v1021_v26 }
  0x28   : > { %607 = vmatprep.mubr.bf16.mxu0 %v1026_v27 }
  0x29   : > { %965 = vmatmul.mubr.bf16.vlgmr.msra.gmra.mrb[0].mxu1 %v1025_v28 }
  0x2a   : > { %968 = vmatprep.mubr.bf16.mxu1 %v1032_v29 }
  0x2f   : > { %608 = vmatmul.mubr.bf16.gmra.mrb[4].mxu0 %v1028_v30 }
  0x30   : > { %615 = vmatprep.mubr.bf16.mxu0 %v1029_v31 }
  0x31   : > { %969 = vmatmul.mubr.bf16.gmra.mrb[4].mxu1 %v1033_v32 }
  0x37   : > { %616 = vmatmul.mubr.bf16.gmra.mrb[8].mxu0 %v1031_v33 }
  0x38   : > { %623 = vmatprep.mubr.bf16.mxu0 %v1034_v34 }
  0x3f   : > { %624 = vmatmul.mubr.bf16.gmra.mrb[12].mxu0 %v1036_v35 }
  0xfa   : > { %v912_v36 = vpop.f32.mrb[0].mxu0 }
  0xfb   : > { %v913_v37 = vpop.f32.mrb[1].mxu0 }
  0xfc   : > { %v914_v38 = vadd.f32 %v913_v37, %v912_v36  ;;  %v915_v39 = vpop.f32.mrb[2].mxu0  ;;  %v966_v40 = vpop.f32.mrb[0].mxu1 }
  0xfd   : > { %v916_v41 = vpop.f32.mrb[3].mxu0  ;;  %v666_v43 = vpop.f32.mrb[1].mxu1 }
  0xfe   : > { %v917_v44 = vadd.f32 %v916_v41, %v915_v39  ;;  %v667_v45 = vadd.f32 %v914_v38, %v666_v43  ;;  %v967_v46 = vpop.f32.mrb[2].mxu1 }
  0xff   : > { %v669_v47 = vpop.f32.mrb[3].mxu1 }
 0x100   : > { %v697_v48 = vadd.f32 %v857_v42, %v667_v45  ;;  %v670_v49 = vadd.f32 %v917_v44, %v669_v47 }
 0x102   : > { %724 = vst [vmem:[%s1201_s27] sm:$0xff] %v697_v48  ;;  %v698_v50 = vadd.f32 %v857_v42, %v670_v49  ;;  %v918_v51 = vpop.f32.mrb[4].mxu0 }
 0x103   : > { %v919_v52 = vpop.f32.mrb[5].mxu0 }
 0x104   : > { %725 = vst [vmem:[%s1201_s27 + $0x8] sm:$0xff] %v698_v50  ;;  %v920_v53 = vadd.f32 %v919_v52, %v918_v51  ;;  %v921_v54 = vpop.f32.mrb[6].mxu0  ;;  %v970_v55 = vpop.f32.mrb[4].mxu1 }
 0x105   : > { %v922_v56 = vpop.f32.mrb[7].mxu0  ;;  %v682_v57 = vpop.f32.mrb[5].mxu1 }
 0x106   : > { %v675_v58 = vadd.f32 %v966_v40, %v920_v53  ;;  %v923_v59 = vadd.f32 %v922_v56, %v921_v54  ;;  %v971_v60 = vpop.f32.mrb[6].mxu1 }
 0x107   : > { %v685_v61 = vpop.f32.mrb[7].mxu1 }
 0x108   : > { %v699_v62 = vadd.f32 %v857_v42, %v675_v58  ;;  %v678_v63 = vadd.f32 %v967_v46, %v923_v59 }
 0x10a   : > { %726 = vst [vmem:[%s1201_s27 + $0x10] sm:$0xff] %v699_v62  ;;  %v700_v0 = vadd.f32 %v857_v42, %v678_v63  ;;  %v924_v1 = vpop.f32.mrb[8].mxu0 }
 0x10b   : > { %v925_v2 = vpop.f32.mrb[9].mxu0 }
 0x10c   : > { %727 = vst [vmem:[%s1201_s27 + $0x18] sm:$0xff] %v700_v0  ;;  %v926_v3 = vadd.f32 %v925_v2, %v924_v1  ;;  %v927_v4 = vpop.f32.mrb[10].mxu0 }
 0x10d   : > { %v928_v5 = vpop.f32.mrb[11].mxu0 }
 0x10e   : > { %v929_v6 = vadd.f32 %v928_v5, %v927_v4  ;;  %v683_v7 = vadd.f32 %v926_v3, %v682_v57 }
 0x110   : > { %v701_v8 = vadd.f32 %v857_v42, %v683_v7  ;;  %v686_v9 = vadd.f32 %v929_v6, %v685_v61 }
 0x112   : > { %728 = vst [vmem:[%s1201_s27 + $0x20] sm:$0xff] %v701_v8  ;;  %v702_v10 = vadd.f32 %v857_v42, %v686_v9  ;;  %v930_v11 = vpop.f32.mrb[12].mxu0 }
 0x113   : > { %v931_v12 = vpop.f32.mrb[13].mxu0 }
 0x114   : > { %729 = vst [vmem:[%s1201_s27 + $0x28] sm:$0xff] %v702_v10  ;;  %v932_v13 = vadd.f32 %v931_v12, %v930_v11  ;;  %v933_v14 = vpop.f32.mrb[14].mxu0 }
 0x115   : > { %v934_v15 = vpop.f32.mrb[15].mxu0 }
 0x116   : > { %v691_v16 = vadd.f32 %v970_v55, %v932_v13  ;;  %v935_v17 = vadd.f32 %v934_v15, %v933_v14 }
 0x118   : > { %v703_v18 = vadd.f32 %v857_v42, %v691_v16  ;;  %v694_v19 = vadd.f32 %v971_v60, %v935_v17 }
 0x11a   : > { %730 = vst [vmem:[%s1201_s27 + $0x30] sm:$0xff] %v703_v18  ;;  %v704_v20 = vadd.f32 %v857_v42, %v694_v19 }
 0x11c   : > { %731 = vst [vmem:[%s1201_s27 + $0x38] sm:$0xff] %v704_v20 }
 0x11d PF: > { %s13_s14 = sadd.s32 1, %s1059_s14   ;;  %s1224_s12 = smov %s1055_s13 }
 0x11e   : > { %p10_p5 = scmp.ge.s32.totalorder %s13_s14, 4   ;;  %s1225_s13 = smov %s1227_s15 }
 0x120   :  { %12 = sbr.rel (!%p10_p5) target bundleno = 2 (0x2), region = 76 }

</bundles_post_ra>
